<compile_context>
chip_gen: v5e
topology: v5e:2x2
jax: 0.10.0
libtpu: 0.0.40
codegen_flags: <defaults>
</compile_context>

<pallas_src>
import functools
import math

import jax
import jax.numpy as jnp
from jax import lax
from jax.experimental import pallas as pl
from jax.experimental.pallas import tpu as pltpu

NEG_SLOPE = 0.01   # nn.LeakyReLU default
BN_EPS = 1e-5      # nn.BatchNorm2d default
LANE = 128
HALO = 8           # top zero band of the flat padded plane (keeps stores aligned)


def _rup(x, m):
    return ((x + m - 1) // m) * m


def _pick_tm(m, cap=512):
    """Row-tile size: large tiles, but >=2 grid steps when possible (v7x megacore)."""
    tm = min(cap, _rup(m, 8))
    if m > 256 and pl.cdiv(m, tm) < 2:
        tm = _rup(pl.cdiv(m, 2), 8)
    return tm


def _nbytes(shape, dtype):
    return math.prod(int(s) for s in shape) * jnp.dtype(dtype).itemsize


def _vmem_limit(block_bytes):
    # double-buffered pipeline + compiler scratch headroom
    return int(min(max(2 * block_bytes + (8 << 20), 32 << 20), 96 << 20))


# ------------------------------------------------------------------ kernels --

def _up_stats_kernel(x_ref, w_ref, b_ref, z_ref, ps_ref, sq_ref,
                     *, tm, cp, m_real, need_mask):
    """ConvTranspose2d(k2,s2) as one matmul over the input grid.

    Emits the four (di,dj) sub-grid outputs (bf16) and per-tile partial BN1
    statistics (f32 sum / sum-of-squares over the 4 sub-grids)."""
    x = x_ref[...].astype(jnp.bfloat16)                               # (tm, Cin)
    acc = jnp.dot(x, w_ref[...], preferred_element_type=jnp.float32)
    acc = acc + b_ref[...]                                            # (tm, 4*cp)

    def emit_stats(v):
        g = [v[:, k * cp:(k + 1) * cp] for k in range(4)]
        s = jnp.sum(g[0] + g[1] + g[2] + g[3], axis=0, keepdims=True)
        q = jnp.sum(g[0] * g[0] + g[1] * g[1] + g[2] * g[2] + g[3] * g[3],
                    axis=0, keepdims=True)
        ps_ref[...] = jnp.broadcast_to(s.reshape(1, 1, cp), ps_ref.shape)
        sq_ref[...] = jnp.broadcast_to(q.reshape(1, 1, cp), sq_ref.shape)

    if need_mask:
        # rows past the true M exist only in the final (partial) tile
        last = pl.program_id(0) == pl.num_programs(0) - 1

        @pl.when(last)
        def _():
            row = (pl.program_id(0) * tm
                   + lax.broadcasted_iota(jnp.int32, (tm, 1), 0))
            emit_stats(jnp.where(row < m_real, acc, 0.0))

        @pl.when(jnp.logical_not(last))
        def _():
            emit_stats(acc)
    else:
        emit_stats(acc)

    for k in range(4):
        z_ref[k] = acc[:, k * cp:(k + 1) * cp].astype(z_ref.dtype)


def _conv3x3_kernel(z_ref, s1_ref, t1_ref, w_ref, b_ref, ml_ref, mr_ref,
                    y_ref, ps_ref, sq_ref, pad_ref,
                    *, H, W, cin_p, cout_p):
    """Per sub-grid plane: BN1+LeakyReLU prologue -> 3x3 (pad=1) conv as 9 MXU
    tap matmuls on a flat, H-halo-only padded VMEM plane -> raw conv output
    (bf16) + per-plane partial BN2 statistics.

    Tap (kh, kw) is a constant-row-offset read of the flat plane (a sublane
    rotate in hardware, same mechanism as pltpu.roll); the wrap-around at the
    left/right image edge is killed by a precomputed per-row mask."""
    total = HALO + (H + 2) * W + 8

    # BN1 (batch statistics) + LeakyReLU, f32
    a = z_ref[0].astype(jnp.float32) * s1_ref[...] + t1_ref[...]
    a = jnp.where(a >= 0.0, a, a * NEG_SLOPE)

    # zero only the halo bands (interior is fully overwritten every step; this
    # stays correct under megacore grid sharding, unlike a program_id==0 guard)
    top = HALO + W
    zband = jnp.zeros((top, cin_p), jnp.float32)
    pad_ref[0:top, :] = zband
    pad_ref[top + H * W:total, :] = jnp.zeros((total - top - H * W, cin_p),
                                              jnp.float32)
    pad_ref[top:top + H * W, :] = a.reshape(H * W, cin_p)

    acc = jnp.zeros((H * W, cout_p), jnp.float32)
    for t in range(9):
        kh, kw = divmod(t, 3)
        start = HALO + kh * W + (kw - 1)          # flat row offset of this tap
        tap = pad_ref[start:start + H * W, :]
        if kw == 0:
            tap = tap * ml_ref[...]               # zero output column w == 0
        elif kw == 2:
            tap = tap * mr_ref[...]               # zero output column w == W-1
        acc = acc + jnp.dot(tap.astype(jnp.bfloat16), w_ref[t],
                            preferred_element_type=jnp.float32)
    acc = acc + b_ref[...]

    y_ref[0] = acc.reshape(H, W, cout_p).astype(y_ref.dtype)
    s = jnp.sum(acc, axis=0, keepdims=True)
    q = jnp.sum(acc * acc, axis=0, keepdims=True)
    ps_ref[...] = jnp.broadcast_to(s.reshape(1, 1, cout_p), ps_ref.shape)
    sq_ref[...] = jnp.broadcast_to(q.reshape(1, 1, cout_p), sq_ref.shape)


def _bn2_conv1x1_interleave_kernel(y_ref, s_ref, t_ref, w_ref, b_ref, o_ref,
                                   *, H, W, cp, npad):
    """leaky( (leaky(y*scale+shift)) @ w + b ), writing the two dj sub-grids of
    one (di, n) pair directly into the interleave-ready (N, H, 2, W, 2*C)
    layout (lane-dense stores, no host-side transpose afterwards)."""
    for dj in range(2):
        v = y_ref[0, dj, 0].astype(jnp.float32)           # (H, W, cp)
        v = v * s_ref[...] + t_ref[...]                    # BN2 (batch stats)
        v = jnp.where(v >= 0.0, v, v * NEG_SLOPE)          # LeakyReLU
        r = jnp.dot(v.reshape(H * W, cp).astype(jnp.bfloat16), w_ref[...],
                    preferred_element_type=jnp.float32)
        r = r + b_ref[...]
        r = jnp.where(r >= 0.0, r, r * NEG_SLOPE)          # final LeakyReLU
        o_ref[0, :, 0, :, dj * npad:(dj + 1) * npad] = r.reshape(H, W, npad)


def _matmul_relu_kernel(x_ref, w_ref, b_ref, o_ref):
    """relu(x @ w + b) — the DeepSal saliency 1x1 conv head."""
    x = x_ref[...].astype(jnp.bfloat16)
    acc = jnp.dot(x, w_ref[...], preferred_element_type=jnp.float32)
    acc = acc + b_ref[...]
    o_ref[...] = jnp.maximum(acc, 0.0)


# ----------------------------------------------------------------- wrappers --

def _conv_transpose_2x2(x_flat, w_up, b_up, cp_in, *, tm):
    """x_flat: (M, Cin) f32. Returns bf16 sub-grids z4 (4, M, cp_in) + BN1 sums."""
    M, Cin = x_flat.shape
    nt = pl.cdiv(M, tm)

    # (ic, oc, di, dj) -> (ic, di, dj, oc_pad) -> (Cin, 4*cp_in); k = 2*di+dj
    w = jnp.transpose(w_up, (0, 2, 3, 1))
    w = jnp.pad(w, ((0, 0), (0, 0), (0, 0), (0, cp_in - Cin)))
    w = w.reshape(Cin, 4 * cp_in).astype(jnp.bfloat16)
    b = jnp.tile(jnp.pad(b_up, (0, cp_in - Cin)), 4).reshape(1, 4 * cp_in)

    blk = (_nbytes((tm, Cin), jnp.float32)
           + _nbytes((Cin, 4 * cp_in), jnp.bfloat16)
           + _nbytes((1, 4 * cp_in), jnp.float32)
           + _nbytes((4, tm, cp_in), jnp.bfloat16)
           + 2 * _nbytes((1, 8, cp_in), jnp.float32))

    z4, ps, sq = pl.pallas_call(
        functools.partial(_up_stats_kernel, tm=tm, cp=cp_in, m_real=M,
                          need_mask=(M % tm != 0)),
        out_shape=(jax.ShapeDtypeStruct((4, M, cp_in), jnp.bfloat16),
                   jax.ShapeDtypeStruct((nt, 8, cp_in), jnp.float32),
                   jax.ShapeDtypeStruct((nt, 8, cp_in), jnp.float32)),
        grid=(nt,),
        in_specs=[pl.BlockSpec((tm, Cin), lambda i: (i, 0)),
                  pl.BlockSpec((Cin, 4 * cp_in), lambda i: (0, 0)),
                  pl.BlockSpec((1, 4 * cp_in), lambda i: (0, 0))],
        out_specs=(pl.BlockSpec((4, tm, cp_in), lambda i: (0, i, 0)),
                   pl.BlockSpec((1, 8, cp_in), lambda i: (i, 0, 0)),
                   pl.BlockSpec((1, 8, cp_in), lambda i: (i, 0, 0))),
        compiler_params=pltpu.CompilerParams(
            dimension_semantics=("parallel",),
            vmem_limit_bytes=_vmem_limit(blk)),
    )(x_flat, w, b)
    return z4, jnp.sum(ps[:, 0, :], axis=0), jnp.sum(sq[:, 0, :], axis=0)


def _dilated_conv3x3(z_sub, scale1, shift1, w_conv, b_conv, cin_p, cout_p):
    """z_sub: (G, H, W, cin_p) bf16 raw (pre-BN1) sub-grid planes."""
    G, H, W, _ = z_sub.shape
    Cout, Cin = w_conv.shape[0], w_conv.shape[1]
    w_taps = jnp.transpose(w_conv, (2, 3, 1, 0)).reshape(9, Cin, Cout)
    w_taps = jnp.pad(w_taps, ((0, 0), (0, cin_p - Cin),
                              (0, cout_p - Cout))).astype(jnp.bfloat16)
    b = jnp.pad(b_conv, (0, cout_p - Cout)).reshape(1, cout_p)
    s1 = jnp.pad(scale1, (0, cin_p - Cin)).reshape(1, cin_p)
    t1 = jnp.pad(shift1, (0, cin_p - Cin)).reshape(1, cin_p)

    # edge-column masks (precomputed, hoisted out of every grid step)
    wcol = jnp.arange(W, dtype=jnp.int32)
    ml = jnp.tile((wcol > 0).astype(jnp.float32), H).reshape(H * W, 1)
    mr = jnp.tile((wcol < W - 1).astype(jnp.float32), H).reshape(H * W, 1)

    pad_rows = HALO + (H + 2) * W + 8
    blk = (_nbytes((1, H, W, cin_p), jnp.bfloat16)
           + 2 * _nbytes((1, cin_p), jnp.float32)
           + _nbytes((9, cin_p, cout_p), jnp.bfloat16)
           + _nbytes((1, cout_p), jnp.float32)
           + 2 * _nbytes((H * W, 1), jnp.float32)
           + _nbytes((1, H, W, cout_p), jnp.bfloat16)
           + 2 * _nbytes((1, 8, cout_p), jnp.float32)
           + _nbytes((pad_rows, cin_p), jnp.float32)
           + _nbytes((H * W, cout_p), jnp.float32))

    y, ps, sq = pl.pallas_call(
        functools.partial(_conv3x3_kernel, H=H, W=W,
                          cin_p=cin_p, cout_p=cout_p),
        out_shape=(jax.ShapeDtypeStruct((G, H, W, cout_p), jnp.bfloat16),
                   jax.ShapeDtypeStruct((G, 8, cout_p), jnp.float32),
                   jax.ShapeDtypeStruct((G, 8, cout_p), jnp.float32)),
        grid=(G,),
        in_specs=[pl.BlockSpec((1, H, W, cin_p), lambda g: (g, 0, 0, 0)),
                  pl.BlockSpec((1, cin_p), lambda g: (0, 0)),
                  pl.BlockSpec((1, cin_p), lambda g: (0, 0)),
                  pl.BlockSpec((9, cin_p, cout_p), lambda g: (0, 0, 0)),
                  pl.BlockSpec((1, cout_p), lambda g: (0, 0)),
                  pl.BlockSpec((H * W, 1), lambda g: (0, 0)),
                  pl.BlockSpec((H * W, 1), lambda g: (0, 0))],
        out_specs=(pl.BlockSpec((1, H, W, cout_p), lambda g: (g, 0, 0, 0)),
                   pl.BlockSpec((1, 8, cout_p), lambda g: (g, 0, 0)),
                   pl.BlockSpec((1, 8, cout_p), lambda g: (g, 0, 0))),
        scratch_shapes=[pltpu.VMEM((pad_rows, cin_p), jnp.float32)],
        compiler_params=pltpu.CompilerParams(
            dimension_semantics=("parallel",),
            vmem_limit_bytes=_vmem_limit(blk)),
    )(z_sub, s1, t1, w_taps, b, ml, mr)
    return y, jnp.sum(ps[:, 0, :], axis=0), jnp.sum(sq[:, 0, :], axis=0)


def _bn2_conv1x1_interleave(y6, scale2, shift2, w_conv2, b2, cp, Cout):
    """y6: (2, 2, N, H, W, cp) bf16 = (di, dj, n, h, w, c) raw conv planes.
    Returns interleaved NHWC (N, 2H, 2W, Cout) f32."""
    _, _, N, H, W, _ = y6.shape
    npad = cp
    w = jnp.transpose(w_conv2.reshape(Cout, Cout), (1, 0))
    w = jnp.pad(w, ((0, cp - Cout), (0, npad - Cout))).astype(jnp.bfloat16)
    b = jnp.pad(b2, (0, npad - Cout)).reshape(1, npad)
    s = jnp.pad(scale2, (0, cp - Cout)).reshape(1, cp)
    t = jnp.pad(shift2, (0, cp - Cout)).reshape(1, cp)

    blk = (_nbytes((1, 2, 1, H, W, cp), jnp.bfloat16)
           + 2 * _nbytes((1, cp), jnp.float32)
           + _nbytes((cp, npad), jnp.bfloat16)
           + _nbytes((1, npad), jnp.float32)
           + _nbytes((1, H, 1, W, 2 * npad), jnp.float32))

    out6 = pl.pallas_call(
        functools.partial(_bn2_conv1x1_interleave_kernel,
                          H=H, W=W, cp=cp, npad=npad),
        out_shape=jax.ShapeDtypeStruct((N, H, 2, W, 2 * npad), jnp.float32),
        grid=(2, N),
        in_specs=[pl.BlockSpec((1, 2, 1, H, W, cp),
                               lambda di, n: (di, 0, n, 0, 0, 0)),
                  pl.BlockSpec((1, cp), lambda di, n: (0, 0)),
                  pl.BlockSpec((1, cp), lambda di, n: (0, 0)),
                  pl.BlockSpec((cp, npad), lambda di, n: (0, 0)),
                  pl.BlockSpec((1, npad), lambda di, n: (0, 0))],
        out_specs=pl.BlockSpec((1, H, 1, W, 2 * npad),
                               lambda di, n: (n, 0, di, 0, 0)),
        compiler_params=pltpu.CompilerParams(
            dimension_semantics=("parallel", "parallel"),
            vmem_limit_bytes=_vmem_limit(blk)),
    )(y6, s, t, w, b)

    # (N, H, 2, W, 2*npad) -> (N, 2H, 2W, npad) is a pure row-major merge (free)
    out = out6.reshape(N, 2 * H, 2 * W, npad)
    return out[..., :Cout]


# ------------------------------------------------------------------ forward --

def scale_up_forward(x_nhwc, params):
    """Faithful ScaleUp forward on NHWC input (training-mode BatchNorm batch
    statistics, biased variance). Returns NHWC (N, 2H, 2W, Cout) f32."""
    N, H, W, Cin = x_nhwc.shape
    Cout = params["conv1_w"].shape[0]
    cp_in = _rup(Cin, LANE)
    cp_out = _rup(Cout, LANE)
    M = N * H * W
    x = x_nhwc.astype(jnp.float32).reshape(M, Cin)

    # up[0]: ConvTranspose2d k2/s2 -> four sub-grids + fused BN1 partial stats
    z4, sum1, sumsq1 = _conv_transpose_2x2(x, params["up_w"], params["up_b"],
                                           cp_in, tm=_pick_tm(M))
    n_up = 4.0 * M
    mean1 = sum1[:Cin] / n_up
    var1 = jnp.maximum(sumsq1[:Cin] / n_up - mean1 * mean1, 0.0)
    scale1 = params["bn1_g"] * lax.rsqrt(var1 + BN_EPS)
    shift1 = params["bn1_b"] - mean1 * scale1

    # conv[0..2]: BN1+Leaky prologue -> dilated 3x3 conv (per sub-grid) + stats
    z_sub = z4.reshape(4 * N, H, W, cp_in)
    y, sum2, sumsq2 = _dilated_conv3x3(z_sub, scale1, shift1,
                                       params["conv1_w"], params["conv1_b"],
                                       cp_in, cp_out)
    mean2 = sum2[:Cout] / n_up
    var2 = jnp.maximum(sumsq2[:Cout] / n_up - mean2 * mean2, 0.0)
    scale2 = params["bn2_g"] * lax.rsqrt(var2 + BN_EPS)
    shift2 = params["bn2_b"] - mean2 * scale2

    # conv[3..4]: BN2+Leaky -> 1x1 conv -> Leaky, written interleave-ready
    return _bn2_conv1x1_interleave(y.reshape(2, 2, N, H, W, cp_out),
                                   scale2, shift2,
                                   params["conv2_w"], params["conv2_b"],
                                   cp_out, Cout)


def conv1x1_relu_head(x_nhwc, w, b):
    """Conv2d(C, Cout, k=1) + ReLU on NHWC input; returns NCHW (module output)."""
    N, H, W, C = x_nhwc.shape
    Cout = w.shape[0]
    kp = _rup(C, LANE)
    npad = _rup(Cout, LANE)
    M = N * H * W
    x = x_nhwc.astype(jnp.float32).reshape(M, C)
    if kp != C:
        x = jnp.pad(x, ((0, 0), (0, kp - C)))
    tm = _pick_tm(M)
    nt = pl.cdiv(M, tm)
    wm = jnp.pad(jnp.transpose(w.reshape(Cout, C), (1, 0)),
                 ((0, kp - C), (0, npad - Cout))).astype(jnp.bfloat16)
    bm = jnp.pad(b, (0, npad - Cout)).reshape(1, npad)

    blk = (_nbytes((tm, kp), jnp.float32) + _nbytes((kp, npad), jnp.bfloat16)
           + _nbytes((1, npad), jnp.float32) + _nbytes((tm, npad), jnp.float32))

    out = pl.pallas_call(
        _matmul_relu_kernel,
        out_shape=jax.ShapeDtypeStruct((M, npad), jnp.float32),
        grid=(nt,),
        in_specs=[pl.BlockSpec((tm, kp), lambda i: (i, 0)),
                  pl.BlockSpec((kp, npad), lambda i: (0, 0)),
                  pl.BlockSpec((1, npad), lambda i: (0, 0))],
        out_specs=pl.BlockSpec((tm, npad), lambda i: (i, 0)),
        compiler_params=pltpu.CompilerParams(
            dimension_semantics=("parallel",),
            vmem_limit_bytes=_vmem_limit(blk)),
    )(x, wm, bm)
    out = out[:, :Cout].reshape(N, H, W, Cout)
    return jnp.transpose(out, (0, 3, 1, 2))


def deep_sal_decoder_forward(feat_nchw, dec_params, sal_w, sal_b):
    """DeepSal decoder stack (decoder1..3) + saliency head on encoder features.
    NCHW only at the module boundary; the whole chain runs NHWC.
    TODO(synk): the pretrained resnet50 encoder is not translated."""
    x = jnp.transpose(feat_nchw, (0, 2, 3, 1))
    for p in dec_params:
        x = scale_up_forward(x, p)
    return conv1x1_relu_head(x, sal_w, sal_b)


# ------------------------------------------------------------------- params --

def init_params(key, in_size, out_size):
    k1, k2, k3 = jax.random.split(key, 3)

    def kaiming(k, shape, fan_in):  # kaiming_normal_, fan_in mode, gain=sqrt(2)
        return jax.random.normal(k, shape, jnp.float32) * jnp.sqrt(2.0 / fan_in)

    return dict(
        # ConvTranspose2d weight (in, out, 2, 2); torch fan_in = out * kh * kw
        up_w=kaiming(k1, (in_size, in_size, 2, 2), in_size * 4),
        up_b=jnp.zeros((in_size,), jnp.float32),
        bn1_g=jnp.ones((in_size,), jnp.float32),
        bn1_b=jnp.zeros((in_size,), jnp.float32),
        # Conv2d weight (out, in, 3, 3); fan_in = in * 9
        conv1_w=kaiming(k2, (out_size, in_size, 3, 3), in_size * 9),
        conv1_b=jnp.zeros((out_size,), jnp.float32),
        bn2_g=jnp.ones((out_size,), jnp.float32),
        bn2_b=jnp.zeros((out_size,), jnp.float32),
        # Conv2d weight (out, out, 1, 1); fan_in = out
        conv2_w=kaiming(k3, (out_size, out_size, 1, 1), out_size),
        conv2_b=jnp.zeros((out_size,), jnp.float32),
    )


if __name__ == "__main__":
    key = jax.random.PRNGKey(0)
    kx, kp, kf, kd1, kd2, kd3, ks = jax.random.split(key, 7)

    # --- ScaleUp block (the DeepSal decoder building block), NHWC -------------
    in_size, out_size = 4, 8
    x = jax.random.normal(kx, (2, 16, 16, in_size), jnp.float32)      # NHWC
    params = init_params(kp, in_size, out_size)
    out = jax.jit(scale_up_forward)(x, params)
    out = jax.block_until_ready(out)
    assert out.shape == (2, 32, 32, out_size), out.shape
    assert out.dtype == jnp.float32
    assert bool(jnp.all(jnp.isfinite(out)))

    # --- DeepSal decoder head: 3 chained ScaleUps + saliency 1x1 conv + ReLU --
    # (small stand-in widths for the original 2048->1024->512->256->1 chain)
    feat = jax.random.normal(kf, (1, 16, 8, 8), jnp.float32)          # NCHW
    dec_params = [init_params(kd1, 16, 8),
                  init_params(kd2, 8, 4),
                  init_params(kd3, 4, 2)]
    sal_w = jax.random.normal(ks, (1, 2, 1, 1), jnp.float32) * jnp.sqrt(2.0 / 2)
    sal_b = jnp.zeros((1,), jnp.float32)
    sal = jax.jit(deep_sal_decoder_forward)(feat, dec_params, sal_w, sal_b)
    sal = jax.block_until_ready(sal)
    assert sal.shape == (1, 1, 64, 64), sal.shape
    assert bool(jnp.all(jnp.isfinite(sal)))

    print("KERNEL_OK")
</pallas_src>

<mosaic_0001>
module attributes {stable_mosaic.version = 11 : i64} {
  func.func @_up_stats_kernel(%arg0: i32, %arg1: memref<256x4xf32, #tpu.memory_space<vmem>>, %arg2: memref<4x512xbf16, #tpu.memory_space<vmem>>, %arg3: memref<1x512xf32, #tpu.memory_space<vmem>>, %arg4: memref<4x256x128xbf16, #tpu.memory_space<vmem>>, %arg5: memref<1x8x128xf32, #tpu.memory_space<vmem>>, %arg6: memref<1x8x128xf32, #tpu.memory_space<vmem>>) attributes {dimension_semantics = [#tpu.dimension_semantics<parallel>], iteration_bounds = array<i64: 2>, scalar_prefetch = 0 : i64, scratch_operands = 0 : i64, tpu.core_type = #tpu.core_type<tc>, window_params = [{transform_indices = @transform_0, window_bounds = array<i64: 256, 4>}, {pipeline_mode = #tpu.pipeline_mode<synchronous>, transform_indices = @transform_1, window_bounds = array<i64: 4, 512>}, {pipeline_mode = #tpu.pipeline_mode<synchronous>, transform_indices = @transform_2, window_bounds = array<i64: 1, 512>}, {transform_indices = @transform_3, window_bounds = array<i64: 4, 256, 128>}, {transform_indices = @transform_4, window_bounds = array<i64: 1, 8, 128>}, {transform_indices = @transform_5, window_bounds = array<i64: 1, 8, 128>}]} {
    %c0 = arith.constant 0 : index
    %c0_0 = arith.constant 0 : index
    %0 = vector.load %arg1[%c0, %c0_0] : memref<256x4xf32, #tpu.memory_space<vmem>>, vector<256x4xf32>
    %1 = arith.truncf %0 : vector<256x4xf32> to vector<256x4xbf16>
    %c0_1 = arith.constant 0 : index
    %c0_2 = arith.constant 0 : index
    %2 = vector.load %arg2[%c0_1, %c0_2] : memref<4x512xbf16, #tpu.memory_space<vmem>>, vector<4x512xbf16>
    %cst = arith.constant dense<0.000000e+00> : vector<256x512xf32>
    %3 = tpu.matmul %1, %2, %cst {dimension_numbers = #tpu.dot_dimension_numbers<[1], [0], [0], [1], [0, 0, 1, 1], [], []>} : vector<256x4xbf16>, vector<4x512xbf16>, vector<256x512xf32> -> vector<256x512xf32>
    %c0_3 = arith.constant 0 : index
    %c0_4 = arith.constant 0 : index
    %4 = vector.load %arg3[%c0_3, %c0_4] : memref<1x512xf32, #tpu.memory_space<vmem>>, vector<1x512xf32>
    %5 = vector.broadcast %4 : vector<1x512xf32> to vector<256x512xf32>
    %6 = arith.addf %3, %5 : vector<256x512xf32>
    %7 = vector.extract_strided_slice %6 {offsets = [0, 0], sizes = [256, 128], strides = [1, 1]} : vector<256x512xf32> to vector<256x128xf32>
    %8 = vector.extract_strided_slice %6 {offsets = [0, 128], sizes = [256, 128], strides = [1, 1]} : vector<256x512xf32> to vector<256x128xf32>
    %9 = vector.extract_strided_slice %6 {offsets = [0, 256], sizes = [256, 128], strides = [1, 1]} : vector<256x512xf32> to vector<256x128xf32>
    %10 = vector.extract_strided_slice %6 {offsets = [0, 384], sizes = [256, 128], strides = [1, 1]} : vector<256x512xf32> to vector<256x128xf32>
    %11 = arith.addf %7, %8 : vector<256x128xf32>
    %12 = arith.addf %11, %9 : vector<256x128xf32>
    %13 = arith.addf %12, %10 : vector<256x128xf32>
    %cst_5 = arith.constant dense<0.000000e+00> : vector<128xf32>
    %14 = vector.multi_reduction <add>, %13, %cst_5 [0] : vector<256x128xf32> to vector<128xf32>
    %15 = vector.shape_cast %14 : vector<128xf32> to vector<1x128xf32>
    %16 = arith.mulf %7, %7 : vector<256x128xf32>
    %17 = arith.mulf %8, %8 : vector<256x128xf32>
    %18 = arith.addf %16, %17 : vector<256x128xf32>
    %19 = arith.mulf %9, %9 : vector<256x128xf32>
    %20 = arith.addf %18, %19 : vector<256x128xf32>
    %21 = arith.mulf %10, %10 : vector<256x128xf32>
    %22 = arith.addf %20, %21 : vector<256x128xf32>
    %cst_6 = arith.constant dense<0.000000e+00> : vector<128xf32>
    %23 = vector.multi_reduction <add>, %22, %cst_6 [0] : vector<256x128xf32> to vector<128xf32>
    %24 = vector.shape_cast %23 : vector<128xf32> to vector<1x128xf32>
    %25 = vector.shape_cast %15 : vector<1x128xf32> to vector<1x1x128xf32>
    %26 = vector.shape_cast %25 : vector<1x1x128xf32> to vector<1x1x128xf32>
    %27 = vector.broadcast %26 : vector<1x1x128xf32> to vector<1x8x128xf32>
    %c0_7 = arith.constant 0 : index
    %c0_8 = arith.constant 0 : index
    %c0_9 = arith.constant 0 : index
    %28 = vector.load %arg5[%c0_7, %c0_8, %c0_9] : memref<1x8x128xf32, #tpu.memory_space<vmem>>, vector<1x8x128xf32>
    tpu.vector_store %arg5[%c0_7, %c0_8, %c0_9], %27 {strides = array<i32>} : memref<1x8x128xf32, #tpu.memory_space<vmem>>, vector<1x8x128xf32>,
    %29 = vector.shape_cast %24 : vector<1x128xf32> to vector<1x1x128xf32>
    %30 = vector.shape_cast %29 : vector<1x1x128xf32> to vector<1x1x128xf32>
    %31 = vector.broadcast %30 : vector<1x1x128xf32> to vector<1x8x128xf32>
    %c0_10 = arith.constant 0 : index
    %c0_11 = arith.constant 0 : index
    %c0_12 = arith.constant 0 : index
    %32 = vector.load %arg6[%c0_10, %c0_11, %c0_12] : memref<1x8x128xf32, #tpu.memory_space<vmem>>, vector<1x8x128xf32>
    tpu.vector_store %arg6[%c0_10, %c0_11, %c0_12], %31 {strides = array<i32>} : memref<1x8x128xf32, #tpu.memory_space<vmem>>, vector<1x8x128xf32>,
    %33 = vector.extract_strided_slice %6 {offsets = [0, 0], sizes = [256, 128], strides = [1, 1]} : vector<256x512xf32> to vector<256x128xf32>
    %34 = arith.truncf %33 : vector<256x128xf32> to vector<256x128xbf16>
    %c0_13 = arith.constant 0 : index
    %c0_14 = arith.constant 0 : index
    %c0_15 = arith.constant 0 : index
    %35 = vector.load %arg4[%c0_13, %c0_14, %c0_15] : memref<4x256x128xbf16, #tpu.memory_space<vmem>>, vector<1x256x128xbf16>
    %36 = vector.shape_cast %35 : vector<1x256x128xbf16> to vector<256x128xbf16>
    %37 = vector.shape_cast %34 : vector<256x128xbf16> to vector<1x256x128xbf16>
    tpu.vector_store %arg4[%c0_13, %c0_14, %c0_15], %37 {strides = array<i32>} : memref<4x256x128xbf16, #tpu.memory_space<vmem>>, vector<1x256x128xbf16>,
    %38 = vector.extract_strided_slice %6 {offsets = [0, 128], sizes = [256, 128], strides = [1, 1]} : vector<256x512xf32> to vector<256x128xf32>
    %39 = arith.truncf %38 : vector<256x128xf32> to vector<256x128xbf16>
    %c1 = arith.constant 1 : index
    %c0_16 = arith.constant 0 : index
    %c0_17 = arith.constant 0 : index
    %40 = vector.load %arg4[%c1, %c0_16, %c0_17] : memref<4x256x128xbf16, #tpu.memory_space<vmem>>, vector<1x256x128xbf16>
    %41 = vector.shape_cast %40 : vector<1x256x128xbf16> to vector<256x128xbf16>
    %42 = vector.shape_cast %39 : vector<256x128xbf16> to vector<1x256x128xbf16>
    tpu.vector_store %arg4[%c1, %c0_16, %c0_17], %42 {strides = array<i32>} : memref<4x256x128xbf16, #tpu.memory_space<vmem>>, vector<1x256x128xbf16>,
    %43 = vector.extract_strided_slice %6 {offsets = [0, 256], sizes = [256, 128], strides = [1, 1]} : vector<256x512xf32> to vector<256x128xf32>
    %44 = arith.truncf %43 : vector<256x128xf32> to vector<256x128xbf16>
    %c2 = arith.constant 2 : index
    %c0_18 = arith.constant 0 : index
    %c0_19 = arith.constant 0 : index
    %45 = vector.load %arg4[%c2, %c0_18, %c0_19] : memref<4x256x128xbf16, #tpu.memory_space<vmem>>, vector<1x256x128xbf16>
    %46 = vector.shape_cast %45 : vector<1x256x128xbf16> to vector<256x128xbf16>
    %47 = vector.shape_cast %44 : vector<256x128xbf16> to vector<1x256x128xbf16>
    tpu.vector_store %arg4[%c2, %c0_18, %c0_19], %47 {strides = array<i32>} : memref<4x256x128xbf16, #tpu.memory_space<vmem>>, vector<1x256x128xbf16>,
    %48 = vector.extract_strided_slice %6 {offsets = [0, 384], sizes = [256, 128], strides = [1, 1]} : vector<256x512xf32> to vector<256x128xf32>
    %49 = arith.truncf %48 : vector<256x128xf32> to vector<256x128xbf16>
    %c3 = arith.constant 3 : index
    %c0_20 = arith.constant 0 : index
    %c0_21 = arith.constant 0 : index
    %50 = vector.load %arg4[%c3, %c0_20, %c0_21] : memref<4x256x128xbf16, #tpu.memory_space<vmem>>, vector<1x256x128xbf16>
    %51 = vector.shape_cast %50 : vector<1x256x128xbf16> to vector<256x128xbf16>
    %52 = vector.shape_cast %49 : vector<256x128xbf16> to vector<1x256x128xbf16>
    tpu.vector_store %arg4[%c3, %c0_20, %c0_21], %52 {strides = array<i32>} : memref<4x256x128xbf16, #tpu.memory_space<vmem>>, vector<1x256x128xbf16>,
    return
  }
  func.func @transform_0(%arg0: i32) -> (i32, i32) {
    %c0_i32 = arith.constant 0 : i32
    %c0_i32_0 = arith.constant 0 : i32
    return %arg0, %c0_i32 : i32, i32
  }
  func.func @transform_1(%arg0: i32) -> (i32, i32) {
    %c0_i32 = arith.constant 0 : i32
    %c0_i32_0 = arith.constant 0 : i32
    %c0_i32_1 = arith.constant 0 : i32
    return %c0_i32, %c0_i32_0 : i32, i32
  }
  func.func @transform_2(%arg0: i32) -> (i32, i32) {
    %c0_i32 = arith.constant 0 : i32
    %c0_i32_0 = arith.constant 0 : i32
    %c0_i32_1 = arith.constant 0 : i32
    return %c0_i32, %c0_i32_0 : i32, i32
  }
  func.func @transform_3(%arg0: i32) -> (i32, i32, i32) {
    %c0_i32 = arith.constant 0 : i32
    %c0_i32_0 = arith.constant 0 : i32
    %c0_i32_1 = arith.constant 0 : i32
    return %c0_i32, %arg0, %c0_i32_0 : i32, i32, i32
  }
  func.func @transform_4(%arg0: i32) -> (i32, i32, i32) {
    %c0_i32 = arith.constant 0 : i32
    %c0_i32_0 = arith.constant 0 : i32
    %c0_i32_1 = arith.constant 0 : i32
    return %arg0, %c0_i32, %c0_i32_0 : i32, i32, i32
  }
  func.func @transform_5(%arg0: i32) -> (i32, i32, i32) {
    %c0_i32 = arith.constant 0 : i32
    %c0_i32_0 = arith.constant 0 : i32
    %c0_i32_1 = arith.constant 0 : i32
    return %arg0, %c0_i32, %c0_i32_0 : i32, i32, i32
  }
}

module attributes {stable_mosaic.version = 11 : i64} {
  func.func @_bn2_conv1x1_interleave_kernel(%arg0: i32, %arg1: i32, %arg2: memref<1x2x1x16x16x128xbf16, #tpu.memory_space<vmem>>, %arg3: memref<1x128xf32, #tpu.memory_space<vmem>>, %arg4: memref<1x128xf32, #tpu.memory_space<vmem>>, %arg5: memref<128x128xbf16, #tpu.memory_space<vmem>>, %arg6: memref<1x128xf32, #tpu.memory_space<vmem>>, %arg7: memref<1x16x1x16x256xf32, #tpu.memory_space<vmem>>) attributes {dimension_semantics = [#tpu.dimension_semantics<parallel>, #tpu.dimension_semantics<parallel>], iteration_bounds = array<i64: 2, 2>, scalar_prefetch = 0 : i64, scratch_operands = 0 : i64, tpu.core_type = #tpu.core_type<tc>, window_params = [{transform_indices = @transform_0, window_bounds = array<i64: 1, 2, 1, 16, 16, 128>}, {pipeline_mode = #tpu.pipeline_mode<synchronous>, transform_indices = @transform_1, window_bounds = array<i64: 1, 128>}, {pipeline_mode = #tpu.pipeline_mode<synchronous>, transform_indices = @transform_2, window_bounds = array<i64: 1, 128>}, {pipeline_mode = #tpu.pipeline_mode<synchronous>, transform_indices = @transform_3, window_bounds = array<i64: 128, 128>}, {pipeline_mode = #tpu.pipeline_mode<synchronous>, transform_indices = @transform_4, window_bounds = array<i64: 1, 128>}, {transform_indices = @transform_5, window_bounds = array<i64: 1, 16, 1, 16, 256>}]} {
    %c0 = arith.constant 0 : index
    %c0_0 = arith.constant 0 : index
    %c0_1 = arith.constant 0 : index
    %c0_2 = arith.constant 0 : index
    %c0_3 = arith.constant 0 : index
    %c0_4 = arith.constant 0 : index
    %0 = vector.load %arg2[%c0, %c0_0, %c0_1, %c0_2, %c0_3, %c0_4] : memref<1x2x1x16x16x128xbf16, #tpu.memory_space<vmem>>, vector<1x1x1x16x16x128xbf16>
    %1 = vector.shape_cast %0 : vector<1x1x1x16x16x128xbf16> to vector<16x16x128xbf16>
    %2 = arith.extf %1 : vector<16x16x128xbf16> to vector<16x16x128xf32>
    %c0_5 = arith.constant 0 : index
    %c0_6 = arith.constant 0 : index
    %3 = vector.load %arg3[%c0_5, %c0_6] : memref<1x128xf32, #tpu.memory_space<vmem>>, vector<1x128xf32>
    %4 = vector.shape_cast %3 : vector<1x128xf32> to vector<1x1x128xf32>
    %5 = vector.broadcast %4 : vector<1x1x128xf32> to vector<16x16x128xf32>
    %6 = arith.mulf %2, %5 : vector<16x16x128xf32>
    %c0_7 = arith.constant 0 : index
    %c0_8 = arith.constant 0 : index
    %7 = vector.load %arg4[%c0_7, %c0_8] : memref<1x128xf32, #tpu.memory_space<vmem>>, vector<1x128xf32>
    %8 = vector.shape_cast %7 : vector<1x128xf32> to vector<1x1x128xf32>
    %9 = vector.broadcast %8 : vector<1x1x128xf32> to vector<16x16x128xf32>
    %10 = arith.addf %6, %9 : vector<16x16x128xf32>
    %cst = arith.constant 0.000000e+00 : f32
    %11 = vector.broadcast %cst : f32 to vector<16x16x128xf32>
    %12 = arith.cmpf oge, %10, %11 : vector<16x16x128xf32>
    %cst_9 = arith.constant 0.00999999977 : f32
    %13 = vector.broadcast %cst_9 : f32 to vector<16x16x128xf32>
    %14 = arith.mulf %10, %13 : vector<16x16x128xf32>
    %15 = arith.select %12, %10, %14 : vector<16x16x128xi1>, vector<16x16x128xf32>
    %16 = vector.shape_cast %15 : vector<16x16x128xf32> to vector<256x128xf32>
    %17 = arith.truncf %16 : vector<256x128xf32> to vector<256x128xbf16>
    %c0_10 = arith.constant 0 : index
    %c0_11 = arith.constant 0 : index
    %18 = vector.load %arg5[%c0_10, %c0_11] : memref<128x128xbf16, #tpu.memory_space<vmem>>, vector<128x128xbf16>
    %cst_12 = arith.constant dense<0.000000e+00> : vector<256x128xf32>
    %19 = tpu.matmul %17, %18, %cst_12 {dimension_numbers = #tpu.dot_dimension_numbers<[1], [0], [0], [1], [0, 0, 1, 1], [], []>} : vector<256x128xbf16>, vector<128x128xbf16>, vector<256x128xf32> -> vector<256x128xf32>
    %c0_13 = arith.constant 0 : index
    %c0_14 = arith.constant 0 : index
    %20 = vector.load %arg6[%c0_13, %c0_14] : memref<1x128xf32, #tpu.memory_space<vmem>>, vector<1x128xf32>
    %21 = vector.broadcast %20 : vector<1x128xf32> to vector<256x128xf32>
    %22 = arith.addf %19, %21 : vector<256x128xf32>
    %cst_15 = arith.constant 0.000000e+00 : f32
    %23 = vector.broadcast %cst_15 : f32 to vector<256x128xf32>
    %24 = arith.cmpf oge, %22, %23 : vector<256x128xf32>
    %cst_16 = arith.constant 0.00999999977 : f32
    %25 = vector.broadcast %cst_16 : f32 to vector<256x128xf32>
    %26 = arith.mulf %22, %25 : vector<256x128xf32>
    %27 = arith.select %24, %22, %26 : vector<256x128xi1>, vector<256x128xf32>
    %28 = vector.shape_cast %27 : vector<256x128xf32> to vector<16x16x128xf32>
    %c0_17 = arith.constant 0 : index
    %c0_18 = arith.constant 0 : index
    %c0_19 = arith.constant 0 : index
    %c0_20 = arith.constant 0 : index
    %c0_21 = arith.constant 0 : index
    %29 = vector.load %arg7[%c0_17, %c0_18, %c0_19, %c0_20, %c0_21] : memref<1x16x1x16x256xf32, #tpu.memory_space<vmem>>, vector<1x16x1x16x128xf32>
    %30 = vector.shape_cast %29 : vector<1x16x1x16x128xf32> to vector<16x16x128xf32>
    %31 = vector.shape_cast %28 : vector<16x16x128xf32> to vector<1x16x1x16x128xf32>
    tpu.vector_store %arg7[%c0_17, %c0_18, %c0_19, %c0_20, %c0_21], %31 {strides = array<i32>} : memref<1x16x1x16x256xf32, #tpu.memory_space<vmem>>, vector<1x16x1x16x128xf32>,
    %c0_22 = arith.constant 0 : index
    %c1 = arith.constant 1 : index
    %c0_23 = arith.constant 0 : index
    %c0_24 = arith.constant 0 : index
    %c0_25 = arith.constant 0 : index
    %c0_26 = arith.constant 0 : index
    %32 = vector.load %arg2[%c0_22, %c1, %c0_23, %c0_24, %c0_25, %c0_26] : memref<1x2x1x16x16x128xbf16, #tpu.memory_space<vmem>>, vector<1x1x1x16x16x128xbf16>
    %33 = vector.shape_cast %32 : vector<1x1x1x16x16x128xbf16> to vector<16x16x128xbf16>
    %34 = arith.extf %33 : vector<16x16x128xbf16> to vector<16x16x128xf32>
    %c0_27 = arith.constant 0 : index
    %c0_28 = arith.constant 0 : index
    %35 = vector.load %arg3[%c0_27, %c0_28] : memref<1x128xf32, #tpu.memory_space<vmem>>, vector<1x128xf32>
    %36 = vector.shape_cast %35 : vector<1x128xf32> to vector<1x1x128xf32>
    %37 = vector.broadcast %36 : vector<1x1x128xf32> to vector<16x16x128xf32>
    %38 = arith.mulf %34, %37 : vector<16x16x128xf32>
    %c0_29 = arith.constant 0 : index
    %c0_30 = arith.constant 0 : index
    %39 = vector.load %arg4[%c0_29, %c0_30] : memref<1x128xf32, #tpu.memory_space<vmem>>, vector<1x128xf32>
    %40 = vector.shape_cast %39 : vector<1x128xf32> to vector<1x1x128xf32>
    %41 = vector.broadcast %40 : vector<1x1x128xf32> to vector<16x16x128xf32>
    %42 = arith.addf %38, %41 : vector<16x16x128xf32>
    %cst_31 = arith.constant 0.000000e+00 : f32
    %43 = vector.broadcast %cst_31 : f32 to vector<16x16x128xf32>
    %44 = arith.cmpf oge, %42, %43 : vector<16x16x128xf32>
    %cst_32 = arith.constant 0.00999999977 : f32
    %45 = vector.broadcast %cst_32 : f32 to vector<16x16x128xf32>
    %46 = arith.mulf %42, %45 : vector<16x16x128xf32>
    %47 = arith.select %44, %42, %46 : vector<16x16x128xi1>, vector<16x16x128xf32>
    %48 = vector.shape_cast %47 : vector<16x16x128xf32> to vector<256x128xf32>
    %49 = arith.truncf %48 : vector<256x128xf32> to vector<256x128xbf16>
    %c0_33 = arith.constant 0 : index
    %c0_34 = arith.constant 0 : index
    %50 = vector.load %arg5[%c0_33, %c0_34] : memref<128x128xbf16, #tpu.memory_space<vmem>>, vector<128x128xbf16>
    %cst_35 = arith.constant dense<0.000000e+00> : vector<256x128xf32>
    %51 = tpu.matmul %49, %50, %cst_35 {dimension_numbers = #tpu.dot_dimension_numbers<[1], [0], [0], [1], [0, 0, 1, 1], [], []>} : vector<256x128xbf16>, vector<128x128xbf16>, vector<256x128xf32> -> vector<256x128xf32>
    %c0_36 = arith.constant 0 : index
    %c0_37 = arith.constant 0 : index
    %52 = vector.load %arg6[%c0_36, %c0_37] : memref<1x128xf32, #tpu.memory_space<vmem>>, vector<1x128xf32>
    %53 = vector.broadcast %52 : vector<1x128xf32> to vector<256x128xf32>
    %54 = arith.addf %51, %53 : vector<256x128xf32>
    %cst_38 = arith.constant 0.000000e+00 : f32
    %55 = vector.broadcast %cst_38 : f32 to vector<256x128xf32>
    %56 = arith.cmpf oge, %54, %55 : vector<256x128xf32>
    %cst_39 = arith.constant 0.00999999977 : f32
    %57 = vector.broadcast %cst_39 : f32 to vector<256x128xf32>
    %58 = arith.mulf %54, %57 : vector<256x128xf32>
    %59 = arith.select %56, %54, %58 : vector<256x128xi1>, vector<256x128xf32>
    %60 = vector.shape_cast %59 : vector<256x128xf32> to vector<16x16x128xf32>
    %c0_40 = arith.constant 0 : index
    %c0_41 = arith.constant 0 : index
    %c0_42 = arith.constant 0 : index
    %c0_43 = arith.constant 0 : index
    %c128 = arith.constant 128 : index
    %61 = vector.load %arg7[%c0_40, %c0_41, %c0_42, %c0_43, %c128] : memref<1x16x1x16x256xf32, #tpu.memory_space<vmem>>, vector<1x16x1x16x128xf32>
    %62 = vector.shape_cast %61 : vector<1x16x1x16x128xf32> to vector<16x16x128xf32>
    %63 = vector.shape_cast %60 : vector<16x16x128xf32> to vector<1x16x1x16x128xf32>
    tpu.vector_store %arg7[%c0_40, %c0_41, %c0_42, %c0_43, %c128], %63 {strides = array<i32>} : memref<1x16x1x16x256xf32, #tpu.memory_space<vmem>>, vector<1x16x1x16x128xf32>,
    return
  }
  func.func @transform_0(%arg0: i32, %arg1: i32) -> (i32, i32, i32, i32, i32, i32) {
    %c0_i32 = arith.constant 0 : i32
    %c0_i32_0 = arith.constant 0 : i32
    %c0_i32_1 = arith.constant 0 : i32
    %c0_i32_2 = arith.constant 0 : i32
    %c0_i32_3 = arith.constant 0 : i32
    return %arg0, %c0_i32, %arg1, %c0_i32_0, %c0_i32_1, %c0_i32_2 : i32, i32, i32, i32, i32, i32
  }
  func.func @transform_1(%arg0: i32, %arg1: i32) -> (i32, i32) {
    %c0_i32 = arith.constant 0 : i32
    %c0_i32_0 = arith.constant 0 : i32
    %c0_i32_1 = arith.constant 0 : i32
    return %c0_i32, %c0_i32_0 : i32, i32
  }
  func.func @transform_2(%arg0: i32, %arg1: i32) -> (i32, i32) {
    %c0_i32 = arith.constant 0 : i32
    %c0_i32_0 = arith.constant 0 : i32
    %c0_i32_1 = arith.constant 0 : i32
    return %c0_i32, %c0_i32_0 : i32, i32
  }
  func.func @transform_3(%arg0: i32, %arg1: i32) -> (i32, i32) {
    %c0_i32 = arith.constant 0 : i32
    %c0_i32_0 = arith.constant 0 : i32
    %c0_i32_1 = arith.constant 0 : i32
    return %c0_i32, %c0_i32_0 : i32, i32
  }
  func.func @transform_4(%arg0: i32, %arg1: i32) -> (i32, i32) {
    %c0_i32 = arith.constant 0 : i32
    %c0_i32_0 = arith.constant 0 : i32
    %c0_i32_1 = arith.constant 0 : i32
    return %c0_i32, %c0_i32_0 : i32, i32
  }
  func.func @transform_5(%arg0: i32, %arg1: i32) -> (i32, i32, i32, i32, i32) {
    %c0_i32 = arith.constant 0 : i32
    %c0_i32_0 = arith.constant 0 : i32
    %c0_i32_1 = arith.constant 0 : i32
    %c0_i32_2 = arith.constant 0 : i32
    return %arg1, %c0_i32, %arg0, %c0_i32_0, %c0_i32_1 : i32, i32, i32, i32, i32
  }
}

module attributes {stable_mosaic.version = 11 : i64} {
  func.func @_conv3x3_kernel(%arg0: i32, %arg1: memref<1x16x16x128xbf16, #tpu.memory_space<vmem>>, %arg2: memref<1x128xf32, #tpu.memory_space<vmem>>, %arg3: memref<1x128xf32, #tpu.memory_space<vmem>>, %arg4: memref<9x128x128xbf16, #tpu.memory_space<vmem>>, %arg5: memref<1x128xf32, #tpu.memory_space<vmem>>, %arg6: memref<256x1xf32, #tpu.memory_space<vmem>>, %arg7: memref<256x1xf32, #tpu.memory_space<vmem>>, %arg8: memref<1x16x16x128xbf16, #tpu.memory_space<vmem>>, %arg9: memref<1x8x128xf32, #tpu.memory_space<vmem>>, %arg10: memref<1x8x128xf32, #tpu.memory_space<vmem>>, %arg11: memref<304x128xf32, #tpu.memory_space<vmem>>) attributes {dimension_semantics = [#tpu.dimension_semantics<parallel>], iteration_bounds = array<i64: 8>, scalar_prefetch = 0 : i64, scratch_operands = 1 : i64, tpu.core_type = #tpu.core_type<tc>, window_params = [{transform_indices = @transform_0, window_bounds = array<i64: 1, 16, 16, 128>}, {pipeline_mode = #tpu.pipeline_mode<synchronous>, transform_indices = @transform_1, window_bounds = array<i64: 1, 128>}, {pipeline_mode = #tpu.pipeline_mode<synchronous>, transform_indices = @transform_2, window_bounds = array<i64: 1, 128>}, {pipeline_mode = #tpu.pipeline_mode<synchronous>, transform_indices = @transform_3, window_bounds = array<i64: 9, 128, 128>}, {pipeline_mode = #tpu.pipeline_mode<synchronous>, transform_indices = @transform_4, window_bounds = array<i64: 1, 128>}, {pipeline_mode = #tpu.pipeline_mode<synchronous>, transform_indices = @transform_5, window_bounds = array<i64: 256, 1>}, {pipeline_mode = #tpu.pipeline_mode<synchronous>, transform_indices = @transform_6, window_bounds = array<i64: 256, 1>}, {transform_indices = @transform_7, window_bounds = array<i64: 1, 16, 16, 128>}, {transform_indices = @transform_8, window_bounds = array<i64: 1, 8, 128>}, {transform_indices = @transform_9, window_bounds = array<i64: 1, 8, 128>}]} {
    %c0 = arith.constant 0 : index
    %c0_0 = arith.constant 0 : index
    %c0_1 = arith.constant 0 : index
    %c0_2 = arith.constant 0 : index
    %0 = vector.load %arg1[%c0, %c0_0, %c0_1, %c0_2] : memref<1x16x16x128xbf16, #tpu.memory_space<vmem>>, vector<1x16x16x128xbf16>
    %1 = vector.shape_cast %0 : vector<1x16x16x128xbf16> to vector<16x16x128xbf16>
    %2 = arith.extf %1 : vector<16x16x128xbf16> to vector<16x16x128xf32>
    %c0_3 = arith.constant 0 : index
    %c0_4 = arith.constant 0 : index
    %3 = vector.load %arg2[%c0_3, %c0_4] : memref<1x128xf32, #tpu.memory_space<vmem>>, vector<1x128xf32>
    %4 = vector.shape_cast %3 : vector<1x128xf32> to vector<1x1x128xf32>
    %5 = vector.broadcast %4 : vector<1x1x128xf32> to vector<16x16x128xf32>
    %6 = arith.mulf %2, %5 : vector<16x16x128xf32>
    %c0_5 = arith.constant 0 : index
    %c0_6 = arith.constant 0 : index
    %7 = vector.load %arg3[%c0_5, %c0_6] : memref<1x128xf32, #tpu.memory_space<vmem>>, vector<1x128xf32>
    %8 = vector.shape_cast %7 : vector<1x128xf32> to vector<1x1x128xf32>
    %9 = vector.broadcast %8 : vector<1x1x128xf32> to vector<16x16x128xf32>
    %10 = arith.addf %6, %9 : vector<16x16x128xf32>
    %cst = arith.constant 0.000000e+00 : f32
    %11 = vector.broadcast %cst : f32 to vector<16x16x128xf32>
    %12 = arith.cmpf oge, %10, %11 : vector<16x16x128xf32>
    %cst_7 = arith.constant 0.00999999977 : f32
    %13 = vector.broadcast %cst_7 : f32 to vector<16x16x128xf32>
    %14 = arith.mulf %10, %13 : vector<16x16x128xf32>
    %15 = arith.select %12, %10, %14 : vector<16x16x128xi1>, vector<16x16x128xf32>
    %cst_8 = arith.constant 0.000000e+00 : f32
    %16 = vector.broadcast %cst_8 : f32 to vector<24x128xf32>
    %c0_9 = arith.constant 0 : index
    %c0_10 = arith.constant 0 : index
    %17 = vector.load %arg11[%c0_9, %c0_10] : memref<304x128xf32, #tpu.memory_space<vmem>>, vector<24x128xf32>
    tpu.vector_store %arg11[%c0_9, %c0_10], %16 {strides = array<i32>} : memref<304x128xf32, #tpu.memory_space<vmem>>, vector<24x128xf32>,
    %cst_11 = arith.constant 0.000000e+00 : f32
    %18 = vector.broadcast %cst_11 : f32 to vector<24x128xf32>
    %c280 = arith.constant 280 : index
    %c0_12 = arith.constant 0 : index
    %19 = vector.load %arg11[%c280, %c0_12] : memref<304x128xf32, #tpu.memory_space<vmem>>, vector<24x128xf32>
    tpu.vector_store %arg11[%c280, %c0_12], %18 {strides = array<i32>} : memref<304x128xf32, #tpu.memory_space<vmem>>, vector<24x128xf32>,
    %20 = vector.shape_cast %15 : vector<16x16x128xf32> to vector<256x128xf32>
    %c24 = arith.constant 24 : index
    %c0_13 = arith.constant 0 : index
    %21 = vector.load %arg11[%c24, %c0_13] : memref<304x128xf32, #tpu.memory_space<vmem>>, vector<256x128xf32>
    tpu.vector_store %arg11[%c24, %c0_13], %20 {strides = array<i32>} : memref<304x128xf32, #tpu.memory_space<vmem>>, vector<256x128xf32>,
    %cst_14 = arith.constant 0.000000e+00 : f32
    %22 = vector.broadcast %cst_14 : f32 to vector<256x128xf32>
    %c7 = arith.constant 7 : index
    %c0_15 = arith.constant 0 : index
    %23 = vector.load %arg11[%c7, %c0_15] : memref<304x128xf32, #tpu.memory_space<vmem>>, vector<256x128xf32>
    %c0_16 = arith.constant 0 : index
    %c0_17 = arith.constant 0 : index
    %24 = vector.load %arg6[%c0_16, %c0_17] : memref<256x1xf32, #tpu.memory_space<vmem>>, vector<256x1xf32>
    %25 = vector.broadcast %24 : vector<256x1xf32> to vector<256x128xf32>
    %26 = arith.mulf %23, %25 : vector<256x128xf32>
    %27 = arith.truncf %26 : vector<256x128xf32> to vector<256x128xbf16>
    %c0_18 = arith.constant 0 : index
    %c0_19 = arith.constant 0 : index
    %c0_20 = arith.constant 0 : index
    %28 = vector.load %arg4[%c0_18, %c0_19, %c0_20] : memref<9x128x128xbf16, #tpu.memory_space<vmem>>, vector<1x128x128xbf16>
    %29 = vector.shape_cast %28 : vector<1x128x128xbf16> to vector<128x128xbf16>
    %cst_21 = arith.constant dense<0.000000e+00> : vector<256x128xf32>
    %30 = tpu.matmul %27, %29, %cst_21 {dimension_numbers = #tpu.dot_dimension_numbers<[1], [0], [0], [1], [0, 0, 1, 1], [], []>} : vector<256x128xbf16>, vector<128x128xbf16>, vector<256x128xf32> -> vector<256x128xf32>
    %31 = arith.addf %22, %30 : vector<256x128xf32>
    %c8 = arith.constant 8 : index
    %c0_22 = arith.constant 0 : index
    %32 = vector.load %arg11[%c8, %c0_22] : memref<304x128xf32, #tpu.memory_space<vmem>>, vector<256x128xf32>
    %33 = arith.truncf %32 : vector<256x128xf32> to vector<256x128xbf16>
    %c1 = arith.constant 1 : index
    %c0_23 = arith.constant 0 : index
    %c0_24 = arith.constant 0 : index
    %34 = vector.load %arg4[%c1, %c0_23, %c0_24] : memref<9x128x128xbf16, #tpu.memory_space<vmem>>, vector<1x128x128xbf16>
    %35 = vector.shape_cast %34 : vector<1x128x128xbf16> to vector<128x128xbf16>
    %cst_25 = arith.constant dense<0.000000e+00> : vector<256x128xf32>
    %36 = tpu.matmul %33, %35, %cst_25 {dimension_numbers = #tpu.dot_dimension_numbers<[1], [0], [0], [1], [0, 0, 1, 1], [], []>} : vector<256x128xbf16>, vector<128x128xbf16>, vector<256x128xf32> -> vector<256x128xf32>
    %37 = arith.addf %31, %36 : vector<256x128xf32>
    %c9 = arith.constant 9 : index
    %c0_26 = arith.constant 0 : index
    %38 = vector.load %arg11[%c9, %c0_26] : memref<304x128xf32, #tpu.memory_space<vmem>>, vector<256x128xf32>
    %c0_27 = arith.constant 0 : index
    %c0_28 = arith.constant 0 : index
    %39 = vector.load %arg7[%c0_27, %c0_28] : memref<256x1xf32, #tpu.memory_space<vmem>>, vector<256x1xf32>
    %40 = vector.broadcast %39 : vector<256x1xf32> to vector<256x128xf32>
    %41 = arith.mulf %38, %40 : vector<256x128xf32>
    %42 = arith.truncf %41 : vector<256x128xf32> to vector<256x128xbf16>
    %c2 = arith.constant 2 : index
    %c0_29 = arith.constant 0 : index
    %c0_30 = arith.constant 0 : index
    %43 = vector.load %arg4[%c2, %c0_29, %c0_30] : memref<9x128x128xbf16, #tpu.memory_space<vmem>>, vector<1x128x128xbf16>
    %44 = vector.shape_cast %43 : vector<1x128x128xbf16> to vector<128x128xbf16>
    %cst_31 = arith.constant dense<0.000000e+00> : vector<256x128xf32>
    %45 = tpu.matmul %42, %44, %cst_31 {dimension_numbers = #tpu.dot_dimension_numbers<[1], [0], [0], [1], [0, 0, 1, 1], [], []>} : vector<256x128xbf16>, vector<128x128xbf16>, vector<256x128xf32> -> vector<256x128xf32>
    %46 = arith.addf %37, %45 : vector<256x128xf32>
    %c23 = arith.constant 23 : index
    %c0_32 = arith.constant 0 : index
    %47 = vector.load %arg11[%c23, %c0_32] : memref<304x128xf32, #tpu.memory_space<vmem>>, vector<256x128xf32>
    %c0_33 = arith.constant 0 : index
    %c0_34 = arith.constant 0 : index
    %48 = vector.load %arg6[%c0_33, %c0_34] : memref<256x1xf32, #tpu.memory_space<vmem>>, vector<256x1xf32>
    %49 = vector.broadcast %48 : vector<256x1xf32> to vector<256x128xf32>
    %50 = arith.mulf %47, %49 : vector<256x128xf32>
    %51 = arith.truncf %50 : vector<256x128xf32> to vector<256x128xbf16>
    %c3 = arith.constant 3 : index
    %c0_35 = arith.constant 0 : index
    %c0_36 = arith.constant 0 : index
    %52 = vector.load %arg4[%c3, %c0_35, %c0_36] : memref<9x128x128xbf16, #tpu.memory_space<vmem>>, vector<1x128x128xbf16>
    %53 = vector.shape_cast %52 : vector<1x128x128xbf16> to vector<128x128xbf16>
    %cst_37 = arith.constant dense<0.000000e+00> : vector<256x128xf32>
    %54 = tpu.matmul %51, %53, %cst_37 {dimension_numbers = #tpu.dot_dimension_numbers<[1], [0], [0], [1], [0, 0, 1, 1], [], []>} : vector<256x128xbf16>, vector<128x128xbf16>, vector<256x128xf32> -> vector<256x128xf32>
    %55 = arith.addf %46, %54 : vector<256x128xf32>
    %c24_38 = arith.constant 24 : index
    %c0_39 = arith.constant 0 : index
    %56 = vector.load %arg11[%c24_38, %c0_39] : memref<304x128xf32, #tpu.memory_space<vmem>>, vector<256x128xf32>
    %57 = arith.truncf %56 : vector<256x128xf32> to vector<256x128xbf16>
    %c4 = arith.constant 4 : index
    %c0_40 = arith.constant 0 : index
    %c0_41 = arith.constant 0 : index
    %58 = vector.load %arg4[%c4, %c0_40, %c0_41] : memref<9x128x128xbf16, #tpu.memory_space<vmem>>, vector<1x128x128xbf16>
    %59 = vector.shape_cast %58 : vector<1x128x128xbf16> to vector<128x128xbf16>
    %cst_42 = arith.constant dense<0.000000e+00> : vector<256x128xf32>
    %60 = tpu.matmul %57, %59, %cst_42 {dimension_numbers = #tpu.dot_dimension_numbers<[1], [0], [0], [1], [0, 0, 1, 1], [], []>} : vector<256x128xbf16>, vector<128x128xbf16>, vector<256x128xf32> -> vector<256x128xf32>
    %61 = arith.addf %55, %60 : vector<256x128xf32>
    %c25 = arith.constant 25 : index
    %c0_43 = arith.constant 0 : index
    %62 = vector.load %arg11[%c25, %c0_43] : memref<304x128xf32, #tpu.memory_space<vmem>>, vector<256x128xf32>
    %c0_44 = arith.constant 0 : index
    %c0_45 = arith.constant 0 : index
    %63 = vector.load %arg7[%c0_44, %c0_45] : memref<256x1xf32, #tpu.memory_space<vmem>>, vector<256x1xf32>
    %64 = vector.broadcast %63 : vector<256x1xf32> to vector<256x128xf32>
    %65 = arith.mulf %62, %64 : vector<256x128xf32>
    %66 = arith.truncf %65 : vector<256x128xf32> to vector<256x128xbf16>
    %c5 = arith.constant 5 : index
    %c0_46 = arith.constant 0 : index
    %c0_47 = arith.constant 0 : index
    %67 = vector.load %arg4[%c5, %c0_46, %c0_47] : memref<9x128x128xbf16, #tpu.memory_space<vmem>>, vector<1x128x128xbf16>
    %68 = vector.shape_cast %67 : vector<1x128x128xbf16> to vector<128x128xbf16>
    %cst_48 = arith.constant dense<0.000000e+00> : vector<256x128xf32>
    %69 = tpu.matmul %66, %68, %cst_48 {dimension_numbers = #tpu.dot_dimension_numbers<[1], [0], [0], [1], [0, 0, 1, 1], [], []>} : vector<256x128xbf16>, vector<128x128xbf16>, vector<256x128xf32> -> vector<256x128xf32>
    %70 = arith.addf %61, %69 : vector<256x128xf32>
    %c39 = arith.constant 39 : index
    %c0_49 = arith.constant 0 : index
    %71 = vector.load %arg11[%c39, %c0_49] : memref<304x128xf32, #tpu.memory_space<vmem>>, vector<256x128xf32>
    %c0_50 = arith.constant 0 : index
    %c0_51 = arith.constant 0 : index
    %72 = vector.load %arg6[%c0_50, %c0_51] : memref<256x1xf32, #tpu.memory_space<vmem>>, vector<256x1xf32>
    %73 = vector.broadcast %72 : vector<256x1xf32> to vector<256x128xf32>
    %74 = arith.mulf %71, %73 : vector<256x128xf32>
    %75 = arith.truncf %74 : vector<256x128xf32> to vector<256x128xbf16>
    %c6 = arith.constant 6 : index
    %c0_52 = arith.constant 0 : index
    %c0_53 = arith.constant 0 : index
    %76 = vector.load %arg4[%c6, %c0_52, %c0_53] : memref<9x128x128xbf16, #tpu.memory_space<vmem>>, vector<1x128x128xbf16>
    %77 = vector.shape_cast %76 : vector<1x128x128xbf16> to vector<128x128xbf16>
    %cst_54 = arith.constant dense<0.000000e+00> : vector<256x128xf32>
    %78 = tpu.matmul %75, %77, %cst_54 {dimension_numbers = #tpu.dot_dimension_numbers<[1], [0], [0], [1], [0, 0, 1, 1], [], []>} : vector<256x128xbf16>, vector<128x128xbf16>, vector<256x128xf32> -> vector<256x128xf32>
    %79 = arith.addf %70, %78 : vector<256x128xf32>
    %c40 = arith.constant 40 : index
    %c0_55 = arith.constant 0 : index
    %80 = vector.load %arg11[%c40, %c0_55] : memref<304x128xf32, #tpu.memory_space<vmem>>, vector<256x128xf32>
    %81 = arith.truncf %80 : vector<256x128xf32> to vector<256x128xbf16>
    %c7_56 = arith.constant 7 : index
    %c0_57 = arith.constant 0 : index
    %c0_58 = arith.constant 0 : index
    %82 = vector.load %arg4[%c7_56, %c0_57, %c0_58] : memref<9x128x128xbf16, #tpu.memory_space<vmem>>, vector<1x128x128xbf16>
    %83 = vector.shape_cast %82 : vector<1x128x128xbf16> to vector<128x128xbf16>
    %cst_59 = arith.constant dense<0.000000e+00> : vector<256x128xf32>
    %84 = tpu.matmul %81, %83, %cst_59 {dimension_numbers = #tpu.dot_dimension_numbers<[1], [0], [0], [1], [0, 0, 1, 1], [], []>} : vector<256x128xbf16>, vector<128x128xbf16>, vector<256x128xf32> -> vector<256x128xf32>
    %85 = arith.addf %79, %84 : vector<256x128xf32>
    %c41 = arith.constant 41 : index
    %c0_60 = arith.constant 0 : index
    %86 = vector.load %arg11[%c41, %c0_60] : memref<304x128xf32, #tpu.memory_space<vmem>>, vector<256x128xf32>
    %c0_61 = arith.constant 0 : index
    %c0_62 = arith.constant 0 : index
    %87 = vector.load %arg7[%c0_61, %c0_62] : memref<256x1xf32, #tpu.memory_space<vmem>>, vector<256x1xf32>
    %88 = vector.broadcast %87 : vector<256x1xf32> to vector<256x128xf32>
    %89 = arith.mulf %86, %88 : vector<256x128xf32>
    %90 = arith.truncf %89 : vector<256x128xf32> to vector<256x128xbf16>
    %c8_63 = arith.constant 8 : index
    %c0_64 = arith.constant 0 : index
    %c0_65 = arith.constant 0 : index
    %91 = vector.load %arg4[%c8_63, %c0_64, %c0_65] : memref<9x128x128xbf16, #tpu.memory_space<vmem>>, vector<1x128x128xbf16>
    %92 = vector.shape_cast %91 : vector<1x128x128xbf16> to vector<128x128xbf16>
    %cst_66 = arith.constant dense<0.000000e+00> : vector<256x128xf32>
    %93 = tpu.matmul %90, %92, %cst_66 {dimension_numbers = #tpu.dot_dimension_numbers<[1], [0], [0], [1], [0, 0, 1, 1], [], []>} : vector<256x128xbf16>, vector<128x128xbf16>, vector<256x128xf32> -> vector<256x128xf32>
    %94 = arith.addf %85, %93 : vector<256x128xf32>
    %c0_67 = arith.constant 0 : index
    %c0_68 = arith.constant 0 : index
    %95 = vector.load %arg5[%c0_67, %c0_68] : memref<1x128xf32, #tpu.memory_space<vmem>>, vector<1x128xf32>
    %96 = vector.broadcast %95 : vector<1x128xf32> to vector<256x128xf32>
    %97 = arith.addf %94, %96 : vector<256x128xf32>
    %98 = vector.shape_cast %97 : vector<256x128xf32> to vector<16x16x128xf32>
    %99 = arith.truncf %98 : vector<16x16x128xf32> to vector<16x16x128xbf16>
    %c0_69 = arith.constant 0 : index
    %c0_70 = arith.constant 0 : index
    %c0_71 = arith.constant 0 : index
    %c0_72 = arith.constant 0 : index
    %100 = vector.load %arg8[%c0_69, %c0_70, %c0_71, %c0_72] : memref<1x16x16x128xbf16, #tpu.memory_space<vmem>>, vector<1x16x16x128xbf16>
    %101 = vector.shape_cast %100 : vector<1x16x16x128xbf16> to vector<16x16x128xbf16>
    %102 = vector.shape_cast %99 : vector<16x16x128xbf16> to vector<1x16x16x128xbf16>
    tpu.vector_store %arg8[%c0_69, %c0_70, %c0_71, %c0_72], %102 {strides = array<i32>} : memref<1x16x16x128xbf16, #tpu.memory_space<vmem>>, vector<1x16x16x128xbf16>,
    %cst_73 = arith.constant dense<0.000000e+00> : vector<128xf32>
    %103 = vector.multi_reduction <add>, %97, %cst_73 [0] : vector<256x128xf32> to vector<128xf32>
    %104 = vector.shape_cast %103 : vector<128xf32> to vector<1x128xf32>
    %105 = arith.mulf %97, %97 : vector<256x128xf32>
    %cst_74 = arith.constant dense<0.000000e+00> : vector<128xf32>
    %106 = vector.multi_reduction <add>, %105, %cst_74 [0] : vector<256x128xf32> to vector<128xf32>
    %107 = vector.shape_cast %106 : vector<128xf32> to vector<1x128xf32>
    %108 = vector.shape_cast %104 : vector<1x128xf32> to vector<1x1x128xf32>
    %109 = vector.shape_cast %108 : vector<1x1x128xf32> to vector<1x1x128xf32>
    %110 = vector.broadcast %109 : vector<1x1x128xf32> to vector<1x8x128xf32>
    %c0_75 = arith.constant 0 : index
    %c0_76 = arith.constant 0 : index
    %c0_77 = arith.constant 0 : index
    %111 = vector.load %arg9[%c0_75, %c0_76, %c0_77] : memref<1x8x128xf32, #tpu.memory_space<vmem>>, vector<1x8x128xf32>
    tpu.vector_store %arg9[%c0_75, %c0_76, %c0_77], %110 {strides = array<i32>} : memref<1x8x128xf32, #tpu.memory_space<vmem>>, vector<1x8x128xf32>,
    %112 = vector.shape_cast %107 : vector<1x128xf32> to vector<1x1x128xf32>
    %113 = vector.shape_cast %112 : vector<1x1x128xf32> to vector<1x1x128xf32>
    %114 = vector.broadcast %113 : vector<1x1x128xf32> to vector<1x8x128xf32>
    %c0_78 = arith.constant 0 : index
    %c0_79 = arith.constant 0 : index
    %c0_80 = arith.constant 0 : index
    %115 = vector.load %arg10[%c0_78, %c0_79, %c0_80] : memref<1x8x128xf32, #tpu.memory_space<vmem>>, vector<1x8x128xf32>
    tpu.vector_store %arg10[%c0_78, %c0_79, %c0_80], %114 {strides = array<i32>} : memref<1x8x128xf32, #tpu.memory_space<vmem>>, vector<1x8x128xf32>,
    return
  }
  func.func @transform_0(%arg0: i32) -> (i32, i32, i32, i32) {
    %c0_i32 = arith.constant 0 : i32
    %c0_i32_0 = arith.constant 0 : i32
    %c0_i32_1 = arith.constant 0 : i32
    %c0_i32_2 = arith.constant 0 : i32
    return %arg0, %c0_i32, %c0_i32_0, %c0_i32_1 : i32, i32, i32, i32
  }
  func.func @transform_1(%arg0: i32) -> (i32, i32) {
    %c0_i32 = arith.constant 0 : i32
    %c0_i32_0 = arith.constant 0 : i32
    %c0_i32_1 = arith.constant 0 : i32
    return %c0_i32, %c0_i32_0 : i32, i32
  }
  func.func @transform_2(%arg0: i32) -> (i32, i32) {
    %c0_i32 = arith.constant 0 : i32
    %c0_i32_0 = arith.constant 0 : i32
    %c0_i32_1 = arith.constant 0 : i32
    return %c0_i32, %c0_i32_0 : i32, i32
  }
  func.func @transform_3(%arg0: i32) -> (i32, i32, i32) {
    %c0_i32 = arith.constant 0 : i32
    %c0_i32_0 = arith.constant 0 : i32
    %c0_i32_1 = arith.constant 0 : i32
    %c0_i32_2 = arith.constant 0 : i32
    return %c0_i32, %c0_i32_0, %c0_i32_1 : i32, i32, i32
  }
  func.func @transform_4(%arg0: i32) -> (i32, i32) {
    %c0_i32 = arith.constant 0 : i32
    %c0_i32_0 = arith.constant 0 : i32
    %c0_i32_1 = arith.constant 0 : i32
    return %c0_i32, %c0_i32_0 : i32, i32
  }
  func.func @transform_5(%arg0: i32) -> (i32, i32) {
    %c0_i32 = arith.constant 0 : i32
    %c0_i32_0 = arith.constant 0 : i32
    %c0_i32_1 = arith.constant 0 : i32
    return %c0_i32, %c0_i32_0 : i32, i32
  }
  func.func @transform_6(%arg0: i32) -> (i32, i32) {
    %c0_i32 = arith.constant 0 : i32
    %c0_i32_0 = arith.constant 0 : i32
    %c0_i32_1 = arith.constant 0 : i32
    return %c0_i32, %c0_i32_0 : i32, i32
  }
  func.func @transform_7(%arg0: i32) -> (i32, i32, i32, i32) {
    %c0_i32 = arith.constant 0 : i32
    %c0_i32_0 = arith.constant 0 : i32
    %c0_i32_1 = arith.constant 0 : i32
    %c0_i32_2 = arith.constant 0 : i32
    return %arg0, %c0_i32, %c0_i32_0, %c0_i32_1 : i32, i32, i32, i32
  }
  func.func @transform_8(%arg0: i32) -> (i32, i32, i32) {
    %c0_i32 = arith.constant 0 : i32
    %c0_i32_0 = arith.constant 0 : i32
    %c0_i32_1 = arith.constant 0 : i32
    return %arg0, %c0_i32, %c0_i32_0 : i32, i32, i32
  }
  func.func @transform_9(%arg0: i32) -> (i32, i32, i32) {
    %c0_i32 = arith.constant 0 : i32
    %c0_i32_0 = arith.constant 0 : i32
    %c0_i32_1 = arith.constant 0 : i32
    return %arg0, %c0_i32, %c0_i32_0 : i32, i32, i32
  }
}

</mosaic_0001>

<bundles_post_ra>
// kernel: tile.18
= control target key start
LH: loop header
LB: loop body
LE: loop exit
PB: predicated region body
PF: predicated region fallthrough
CT: control target
= control target key end

     0   :  { %s22_s0 = inlined_call_operand.vmem [shape: f32[128], index: 0, kind: input, shape index: {}]   ;;  %s23_s1 = inlined_call_operand.vmem [shape: f32[4,128], index: 1, kind: output, shape index: {}]  }
   0x1   :  { %v4_v0 = vld [vmem:[%s22_s0] ss:$0 sm:$0xff] }
   0x2   :  { %5 = vst [vmem:[%s23_s1] sm:$0xf] %v4_v0 }

// kernel: tile.28
= control target key start
LH: loop header
LB: loop body
LE: loop exit
PB: predicated region body
PF: predicated region fallthrough
CT: control target
= control target key end

     0   :  { %s28_s0 = inlined_call_operand.vmem [shape: f32[16], index: 0, kind: input, shape index: {}]   ;;  %s29_s1 = inlined_call_operand.vmem [shape: f32[16,16], index: 1, kind: output, shape index: {}]  }
   0x1   :  { %v4_v0 = vld [vmem:[%s28_s0] ss:$0 sm:$0xff] }
   0x2   :  { %5 = vst [vmem:[%s29_s1] sm:$0xff] %v4_v0 }
   0x3   :  { %8 = vst [vmem:[%s29_s1 + $0x8] sm:$0xff] %v4_v0 }

// kernel: tile.0
= control target key start
LH: loop header
LB: loop body
LE: loop exit
PB: predicated region body
PF: predicated region fallthrough
CT: control target
= control target key end

     0   :  { %s549_s8 = smov 126   ;;  %s550_s9 = smov 127   ;;  %vm3_vm0 = vcmask 7168   ;;  %s1092_s0 = inlined_call_operand.vmem [shape: f32[16,16], index: 0, kind: input, shape index: {}]   ;;  %s1093_s1 = inlined_call_operand.vmem [shape: f32[256,1], index: 1, kind: output, shape index: {}]  }
   0x1   :  { %v44_v0 = vld [vmem:[%s1092_s0] sm:$0xff]   ;;  %s551_s10 = smov 125   ;;  %v412_v1 = vld [vmem:[%s1092_s0 + $0x8] sm:$0xff]   ;;  %s552_s0 = smov 124  }
   0x2   :  { %45 = vrot.lane.b32.xlu1 %v44_v0, %s549_s8  ;;  %20 = vrot.lane.b32.xlu0 %v44_v0, %s550_s9  ;;  %s553_s13 = smov 123   ;;  %s554_s14 = smov 122   ;;  %4 = vst.msk [vmem:[%s1093_s1] ss:$16 sm:$0x3] %vm3_vm0, %v44_v0  }
   0x3   :  { %70 = vrot.lane.b32.xlu2 %v44_v0, %s551_s10  ;;  %s555_s15 = smov 121   ;;  %s556_s16 = smov 120   ;;  %5 = vst.msk [vmem:[%s1093_s1] ss:$16 sm:$0xc] %vm3_vm0, %v44_v0  }
   0x4   :  { %s557_s17 = smov 119   ;;  %6 = vst.msk [vmem:[%s1093_s1] ss:$16 sm:$0x30] %vm3_vm0, %v44_v0   ;;  %s558_s30 = smov 118  }
   0x5   :  { %7 = vst.msk [vmem:[%s1093_s1] ss:$16 sm:$0xc0] %vm3_vm0, %v44_v0   ;;  %s559_s4 = smov 117   ;;  %s560_s7 = smov 116  }
   0x6   :  { %395 = vst.msk [vmem:[%s1093_s1 + $0x80] ss:$16 sm:$0x3] %vm3_vm0, %v412_v1  }
   0x7   :  { %396 = vst.msk [vmem:[%s1093_s1 + $0x80] ss:$16 sm:$0xc] %vm3_vm0, %v412_v1  }
   0x8   :  { %397 = vst.msk [vmem:[%s1093_s1 + $0x80] ss:$16 sm:$0x30] %vm3_vm0, %v412_v1  }
   0x9   :  { %398 = vst.msk [vmem:[%s1093_s1 + $0x80] ss:$16 sm:$0xc0] %vm3_vm0, %v412_v1  }
   0xa   :  { %58 = vrot.lane.b32.xlu1 %v412_v1, %s549_s8  ;;  %33 = vrot.lane.b32.xlu0 %v412_v1, %s550_s9  ;;  %s561_s8 = smov 115   ;;  %s562_s9 = smov 114  }
   0xb   :  { %83 = vrot.lane.b32.xlu2 %v412_v1, %s551_s10  ;;  %s563_s10 = smov 113  }
  0x12   :  { %108 = vrot.lane.b32.xlu1 %v412_v1, %s552_s0  ;;  %95 = vrot.lane.b32.xlu0 %v44_v0, %s552_s0 }
  0x13   :  { %120 = vrot.lane.b32.xlu2 %v44_v0, %s553_s13 }
  0x1a   :  { %145 = vrot.lane.b32.xlu1 %v44_v0, %s554_s14  ;;  %133 = vrot.lane.b32.xlu0 %v412_v1, %s553_s13 }
  0x1b   :  { %158 = vrot.lane.b32.xlu2 %v412_v1, %s554_s14 }
  0x22   :  { %183 = vrot.lane.b32.xlu1 %v412_v1, %s555_s15  ;;  %170 = vrot.lane.b32.xlu0 %v44_v0, %s555_s15 }
  0x23   :  { %195 = vrot.lane.b32.xlu2 %v44_v0, %s556_s16 }
  0x2a   :  { %220 = vrot.lane.b32.xlu1 %v44_v0, %s557_s17  ;;  %208 = vrot.lane.b32.xlu0 %v412_v1, %s556_s16 }
  0x2b   :  { %233 = vrot.lane.b32.xlu2 %v412_v1, %s557_s17 }
  0x32   :  { %258 = vrot.lane.b32.xlu1 %v412_v1, %s558_s30  ;;  %245 = vrot.lane.b32.xlu0 %v44_v0, %s558_s30 }
  0x33   :  { %270 = vrot.lane.b32.xlu2 %v44_v0, %s559_s4 }
  0x3a   :  { %295 = vrot.lane.b32.xlu1 %v44_v0, %s560_s7  ;;  %283 = vrot.lane.b32.xlu0 %v412_v1, %s559_s4 }
  0x3b   :  { %308 = vrot.lane.b32.xlu2 %v412_v1, %s560_s7 }
  0x42   :  { %333 = vrot.lane.b32.xlu1 %v412_v1, %s561_s8  ;;  %320 = vrot.lane.b32.xlu0 %v44_v0, %s561_s8 }
  0x43   :  { %345 = vrot.lane.b32.xlu2 %v44_v0, %s562_s9 }
  0x4a   :  { %370 = vrot.lane.b32.xlu1 %v44_v0, %s563_s10  ;;  %358 = vrot.lane.b32.xlu0 %v412_v1, %s562_s9 }
  0x4b   :  { %383 = vrot.lane.b32.xlu2 %v412_v1, %s563_s10 }
  0x5d   :  { %v71_v2 = vpop.permute.xlu2 %70  }
  0x5e   :  { %417 = vst.msk [vmem:[%s1093_s1 + $0x3] ss:$16 sm:$0x3] %vm3_vm0, %v71_v2  }
  0x5f   :  { %418 = vst.msk [vmem:[%s1093_s1 + $0x3] ss:$16 sm:$0xc] %vm3_vm0, %v71_v2  }
  0x60   :  { %419 = vst.msk [vmem:[%s1093_s1 + $0x3] ss:$16 sm:$0x30] %vm3_vm0, %v71_v2  }
  0x61   :  { %420 = vst.msk [vmem:[%s1093_s1 + $0x3] ss:$16 sm:$0xc0] %vm3_vm0, %v71_v2  }
  0x65   :  { %v84_v3 = vpop.permute.xlu2 %83  }
  0x66   :  { %422 = vst.msk [vmem:[%s1093_s1 + $0x83] ss:$16 sm:$0x3] %vm3_vm0, %v84_v3  }
  0x67   :  { %423 = vst.msk [vmem:[%s1093_s1 + $0x83] ss:$16 sm:$0xc] %vm3_vm0, %v84_v3  }
  0x68   :  { %424 = vst.msk [vmem:[%s1093_s1 + $0x83] ss:$16 sm:$0x30] %vm3_vm0, %v84_v3  }
  0x69   :  { %425 = vst.msk [vmem:[%s1093_s1 + $0x83] ss:$16 sm:$0xc0] %vm3_vm0, %v84_v3  }
  0x6d   :  { %v121_v4 = vpop.permute.xlu2 %120  }
  0x6e   :  { %435 = vst.msk [vmem:[%s1093_s1 + $0x5] ss:$16 sm:$0x3] %vm3_vm0, %v121_v4  }
  0x6f   :  { %436 = vst.msk [vmem:[%s1093_s1 + $0x5] ss:$16 sm:$0xc] %vm3_vm0, %v121_v4  }
  0x70   :  { %437 = vst.msk [vmem:[%s1093_s1 + $0x5] ss:$16 sm:$0x30] %vm3_vm0, %v121_v4  }
  0x71   :  { %438 = vst.msk [vmem:[%s1093_s1 + $0x5] ss:$16 sm:$0xc0] %vm3_vm0, %v121_v4  }
  0x74   :  { %v46_v5 = vpop.permute.xlu1 %45   ;;  %v21_v6 = vpop.permute.xlu0 %20  }
  0x75   :  { %408 = vst.msk [vmem:[%s1093_s1 + $0x2] ss:$16 sm:$0x3] %vm3_vm0, %v46_v5   ;;  %v159_v7 = vpop.permute.xlu2 %158  }
  0x76   :  { %409 = vst.msk [vmem:[%s1093_s1 + $0x2] ss:$16 sm:$0xc] %vm3_vm0, %v46_v5  }
  0x77   :  { %410 = vst.msk [vmem:[%s1093_s1 + $0x2] ss:$16 sm:$0x30] %vm3_vm0, %v46_v5  }
  0x78   :  { %411 = vst.msk [vmem:[%s1093_s1 + $0x2] ss:$16 sm:$0xc0] %vm3_vm0, %v46_v5  }
  0x79   :  { %399 = vst.msk [vmem:[%s1093_s1 + $0x1] ss:$16 sm:$0x3] %vm3_vm0, %v21_v6  }
  0x7a   :  { %400 = vst.msk [vmem:[%s1093_s1 + $0x1] ss:$16 sm:$0xc] %vm3_vm0, %v21_v6  }
  0x7b   :  { %401 = vst.msk [vmem:[%s1093_s1 + $0x1] ss:$16 sm:$0x30] %vm3_vm0, %v21_v6  }
  0x7c   :  { %402 = vst.msk [vmem:[%s1093_s1 + $0x1] ss:$16 sm:$0xc0] %vm3_vm0, %v21_v6   ;;  %v59_v8 = vpop.permute.xlu1 %58   ;;  %v34_v9 = vpop.permute.xlu0 %33  }
  0x7d   :  { %413 = vst.msk [vmem:[%s1093_s1 + $0x82] ss:$16 sm:$0x3] %vm3_vm0, %v59_v8   ;;  %v196_v10 = vpop.permute.xlu2 %195  }
  0x7e   :  { %414 = vst.msk [vmem:[%s1093_s1 + $0x82] ss:$16 sm:$0xc] %vm3_vm0, %v59_v8  }
  0x7f   :  { %415 = vst.msk [vmem:[%s1093_s1 + $0x82] ss:$16 sm:$0x30] %vm3_vm0, %v59_v8  }
  0x80   :  { %416 = vst.msk [vmem:[%s1093_s1 + $0x82] ss:$16 sm:$0xc0] %vm3_vm0, %v59_v8  }
  0x81   :  { %404 = vst.msk [vmem:[%s1093_s1 + $0x81] ss:$16 sm:$0x3] %vm3_vm0, %v34_v9  }
  0x82   :  { %405 = vst.msk [vmem:[%s1093_s1 + $0x81] ss:$16 sm:$0xc] %vm3_vm0, %v34_v9  }
  0x83   :  { %406 = vst.msk [vmem:[%s1093_s1 + $0x81] ss:$16 sm:$0x30] %vm3_vm0, %v34_v9  }
  0x84   :  { %407 = vst.msk [vmem:[%s1093_s1 + $0x81] ss:$16 sm:$0xc0] %vm3_vm0, %v34_v9   ;;  %v109_v11 = vpop.permute.xlu1 %108   ;;  %v96_v12 = vpop.permute.xlu0 %95  }
  0x85   :  { %431 = vst.msk [vmem:[%s1093_s1 + $0x84] ss:$16 sm:$0x3] %vm3_vm0, %v109_v11   ;;  %v234_v13 = vpop.permute.xlu2 %233  }
  0x86   :  { %432 = vst.msk [vmem:[%s1093_s1 + $0x84] ss:$16 sm:$0xc] %vm3_vm0, %v109_v11  }
  0x87   :  { %433 = vst.msk [vmem:[%s1093_s1 + $0x84] ss:$16 sm:$0x30] %vm3_vm0, %v109_v11  }
  0x88   :  { %434 = vst.msk [vmem:[%s1093_s1 + $0x84] ss:$16 sm:$0xc0] %vm3_vm0, %v109_v11  }
  0x89   :  { %426 = vst.msk [vmem:[%s1093_s1 + $0x4] ss:$16 sm:$0x3] %vm3_vm0, %v96_v12  }
  0x8a   :  { %427 = vst.msk [vmem:[%s1093_s1 + $0x4] ss:$16 sm:$0xc] %vm3_vm0, %v96_v12  }
  0x8b   :  { %428 = vst.msk [vmem:[%s1093_s1 + $0x4] ss:$16 sm:$0x30] %vm3_vm0, %v96_v12  }
  0x8c   :  { %429 = vst.msk [vmem:[%s1093_s1 + $0x4] ss:$16 sm:$0xc0] %vm3_vm0, %v96_v12   ;;  %v146_v14 = vpop.permute.xlu1 %145   ;;  %v134_v15 = vpop.permute.xlu0 %133  }
  0x8d   :  { %449 = vst.msk [vmem:[%s1093_s1 + $0x86] ss:$16 sm:$0x3] %vm3_vm0, %v159_v7   ;;  %v271_v16 = vpop.permute.xlu2 %270  }
  0x8e   :  { %450 = vst.msk [vmem:[%s1093_s1 + $0x86] ss:$16 sm:$0xc] %vm3_vm0, %v159_v7  }
  0x8f   :  { %451 = vst.msk [vmem:[%s1093_s1 + $0x86] ss:$16 sm:$0x30] %vm3_vm0, %v159_v7  }
  0x90   :  { %452 = vst.msk [vmem:[%s1093_s1 + $0x86] ss:$16 sm:$0xc0] %vm3_vm0, %v159_v7  }
  0x91   :  { %444 = vst.msk [vmem:[%s1093_s1 + $0x6] ss:$16 sm:$0x3] %vm3_vm0, %v146_v14  }
  0x92   :  { %445 = vst.msk [vmem:[%s1093_s1 + $0x6] ss:$16 sm:$0xc] %vm3_vm0, %v146_v14  }
  0x93   :  { %446 = vst.msk [vmem:[%s1093_s1 + $0x6] ss:$16 sm:$0x30] %vm3_vm0, %v146_v14  }
  0x94   :  { %447 = vst.msk [vmem:[%s1093_s1 + $0x6] ss:$16 sm:$0xc0] %vm3_vm0, %v146_v14   ;;  %v184_v17 = vpop.permute.xlu1 %183   ;;  %v171_v18 = vpop.permute.xlu0 %170  }
  0x95   :  { %440 = vst.msk [vmem:[%s1093_s1 + $0x85] ss:$16 sm:$0x3] %vm3_vm0, %v134_v15   ;;  %v309_v21 = vpop.permute.xlu2 %308  }
  0x96   :  { %441 = vst.msk [vmem:[%s1093_s1 + $0x85] ss:$16 sm:$0xc] %vm3_vm0, %v134_v15  }
  0x97   :  { %442 = vst.msk [vmem:[%s1093_s1 + $0x85] ss:$16 sm:$0x30] %vm3_vm0, %v134_v15  }
  0x98   :  { %443 = vst.msk [vmem:[%s1093_s1 + $0x85] ss:$16 sm:$0xc0] %vm3_vm0, %v134_v15  }
  0x99   :  { %462 = vst.msk [vmem:[%s1093_s1 + $0x8] ss:$16 sm:$0x3] %vm3_vm0, %v196_v10  }
  0x9a   :  { %463 = vst.msk [vmem:[%s1093_s1 + $0x8] ss:$16 sm:$0xc] %vm3_vm0, %v196_v10  }
  0x9b   :  { %464 = vst.msk [vmem:[%s1093_s1 + $0x8] ss:$16 sm:$0x30] %vm3_vm0, %v196_v10  }
  0x9c   :  { %465 = vst.msk [vmem:[%s1093_s1 + $0x8] ss:$16 sm:$0xc0] %vm3_vm0, %v196_v10   ;;  %v221_v19 = vpop.permute.xlu1 %220   ;;  %v209_v20 = vpop.permute.xlu0 %208  }
  0x9d   :  { %458 = vst.msk [vmem:[%s1093_s1 + $0x87] ss:$16 sm:$0x3] %vm3_vm0, %v184_v17   ;;  %v346_v24 = vpop.permute.xlu2 %345  }
  0x9e   :  { %459 = vst.msk [vmem:[%s1093_s1 + $0x87] ss:$16 sm:$0xc] %vm3_vm0, %v184_v17  }
  0x9f   :  { %460 = vst.msk [vmem:[%s1093_s1 + $0x87] ss:$16 sm:$0x30] %vm3_vm0, %v184_v17  }
  0xa0   :  { %461 = vst.msk [vmem:[%s1093_s1 + $0x87] ss:$16 sm:$0xc0] %vm3_vm0, %v184_v17  }
  0xa1   :  { %453 = vst.msk [vmem:[%s1093_s1 + $0x7] ss:$16 sm:$0x3] %vm3_vm0, %v171_v18  }
  0xa2   :  { %454 = vst.msk [vmem:[%s1093_s1 + $0x7] ss:$16 sm:$0xc] %vm3_vm0, %v171_v18  }
  0xa3   :  { %455 = vst.msk [vmem:[%s1093_s1 + $0x7] ss:$16 sm:$0x30] %vm3_vm0, %v171_v18  }
  0xa4   :  { %456 = vst.msk [vmem:[%s1093_s1 + $0x7] ss:$16 sm:$0xc0] %vm3_vm0, %v171_v18   ;;  %v259_v22 = vpop.permute.xlu1 %258   ;;  %v246_v23 = vpop.permute.xlu0 %245  }
  0xa5   :  { %476 = vst.msk [vmem:[%s1093_s1 + $0x89] ss:$16 sm:$0x3] %vm3_vm0, %v234_v13   ;;  %v384_v29 = vpop.permute.xlu2 %383  }
  0xa6   :  { %477 = vst.msk [vmem:[%s1093_s1 + $0x89] ss:$16 sm:$0xc] %vm3_vm0, %v234_v13  }
  0xa7   :  { %478 = vst.msk [vmem:[%s1093_s1 + $0x89] ss:$16 sm:$0x30] %vm3_vm0, %v234_v13  }
  0xa8   :  { %479 = vst.msk [vmem:[%s1093_s1 + $0x89] ss:$16 sm:$0xc0] %vm3_vm0, %v234_v13  }
  0xa9   :  { %471 = vst.msk [vmem:[%s1093_s1 + $0x9] ss:$16 sm:$0x3] %vm3_vm0, %v221_v19  }
  0xaa   :  { %472 = vst.msk [vmem:[%s1093_s1 + $0x9] ss:$16 sm:$0xc] %vm3_vm0, %v221_v19  }
  0xab   :  { %473 = vst.msk [vmem:[%s1093_s1 + $0x9] ss:$16 sm:$0x30] %vm3_vm0, %v221_v19  }
  0xac   :  { %474 = vst.msk [vmem:[%s1093_s1 + $0x9] ss:$16 sm:$0xc0] %vm3_vm0, %v221_v19   ;;  %v296_v25 = vpop.permute.xlu1 %295   ;;  %v284_v26 = vpop.permute.xlu0 %283  }
  0xad   :  { %467 = vst.msk [vmem:[%s1093_s1 + $0x88] ss:$16 sm:$0x3] %vm3_vm0, %v209_v20  }
  0xae   :  { %468 = vst.msk [vmem:[%s1093_s1 + $0x88] ss:$16 sm:$0xc] %vm3_vm0, %v209_v20  }
  0xaf   :  { %469 = vst.msk [vmem:[%s1093_s1 + $0x88] ss:$16 sm:$0x30] %vm3_vm0, %v209_v20  }
  0xb0   :  { %470 = vst.msk [vmem:[%s1093_s1 + $0x88] ss:$16 sm:$0xc0] %vm3_vm0, %v209_v20  }
  0xb1   :  { %489 = vst.msk [vmem:[%s1093_s1 + $0xb] ss:$16 sm:$0x3] %vm3_vm0, %v271_v16  }
  0xb2   :  { %490 = vst.msk [vmem:[%s1093_s1 + $0xb] ss:$16 sm:$0xc] %vm3_vm0, %v271_v16  }
  0xb3   :  { %491 = vst.msk [vmem:[%s1093_s1 + $0xb] ss:$16 sm:$0x30] %vm3_vm0, %v271_v16  }
  0xb4   :  { %492 = vst.msk [vmem:[%s1093_s1 + $0xb] ss:$16 sm:$0xc0] %vm3_vm0, %v271_v16   ;;  %v334_v27 = vpop.permute.xlu1 %333   ;;  %v321_v28 = vpop.permute.xlu0 %320  }
  0xb5   :  { %485 = vst.msk [vmem:[%s1093_s1 + $0x8a] ss:$16 sm:$0x3] %vm3_vm0, %v259_v22  }
  0xb6   :  { %486 = vst.msk [vmem:[%s1093_s1 + $0x8a] ss:$16 sm:$0xc] %vm3_vm0, %v259_v22  }
  0xb7   :  { %487 = vst.msk [vmem:[%s1093_s1 + $0x8a] ss:$16 sm:$0x30] %vm3_vm0, %v259_v22  }
  0xb8   :  { %488 = vst.msk [vmem:[%s1093_s1 + $0x8a] ss:$16 sm:$0xc0] %vm3_vm0, %v259_v22  }
  0xb9   :  { %480 = vst.msk [vmem:[%s1093_s1 + $0xa] ss:$16 sm:$0x3] %vm3_vm0, %v246_v23  }
  0xba   :  { %481 = vst.msk [vmem:[%s1093_s1 + $0xa] ss:$16 sm:$0xc] %vm3_vm0, %v246_v23  }
  0xbb   :  { %482 = vst.msk [vmem:[%s1093_s1 + $0xa] ss:$16 sm:$0x30] %vm3_vm0, %v246_v23  }
  0xbc   :  { %483 = vst.msk [vmem:[%s1093_s1 + $0xa] ss:$16 sm:$0xc0] %vm3_vm0, %v246_v23   ;;  %v371_v30 = vpop.permute.xlu1 %370   ;;  %v359_v31 = vpop.permute.xlu0 %358  }
  0xbd   :  { %503 = vst.msk [vmem:[%s1093_s1 + $0x8c] ss:$16 sm:$0x3] %vm3_vm0, %v309_v21  }
  0xbe   :  { %504 = vst.msk [vmem:[%s1093_s1 + $0x8c] ss:$16 sm:$0xc] %vm3_vm0, %v309_v21  }
  0xbf   :  { %505 = vst.msk [vmem:[%s1093_s1 + $0x8c] ss:$16 sm:$0x30] %vm3_vm0, %v309_v21  }
  0xc0   :  { %506 = vst.msk [vmem:[%s1093_s1 + $0x8c] ss:$16 sm:$0xc0] %vm3_vm0, %v309_v21  }
  0xc1   :  { %498 = vst.msk [vmem:[%s1093_s1 + $0xc] ss:$16 sm:$0x3] %vm3_vm0, %v296_v25  }
  0xc2   :  { %499 = vst.msk [vmem:[%s1093_s1 + $0xc] ss:$16 sm:$0xc] %vm3_vm0, %v296_v25  }
  0xc3   :  { %500 = vst.msk [vmem:[%s1093_s1 + $0xc] ss:$16 sm:$0x30] %vm3_vm0, %v296_v25  }
  0xc4   :  { %501 = vst.msk [vmem:[%s1093_s1 + $0xc] ss:$16 sm:$0xc0] %vm3_vm0, %v296_v25  }
  0xc5   :  { %494 = vst.msk [vmem:[%s1093_s1 + $0x8b] ss:$16 sm:$0x3] %vm3_vm0, %v284_v26  }
  0xc6   :  { %495 = vst.msk [vmem:[%s1093_s1 + $0x8b] ss:$16 sm:$0xc] %vm3_vm0, %v284_v26  }
  0xc7   :  { %496 = vst.msk [vmem:[%s1093_s1 + $0x8b] ss:$16 sm:$0x30] %vm3_vm0, %v284_v26  }
  0xc8   :  { %497 = vst.msk [vmem:[%s1093_s1 + $0x8b] ss:$16 sm:$0xc0] %vm3_vm0, %v284_v26  }
  0xc9   :  { %516 = vst.msk [vmem:[%s1093_s1 + $0xe] ss:$16 sm:$0x3] %vm3_vm0, %v346_v24  }
  0xca   :  { %517 = vst.msk [vmem:[%s1093_s1 + $0xe] ss:$16 sm:$0xc] %vm3_vm0, %v346_v24  }
  0xcb   :  { %518 = vst.msk [vmem:[%s1093_s1 + $0xe] ss:$16 sm:$0x30] %vm3_vm0, %v346_v24  }
  0xcc   :  { %519 = vst.msk [vmem:[%s1093_s1 + $0xe] ss:$16 sm:$0xc0] %vm3_vm0, %v346_v24  }
  0xcd   :  { %512 = vst.msk [vmem:[%s1093_s1 + $0x8d] ss:$16 sm:$0x3] %vm3_vm0, %v334_v27  }
  0xce   :  { %513 = vst.msk [vmem:[%s1093_s1 + $0x8d] ss:$16 sm:$0xc] %vm3_vm0, %v334_v27  }
  0xcf   :  { %514 = vst.msk [vmem:[%s1093_s1 + $0x8d] ss:$16 sm:$0x30] %vm3_vm0, %v334_v27  }
  0xd0   :  { %515 = vst.msk [vmem:[%s1093_s1 + $0x8d] ss:$16 sm:$0xc0] %vm3_vm0, %v334_v27  }
  0xd1   :  { %507 = vst.msk [vmem:[%s1093_s1 + $0xd] ss:$16 sm:$0x3] %vm3_vm0, %v321_v28  }
  0xd2   :  { %508 = vst.msk [vmem:[%s1093_s1 + $0xd] ss:$16 sm:$0xc] %vm3_vm0, %v321_v28  }
  0xd3   :  { %509 = vst.msk [vmem:[%s1093_s1 + $0xd] ss:$16 sm:$0x30] %vm3_vm0, %v321_v28  }
  0xd4   :  { %510 = vst.msk [vmem:[%s1093_s1 + $0xd] ss:$16 sm:$0xc0] %vm3_vm0, %v321_v28  }
  0xd5   :  { %530 = vst.msk [vmem:[%s1093_s1 + $0x8f] ss:$16 sm:$0x3] %vm3_vm0, %v384_v29  }
  0xd6   :  { %531 = vst.msk [vmem:[%s1093_s1 + $0x8f] ss:$16 sm:$0xc] %vm3_vm0, %v384_v29  }
  0xd7   :  { %532 = vst.msk [vmem:[%s1093_s1 + $0x8f] ss:$16 sm:$0x30] %vm3_vm0, %v384_v29  }
  0xd8   :  { %533 = vst.msk [vmem:[%s1093_s1 + $0x8f] ss:$16 sm:$0xc0] %vm3_vm0, %v384_v29  }
  0xd9   :  { %525 = vst.msk [vmem:[%s1093_s1 + $0xf] ss:$16 sm:$0x3] %vm3_vm0, %v371_v30  }
  0xda   :  { %526 = vst.msk [vmem:[%s1093_s1 + $0xf] ss:$16 sm:$0xc] %vm3_vm0, %v371_v30  }
  0xdb   :  { %527 = vst.msk [vmem:[%s1093_s1 + $0xf] ss:$16 sm:$0x30] %vm3_vm0, %v371_v30  }
  0xdc   :  { %528 = vst.msk [vmem:[%s1093_s1 + $0xf] ss:$16 sm:$0xc0] %vm3_vm0, %v371_v30  }
  0xdd   :  { %521 = vst.msk [vmem:[%s1093_s1 + $0x8e] ss:$16 sm:$0x3] %vm3_vm0, %v359_v31  }
  0xde   :  { %522 = vst.msk [vmem:[%s1093_s1 + $0x8e] ss:$16 sm:$0xc] %vm3_vm0, %v359_v31  }
  0xdf   :  { %523 = vst.msk [vmem:[%s1093_s1 + $0x8e] ss:$16 sm:$0x30] %vm3_vm0, %v359_v31  }
  0xe0   :  { %524 = vst.msk [vmem:[%s1093_s1 + $0x8e] ss:$16 sm:$0xc0] %vm3_vm0, %v359_v31  }

// kernel: scale_up_forward.5
= control target key start
LH: loop header
LB: loop body
LE: loop exit
PB: predicated region body
PF: predicated region fallthrough
CT: control target
= control target key end

     0   :  { %s2281_s18 = smov 0   ;;  %s2283_s19 = smov 0   ;;  %s2966_s0 = inlined_call_operand.vmem [shape: bf16[2,2,2,16,16,128], index: 0, kind: input, shape index: {}]   ;;  %s2967_s1 = inlined_call_operand.vmem [shape: f32[1,128], index: 1, kind: input, shape index: {}]   ;;  %s2968_s2 = inlined_call_operand.vmem [shape: f32[1,128], index: 2, kind: input, shape index: {}]   ;;  %s2969_s3 = inlined_call_operand.vmem [shape: bf16[128,128], index: 3, kind: input, shape index: {}]   ;;  %s2970_s4 = inlined_call_operand.vmem [shape: f32[1,128], index: 4, kind: input, shape index: {}]   ;;  %s2971_s5 = inlined_call_operand.vmem [shape: f32[2,16,2,16,256], index: 5, kind: output, shape index: {}]  }
   0x1   :  { %s2285_s20 = smov 0   ;;  %s2287_s21 = smov 0  }
   0x2   :  { %s2289_s22 = smov 0   ;;  %s2291_s23 = smov 0  }
   0x3   :  { %s2293_s24 = smov 0  }
   0x4 LB: > { %s24_s25 = sadd.s32 1, %s2241_s22  ;;  %s27_s26 = sadd.s32 1, %s2245_s23  ;;  %s2249_s24 = sphi %s2293_s24, %s15_s24   ;;  %s2245_s23 = sphi %s2291_s23, %s2978_s23   ;;  %s2241_s22 = sphi %s2289_s22, %s2977_s22   ;;  %s2237_s21 = sphi %s2287_s21, %s2976_s21   ;;  %s2233_s20 = sphi %s2285_s20, %s2975_s20   ;;  %s2229_s19 = sphi %s2283_s19, %s2974_s19   ;;  %s2225_s18 = sphi %s2281_s18, %s2973_s18  }
   0x5   : > { %p25_p0 = scmp.ge.s32.totalorder %s24_s25, 2  ;;  %s1829_s27 = sadd.s32 4294967295, %s2249_s24  }
   0x6   : > { %p43_p1 = scmp.ne.s32.totalorder %s2229_s19, %s2225_s18  ;;  %p44_p2 = scmp.eq.s32.totalorder %s2249_s24, 0 }
   0x7   : > { %s2980_s25 = smov (%p25_p0, %s24_s25), 0  ;;  %s2982_s26 = smov (!%p25_p0, %s27_s26), %s2245_s23 }
   0x8   : > { %p29_p3 = scmp.ge.s32.totalorder %s2982_s26, 2  ;;  %p159_p4 = scmp.eq.s32.totalorder %s1829_s27, 3 }
   0x9   : > { %s32_s28 = ssub.s32 %s2241_s22, %s2980_s25  ;;  %p45_p5 = por %p44_p2, %p43_p1 }
   0xa   : > { %s2984_s26 = smov (%p29_p3, %s2982_s26), 0  ;;  %p2329_p6 = por %p159_p4, %p43_p1 }
   0xb   : > { %s31_s30 = ssub.s32 %s2245_s23, %s2984_s26  ;;  %s36_s7 = sadd.s32 1, %s2229_s19 }
   0xc   : > { %s33_s6 = sor.u32 %s32_s28, %s31_s30  ;;  %p1832_p8 = scmp.ge.s32.totalorder %s2249_s24, 4 }
   0xd   : > { %p34_p7 = scmp.eq.s32.totalorder %s33_s6, 0 }
   0xe   : > { %193 = sbr.rel (%p1832_p8) target bundleno = 58 (0x3a), region = 32 }
   0xf   : > { %s2337_s8 = scalar_select %p34_p7, %s2229_s19, %s36_s7  }
  0x13   : > { %196 = sbr.rel (!%p45_p5) target bundleno = 58 (0x3a), region = 36  ;;  %s198_s9 = sand.u32 (%p45_p5), 1, %s2229_s19  }
  0x14   : > { %s1834_s10 = sshll.u32 (%p45_p5), %s2241_s22, 5  ;;  %s1833_s11 = sshll.u32 (%p45_p5), %s198_s9, 8 }
  0x15   : > { %s1835_s12 = sshll.u32 (%p45_p5), %s2245_s23, 7  ;;  %s2351_s27 = scalar_lea.vmem (%p45_p5), [#allocation2], %s1833_s11 }
  0x16   : > { %s203_s13 = sadd.s32 (%p45_p5), %s1835_s12, %s1834_s10 }
  0x17   : > { %s1836_s14 = sshll.u32 (%p45_p5), %s203_s13, 2 }
  0x18   : > { %s2346_s17 = scalar_lea.vmem %s2966_s0, %s1836_s14 }
  0x19   : > { %v222_v0 = vld [vmem:[%s2346_s17] sm:$0xff]   ;;  %v226_v1 = vld [vmem:[%s2346_s17 + $0x8] sm:$0xff]   ;;  %v230_v2 = vld [vmem:[%s2346_s17 + $0x10] sm:$0xff]  }
  0x1a   : > { %223 = vst [vmem:[%s2351_s27] sm:$0xff] %v222_v0   ;;  %v234_v3 = vld [vmem:[%s2346_s17 + $0x18] sm:$0xff]   ;;  %v238_v4 = vld [vmem:[%s2346_s17 + $0x20] sm:$0xff]   ;;  %v242_v5 = vld [vmem:[%s2346_s17 + $0x28] sm:$0xff]  }
  0x1b   : > { %227 = vst [vmem:[%s2351_s27 + $0x8] sm:$0xff] %v226_v1   ;;  %v246_v6 = vld [vmem:[%s2346_s17 + $0x30] sm:$0xff]   ;;  %v250_v7 = vld [vmem:[%s2346_s17 + $0x38] sm:$0xff]   ;;  %v254_v8 = vld [vmem:[%s2346_s17 + $0x40] sm:$0xff]  }
  0x1c   : > { %231 = vst [vmem:[%s2351_s27 + $0x10] sm:$0xff] %v230_v2   ;;  %v258_v9 = vld [vmem:[%s2346_s17 + $0x48] sm:$0xff]   ;;  %v262_v10 = vld [vmem:[%s2346_s17 + $0x50] sm:$0xff]   ;;  %v266_v11 = vld [vmem:[%s2346_s17 + $0x58] sm:$0xff]  }
  0x1d   : > { %235 = vst [vmem:[%s2351_s27 + $0x18] sm:$0xff] %v234_v3   ;;  %v270_v12 = vld [vmem:[%s2346_s17 + $0x60] sm:$0xff]   ;;  %v274_v13 = vld [vmem:[%s2346_s17 + $0x68] sm:$0xff]   ;;  %v278_v14 = vld [vmem:[%s2346_s17 + $0x70] sm:$0xff]  }
  0x1e   : > { %239 = vst [vmem:[%s2351_s27 + $0x20] sm:$0xff] %v238_v4   ;;  %v282_v15 = vld [vmem:[%s2346_s17 + $0x78] sm:$0xff]   ;;  %v286_v16 = vld [vmem:[%s2346_s17 + $0x100] sm:$0xff]   ;;  %v290_v17 = vld [vmem:[%s2346_s17 + $0x108] sm:$0xff]  }
  0x1f   : > { %243 = vst [vmem:[%s2351_s27 + $0x28] sm:$0xff] %v242_v5   ;;  %v294_v18 = vld [vmem:[%s2346_s17 + $0x110] sm:$0xff]   ;;  %v298_v19 = vld [vmem:[%s2346_s17 + $0x118] sm:$0xff]   ;;  %v302_v20 = vld [vmem:[%s2346_s17 + $0x120] sm:$0xff]  }
  0x20   : > { %247 = vst [vmem:[%s2351_s27 + $0x30] sm:$0xff] %v246_v6   ;;  %v306_v21 = vld [vmem:[%s2346_s17 + $0x128] sm:$0xff]   ;;  %v310_v22 = vld [vmem:[%s2346_s17 + $0x130] sm:$0xff]   ;;  %v314_v23 = vld [vmem:[%s2346_s17 + $0x138] sm:$0xff]  }
  0x21   : > { %251 = vst [vmem:[%s2351_s27 + $0x38] sm:$0xff] %v250_v7   ;;  %v318_v24 = vld [vmem:[%s2346_s17 + $0x140] sm:$0xff]   ;;  %v322_v25 = vld [vmem:[%s2346_s17 + $0x148] sm:$0xff]   ;;  %v326_v26 = vld [vmem:[%s2346_s17 + $0x150] sm:$0xff]  }
  0x22   : > { %255 = vst [vmem:[%s2351_s27 + $0x40] sm:$0xff] %v254_v8   ;;  %v330_v27 = vld [vmem:[%s2346_s17 + $0x158] sm:$0xff]   ;;  %v334_v28 = vld [vmem:[%s2346_s17 + $0x160] sm:$0xff]   ;;  %v338_v29 = vld [vmem:[%s2346_s17 + $0x168] sm:$0xff]  }
  0x23   : > { %259 = vst [vmem:[%s2351_s27 + $0x48] sm:$0xff] %v258_v9   ;;  %v342_v30 = vld [vmem:[%s2346_s17 + $0x170] sm:$0xff]   ;;  %v346_v31 = vld [vmem:[%s2346_s17 + $0x178] sm:$0xff]  }
  0x24   : > { %263 = vst [vmem:[%s2351_s27 + $0x50] sm:$0xff] %v262_v10  }
  0x25   : > { %267 = vst [vmem:[%s2351_s27 + $0x58] sm:$0xff] %v266_v11  }
  0x26   : > { %271 = vst [vmem:[%s2351_s27 + $0x60] sm:$0xff] %v270_v12  }
  0x27   : > { %275 = vst [vmem:[%s2351_s27 + $0x68] sm:$0xff] %v274_v13  }
  0x28   : > { %279 = vst [vmem:[%s2351_s27 + $0x70] sm:$0xff] %v278_v14  }
  0x29   : > { %283 = vst [vmem:[%s2351_s27 + $0x78] sm:$0xff] %v282_v15  }
  0x2a   : > { %287 = vst [vmem:[%s2351_s27 + $0x80] sm:$0xff] %v286_v16  }
  0x2b   : > { %291 = vst [vmem:[%s2351_s27 + $0x88] sm:$0xff] %v290_v17  }
  0x2c   : > { %295 = vst [vmem:[%s2351_s27 + $0x90] sm:$0xff] %v294_v18  }
  0x2d   : > { %299 = vst [vmem:[%s2351_s27 + $0x98] sm:$0xff] %v298_v19  }
  0x2e   : > { %303 = vst [vmem:[%s2351_s27 + $0xa0] sm:$0xff] %v302_v20  }
  0x2f   : > { %307 = vst [vmem:[%s2351_s27 + $0xa8] sm:$0xff] %v306_v21  }
  0x30   : > { %311 = vst [vmem:[%s2351_s27 + $0xb0] sm:$0xff] %v310_v22  }
  0x31   : > { %315 = vst [vmem:[%s2351_s27 + $0xb8] sm:$0xff] %v314_v23  }
  0x32   : > { %319 = vst [vmem:[%s2351_s27 + $0xc0] sm:$0xff] %v318_v24  }
  0x33   : > { %323 = vst [vmem:[%s2351_s27 + $0xc8] sm:$0xff] %v322_v25  }
  0x34   : > { %327 = vst [vmem:[%s2351_s27 + $0xd0] sm:$0xff] %v326_v26  }
  0x35   : > { %331 = vst [vmem:[%s2351_s27 + $0xd8] sm:$0xff] %v330_v27  }
  0x36   : > { %335 = vst [vmem:[%s2351_s27 + $0xe0] sm:$0xff] %v334_v28  }
  0x37   : > { %339 = vst [vmem:[%s2351_s27 + $0xe8] sm:$0xff] %v338_v29  }
  0x38   : > { %343 = vst [vmem:[%s2351_s27 + $0xf0] sm:$0xff] %v342_v30  }
  0x39   : > { %347 = vst [vmem:[%s2351_s27 + $0xf8] sm:$0xff] %v346_v31  }
  0x3a PF: > { %p1837_p9 = scmp.ge.s32.totalorder %s2249_s24, 1  ;;  %p500_p10 = scmp.lt.s32.totalorder %s2249_s24, 5 }
  0x3c   : > { %p501_p11 = pnand %p1837_p9, %p500_p10 }
  0x3d   : > { %s507_s9 = sand.u32 (!%p501_p11), 1, %s2225_s18  }
  0x3e   : > { %504 = sbr.rel (%p501_p11) target bundleno = 406 (0x196), region = 77  ;;  %s1838_s10 = sshll.u32 (!%p501_p11), %s507_s9, 8 }
  0x3f   : > { %s2434_s17 = scalar_lea.vmem (!%p501_p11), [#allocation2], %s1838_s10  ;;  %s1839_s14 = sshll.u32 (!%p501_p11), %s507_s9, 9 }
  0x40   : > { %s2680_s15 = scalar_lea.vmem (!%p501_p11), [#allocation3], %s1839_s14 }
  0x43   : > { %v1949_v32 = vld [vmem:[%s2969_s3 + $0x38] sm:$0xff]  ;;  %v1948_v34 = vld [vmem:[%s2969_s3 + $0x30] sm:$0xff]  ;;  %v1947_v36 = vld [vmem:[%s2969_s3 + $0x28] sm:$0xff]  ;;  %s1937_s18 = sshll.u32 (%p2329_p6), %s2237_s21, 2  ;;  %s1938_s9 = sshll.u32 (%p2329_p6), %s2233_s20, 7 }
  0x44   : > { %v1957_v33 = vld [vmem:[%s2969_s3 + $0x38] sm:$0xff]  ;;  %849 = vmatpush.bf16.msra.mxu0 %v1949_v32  ;;  %2117 = vmatpush.bf16.msra.mxu2 %v1949_v32  ;;  %v1956_v35 = vld [vmem:[%s2969_s3 + $0x30] sm:$0xff]  ;;  %v1959_v37 = vld [vmem:[%s2434_s17] sm:$0xff]   ;;  %s1609_s16 = sadd.s32 (%p2329_p6), %s1938_s9, %s1937_s18 }
  0x45   : > { %1383 = vmatpush.bf16.msra.mxu1 %v1957_v33  ;;  %2125 = vmatpush.bf16.msra.mxu3 %v1957_v33  ;;  %v1955_v38 = vld [vmem:[%s2969_s3 + $0x28] sm:$0xff]  ;;  %v1960_v39 = vunpack.c.l.bf16 %v1959_v37  ;;  %v1961_v40 = vunpack.c.h.bf16 %v1959_v37  ;;  %v2443_v41 = vld [vmem:[%s2967_s1] ss:$0 sm:$0xff]  ;;  %v1945_v60 = vld [vmem:[%s2969_s3 + $0x18] sm:$0xff]  ;;  %s1939_s27 = sshll.u32 (%p2329_p6), %s1609_s16, 3 }
  0x46   : > { %v2093_v42 = vld [vmem:[%s2434_s17 + $0x40] sm:$0xff]   ;;  %v1953_v1 = vld [vmem:[%s2969_s3 + $0x18] sm:$0xff]  ;;  %v2086_v7 = vld [vmem:[%s2434_s17 + $0x8] sm:$0xff]   ;;  %s2817_s30 = scalar_lea.vmem (%p2329_p6), %s2971_s5, %s1939_s27 }
  0x47   : > { %v2101_v43 = vld [vmem:[%s2434_s17 + $0x80] sm:$0xff]   ;;  %v1992_v44 = vunpack.c.l.bf16 %v2093_v42  ;;  %v601_v45 = vmul.f32 %v2443_v41, %v1960_v39  ;;  %v1993_v47 = vunpack.c.h.bf16 %v2093_v42  ;;  %v602_v50 = vmul.f32 %v2443_v41, %v1961_v40  ;;  %v1944_v8 = vld [vmem:[%s2969_s3 + $0x10] sm:$0xff]  ;;  %v1943_v17 = vld [vmem:[%s2969_s3 + $0x8] sm:$0xff] }
  0x48   : > { %850 = vmatpush.bf16.msra.mxu0 %v1948_v34  ;;  %2118 = vmatpush.bf16.msra.mxu2 %v1948_v34  ;;  %v2451_v46 = vld [vmem:[%s2968_s2] ss:$0 sm:$0xff]  ;;  %v2024_v51 = vunpack.c.l.bf16 %v2101_v43  ;;  %v2025_v52 = vunpack.c.h.bf16 %v2101_v43  ;;  %v1952_v12 = vld [vmem:[%s2969_s3 + $0x10] sm:$0xff]  ;;  %v1964_v16 = vunpack.c.l.bf16 %v2086_v7  ;;  %v1951_v18 = vld [vmem:[%s2969_s3 + $0x8] sm:$0xff]  ;;  %v1965_v21 = vunpack.c.h.bf16 %v2086_v7 }
  0x49   : > { %1384 = vmatpush.bf16.msra.mxu1 %v1956_v35  ;;  %2126 = vmatpush.bf16.msra.mxu3 %v1956_v35  ;;  %v2109_v48 = vld [vmem:[%s2434_s17 + $0xc0] sm:$0xff]   ;;  %v617_v56 = vmul.f32 %v2443_v41, %v1992_v44  ;;  %v637_v57 = vadd.f32 %v2451_v46, %v601_v45  ;;  %v618_v58 = vmul.f32 %v2443_v41, %v1993_v47  ;;  %v2094_v22 = vld [vmem:[%s2434_s17 + $0x48] sm:$0xff]  }
  0x4a   : > { %v1946_v49 = vld [vmem:[%s2969_s3 + $0x20] sm:$0xff]  ;;  %v2056_v55 = vunpack.c.l.bf16 %v2109_v48  ;;  %v2057_v59 = vunpack.c.h.bf16 %v2109_v48  ;;  %v638_v61 = vadd.f32 %v2451_v46, %v602_v50  ;;  %v2102_v26 = vld [vmem:[%s2434_s17 + $0x88] sm:$0xff]   ;;  %v603_v30 = vmul.f32 %v2443_v41, %v1964_v16  ;;  %v2103_v16 = vld [vmem:[%s2434_s17 + $0x90] sm:$0xff]  }
  0x4b   : > { %v2461_v53 = vld [vmem:[%s2967_s1] ss:$0 sm:$0xff]  ;;  %v653_v3 = vadd.f32 %v2451_v46, %v617_v56  ;;  %v701_v4 = vmul.f32 0.01, %v637_v57  ;;  %v654_v5 = vadd.f32 %v2451_v46, %v618_v58  ;;  %vm669_vm0 = vcmp.ge.f32.partialorder %v637_v57, 0.0  ;;  %v2110_v31 = vld [vmem:[%s2434_s17 + $0xc8] sm:$0xff]  }
  0x4c   : > { %851 = vmatpush.bf16.msra.mxu0 %v1947_v36  ;;  %2119 = vmatpush.bf16.msra.mxu2 %v1947_v36  ;;  %v1954_v54 = vld [vmem:[%s2969_s3 + $0x20] sm:$0xff]  ;;  %v1135_v62 = vmul.f32 %v2461_v53, %v2024_v51  ;;  %v1136_v63 = vmul.f32 %v2461_v53, %v2025_v52  ;;  %v1151_v2 = vmul.f32 %v2461_v53, %v2056_v55  ;;  %v702_v9 = vmul.f32 0.01, %v638_v61 }
  0x4d   : > { %1385 = vmatpush.bf16.msra.mxu1 %v1955_v38  ;;  %2127 = vmatpush.bf16.msra.mxu3 %v1955_v38  ;;  %v2478_v0 = vld [vmem:[%s2968_s2] ss:$0 sm:$0xff]  ;;  %v1152_v6 = vmul.f32 %v2461_v53, %v2057_v59  ;;  %vm670_vm1 = vcmp.ge.f32.partialorder %v638_v61, 0.0  ;;  %v717_v15 = vmul.f32 0.01, %v653_v3  ;;  %v733_v19 = vsel %vm669_vm0, %v637_v57, %v701_v4 }
  0x4e   : > { %v1171_v10 = vadd.f32 %v2478_v0, %v1135_v62  ;;  %v1172_v11 = vadd.f32 %v2478_v0, %v1136_v63  ;;  %v1187_v13 = vadd.f32 %v2478_v0, %v1151_v2  ;;  %vm685_vm2 = vcmp.ge.f32.partialorder %v653_v3, 0.0  ;;  %v1942_v36 = vld [vmem:[%s2969_s3] sm:$0xff]  ;;  %v2087_v2 = vld [vmem:[%s2434_s17 + $0x10] sm:$0xff]  }
  0x4f   : > { %v1188_v14 = vadd.f32 %v2478_v0, %v1152_v6  ;;  %v718_v20 = vmul.f32 0.01, %v654_v5  ;;  %v734_v23 = vsel %vm670_vm1, %v638_v61, %v702_v9  ;;  %vm686_vm3 = vcmp.ge.f32.partialorder %v654_v5, 0.0  ;;  %v1950_v42 = vld [vmem:[%s2969_s3] sm:$0xff] }
  0x50   : > { %852 = vmatpush.bf16.msra.mxu0 %v1946_v49  ;;  %2120 = vmatpush.bf16.msra.mxu2 %v1946_v49  ;;  %v1235_v24 = vmul.f32 0.01, %v1171_v10  ;;  %v1236_v25 = vmul.f32 0.01, %v1172_v11  ;;  %vm1203_vm4 = vcmp.ge.f32.partialorder %v1171_v10, 0.0  ;;  %vm1204_vm5 = vcmp.ge.f32.partialorder %v1172_v11, 0.0 }
  0x51   : > { %1386 = vmatpush.bf16.msra.mxu1 %v1954_v54  ;;  %2128 = vmatpush.bf16.msra.mxu3 %v1954_v54  ;;  %v1251_v27 = vmul.f32 0.01, %v1187_v13  ;;  %v1252_v28 = vmul.f32 0.01, %v1188_v14  ;;  %v749_v29 = vsel %vm685_vm2, %v653_v3, %v717_v15  ;;  %vm1219_vm6 = vcmp.ge.f32.partialorder %v1187_v13, 0.0 }
  0x52   : > { %vm1220_vm7 = vcmp.ge.f32.partialorder %v1188_v14, 0.0  ;;  %v750_v32 = vsel %vm686_vm3, %v654_v5, %v718_v20  ;;  %v604_v33 = vmul.f32 %v2443_v41, %v1965_v21  ;;  %v1996_v34 = vunpack.c.l.bf16 %v2094_v22  ;;  %v2111_v21 = vld [vmem:[%s2434_s17 + $0xd0] sm:$0xff]  }
  0x53   : > { %v1997_v35 = vunpack.c.h.bf16 %v2094_v22  ;;  %v1267_v37 = vsel %vm1203_vm4, %v1171_v10, %v1235_v24  ;;  %v1268_v38 = vsel %vm1204_vm5, %v1172_v11, %v1236_v25  ;;  %v2028_v39 = vunpack.c.l.bf16 %v2102_v26 }
  0x54   : > { %853 = vmatpush.bf16.msra.mxu0 %v1945_v60  ;;  %2121 = vmatpush.bf16.msra.mxu2 %v1945_v60  ;;  %v2029_v40 = vunpack.c.h.bf16 %v2102_v26  ;;  %v1283_v43 = vsel %vm1219_vm6, %v1187_v13, %v1251_v27  ;;  %v1284_v44 = vsel %vm1220_vm7, %v1188_v14, %v1252_v28  ;;  %v2060_v45 = vunpack.c.l.bf16 %v2110_v31 }
  0x55   : > { %1387 = vmatpush.bf16.msra.mxu1 %v1953_v1  ;;  %2129 = vmatpush.bf16.msra.mxu3 %v1953_v1  ;;  %v2061_v47 = vunpack.c.h.bf16 %v2110_v31  ;;  %v765_v48 = vpack.c.bf16 %v734_v23, %v733_v19  ;;  %v773_v49 = vpack.c.bf16 %v750_v32, %v749_v29  ;;  %v639_v50 = vadd.f32 %v2451_v46, %v603_v30 }
  0x56   : > { %v1299_v51 = vpack.c.bf16 %v1268_v38, %v1267_v37  ;;  %v640_v52 = vadd.f32 %v2451_v46, %v604_v33  ;;  %v619_v54 = vmul.f32 %v2443_v41, %v1996_v34  ;;  %v620_v55 = vmul.f32 %v2443_v41, %v1997_v35 }
  0x57   : > { %v1307_v56 = vpack.c.bf16 %v1284_v44, %v1283_v43  ;;  %v1137_v57 = vmul.f32 %v2461_v53, %v2028_v39  ;;  %v1138_v58 = vmul.f32 %v2461_v53, %v2029_v40  ;;  %v1153_v59 = vmul.f32 %v2461_v53, %v2060_v45 }
  0x58   : > { %854 = vmatpush.bf16.msra.mxu0 %v1944_v8  ;;  %2122 = vmatpush.bf16.msra.mxu2 %v1944_v8  ;;  %v1154_v60 = vmul.f32 %v2461_v53, %v2061_v47  ;;  %v703_v61 = vmul.f32 0.01, %v639_v50  ;;  %vm671_vm8 = vcmp.ge.f32.partialorder %v639_v50, 0.0  ;;  %v704_v62 = vmul.f32 0.01, %v640_v52 }
  0x59   : > { %1388 = vmatpush.bf16.msra.mxu1 %v1952_v12  ;;  %2130 = vmatpush.bf16.msra.mxu3 %v1952_v12  ;;  %v655_v63 = vadd.f32 %v2451_v46, %v619_v54  ;;  %v656_v1 = vadd.f32 %v2451_v46, %v620_v55  ;;  %vm672_vm9 = vcmp.ge.f32.partialorder %v640_v52, 0.0  ;;  %v1173_v3 = vadd.f32 %v2478_v0, %v1137_v57  ;;  %v2095_v12 = vld [vmem:[%s2434_s17 + $0x50] sm:$0xff]   ;;  %v2088_v54 = vld [vmem:[%s2434_s17 + $0x18] sm:$0xff]  }
  0x5a   : > { %v1174_v4 = vadd.f32 %v2478_v0, %v1138_v58  ;;  %v1189_v5 = vadd.f32 %v2478_v0, %v1153_v59  ;;  %v1190_v6 = vadd.f32 %v2478_v0, %v1154_v60  ;;  %v735_v7 = vsel %vm671_vm8, %v639_v50, %v703_v61 }
  0x5b   : > { %v1968_v8 = vunpack.c.l.bf16 %v2087_v2  ;;  %v736_v9 = vsel %vm672_vm9, %v640_v52, %v704_v62  ;;  %vm687_vm10 = vcmp.ge.f32.partialorder %v655_v63, 0.0  ;;  %v719_v10 = vmul.f32 0.01, %v655_v63 }
  0x5c   : > { %855 = vmatpush.bf16.msra.mxu0 %v1943_v17  ;;  %2123 = vmatpush.bf16.msra.mxu2 %v1943_v17  ;;  %v720_v11 = vmul.f32 0.01, %v656_v1  ;;  %vm688_vm11 = vcmp.ge.f32.partialorder %v656_v1, 0.0  ;;  %v1237_v13 = vmul.f32 0.01, %v1173_v3  ;;  %v1969_v15 = vunpack.c.h.bf16 %v2087_v2 }
  0x5d   : > { %1389 = vmatpush.bf16.msra.mxu1 %v1951_v18  ;;  %2131 = vmatpush.bf16.msra.mxu3 %v1951_v18  ;;  %v1238_v14 = vmul.f32 0.01, %v1174_v4  ;;  %vm1205_vm12 = vcmp.ge.f32.partialorder %v1173_v3, 0.0  ;;  %vm1206_vm13 = vcmp.ge.f32.partialorder %v1174_v4, 0.0  ;;  %v1253_v17 = vmul.f32 0.01, %v1189_v5 }
  0x5e   : > { %v1254_v18 = vmul.f32 0.01, %v1190_v6  ;;  %vm1221_vm14 = vcmp.ge.f32.partialorder %v1189_v5, 0.0  ;;  %vm1222_vm15 = vcmp.ge.f32.partialorder %v1190_v6, 0.0  ;;  %v605_v19 = vmul.f32 %v2443_v41, %v1968_v8 }
  0x5f   : > { %v2000_v20 = vunpack.c.l.bf16 %v2095_v12  ;;  %v751_v22 = vsel %vm687_vm10, %v655_v63, %v719_v10  ;;  %v752_v23 = vsel %vm688_vm11, %v656_v1, %v720_v11  ;;  %v2001_v24 = vunpack.c.h.bf16 %v2095_v12  ;;  %v2096_v63 = vld [vmem:[%s2434_s17 + $0x58] sm:$0xff]  }
  0x60   : > { %856 = vmatpush.bf16.msra.mxu0 %v1942_v36  ;;  %2124 = vmatpush.bf16.msra.mxu2 %v1942_v36  ;;  %v2032_v25 = vunpack.c.l.bf16 %v2103_v16  ;;  %v1269_v26 = vsel %vm1205_vm12, %v1173_v3, %v1237_v13  ;;  %v1270_v27 = vsel %vm1206_vm13, %v1174_v4, %v1238_v14  ;;  %v606_v28 = vmul.f32 %v2443_v41, %v1969_v15 }
  0x61   : > { %1390 = vmatpush.bf16.msra.mxu1 %v1950_v42  ;;  %2132 = vmatpush.bf16.msra.mxu3 %v1950_v42  ;;  %v2033_v29 = vunpack.c.h.bf16 %v2103_v16  ;;  %v1285_v30 = vsel %vm1221_vm14, %v1189_v5, %v1253_v17  ;;  %v1286_v31 = vsel %vm1222_vm15, %v1190_v6, %v1254_v18  ;;  %v2064_v32 = vunpack.c.l.bf16 %v2111_v21  ;;  %v2104_v6 = vld [vmem:[%s2434_s17 + $0x98] sm:$0xff]  }
  0x62   : > { %v2065_v33 = vunpack.c.h.bf16 %v2111_v21  ;;  %v641_v34 = vadd.f32 %v2451_v46, %v605_v19  ;;  %v621_v35 = vmul.f32 %v2443_v41, %v2000_v20  ;;  %v766_v36 = vpack.c.bf16 %v736_v9, %v735_v7  ;;  %v2112_v9 = vld [vmem:[%s2434_s17 + $0xd8] sm:$0xff]  }
  0x63   : > { %857 = vmatmul.bf16.vlgmr.msra.gmra.mxu0 %v765_v48  ;;  %897 = vmatmul.bf16.vlgmr.msra.gmra.mxu2 %v773_v49  ;;  %v774_v37 = vpack.c.bf16 %v752_v23, %v751_v22  ;;  %v622_v38 = vmul.f32 %v2443_v41, %v2001_v24  ;;  %v1139_v39 = vmul.f32 %v2461_v53, %v2032_v25  ;;  %v1972_v62 = vunpack.c.l.bf16 %v2088_v54 }
  0x64   : > { %1391 = vmatmul.bf16.vlgmr.msra.gmra.mxu1 %v1299_v51  ;;  %1431 = vmatmul.bf16.vlgmr.msra.gmra.mxu3 %v1307_v56  ;;  %v1300_v40 = vpack.c.bf16 %v1270_v27, %v1269_v26  ;;  %v1308_v42 = vpack.c.bf16 %v1286_v31, %v1285_v30  ;;  %v1140_v43 = vmul.f32 %v2461_v53, %v2033_v29  ;;  %v705_v48 = vmul.f32 0.01, %v641_v34 }
  0x65   : > { %v642_v44 = vadd.f32 %v2451_v46, %v606_v28  ;;  %v1155_v45 = vmul.f32 %v2461_v53, %v2064_v32  ;;  %v1156_v47 = vmul.f32 %v2461_v53, %v2065_v33  ;;  %v657_v49 = vadd.f32 %v2451_v46, %v621_v35 }
  0x66   : > { %vm673_vm0 = vcmp.ge.f32.partialorder %v641_v34, 0.0  ;;  %v658_v50 = vadd.f32 %v2451_v46, %v622_v38  ;;  %v1175_v51 = vadd.f32 %v2478_v0, %v1139_v39  ;;  %v1176_v52 = vadd.f32 %v2478_v0, %v1140_v43 }
  0x67   : > { %v706_v55 = vmul.f32 0.01, %v642_v44  ;;  %v1191_v56 = vadd.f32 %v2478_v0, %v1155_v45  ;;  %v1192_v57 = vadd.f32 %v2478_v0, %v1156_v47  ;;  %vm674_vm1 = vcmp.ge.f32.partialorder %v642_v44, 0.0 }
  0x68   : > { %v737_v58 = vsel %vm673_vm0, %v641_v34, %v705_v48  ;;  %v721_v59 = vmul.f32 0.01, %v657_v49  ;;  %vm689_vm2 = vcmp.ge.f32.partialorder %v657_v49, 0.0  ;;  %v722_v60 = vmul.f32 0.01, %v658_v50 }
  0x69   : > { %v1239_v61 = vmul.f32 0.01, %v1175_v51  ;;  %vm690_vm3 = vcmp.ge.f32.partialorder %v658_v50, 0.0  ;;  %vm1207_vm4 = vcmp.ge.f32.partialorder %v1175_v51, 0.0  ;;  %v1240_v1 = vmul.f32 0.01, %v1176_v52 }
  0x6a   : > { %v1973_v2 = vunpack.c.h.bf16 %v2088_v54  ;;  %v738_v3 = vsel %vm674_vm1, %v642_v44, %v706_v55  ;;  %vm1208_vm5 = vcmp.ge.f32.partialorder %v1176_v52, 0.0  ;;  %v1255_v4 = vmul.f32 0.01, %v1191_v56  ;;  %v2105_v55 = vld [vmem:[%s2434_s17 + $0xa0] sm:$0xff]  }
  0x6b   : > { %v1256_v5 = vmul.f32 0.01, %v1192_v57  ;;  %v753_v7 = vsel %vm689_vm2, %v657_v49, %v721_v59  ;;  %vm1223_vm6 = vcmp.ge.f32.partialorder %v1191_v56, 0.0  ;;  %vm1224_vm7 = vcmp.ge.f32.partialorder %v1192_v57, 0.0 }
  0x6c   : > { %v2004_v8 = vunpack.c.l.bf16 %v2096_v63  ;;  %v754_v10 = vsel %vm690_vm3, %v658_v50, %v722_v60  ;;  %v1271_v11 = vsel %vm1207_vm4, %v1175_v51, %v1239_v61  ;;  %v607_v12 = vmul.f32 %v2443_v41, %v1972_v62  ;;  %v2097_v50 = vld [vmem:[%s2434_s17 + $0x60] sm:$0xff]  }
  0x6d   : > { %v2005_v13 = vunpack.c.h.bf16 %v2096_v63  ;;  %v1272_v14 = vsel %vm1208_vm5, %v1176_v52, %v1240_v1  ;;  %v608_v15 = vmul.f32 %v2443_v41, %v1973_v2  ;;  %v2036_v16 = vunpack.c.l.bf16 %v2104_v6  ;;  %v2113_v60 = vld [vmem:[%s2434_s17 + $0xe0] sm:$0xff]  }
  0x6e   : > { %v2037_v17 = vunpack.c.h.bf16 %v2104_v6  ;;  %v1287_v18 = vsel %vm1223_vm6, %v1191_v56, %v1255_v4  ;;  %v1288_v19 = vsel %vm1224_vm7, %v1192_v57, %v1256_v5  ;;  %v2068_v20 = vunpack.c.l.bf16 %v2112_v9 }
  0x6f   : > { %v2069_v21 = vunpack.c.h.bf16 %v2112_v9  ;;  %v767_v22 = vpack.c.bf16 %v738_v3, %v737_v58  ;;  %v623_v23 = vmul.f32 %v2443_v41, %v2004_v8  ;;  %v775_v24 = vpack.c.bf16 %v754_v10, %v753_v7 }
  0x70   : > { %v1301_v25 = vpack.c.bf16 %v1272_v14, %v1271_v11  ;;  %v643_v26 = vadd.f32 %v2451_v46, %v607_v12  ;;  %v624_v27 = vmul.f32 %v2443_v41, %v2005_v13  ;;  %v1309_v28 = vpack.c.bf16 %v1288_v19, %v1287_v18 }
  0x71   : > { %v644_v29 = vadd.f32 %v2451_v46, %v608_v15  ;;  %v1141_v30 = vmul.f32 %v2461_v53, %v2036_v16  ;;  %v1142_v31 = vmul.f32 %v2461_v53, %v2037_v17  ;;  %v1157_v32 = vmul.f32 %v2461_v53, %v2068_v20 }
  0x72   : > { %v1158_v33 = vmul.f32 %v2461_v53, %v2069_v21  ;;  %v659_v34 = vadd.f32 %v2451_v46, %v623_v23  ;;  %v707_v35 = vmul.f32 0.01, %v643_v26  ;;  %vm675_vm8 = vcmp.ge.f32.partialorder %v643_v26, 0.0 }
  0x73   : > { %862 = vmatmul.bf16.gmra.mxu0 %v766_v36  ;;  %902 = vmatmul.bf16.gmra.mxu2 %v774_v37  ;;  %v660_v36 = vadd.f32 %v2451_v46, %v624_v27  ;;  %v2089_v37 = vld [vmem:[%s2434_s17 + $0x20] sm:$0xff]   ;;  %v708_v38 = vmul.f32 0.01, %v644_v29  ;;  %v1177_v39 = vadd.f32 %v2478_v0, %v1141_v30  ;;  %vm676_vm9 = vcmp.ge.f32.partialorder %v644_v29, 0.0  ;;  %v2090_v27 = vld [vmem:[%s2434_s17 + $0x28] sm:$0xff]  }
  0x74   : > { %1396 = vmatmul.bf16.gmra.mxu1 %v1300_v40  ;;  %1436 = vmatmul.bf16.gmra.mxu3 %v1308_v42  ;;  %v1178_v40 = vadd.f32 %v2478_v0, %v1142_v31  ;;  %v1193_v42 = vadd.f32 %v2478_v0, %v1157_v32  ;;  %v1194_v43 = vadd.f32 %v2478_v0, %v1158_v33  ;;  %vm691_vm10 = vcmp.ge.f32.partialorder %v659_v34, 0.0 }
  0x75   : > { %v1976_v44 = vunpack.c.l.bf16 %v2089_v37  ;;  %v739_v45 = vsel %vm675_vm8, %v643_v26, %v707_v35  ;;  %v723_v47 = vmul.f32 0.01, %v659_v34  ;;  %v724_v48 = vmul.f32 0.01, %v660_v36 }
  0x76   : > { %v1977_v49 = vunpack.c.h.bf16 %v2089_v37  ;;  %v740_v51 = vsel %vm676_vm9, %v644_v29, %v708_v38  ;;  %vm692_vm11 = vcmp.ge.f32.partialorder %v660_v36, 0.0  ;;  %v1241_v52 = vmul.f32 0.01, %v1177_v39 }
  0x77   : > { %v1242_v54 = vmul.f32 0.01, %v1178_v40  ;;  %vm1209_vm12 = vcmp.ge.f32.partialorder %v1177_v39, 0.0  ;;  %vm1210_vm13 = vcmp.ge.f32.partialorder %v1178_v40, 0.0  ;;  %v1257_v56 = vmul.f32 0.01, %v1193_v42 }
  0x78   : > { %v1258_v57 = vmul.f32 0.01, %v1194_v43  ;;  %vm1225_vm14 = vcmp.ge.f32.partialorder %v1193_v42, 0.0  ;;  %vm1226_vm15 = vcmp.ge.f32.partialorder %v1194_v43, 0.0  ;;  %v609_v58 = vmul.f32 %v2443_v41, %v1976_v44 }
  0x79   : > { %v2008_v59 = vunpack.c.l.bf16 %v2097_v50  ;;  %v755_v61 = vsel %vm691_vm10, %v659_v34, %v723_v47  ;;  %v756_v62 = vsel %vm692_vm11, %v660_v36, %v724_v48  ;;  %v610_v63 = vmul.f32 %v2443_v41, %v1977_v49  ;;  %v2098_v36 = vld [vmem:[%s2434_s17 + $0x68] sm:$0xff]  }
  0x7a   : > { %v2009_v1 = vunpack.c.h.bf16 %v2097_v50  ;;  %v1273_v2 = vsel %vm1209_vm12, %v1177_v39, %v1241_v52  ;;  %v1274_v3 = vsel %vm1210_vm13, %v1178_v40, %v1242_v54  ;;  %v2040_v4 = vunpack.c.l.bf16 %v2105_v55  ;;  %v2114_v47 = vld [vmem:[%s2434_s17 + $0xe8] sm:$0xff]  }
  0x7b   : > { %v2041_v5 = vunpack.c.h.bf16 %v2105_v55  ;;  %v1289_v6 = vsel %vm1225_vm14, %v1193_v42, %v1257_v56  ;;  %v1290_v7 = vsel %vm1226_vm15, %v1194_v43, %v1258_v57  ;;  %v2072_v8 = vunpack.c.l.bf16 %v2113_v60  ;;  %v2106_v43 = vld [vmem:[%s2434_s17 + $0xa8] sm:$0xff]  }
  0x7c   : > { %v2073_v9 = vunpack.c.h.bf16 %v2113_v60  ;;  %v645_v10 = vadd.f32 %v2451_v46, %v609_v58  ;;  %v625_v11 = vmul.f32 %v2443_v41, %v2008_v59  ;;  %v768_v12 = vpack.c.bf16 %v740_v51, %v739_v45 }
  0x7d   : > { %v776_v13 = vpack.c.bf16 %v756_v62, %v755_v61  ;;  %v626_v14 = vmul.f32 %v2443_v41, %v2009_v1  ;;  %v1302_v15 = vpack.c.bf16 %v1274_v3, %v1273_v2  ;;  %v1310_v16 = vpack.c.bf16 %v1290_v7, %v1289_v6 }
  0x7e   : > { %v1143_v17 = vmul.f32 %v2461_v53, %v2040_v4  ;;  %v1144_v18 = vmul.f32 %v2461_v53, %v2041_v5  ;;  %v646_v19 = vadd.f32 %v2451_v46, %v610_v63  ;;  %v1159_v20 = vmul.f32 %v2461_v53, %v2072_v8 }
  0x7f   : > { %v1160_v21 = vmul.f32 %v2461_v53, %v2073_v9  ;;  %v661_v23 = vadd.f32 %v2451_v46, %v625_v11  ;;  %vm677_vm0 = vcmp.ge.f32.partialorder %v645_v10, 0.0  ;;  %v1980_v34 = vunpack.c.l.bf16 %v2090_v27 }
  0x80   : > { %v1180_v26 = vadd.f32 %v2478_v0, %v1144_v18  ;;  %v1195_v29 = vadd.f32 %v2478_v0, %v1159_v20  ;;  %vm678_vm1 = vcmp.ge.f32.partialorder %v646_v19, 0.0  ;;  %v1981_v35 = vunpack.c.h.bf16 %v2090_v27  ;;  %v2091_v18 = vld [vmem:[%s2434_s17 + $0x30] sm:$0xff]  }
  0x81   : > { %v1196_v30 = vadd.f32 %v2478_v0, %v1160_v21  ;;  %v725_v32 = vmul.f32 0.01, %v661_v23  ;;  %vm693_vm2 = vcmp.ge.f32.partialorder %v661_v23, 0.0  ;;  %v2012_v45 = vunpack.c.l.bf16 %v2098_v36 }
  0x82   : > { %v1244_v38 = vmul.f32 0.01, %v1180_v26  ;;  %vm1212_vm5 = vcmp.ge.f32.partialorder %v1180_v26, 0.0  ;;  %v1259_v40 = vmul.f32 0.01, %v1195_v29  ;;  %vm1227_vm6 = vcmp.ge.f32.partialorder %v1195_v29, 0.0 }
  0x83   : > { %867 = vmatmul.bf16.gmra.mxu0 %v767_v22  ;;  %907 = vmatmul.bf16.gmra.mxu2 %v775_v24  ;;  %v709_v22 = vmul.f32 0.01, %v645_v10  ;;  %v662_v24 = vadd.f32 %v2451_v46, %v626_v14  ;;  %v1260_v42 = vmul.f32 0.01, %v1196_v30  ;;  %v757_v44 = vsel %vm693_vm2, %v661_v23, %v725_v32 }
  0x84   : > { %1401 = vmatmul.bf16.gmra.mxu1 %v1301_v25  ;;  %1441 = vmatmul.bf16.gmra.mxu3 %v1309_v28  ;;  %v1179_v25 = vadd.f32 %v2478_v0, %v1143_v17  ;;  %v710_v28 = vmul.f32 0.01, %v646_v19  ;;  %vm1228_vm7 = vcmp.ge.f32.partialorder %v1196_v30, 0.0  ;;  %v611_v49 = vmul.f32 %v2443_v41, %v1980_v34 }
  0x85   : > { %v741_v31 = vsel %vm677_vm0, %v645_v10, %v709_v22  ;;  %v726_v33 = vmul.f32 0.01, %v662_v24  ;;  %vm694_vm3 = vcmp.ge.f32.partialorder %v662_v24, 0.0  ;;  %v612_v50 = vmul.f32 %v2443_v41, %v1981_v35  ;;  %v2099_v22 = vld [vmem:[%s2434_s17 + $0x70] sm:$0xff]  }
  0x86   : > { %vm1211_vm4 = vcmp.ge.f32.partialorder %v1179_v25, 0.0  ;;  %v1243_v37 = vmul.f32 0.01, %v1179_v25  ;;  %v742_v39 = vsel %vm678_vm1, %v646_v19, %v710_v28  ;;  %v2013_v51 = vunpack.c.h.bf16 %v2098_v36 }
  0x87   : > { %v758_v48 = vsel %vm694_vm3, %v662_v24, %v726_v33  ;;  %v1276_v54 = vsel %vm1212_vm5, %v1180_v26, %v1244_v38  ;;  %v2044_v55 = vunpack.c.l.bf16 %v2106_v43  ;;  %v2045_v56 = vunpack.c.h.bf16 %v2106_v43  ;;  %v2107_v26 = vld [vmem:[%s2434_s17 + $0xb0] sm:$0xff]  }
  0x88   : > { %v1275_v52 = vsel %vm1211_vm4, %v1179_v25, %v1243_v37  ;;  %v1291_v57 = vsel %vm1227_vm6, %v1195_v29, %v1259_v40  ;;  %v1292_v58 = vsel %vm1228_vm7, %v1196_v30, %v1260_v42  ;;  %v2076_v59 = vunpack.c.l.bf16 %v2114_v47  ;;  %v2115_v30 = vld [vmem:[%s2434_s17 + $0xf0] sm:$0xff]  }
  0x89   : > { %v2077_v60 = vunpack.c.h.bf16 %v2114_v47  ;;  %v769_v61 = vpack.c.bf16 %v742_v39, %v741_v31  ;;  %v627_v62 = vmul.f32 %v2443_v41, %v2012_v45  ;;  %v777_v63 = vpack.c.bf16 %v758_v48, %v757_v44 }
  0x8a   : > { %v647_v1 = vadd.f32 %v2451_v46, %v611_v49  ;;  %v648_v2 = vadd.f32 %v2451_v46, %v612_v50  ;;  %v628_v3 = vmul.f32 %v2443_v41, %v2013_v51  ;;  %v1303_v4 = vpack.c.bf16 %v1276_v54, %v1275_v52 }
  0x8b   : > { %v1311_v5 = vpack.c.bf16 %v1292_v58, %v1291_v57  ;;  %v1145_v6 = vmul.f32 %v2461_v53, %v2044_v55  ;;  %v1146_v7 = vmul.f32 %v2461_v53, %v2045_v56  ;;  %v1161_v8 = vmul.f32 %v2461_v53, %v2076_v59 }
  0x8c   : > { %v1162_v9 = vmul.f32 %v2461_v53, %v2077_v60  ;;  %v663_v10 = vadd.f32 %v2451_v46, %v627_v62  ;;  %v711_v11 = vmul.f32 0.01, %v647_v1  ;;  %vm679_vm8 = vcmp.ge.f32.partialorder %v647_v1, 0.0 }
  0x8d   : > { %v1181_v14 = vadd.f32 %v2478_v0, %v1145_v6  ;;  %vm680_vm9 = vcmp.ge.f32.partialorder %v648_v2, 0.0  ;;  %v1984_v29 = vunpack.c.l.bf16 %v2091_v18  ;;  %v1985_v31 = vunpack.c.h.bf16 %v2091_v18 }
  0x8e   : > { %v1198_v17 = vadd.f32 %v2478_v0, %v1162_v9  ;;  %vm695_vm10 = vcmp.ge.f32.partialorder %v663_v10, 0.0  ;;  %v743_v19 = vsel %vm679_vm8, %v647_v1, %v711_v11  ;;  %v727_v20 = vmul.f32 0.01, %v663_v10  ;;  %v2092_v9 = vld [vmem:[%s2434_s17 + $0x38] sm:$0xff]  }
  0x8f   : > { %vm1213_vm12 = vcmp.ge.f32.partialorder %v1181_v14, 0.0  ;;  %v1245_v24 = vmul.f32 0.01, %v1181_v14  ;;  %v2016_v32 = vunpack.c.l.bf16 %v2099_v22  ;;  %v2017_v35 = vunpack.c.h.bf16 %v2099_v22 }
  0x90   : > { %v1262_v28 = vmul.f32 0.01, %v1198_v17  ;;  %vm1230_vm15 = vcmp.ge.f32.partialorder %v1198_v17, 0.0  ;;  %v759_v33 = vsel %vm695_vm10, %v663_v10, %v727_v20  ;;  %v2048_v36 = vunpack.c.l.bf16 %v2107_v26 }
  0x91   : > { %v1277_v37 = vsel %vm1213_vm12, %v1181_v14, %v1245_v24  ;;  %v2049_v39 = vunpack.c.h.bf16 %v2107_v26  ;;  %v2080_v40 = vunpack.c.l.bf16 %v2115_v30  ;;  %v613_v44 = vmul.f32 %v2443_v41, %v1984_v29 }
  0x92   : > { %v1294_v43 = vsel %vm1230_vm15, %v1198_v17, %v1262_v28  ;;  %v2081_v45 = vunpack.c.h.bf16 %v2115_v30  ;;  %v614_v47 = vmul.f32 %v2443_v41, %v1985_v31  ;;  %v629_v48 = vmul.f32 %v2443_v41, %v2016_v32 }
  0x93   : > { %872 = vmatmul.bf16.gmra.mxu0 %v768_v12  ;;  %912 = vmatmul.bf16.gmra.mxu2 %v776_v13  ;;  %v664_v12 = vadd.f32 %v2451_v46, %v628_v3  ;;  %v712_v13 = vmul.f32 0.01, %v648_v2  ;;  %v630_v51 = vmul.f32 %v2443_v41, %v2017_v35  ;;  %v1147_v52 = vmul.f32 %v2461_v53, %v2048_v36 }
  0x94   : > { %1406 = vmatmul.bf16.gmra.mxu1 %v1302_v15  ;;  %1446 = vmatmul.bf16.gmra.mxu3 %v1310_v16  ;;  %v1182_v15 = vadd.f32 %v2478_v0, %v1146_v7  ;;  %v1197_v16 = vadd.f32 %v2478_v0, %v1161_v8  ;;  %v1148_v56 = vmul.f32 %v2461_v53, %v2049_v39  ;;  %v1988_v17 = vunpack.c.l.bf16 %v2092_v9 }
  0x95   : > { %vm696_vm11 = vcmp.ge.f32.partialorder %v664_v12, 0.0  ;;  %v728_v21 = vmul.f32 0.01, %v664_v12  ;;  %v744_v23 = vsel %vm680_vm9, %v648_v2, %v712_v13  ;;  %v1163_v57 = vmul.f32 %v2461_v53, %v2080_v40 }
  0x96   : > { %v1246_v25 = vmul.f32 0.01, %v1182_v15  ;;  %vm1214_vm13 = vcmp.ge.f32.partialorder %v1182_v15, 0.0  ;;  %v1261_v27 = vmul.f32 0.01, %v1197_v16  ;;  %vm1229_vm14 = vcmp.ge.f32.partialorder %v1197_v16, 0.0 }
  0x97   : > { %v760_v34 = vsel %vm696_vm11, %v664_v12, %v728_v21  ;;  %v770_v49 = vpack.c.bf16 %v744_v23, %v743_v19  ;;  %v649_v58 = vadd.f32 %v2451_v46, %v613_v44  ;;  %v1164_v59 = vmul.f32 %v2461_v53, %v2081_v45  ;;  %v2100_v12 = vld [vmem:[%s2434_s17 + $0x78] sm:$0xff]  }
  0x98   : > { %v1278_v38 = vsel %vm1214_vm13, %v1182_v15, %v1246_v25  ;;  %v1293_v42 = vsel %vm1229_vm14, %v1197_v16, %v1261_v27  ;;  %v778_v50 = vpack.c.bf16 %v760_v34, %v759_v33  ;;  %v650_v60 = vadd.f32 %v2451_v46, %v614_v47  ;;  %v2108_v15 = vld [vmem:[%s2434_s17 + $0xb8] sm:$0xff]  }
  0x99   : > { %v1304_v54 = vpack.c.bf16 %v1278_v38, %v1277_v37  ;;  %v1312_v55 = vpack.c.bf16 %v1294_v43, %v1293_v42  ;;  %v666_v62 = vadd.f32 %v2451_v46, %v630_v51  ;;  %v1184_v1 = vadd.f32 %v2478_v0, %v1148_v56  ;;  %v2116_v19 = vld [vmem:[%s2434_s17 + $0xf8] sm:$0xff]  }
  0x9a   : > { %v1199_v2 = vadd.f32 %v2478_v0, %v1163_v57  ;;  %vm681_vm0 = vcmp.ge.f32.partialorder %v649_v58, 0.0  ;;  %v713_v3 = vmul.f32 0.01, %v649_v58  ;;  %vm682_vm1 = vcmp.ge.f32.partialorder %v650_v60, 0.0 }
  0x9b   : > { %vm698_vm3 = vcmp.ge.f32.partialorder %v666_v62, 0.0  ;;  %v730_v7 = vmul.f32 0.01, %v666_v62  ;;  %v1248_v10 = vmul.f32 0.01, %v1184_v1  ;;  %vm1216_vm5 = vcmp.ge.f32.partialorder %v1184_v1, 0.0 }
  0x9c   : > { %v1263_v11 = vmul.f32 0.01, %v1199_v2  ;;  %v745_v13 = vsel %vm681_vm0, %v649_v58, %v713_v3  ;;  %vm1231_vm6 = vcmp.ge.f32.partialorder %v1199_v2, 0.0  ;;  %v1989_v18 = vunpack.c.h.bf16 %v2092_v9  ;;  %v2674_v9 = vld [vmem:[%s2970_s4] ss:$0 sm:$0xff] }
  0x9d   : > { %v762_v21 = vsel %vm698_vm3, %v666_v62, %v730_v7  ;;  %v2020_v23 = vunpack.c.l.bf16 %v2100_v12  ;;  %v1280_v24 = vsel %vm1216_vm5, %v1184_v1, %v1248_v10  ;;  %v2021_v26 = vunpack.c.h.bf16 %v2100_v12 }
  0x9e   : > { %v1295_v25 = vsel %vm1231_vm6, %v1199_v2, %v1263_v11  ;;  %v2052_v27 = vunpack.c.l.bf16 %v2108_v15  ;;  %v2053_v29 = vunpack.c.h.bf16 %v2108_v15  ;;  %v2084_v30 = vunpack.c.l.bf16 %v2116_v19 }
  0x9f   : > { %v2085_v31 = vunpack.c.h.bf16 %v2116_v19  ;;  %v615_v32 = vmul.f32 %v2443_v41, %v1988_v17  ;;  %v616_v33 = vmul.f32 %v2443_v41, %v1989_v18  ;;  %v631_v36 = vmul.f32 %v2443_v41, %v2020_v23 }
  0xa0   : > { %v632_v39 = vmul.f32 %v2443_v41, %v2021_v26  ;;  %v1149_v40 = vmul.f32 %v2461_v53, %v2052_v27  ;;  %v1150_v42 = vmul.f32 %v2461_v53, %v2053_v29  ;;  %v1165_v43 = vmul.f32 %v2461_v53, %v2084_v30 }
  0xa1   : > { %v1166_v44 = vmul.f32 %v2461_v53, %v2085_v31  ;;  %v651_v45 = vadd.f32 %v2451_v46, %v615_v32  ;;  %v652_v47 = vadd.f32 %v2451_v46, %v616_v33 }
  0xa2   : > { %v668_v41 = vadd.f32 %v2451_v46, %v632_v39  ;;  %v1201_v51 = vadd.f32 %v2478_v0, %v1165_v43 }
  0xa3   : > { %877 = vmatmul.bf16.gmra.mxu0 %v769_v61  ;;  %917 = vmatmul.bf16.gmra.mxu2 %v777_v63  ;;  %v665_v61 = vadd.f32 %v2451_v46, %v629_v48  ;;  %v1183_v63 = vadd.f32 %v2478_v0, %v1147_v52  ;;  %v667_v48 = vadd.f32 %v2451_v46, %v631_v36  ;;  %vm683_vm8 = vcmp.ge.f32.partialorder %v651_v45, 0.0 }
  0xa4   : > { %1411 = vmatmul.bf16.gmra.mxu1 %v1303_v4  ;;  %1451 = vmatmul.bf16.gmra.mxu3 %v1311_v5  ;;  %v1200_v4 = vadd.f32 %v2478_v0, %v1164_v59  ;;  %v714_v5 = vmul.f32 0.01, %v650_v60  ;;  %v1202_v53 = vadd.f32 %v2478_v0, %v1166_v44  ;;  %vm684_vm9 = vcmp.ge.f32.partialorder %v652_v47, 0.0 }
  0xa5   : > { %vm697_vm2 = vcmp.ge.f32.partialorder %v665_v61, 0.0  ;;  %v729_v6 = vmul.f32 0.01, %v665_v61  ;;  %v1247_v8 = vmul.f32 0.01, %v1183_v63  ;;  %vm1215_vm4 = vcmp.ge.f32.partialorder %v1183_v63, 0.0 }
  0xa6   : > { %v1264_v14 = vmul.f32 0.01, %v1200_v4  ;;  %v746_v16 = vsel %vm682_vm1, %v650_v60, %v714_v5  ;;  %vm1232_vm7 = vcmp.ge.f32.partialorder %v1200_v4, 0.0  ;;  %v715_v52 = vmul.f32 0.01, %v651_v45 }
  0xa7   : > { %v761_v20 = vsel %vm697_vm2, %v665_v61, %v729_v6  ;;  %v1279_v22 = vsel %vm1215_vm4, %v1183_v63, %v1247_v8  ;;  %v771_v34 = vpack.c.bf16 %v746_v16, %v745_v13  ;;  %vm699_vm10 = vcmp.ge.f32.partialorder %v667_v48, 0.0  ;;  %v2669_v8 = vld [vmem:[%s2970_s4] ss:$0 sm:$0xff] }
  0xa8   : > { %v1296_v28 = vsel %vm1232_vm7, %v1200_v4, %v1264_v14  ;;  %v779_v35 = vpack.c.bf16 %v762_v21, %v761_v20  ;;  %v1305_v37 = vpack.c.bf16 %v1280_v24, %v1279_v22  ;;  %vm700_vm11 = vcmp.ge.f32.partialorder %v668_v41, 0.0 }
  0xa9   : > { %v1313_v38 = vpack.c.bf16 %v1296_v28, %v1295_v25  ;;  %v732_v56 = vmul.f32 0.01, %v668_v41  ;;  %v1265_v59 = vmul.f32 0.01, %v1201_v51  ;;  %v1266_v46 = vmul.f32 0.01, %v1202_v53 }
  0xaa   : > { %vm1233_vm14 = vcmp.ge.f32.partialorder %v1201_v51, 0.0  ;;  %vm1234_vm15 = vcmp.ge.f32.partialorder %v1202_v53, 0.0  ;;  %v747_v60 = vsel %vm683_vm8, %v651_v45, %v715_v52 }
  0xab   : > { %v764_v62 = vsel %vm700_vm11, %v668_v41, %v732_v56  ;;  %v1297_v2 = vsel %vm1233_vm14, %v1201_v51, %v1265_v59  ;;  %v1298_v3 = vsel %vm1234_vm15, %v1202_v53, %v1266_v46 }
  0xac   : > { %v1314_v7 = vpack.c.bf16 %v1298_v3, %v1297_v2 }
  0xb3   : > { %882 = vmatmul.bf16.gmra.mxu0 %v770_v49  ;;  %922 = vmatmul.bf16.gmra.mxu2 %v778_v50  ;;  %v1185_v49 = vadd.f32 %v2478_v0, %v1149_v40  ;;  %v1186_v50 = vadd.f32 %v2478_v0, %v1150_v42 }
  0xb4   : > { %1416 = vmatmul.bf16.gmra.mxu1 %v1304_v54  ;;  %1456 = vmatmul.bf16.gmra.mxu3 %v1312_v55  ;;  %v716_v54 = vmul.f32 0.01, %v652_v47  ;;  %v731_v55 = vmul.f32 0.01, %v667_v48 }
  0xb5   : > { %v1249_v57 = vmul.f32 0.01, %v1185_v49  ;;  %v1250_v58 = vmul.f32 0.01, %v1186_v50  ;;  %vm1217_vm12 = vcmp.ge.f32.partialorder %v1185_v49, 0.0  ;;  %vm1218_vm13 = vcmp.ge.f32.partialorder %v1186_v50, 0.0 }
  0xb6   : > { %v748_v0 = vsel %vm684_vm9, %v652_v47, %v716_v54  ;;  %v763_v61 = vsel %vm699_vm10, %v667_v48, %v731_v55 }
  0xb7   : > { %v1281_v63 = vsel %vm1217_vm12, %v1185_v49, %v1249_v57  ;;  %v1282_v1 = vsel %vm1218_vm13, %v1186_v50, %v1250_v58  ;;  %v772_v4 = vpack.c.bf16 %v748_v0, %v747_v60  ;;  %v780_v5 = vpack.c.bf16 %v764_v62, %v763_v61 }
  0xb8   : > { %v1306_v6 = vpack.c.bf16 %v1282_v1, %v1281_v63 }
  0xc3   : > { %887 = vmatmul.bf16.gmra.mxu0 %v771_v34  ;;  %927 = vmatmul.bf16.gmra.mxu2 %v779_v35 }
  0xc4   : > { %1421 = vmatmul.bf16.gmra.mxu1 %v1305_v37  ;;  %1461 = vmatmul.bf16.gmra.mxu3 %v1313_v38 }
  0xd3   : > { %892 = vmatmul.bf16.gmra.mxu0 %v772_v4  ;;  %932 = vmatmul.bf16.gmra.mxu2 %v780_v5 }
  0xd4   : > { %1426 = vmatmul.bf16.gmra.mxu1 %v1306_v6  ;;  %1466 = vmatmul.bf16.gmra.mxu3 %v1314_v7 }
  0xe0   : > { %v858_v10 = vpop.f32.mrf.mxu0 }
  0xe1   : > { %v859_v11 = vadd.f32 %v2669_v8, %v858_v10  ;;  %v1392_v12 = vpop.f32.mrf.mxu1 }
  0xe2   : > { %v1393_v13 = vadd.f32 %v2674_v9, %v1392_v12 }
  0xe3   : > { %vm938_vm0 = vcmp.ge.f32.partialorder %v859_v11, 0.0  ;;  %v970_v14 = vmul.f32 0.01, %v859_v11 }
  0xe4   : > { %vm1472_vm1 = vcmp.ge.f32.partialorder %v1393_v13, 0.0  ;;  %v1504_v15 = vmul.f32 0.01, %v1393_v13 }
  0xe5   : > { %v1002_v16 = vsel %vm938_vm0, %v859_v11, %v970_v14 }
  0xe6   : > { %1034 = vst [vmem:[%s2680_s15] sm:$0xff] %v1002_v16  ;;  %v1536_v17 = vsel %vm1472_vm1, %v1393_v13, %v1504_v15  ;;  %v898_v18 = vpop.f32.mrf.mxu2 }
  0xe7   : > { %1568 = vst [vmem:[%s2680_s15 + $0x8] sm:$0xff] %v1536_v17  ;;  %v899_v19 = vadd.f32 %v2669_v8, %v898_v18  ;;  %v1432_v20 = vpop.f32.mrf.mxu3 }
  0xe8   : > { %v1433_v21 = vadd.f32 %v2674_v9, %v1432_v20  ;;  %v860_v22 = vpop.f32.mrf.mxu0 }
  0xe9   : > { %vm954_vm2 = vcmp.ge.f32.partialorder %v899_v19, 0.0  ;;  %v986_v23 = vmul.f32 0.01, %v899_v19  ;;  %v861_v24 = vadd.f32 %v2669_v8, %v860_v22  ;;  %v1394_v25 = vpop.f32.mrf.mxu1 }
  0xea   : > { %vm1488_vm3 = vcmp.ge.f32.partialorder %v1433_v21, 0.0  ;;  %v1520_v26 = vmul.f32 0.01, %v1433_v21  ;;  %v1395_v27 = vadd.f32 %v2674_v9, %v1394_v25 }
  0xeb   : > { %v1018_v28 = vsel %vm954_vm2, %v899_v19, %v986_v23  ;;  %vm939_vm4 = vcmp.ge.f32.partialorder %v861_v24, 0.0  ;;  %v971_v29 = vmul.f32 0.01, %v861_v24 }
  0xec   : > { %1050 = vst [vmem:[%s2680_s15 + $0x100] sm:$0xff] %v1018_v28  ;;  %v1552_v30 = vsel %vm1488_vm3, %v1433_v21, %v1520_v26  ;;  %vm1473_vm5 = vcmp.ge.f32.partialorder %v1395_v27, 0.0  ;;  %v1505_v31 = vmul.f32 0.01, %v1395_v27 }
  0xed   : > { %1584 = vst [vmem:[%s2680_s15 + $0x108] sm:$0xff] %v1552_v30  ;;  %v1003_v32 = vsel %vm939_vm4, %v861_v24, %v971_v29 }
  0xee   : > { %1035 = vst [vmem:[%s2680_s15 + $0x10] sm:$0xff] %v1003_v32  ;;  %v1537_v33 = vsel %vm1473_vm5, %v1395_v27, %v1505_v31  ;;  %v900_v34 = vpop.f32.mrf.mxu2 }
  0xef   : > { %1569 = vst [vmem:[%s2680_s15 + $0x18] sm:$0xff] %v1537_v33  ;;  %v901_v35 = vadd.f32 %v2669_v8, %v900_v34  ;;  %v1434_v36 = vpop.f32.mrf.mxu3 }
  0xf0   : > { %v1435_v37 = vadd.f32 %v2674_v9, %v1434_v36  ;;  %v863_v38 = vpop.f32.mrf.mxu0 }
  0xf1   : > { %vm955_vm6 = vcmp.ge.f32.partialorder %v901_v35, 0.0  ;;  %v987_v39 = vmul.f32 0.01, %v901_v35  ;;  %v864_v40 = vadd.f32 %v2669_v8, %v863_v38  ;;  %v1397_v42 = vpop.f32.mrf.mxu1 }
  0xf2   : > { %vm1489_vm7 = vcmp.ge.f32.partialorder %v1435_v37, 0.0  ;;  %v1521_v43 = vmul.f32 0.01, %v1435_v37  ;;  %v1398_v44 = vadd.f32 %v2674_v9, %v1397_v42 }
  0xf3   : > { %v1019_v45 = vsel %vm955_vm6, %v901_v35, %v987_v39  ;;  %vm940_vm8 = vcmp.ge.f32.partialorder %v864_v40, 0.0  ;;  %v972_v47 = vmul.f32 0.01, %v864_v40 }
  0xf4   : > { %1051 = vst [vmem:[%s2680_s15 + $0x110] sm:$0xff] %v1019_v45  ;;  %v1553_v48 = vsel %vm1489_vm7, %v1435_v37, %v1521_v43  ;;  %vm1474_vm9 = vcmp.ge.f32.partialorder %v1398_v44, 0.0  ;;  %v1506_v41 = vmul.f32 0.01, %v1398_v44 }
  0xf5   : > { %1585 = vst [vmem:[%s2680_s15 + $0x118] sm:$0xff] %v1553_v48  ;;  %v1004_v49 = vsel %vm940_vm8, %v864_v40, %v972_v47 }
  0xf6   : > { %1036 = vst [vmem:[%s2680_s15 + $0x20] sm:$0xff] %v1004_v49  ;;  %v1538_v50 = vsel %vm1474_vm9, %v1398_v44, %v1506_v41  ;;  %v903_v51 = vpop.f32.mrf.mxu2 }
  0xf7   : > { %1570 = vst [vmem:[%s2680_s15 + $0x28] sm:$0xff] %v1538_v50  ;;  %v904_v53 = vadd.f32 %v2669_v8, %v903_v51  ;;  %v1437_v52 = vpop.f32.mrf.mxu3 }
  0xf8   : > { %v1438_v54 = vadd.f32 %v2674_v9, %v1437_v52  ;;  %v865_v55 = vpop.f32.mrf.mxu0 }
  0xf9   : > { %vm956_vm10 = vcmp.ge.f32.partialorder %v904_v53, 0.0  ;;  %v988_v56 = vmul.f32 0.01, %v904_v53  ;;  %v866_v57 = vadd.f32 %v2669_v8, %v865_v55  ;;  %v1399_v58 = vpop.f32.mrf.mxu1 }
  0xfa   : > { %vm1490_vm11 = vcmp.ge.f32.partialorder %v1438_v54, 0.0  ;;  %v1522_v59 = vmul.f32 0.01, %v1438_v54  ;;  %v1400_v46 = vadd.f32 %v2674_v9, %v1399_v58 }
  0xfb   : > { %v1020_v60 = vsel %vm956_vm10, %v904_v53, %v988_v56  ;;  %vm941_vm12 = vcmp.ge.f32.partialorder %v866_v57, 0.0  ;;  %v973_v0 = vmul.f32 0.01, %v866_v57 }
  0xfc   : > { %1052 = vst [vmem:[%s2680_s15 + $0x120] sm:$0xff] %v1020_v60  ;;  %v1554_v61 = vsel %vm1490_vm11, %v1438_v54, %v1522_v59  ;;  %vm1475_vm13 = vcmp.ge.f32.partialorder %v1400_v46, 0.0  ;;  %v1507_v62 = vmul.f32 0.01, %v1400_v46 }
  0xfd   : > { %1586 = vst [vmem:[%s2680_s15 + $0x128] sm:$0xff] %v1554_v61  ;;  %v1005_v63 = vsel %vm941_vm12, %v866_v57, %v973_v0 }
  0xfe   : > { %1037 = vst [vmem:[%s2680_s15 + $0x30] sm:$0xff] %v1005_v63  ;;  %v1539_v1 = vsel %vm1475_vm13, %v1400_v46, %v1507_v62  ;;  %v905_v2 = vpop.f32.mrf.mxu2 }
  0xff   : > { %1571 = vst [vmem:[%s2680_s15 + $0x38] sm:$0xff] %v1539_v1  ;;  %v906_v3 = vadd.f32 %v2669_v8, %v905_v2  ;;  %v1439_v4 = vpop.f32.mrf.mxu3 }
 0x100   : > { %v1440_v5 = vadd.f32 %v2674_v9, %v1439_v4  ;;  %v868_v6 = vpop.f32.mrf.mxu0 }
 0x101   : > { %vm957_vm14 = vcmp.ge.f32.partialorder %v906_v3, 0.0  ;;  %v989_v7 = vmul.f32 0.01, %v906_v3  ;;  %v869_v10 = vadd.f32 %v2669_v8, %v868_v6  ;;  %v1402_v11 = vpop.f32.mrf.mxu1 }
 0x102   : > { %vm1491_vm15 = vcmp.ge.f32.partialorder %v1440_v5, 0.0  ;;  %v1523_v12 = vmul.f32 0.01, %v1440_v5  ;;  %v1403_v13 = vadd.f32 %v2674_v9, %v1402_v11 }
 0x103   : > { %v1021_v14 = vsel %vm957_vm14, %v906_v3, %v989_v7  ;;  %vm942_vm0 = vcmp.ge.f32.partialorder %v869_v10, 0.0  ;;  %v974_v15 = vmul.f32 0.01, %v869_v10 }
 0x104   : > { %1053 = vst [vmem:[%s2680_s15 + $0x130] sm:$0xff] %v1021_v14  ;;  %v1555_v16 = vsel %vm1491_vm15, %v1440_v5, %v1523_v12  ;;  %vm1476_vm1 = vcmp.ge.f32.partialorder %v1403_v13, 0.0  ;;  %v1508_v17 = vmul.f32 0.01, %v1403_v13 }
 0x105   : > { %1587 = vst [vmem:[%s2680_s15 + $0x138] sm:$0xff] %v1555_v16  ;;  %v1006_v18 = vsel %vm942_vm0, %v869_v10, %v974_v15 }
 0x106   : > { %1038 = vst [vmem:[%s2680_s15 + $0x40] sm:$0xff] %v1006_v18  ;;  %v1540_v19 = vsel %vm1476_vm1, %v1403_v13, %v1508_v17  ;;  %v908_v20 = vpop.f32.mrf.mxu2 }
 0x107   : > { %1572 = vst [vmem:[%s2680_s15 + $0x48] sm:$0xff] %v1540_v19  ;;  %v909_v21 = vadd.f32 %v2669_v8, %v908_v20  ;;  %v1442_v22 = vpop.f32.mrf.mxu3 }
 0x108   : > { %v1443_v23 = vadd.f32 %v2674_v9, %v1442_v22  ;;  %v870_v24 = vpop.f32.mrf.mxu0 }
 0x109   : > { %vm958_vm2 = vcmp.ge.f32.partialorder %v909_v21, 0.0  ;;  %v990_v25 = vmul.f32 0.01, %v909_v21  ;;  %v871_v26 = vadd.f32 %v2669_v8, %v870_v24  ;;  %v1404_v27 = vpop.f32.mrf.mxu1 }
 0x10a   : > { %vm1492_vm3 = vcmp.ge.f32.partialorder %v1443_v23, 0.0  ;;  %v1524_v28 = vmul.f32 0.01, %v1443_v23  ;;  %v1405_v29 = vadd.f32 %v2674_v9, %v1404_v27 }
 0x10b   : > { %v1022_v30 = vsel %vm958_vm2, %v909_v21, %v990_v25  ;;  %vm943_vm4 = vcmp.ge.f32.partialorder %v871_v26, 0.0  ;;  %v975_v31 = vmul.f32 0.01, %v871_v26 }
 0x10c   : > { %1054 = vst [vmem:[%s2680_s15 + $0x140] sm:$0xff] %v1022_v30  ;;  %v1556_v32 = vsel %vm1492_vm3, %v1443_v23, %v1524_v28  ;;  %vm1477_vm5 = vcmp.ge.f32.partialorder %v1405_v29, 0.0  ;;  %v1509_v33 = vmul.f32 0.01, %v1405_v29 }
 0x10d   : > { %1588 = vst [vmem:[%s2680_s15 + $0x148] sm:$0xff] %v1556_v32  ;;  %v1007_v34 = vsel %vm943_vm4, %v871_v26, %v975_v31 }
 0x10e   : > { %1039 = vst [vmem:[%s2680_s15 + $0x50] sm:$0xff] %v1007_v34  ;;  %v1541_v35 = vsel %vm1477_vm5, %v1405_v29, %v1509_v33  ;;  %v910_v36 = vpop.f32.mrf.mxu2 }
 0x10f   : > { %1573 = vst [vmem:[%s2680_s15 + $0x58] sm:$0xff] %v1541_v35  ;;  %v911_v37 = vadd.f32 %v2669_v8, %v910_v36  ;;  %v1444_v38 = vpop.f32.mrf.mxu3 }
 0x110   : > { %v1445_v39 = vadd.f32 %v2674_v9, %v1444_v38  ;;  %v873_v40 = vpop.f32.mrf.mxu0 }
 0x111   : > { %vm959_vm6 = vcmp.ge.f32.partialorder %v911_v37, 0.0  ;;  %v991_v42 = vmul.f32 0.01, %v911_v37  ;;  %v874_v43 = vadd.f32 %v2669_v8, %v873_v40  ;;  %v1407_v44 = vpop.f32.mrf.mxu1 }
 0x112   : > { %vm1493_vm7 = vcmp.ge.f32.partialorder %v1445_v39, 0.0  ;;  %v1525_v45 = vmul.f32 0.01, %v1445_v39  ;;  %v1408_v47 = vadd.f32 %v2674_v9, %v1407_v44 }
 0x113   : > { %v1023_v48 = vsel %vm959_vm6, %v911_v37, %v991_v42  ;;  %vm944_vm8 = vcmp.ge.f32.partialorder %v874_v43, 0.0  ;;  %v976_v41 = vmul.f32 0.01, %v874_v43 }
 0x114   : > { %1055 = vst [vmem:[%s2680_s15 + $0x150] sm:$0xff] %v1023_v48  ;;  %v1557_v49 = vsel %vm1493_vm7, %v1445_v39, %v1525_v45  ;;  %vm1478_vm9 = vcmp.ge.f32.partialorder %v1408_v47, 0.0  ;;  %v1510_v50 = vmul.f32 0.01, %v1408_v47 }
 0x115   : > { %1589 = vst [vmem:[%s2680_s15 + $0x158] sm:$0xff] %v1557_v49  ;;  %v1008_v51 = vsel %vm944_vm8, %v874_v43, %v976_v41 }
 0x116   : > { %1040 = vst [vmem:[%s2680_s15 + $0x60] sm:$0xff] %v1008_v51  ;;  %v1542_v53 = vsel %vm1478_vm9, %v1408_v47, %v1510_v50  ;;  %v913_v52 = vpop.f32.mrf.mxu2 }
 0x117   : > { %1574 = vst [vmem:[%s2680_s15 + $0x68] sm:$0xff] %v1542_v53  ;;  %v914_v54 = vadd.f32 %v2669_v8, %v913_v52  ;;  %v1447_v55 = vpop.f32.mrf.mxu3 }
 0x118   : > { %v1448_v56 = vadd.f32 %v2674_v9, %v1447_v55  ;;  %v875_v57 = vpop.f32.mrf.mxu0 }
 0x119   : > { %vm960_vm10 = vcmp.ge.f32.partialorder %v914_v54, 0.0  ;;  %v992_v58 = vmul.f32 0.01, %v914_v54  ;;  %v876_v59 = vadd.f32 %v2669_v8, %v875_v57  ;;  %v1409_v46 = vpop.f32.mrf.mxu1 }
 0x11a   : > { %vm1494_vm11 = vcmp.ge.f32.partialorder %v1448_v56, 0.0  ;;  %v1526_v60 = vmul.f32 0.01, %v1448_v56  ;;  %v1410_v0 = vadd.f32 %v2674_v9, %v1409_v46 }
 0x11b   : > { %v1024_v61 = vsel %vm960_vm10, %v914_v54, %v992_v58  ;;  %vm945_vm12 = vcmp.ge.f32.partialorder %v876_v59, 0.0  ;;  %v977_v62 = vmul.f32 0.01, %v876_v59 }
 0x11c   : > { %1056 = vst [vmem:[%s2680_s15 + $0x160] sm:$0xff] %v1024_v61  ;;  %v1558_v63 = vsel %vm1494_vm11, %v1448_v56, %v1526_v60  ;;  %vm1479_vm13 = vcmp.ge.f32.partialorder %v1410_v0, 0.0  ;;  %v1511_v1 = vmul.f32 0.01, %v1410_v0 }
 0x11d   : > { %1590 = vst [vmem:[%s2680_s15 + $0x168] sm:$0xff] %v1558_v63  ;;  %v1009_v2 = vsel %vm945_vm12, %v876_v59, %v977_v62 }
 0x11e   : > { %1041 = vst [vmem:[%s2680_s15 + $0x70] sm:$0xff] %v1009_v2  ;;  %v1543_v3 = vsel %vm1479_vm13, %v1410_v0, %v1511_v1  ;;  %v915_v4 = vpop.f32.mrf.mxu2 }
 0x11f   : > { %1575 = vst [vmem:[%s2680_s15 + $0x78] sm:$0xff] %v1543_v3  ;;  %v916_v5 = vadd.f32 %v2669_v8, %v915_v4  ;;  %v1449_v6 = vpop.f32.mrf.mxu3 }
 0x120   : > { %v1450_v7 = vadd.f32 %v2674_v9, %v1449_v6  ;;  %v878_v10 = vpop.f32.mrf.mxu0 }
 0x121   : > { %vm961_vm14 = vcmp.ge.f32.partialorder %v916_v5, 0.0  ;;  %v993_v11 = vmul.f32 0.01, %v916_v5  ;;  %v879_v12 = vadd.f32 %v2669_v8, %v878_v10  ;;  %v1412_v13 = vpop.f32.mrf.mxu1 }
 0x122   : > { %vm1495_vm15 = vcmp.ge.f32.partialorder %v1450_v7, 0.0  ;;  %v1527_v14 = vmul.f32 0.01, %v1450_v7  ;;  %v1413_v15 = vadd.f32 %v2674_v9, %v1412_v13 }
 0x123   : > { %v1025_v16 = vsel %vm961_vm14, %v916_v5, %v993_v11  ;;  %vm946_vm0 = vcmp.ge.f32.partialorder %v879_v12, 0.0  ;;  %v978_v17 = vmul.f32 0.01, %v879_v12 }
 0x124   : > { %1057 = vst [vmem:[%s2680_s15 + $0x170] sm:$0xff] %v1025_v16  ;;  %v1559_v18 = vsel %vm1495_vm15, %v1450_v7, %v1527_v14  ;;  %vm1480_vm1 = vcmp.ge.f32.partialorder %v1413_v15, 0.0  ;;  %v1512_v19 = vmul.f32 0.01, %v1413_v15 }
 0x125   : > { %1591 = vst [vmem:[%s2680_s15 + $0x178] sm:$0xff] %v1559_v18  ;;  %v1010_v20 = vsel %vm946_vm0, %v879_v12, %v978_v17 }
 0x126   : > { %1042 = vst [vmem:[%s2680_s15 + $0x80] sm:$0xff] %v1010_v20  ;;  %v1544_v21 = vsel %vm1480_vm1, %v1413_v15, %v1512_v19  ;;  %v918_v22 = vpop.f32.mrf.mxu2 }
 0x127   : > { %1576 = vst [vmem:[%s2680_s15 + $0x88] sm:$0xff] %v1544_v21  ;;  %v919_v23 = vadd.f32 %v2669_v8, %v918_v22  ;;  %v1452_v24 = vpop.f32.mrf.mxu3 }
 0x128   : > { %v1453_v25 = vadd.f32 %v2674_v9, %v1452_v24  ;;  %v880_v26 = vpop.f32.mrf.mxu0 }
 0x129   : > { %vm962_vm2 = vcmp.ge.f32.partialorder %v919_v23, 0.0  ;;  %v994_v27 = vmul.f32 0.01, %v919_v23  ;;  %v881_v28 = vadd.f32 %v2669_v8, %v880_v26  ;;  %v1414_v29 = vpop.f32.mrf.mxu1 }
 0x12a   : > { %vm1496_vm3 = vcmp.ge.f32.partialorder %v1453_v25, 0.0  ;;  %v1528_v30 = vmul.f32 0.01, %v1453_v25  ;;  %v1415_v31 = vadd.f32 %v2674_v9, %v1414_v29 }
 0x12b   : > { %v1026_v32 = vsel %vm962_vm2, %v919_v23, %v994_v27  ;;  %vm947_vm4 = vcmp.ge.f32.partialorder %v881_v28, 0.0  ;;  %v979_v33 = vmul.f32 0.01, %v881_v28 }
 0x12c   : > { %1058 = vst [vmem:[%s2680_s15 + $0x180] sm:$0xff] %v1026_v32  ;;  %v1560_v34 = vsel %vm1496_vm3, %v1453_v25, %v1528_v30  ;;  %vm1481_vm5 = vcmp.ge.f32.partialorder %v1415_v31, 0.0  ;;  %v1513_v35 = vmul.f32 0.01, %v1415_v31 }
 0x12d   : > { %1592 = vst [vmem:[%s2680_s15 + $0x188] sm:$0xff] %v1560_v34  ;;  %v1011_v36 = vsel %vm947_vm4, %v881_v28, %v979_v33 }
 0x12e   : > { %1043 = vst [vmem:[%s2680_s15 + $0x90] sm:$0xff] %v1011_v36  ;;  %v1545_v37 = vsel %vm1481_vm5, %v1415_v31, %v1513_v35  ;;  %v920_v38 = vpop.f32.mrf.mxu2 }
 0x12f   : > { %1577 = vst [vmem:[%s2680_s15 + $0x98] sm:$0xff] %v1545_v37  ;;  %v921_v39 = vadd.f32 %v2669_v8, %v920_v38  ;;  %v1454_v40 = vpop.f32.mrf.mxu3 }
 0x130   : > { %v1455_v42 = vadd.f32 %v2674_v9, %v1454_v40  ;;  %v883_v43 = vpop.f32.mrf.mxu0 }
 0x131   : > { %vm963_vm6 = vcmp.ge.f32.partialorder %v921_v39, 0.0  ;;  %v995_v44 = vmul.f32 0.01, %v921_v39  ;;  %v884_v45 = vadd.f32 %v2669_v8, %v883_v43  ;;  %v1417_v47 = vpop.f32.mrf.mxu1 }
 0x132   : > { %vm1497_vm7 = vcmp.ge.f32.partialorder %v1455_v42, 0.0  ;;  %v1529_v48 = vmul.f32 0.01, %v1455_v42  ;;  %v1418_v41 = vadd.f32 %v2674_v9, %v1417_v47 }
 0x133   : > { %v1027_v49 = vsel %vm963_vm6, %v921_v39, %v995_v44  ;;  %vm948_vm8 = vcmp.ge.f32.partialorder %v884_v45, 0.0  ;;  %v980_v50 = vmul.f32 0.01, %v884_v45 }
 0x134   : > { %1059 = vst [vmem:[%s2680_s15 + $0x190] sm:$0xff] %v1027_v49  ;;  %v1561_v51 = vsel %vm1497_vm7, %v1455_v42, %v1529_v48  ;;  %vm1482_vm9 = vcmp.ge.f32.partialorder %v1418_v41, 0.0  ;;  %v1514_v53 = vmul.f32 0.01, %v1418_v41 }
 0x135   : > { %1593 = vst [vmem:[%s2680_s15 + $0x198] sm:$0xff] %v1561_v51  ;;  %v1012_v52 = vsel %vm948_vm8, %v884_v45, %v980_v50 }
 0x136   : > { %1044 = vst [vmem:[%s2680_s15 + $0xa0] sm:$0xff] %v1012_v52  ;;  %v1546_v54 = vsel %vm1482_vm9, %v1418_v41, %v1514_v53  ;;  %v923_v55 = vpop.f32.mrf.mxu2 }
 0x137   : > { %1578 = vst [vmem:[%s2680_s15 + $0xa8] sm:$0xff] %v1546_v54  ;;  %v924_v56 = vadd.f32 %v2669_v8, %v923_v55  ;;  %v1457_v57 = vpop.f32.mrf.mxu3 }
 0x138   : > { %v1458_v58 = vadd.f32 %v2674_v9, %v1457_v57  ;;  %v885_v59 = vpop.f32.mrf.mxu0 }
 0x139   : > { %vm964_vm10 = vcmp.ge.f32.partialorder %v924_v56, 0.0  ;;  %v996_v46 = vmul.f32 0.01, %v924_v56  ;;  %v886_v60 = vadd.f32 %v2669_v8, %v885_v59  ;;  %v1419_v0 = vpop.f32.mrf.mxu1 }
 0x13a   : > { %vm1498_vm11 = vcmp.ge.f32.partialorder %v1458_v58, 0.0  ;;  %v1530_v61 = vmul.f32 0.01, %v1458_v58  ;;  %v1420_v62 = vadd.f32 %v2674_v9, %v1419_v0 }
 0x13b   : > { %v1028_v63 = vsel %vm964_vm10, %v924_v56, %v996_v46  ;;  %vm949_vm12 = vcmp.ge.f32.partialorder %v886_v60, 0.0  ;;  %v981_v1 = vmul.f32 0.01, %v886_v60 }
 0x13c   : > { %1060 = vst [vmem:[%s2680_s15 + $0x1a0] sm:$0xff] %v1028_v63  ;;  %v1562_v2 = vsel %vm1498_vm11, %v1458_v58, %v1530_v61  ;;  %vm1483_vm13 = vcmp.ge.f32.partialorder %v1420_v62, 0.0  ;;  %v1515_v3 = vmul.f32 0.01, %v1420_v62 }
 0x13d   : > { %1594 = vst [vmem:[%s2680_s15 + $0x1a8] sm:$0xff] %v1562_v2  ;;  %v1013_v4 = vsel %vm949_vm12, %v886_v60, %v981_v1 }
 0x13e   : > { %1045 = vst [vmem:[%s2680_s15 + $0xb0] sm:$0xff] %v1013_v4  ;;  %v1547_v5 = vsel %vm1483_vm13, %v1420_v62, %v1515_v3  ;;  %v925_v6 = vpop.f32.mrf.mxu2 }
 0x13f   : > { %1579 = vst [vmem:[%s2680_s15 + $0xb8] sm:$0xff] %v1547_v5  ;;  %v926_v7 = vadd.f32 %v2669_v8, %v925_v6  ;;  %v1459_v10 = vpop.f32.mrf.mxu3 }
 0x140   : > { %v1460_v11 = vadd.f32 %v2674_v9, %v1459_v10  ;;  %v888_v12 = vpop.f32.mrf.mxu0 }
 0x141   : > { %vm965_vm14 = vcmp.ge.f32.partialorder %v926_v7, 0.0  ;;  %v997_v13 = vmul.f32 0.01, %v926_v7  ;;  %v889_v14 = vadd.f32 %v2669_v8, %v888_v12  ;;  %v1422_v15 = vpop.f32.mrf.mxu1 }
 0x142   : > { %vm1499_vm15 = vcmp.ge.f32.partialorder %v1460_v11, 0.0  ;;  %v1531_v16 = vmul.f32 0.01, %v1460_v11  ;;  %v1423_v17 = vadd.f32 %v2674_v9, %v1422_v15 }
 0x143   : > { %v1029_v18 = vsel %vm965_vm14, %v926_v7, %v997_v13  ;;  %vm950_vm0 = vcmp.ge.f32.partialorder %v889_v14, 0.0  ;;  %v982_v19 = vmul.f32 0.01, %v889_v14 }
 0x144   : > { %1061 = vst [vmem:[%s2680_s15 + $0x1b0] sm:$0xff] %v1029_v18  ;;  %v1563_v20 = vsel %vm1499_vm15, %v1460_v11, %v1531_v16  ;;  %vm1484_vm1 = vcmp.ge.f32.partialorder %v1423_v17, 0.0  ;;  %v1516_v21 = vmul.f32 0.01, %v1423_v17  ;;  %v1628_v18 = vld [vmem:[%s2680_s15 + $0x10] sm:$0xff] (%p2329_p6) }
 0x145   : > { %1595 = vst [vmem:[%s2680_s15 + $0x1b8] sm:$0xff] %v1563_v20  ;;  %v1014_v22 = vsel %vm950_vm0, %v889_v14, %v982_v19  ;;  %v1630_v19 = vld [vmem:[%s2680_s15 + $0x18] sm:$0xff] (%p2329_p6)  ;;  %v1632_v20 = vld [vmem:[%s2680_s15 + $0x20] sm:$0xff] (%p2329_p6) }
 0x146   : > { %1046 = vst [vmem:[%s2680_s15 + $0xc0] sm:$0xff] %v1014_v22  ;;  %v1548_v23 = vsel %vm1484_vm1, %v1423_v17, %v1516_v21  ;;  %v928_v24 = vpop.f32.mrf.mxu2  ;;  %v1634_v21 = vld [vmem:[%s2680_s15 + $0x28] sm:$0xff] (%p2329_p6)  ;;  %v1636_v22 = vld [vmem:[%s2680_s15 + $0x30] sm:$0xff] (%p2329_p6) }
 0x147   : > { %1580 = vst [vmem:[%s2680_s15 + $0xc8] sm:$0xff] %v1548_v23  ;;  %v929_v25 = vadd.f32 %v2669_v8, %v928_v24  ;;  %v1462_v26 = vpop.f32.mrf.mxu3  ;;  %v1638_v23 = vld [vmem:[%s2680_s15 + $0x38] sm:$0xff] (%p2329_p6)  ;;  %v1640_v24 = vld [vmem:[%s2680_s15 + $0x40] sm:$0xff] (%p2329_p6) }
 0x148   : > { %v1463_v27 = vadd.f32 %v2674_v9, %v1462_v26  ;;  %v890_v28 = vpop.f32.mrf.mxu0  ;;  %1629 = vst [vmem:[%s2817_s30 + $0x10] sm:$0xff] (%p2329_p6), %v1628_v18  ;;  %v1644_v26 = vld [vmem:[%s2680_s15 + $0x50] sm:$0xff] (%p2329_p6) }
 0x149   : > { %vm966_vm2 = vcmp.ge.f32.partialorder %v929_v25, 0.0  ;;  %v998_v29 = vmul.f32 0.01, %v929_v25  ;;  %v891_v30 = vadd.f32 %v2669_v8, %v890_v28  ;;  %v1424_v31 = vpop.f32.mrf.mxu1  ;;  %1631 = vst [vmem:[%s2817_s30 + $0x18] sm:$0xff] (%p2329_p6), %v1630_v19  ;;  %v1648_v28 = vld [vmem:[%s2680_s15 + $0x60] sm:$0xff] (%p2329_p6) }
 0x14a   : > { %vm1500_vm3 = vcmp.ge.f32.partialorder %v1463_v27, 0.0  ;;  %v1532_v32 = vmul.f32 0.01, %v1463_v27  ;;  %v1425_v33 = vadd.f32 %v2674_v9, %v1424_v31  ;;  %1633 = vst [vmem:[%s2817_s30 + $0x40] sm:$0xff] (%p2329_p6), %v1632_v20  ;;  %v1654_v31 = vld [vmem:[%s2680_s15 + $0x78] sm:$0xff] (%p2329_p6) }
 0x14b   : > { %v1030_v34 = vsel %vm966_vm2, %v929_v25, %v998_v29  ;;  %vm951_vm4 = vcmp.ge.f32.partialorder %v891_v30, 0.0  ;;  %v983_v35 = vmul.f32 0.01, %v891_v30  ;;  %1635 = vst [vmem:[%s2817_s30 + $0x48] sm:$0xff] (%p2329_p6), %v1634_v21  ;;  %v1642_v25 = vld [vmem:[%s2680_s15 + $0x48] sm:$0xff] (%p2329_p6) }
 0x14c   : > { %1062 = vst [vmem:[%s2680_s15 + $0x1c0] sm:$0xff] %v1030_v34  ;;  %v1564_v36 = vsel %vm1500_vm3, %v1463_v27, %v1532_v32  ;;  %vm1485_vm5 = vcmp.ge.f32.partialorder %v1425_v33, 0.0  ;;  %v1517_v37 = vmul.f32 0.01, %v1425_v33  ;;  %v1646_v27 = vld [vmem:[%s2680_s15 + $0x58] sm:$0xff] (%p2329_p6)  ;;  %v1650_v29 = vld [vmem:[%s2680_s15 + $0x68] sm:$0xff] (%p2329_p6) }
 0x14d   : > { %1596 = vst [vmem:[%s2680_s15 + $0x1c8] sm:$0xff] %v1564_v36  ;;  %v1015_v38 = vsel %vm951_vm4, %v891_v30, %v983_v35  ;;  %v1652_v30 = vld [vmem:[%s2680_s15 + $0x70] sm:$0xff] (%p2329_p6)  ;;  %v1656_v32 = vld [vmem:[%s2680_s15 + $0x80] sm:$0xff] (%p2329_p6)  ;;  %v1662_v35 = vld [vmem:[%s2680_s15 + $0x98] sm:$0xff] (%p2329_p6) }
 0x14e   : > { %1047 = vst [vmem:[%s2680_s15 + $0xd0] sm:$0xff] %v1015_v38  ;;  %v1549_v39 = vsel %vm1485_vm5, %v1425_v33, %v1517_v37  ;;  %v930_v40 = vpop.f32.mrf.mxu2  ;;  %v1658_v33 = vld [vmem:[%s2680_s15 + $0x88] sm:$0xff] (%p2329_p6)  ;;  %v1660_v34 = vld [vmem:[%s2680_s15 + $0x90] sm:$0xff] (%p2329_p6)  ;;  %v1664_v36 = vld [vmem:[%s2680_s15 + $0xa0] sm:$0xff] (%p2329_p6) }
 0x14f   : > { %1581 = vst [vmem:[%s2680_s15 + $0xd8] sm:$0xff] %v1549_v39  ;;  %v931_v42 = vadd.f32 %v2669_v8, %v930_v40  ;;  %v1464_v43 = vpop.f32.mrf.mxu3  ;;  %v1666_v37 = vld [vmem:[%s2680_s15 + $0xa8] sm:$0xff] (%p2329_p6)  ;;  %v1668_v38 = vld [vmem:[%s2680_s15 + $0xb0] sm:$0xff] (%p2329_p6)  ;;  %v1670_v39 = vld [vmem:[%s2680_s15 + $0xb8] sm:$0xff] (%p2329_p6) }
 0x150   : > { %v1465_v44 = vadd.f32 %v2674_v9, %v1464_v43  ;;  %v893_v45 = vpop.f32.mrf.mxu0  ;;  %1637 = vst [vmem:[%s2817_s30 + $0x50] sm:$0xff] (%p2329_p6), %v1636_v22  ;;  %v1672_v40 = vld [vmem:[%s2680_s15 + $0xc0] sm:$0xff] (%p2329_p6) }
 0x151   : > { %vm967_vm6 = vcmp.ge.f32.partialorder %v931_v42, 0.0  ;;  %v999_v47 = vmul.f32 0.01, %v931_v42  ;;  %v894_v48 = vadd.f32 %v2669_v8, %v893_v45  ;;  %v1427_v41 = vpop.f32.mrf.mxu1  ;;  %1639 = vst [vmem:[%s2817_s30 + $0x58] sm:$0xff] (%p2329_p6), %v1638_v23 }
 0x152   : > { %vm1501_vm7 = vcmp.ge.f32.partialorder %v1465_v44, 0.0  ;;  %v1533_v49 = vmul.f32 0.01, %v1465_v44  ;;  %v1428_v50 = vadd.f32 %v2674_v9, %v1427_v41  ;;  %1641 = vst [vmem:[%s2817_s30 + $0x80] sm:$0xff] (%p2329_p6), %v1640_v24 }
 0x153   : > { %v1031_v51 = vsel %vm967_vm6, %v931_v42, %v999_v47  ;;  %vm952_vm8 = vcmp.ge.f32.partialorder %v894_v48, 0.0  ;;  %v984_v53 = vmul.f32 0.01, %v894_v48  ;;  %1643 = vst [vmem:[%s2817_s30 + $0x88] sm:$0xff] (%p2329_p6), %v1642_v25  ;;  %v1674_v42 = vld [vmem:[%s2680_s15 + $0xc8] sm:$0xff] (%p2329_p6) }
 0x154   : > { %1063 = vst [vmem:[%s2680_s15 + $0x1d0] sm:$0xff] %v1031_v51  ;;  %v1565_v52 = vsel %vm1501_vm7, %v1465_v44, %v1533_v49  ;;  %vm1486_vm9 = vcmp.ge.f32.partialorder %v1428_v50, 0.0  ;;  %v1518_v54 = vmul.f32 0.01, %v1428_v50  ;;  %v1688_v49 = vld [vmem:[%s2680_s15 + $0x100] sm:$0xff] (%p2329_p6)  ;;  %v1692_v51 = vld [vmem:[%s2680_s15 + $0x110] sm:$0xff] (%p2329_p6) }
 0x155   : > { %1597 = vst [vmem:[%s2680_s15 + $0x1d8] sm:$0xff] %v1565_v52  ;;  %v1016_v55 = vsel %vm952_vm8, %v894_v48, %v984_v53  ;;  %v1676_v43 = vld [vmem:[%s2680_s15 + $0xd0] sm:$0xff] (%p2329_p6)  ;;  %v1694_v53 = vld [vmem:[%s2680_s15 + $0x118] sm:$0xff] (%p2329_p6)  ;;  %v1696_v52 = vld [vmem:[%s2680_s15 + $0x120] sm:$0xff] (%p2329_p6) }
 0x156   : > { %1048 = vst [vmem:[%s2680_s15 + $0xe0] sm:$0xff] %v1016_v55  ;;  %v1550_v56 = vsel %vm1486_vm9, %v1428_v50, %v1518_v54  ;;  %v933_v57 = vpop.f32.mrf.mxu2  ;;  %v1678_v44 = vld [vmem:[%s2680_s15 + $0xd8] sm:$0xff] (%p2329_p6)  ;;  %v1690_v50 = vld [vmem:[%s2680_s15 + $0x108] sm:$0xff] (%p2329_p6)  ;;  %v1700_v55 = vld [vmem:[%s2680_s15 + $0x130] sm:$0xff] (%p2329_p6) }
 0x157   : > { %1582 = vst [vmem:[%s2680_s15 + $0xe8] sm:$0xff] %v1550_v56  ;;  %v934_v58 = vadd.f32 %v2669_v8, %v933_v57  ;;  %v1467_v59 = vpop.f32.mrf.mxu3  ;;  %v1698_v54 = vld [vmem:[%s2680_s15 + $0x128] sm:$0xff] (%p2329_p6)  ;;  %v1702_v56 = vld [vmem:[%s2680_s15 + $0x138] sm:$0xff] (%p2329_p6)  ;;  %v1704_v57 = vld [vmem:[%s2680_s15 + $0x140] sm:$0xff] (%p2329_p6) }
 0x158   : > { %v1468_v46 = vadd.f32 %v2674_v9, %v1467_v59  ;;  %v895_v60 = vpop.f32.mrf.mxu0  ;;  %1645 = vst [vmem:[%s2817_s30 + $0x90] sm:$0xff] (%p2329_p6), %v1644_v26  ;;  %v1708_v59 = vld [vmem:[%s2680_s15 + $0x150] sm:$0xff] (%p2329_p6) }
 0x159   : > { %vm968_vm10 = vcmp.ge.f32.partialorder %v934_v58, 0.0  ;;  %v1000_v0 = vmul.f32 0.01, %v934_v58  ;;  %v896_v61 = vadd.f32 %v2669_v8, %v895_v60  ;;  %v1429_v62 = vpop.f32.mrf.mxu1  ;;  %1647 = vst [vmem:[%s2817_s30 + $0x98] sm:$0xff] (%p2329_p6), %v1646_v27  ;;  %v1712_v60 = vld [vmem:[%s2680_s15 + $0x160] sm:$0xff] (%p2329_p6) }
 0x15a   : > { %vm1502_vm11 = vcmp.ge.f32.partialorder %v1468_v46, 0.0  ;;  %v1534_v63 = vmul.f32 0.01, %v1468_v46  ;;  %v1430_v1 = vadd.f32 %v2674_v9, %v1429_v62  ;;  %1649 = vst [vmem:[%s2817_s30 + $0xc0] sm:$0xff] (%p2329_p6), %v1648_v28  ;;  %v1718_v62 = vld [vmem:[%s2680_s15 + $0x178] sm:$0xff] (%p2329_p6) }
 0x15b   : > { %v1032_v2 = vsel %vm968_vm10, %v934_v58, %v1000_v0  ;;  %vm953_vm12 = vcmp.ge.f32.partialorder %v896_v61, 0.0  ;;  %v985_v3 = vmul.f32 0.01, %v896_v61  ;;  %1651 = vst [vmem:[%s2817_s30 + $0xc8] sm:$0xff] (%p2329_p6), %v1650_v29  ;;  %v1706_v58 = vld [vmem:[%s2680_s15 + $0x148] sm:$0xff] (%p2329_p6) }
 0x15c   : > { %1064 = vst [vmem:[%s2680_s15 + $0x1e0] sm:$0xff] %v1032_v2  ;;  %v1566_v4 = vsel %vm1502_vm11, %v1468_v46, %v1534_v63  ;;  %vm1487_vm13 = vcmp.ge.f32.partialorder %v1430_v1, 0.0  ;;  %v1519_v5 = vmul.f32 0.01, %v1430_v1  ;;  %v1710_v46 = vld [vmem:[%s2680_s15 + $0x158] sm:$0xff] (%p2329_p6)  ;;  %v1714_v0 = vld [vmem:[%s2680_s15 + $0x168] sm:$0xff] (%p2329_p6) }
 0x15d   : > { %1598 = vst [vmem:[%s2680_s15 + $0x1e8] sm:$0xff] %v1566_v4  ;;  %v1017_v6 = vsel %vm953_vm12, %v896_v61, %v985_v3  ;;  %v1680_v45 = vld [vmem:[%s2680_s15 + $0xe0] sm:$0xff] (%p2329_p6)  ;;  %v1716_v61 = vld [vmem:[%s2680_s15 + $0x170] sm:$0xff] (%p2329_p6)  ;;  %v1726_v3 = vld [vmem:[%s2680_s15 + $0x198] sm:$0xff] (%p2329_p6) }
 0x15e   : > { %1049 = vst [vmem:[%s2680_s15 + $0xf0] sm:$0xff] %v1017_v6  ;;  %v1551_v7 = vsel %vm1487_vm13, %v1430_v1, %v1519_v5  ;;  %v935_v10 = vpop.f32.mrf.mxu2  ;;  %v1682_v47 = vld [vmem:[%s2680_s15 + $0xe8] sm:$0xff] (%p2329_p6)  ;;  %v1720_v63 = vld [vmem:[%s2680_s15 + $0x180] sm:$0xff] (%p2329_p6)  ;;  %v1724_v2 = vld [vmem:[%s2680_s15 + $0x190] sm:$0xff] (%p2329_p6) }
 0x15f   : > { %1583 = vst [vmem:[%s2680_s15 + $0xf8] sm:$0xff] %v1551_v7  ;;  %v936_v11 = vadd.f32 %v2669_v8, %v935_v10  ;;  %v1469_v12 = vpop.f32.mrf.mxu3  ;;  %v1624_v8 = vld [vmem:[%s2680_s15] sm:$0xff] (%p2329_p6)  ;;  %v1722_v1 = vld [vmem:[%s2680_s15 + $0x188] sm:$0xff] (%p2329_p6)  ;;  %v1732_v6 = vld [vmem:[%s2680_s15 + $0x1b0] sm:$0xff] (%p2329_p6) }
 0x160   : > { %v1470_v13 = vadd.f32 %v2674_v9, %v1469_v12  ;;  %v1626_v9 = vld [vmem:[%s2680_s15 + $0x8] sm:$0xff] (%p2329_p6)  ;;  %1625 = vst [vmem:[%s2817_s30] sm:$0xff] (%p2329_p6), %v1624_v8  ;;  %v1728_v4 = vld [vmem:[%s2680_s15 + $0x1a0] sm:$0xff] (%p2329_p6)  ;;  %v1734_v7 = vld [vmem:[%s2680_s15 + $0x1b8] sm:$0xff] (%p2329_p6) }
 0x161   : > { %vm969_vm14 = vcmp.ge.f32.partialorder %v936_v11, 0.0  ;;  %v1001_v14 = vmul.f32 0.01, %v936_v11  ;;  %1606 = sbr.rel (!%p2329_p6) target bundleno = 406 (0x196), region = 85  ;;  %1627 = vst [vmem:[%s2817_s30 + $0x8] sm:$0xff] (%p2329_p6), %v1626_v9  ;;  %v1730_v5 = vld [vmem:[%s2680_s15 + $0x1a8] sm:$0xff] (%p2329_p6) }
 0x162   : > { %vm1503_vm15 = vcmp.ge.f32.partialorder %v1470_v13, 0.0  ;;  %v1535_v15 = vmul.f32 0.01, %v1470_v13  ;;  %1653 = vst [vmem:[%s2817_s30 + $0xd0] sm:$0xff] (%p2329_p6), %v1652_v30  ;;  %v1736_v10 = vld [vmem:[%s2680_s15 + $0x1c0] sm:$0xff] (%p2329_p6)  ;;  %v1740_v12 = vld [vmem:[%s2680_s15 + $0x1d0] sm:$0xff] (%p2329_p6) }
 0x163   : > { %v1033_v16 = vsel %vm969_vm14, %v936_v11, %v1001_v14  ;;  %1655 = vst [vmem:[%s2817_s30 + $0xd8] sm:$0xff] (%p2329_p6), %v1654_v31  ;;  %v1738_v11 = vld [vmem:[%s2680_s15 + $0x1c8] sm:$0xff] (%p2329_p6)  ;;  %v1744_v14 = vld [vmem:[%s2680_s15 + $0x1e0] sm:$0xff] (%p2329_p6) }
 0x164   : > { %1065 = vst [vmem:[%s2680_s15 + $0x1f0] sm:$0xff] %v1033_v16  ;;  %v1567_v17 = vsel %vm1503_vm15, %v1470_v13, %v1535_v15  ;;  %v1742_v13 = vld [vmem:[%s2680_s15 + $0x1d8] sm:$0xff] (%p2329_p6)  ;;  %v1746_v15 = vld [vmem:[%s2680_s15 + $0x1e8] sm:$0xff] (%p2329_p6) }
 0x165   : > { %1599 = vst [vmem:[%s2680_s15 + $0x1f8] sm:$0xff] %v1567_v17  ;;  %v1684_v48 = vld [vmem:[%s2680_s15 + $0xf0] sm:$0xff] (%p2329_p6) }
 0x166   : > { %1657 = vst [vmem:[%s2817_s30 + $0x100] sm:$0xff] %v1656_v32  ;;  %v1686_v41 = vld [vmem:[%s2680_s15 + $0xf8] sm:$0xff] }
 0x167   : > { %1659 = vst [vmem:[%s2817_s30 + $0x108] sm:$0xff] %v1658_v33 }
 0x168   : > { %1661 = vst [vmem:[%s2817_s30 + $0x110] sm:$0xff] %v1660_v34 }
 0x169   : > { %1663 = vst [vmem:[%s2817_s30 + $0x118] sm:$0xff] %v1662_v35 }
 0x16a   : > { %1665 = vst [vmem:[%s2817_s30 + $0x140] sm:$0xff] %v1664_v36 }
 0x16b   : > { %1667 = vst [vmem:[%s2817_s30 + $0x148] sm:$0xff] %v1666_v37  ;;  %v1748_v16 = vld [vmem:[%s2680_s15 + $0x1f0] sm:$0xff] }
 0x16c   : > { %1669 = vst [vmem:[%s2817_s30 + $0x150] sm:$0xff] %v1668_v38  ;;  %v1750_v17 = vld [vmem:[%s2680_s15 + $0x1f8] sm:$0xff] }
 0x16d   : > { %1671 = vst [vmem:[%s2817_s30 + $0x158] sm:$0xff] %v1670_v39 }
 0x16e   : > { %1673 = vst [vmem:[%s2817_s30 + $0x180] sm:$0xff] %v1672_v40 }
 0x16f   : > { %1675 = vst [vmem:[%s2817_s30 + $0x188] sm:$0xff] %v1674_v42 }
 0x170   : > { %1677 = vst [vmem:[%s2817_s30 + $0x190] sm:$0xff] %v1676_v43 }
 0x171   : > { %1679 = vst [vmem:[%s2817_s30 + $0x198] sm:$0xff] %v1678_v44 }
 0x172   : > { %1681 = vst [vmem:[%s2817_s30 + $0x1c0] sm:$0xff] %v1680_v45 }
 0x173   : > { %1683 = vst [vmem:[%s2817_s30 + $0x1c8] sm:$0xff] %v1682_v47 }
 0x174   : > { %1685 = vst [vmem:[%s2817_s30 + $0x1d0] sm:$0xff] %v1684_v48 }
 0x175   : > { %1687 = vst [vmem:[%s2817_s30 + $0x1d8] sm:$0xff] %v1686_v41 }
 0x176   : > { %1689 = vst [vmem:[%s2817_s30 + $0x200] sm:$0xff] %v1688_v49 }
 0x177   : > { %1691 = vst [vmem:[%s2817_s30 + $0x208] sm:$0xff] %v1690_v50 }
 0x178   : > { %1693 = vst [vmem:[%s2817_s30 + $0x210] sm:$0xff] %v1692_v51 }
 0x179   : > { %1695 = vst [vmem:[%s2817_s30 + $0x218] sm:$0xff] %v1694_v53 }
 0x17a   : > { %1697 = vst [vmem:[%s2817_s30 + $0x240] sm:$0xff] %v1696_v52 }
 0x17b   : > { %1699 = vst [vmem:[%s2817_s30 + $0x248] sm:$0xff] %v1698_v54 }
 0x17c   : > { %1701 = vst [vmem:[%s2817_s30 + $0x250] sm:$0xff] %v1700_v55 }
 0x17d   : > { %1703 = vst [vmem:[%s2817_s30 + $0x258] sm:$0xff] %v1702_v56 }
 0x17e   : > { %1705 = vst [vmem:[%s2817_s30 + $0x280] sm:$0xff] %v1704_v57 }
 0x17f   : > { %1707 = vst [vmem:[%s2817_s30 + $0x288] sm:$0xff] %v1706_v58 }
 0x180   : > { %1709 = vst [vmem:[%s2817_s30 + $0x290] sm:$0xff] %v1708_v59 }
 0x181   : > { %1711 = vst [vmem:[%s2817_s30 + $0x298] sm:$0xff] %v1710_v46 }
 0x182   : > { %1713 = vst [vmem:[%s2817_s30 + $0x2c0] sm:$0xff] %v1712_v60 }
 0x183   : > { %1715 = vst [vmem:[%s2817_s30 + $0x2c8] sm:$0xff] %v1714_v0 }
 0x184   : > { %1717 = vst [vmem:[%s2817_s30 + $0x2d0] sm:$0xff] %v1716_v61 }
 0x185   : > { %1719 = vst [vmem:[%s2817_s30 + $0x2d8] sm:$0xff] %v1718_v62 }
 0x186   : > { %1721 = vst [vmem:[%s2817_s30 + $0x300] sm:$0xff] %v1720_v63 }
 0x187   : > { %1723 = vst [vmem:[%s2817_s30 + $0x308] sm:$0xff] %v1722_v1 }
 0x188   : > { %1725 = vst [vmem:[%s2817_s30 + $0x310] sm:$0xff] %v1724_v2 }
 0x189   : > { %1727 = vst [vmem:[%s2817_s30 + $0x318] sm:$0xff] %v1726_v3 }
 0x18a   : > { %1729 = vst [vmem:[%s2817_s30 + $0x340] sm:$0xff] %v1728_v4 }
 0x18b   : > { %1731 = vst [vmem:[%s2817_s30 + $0x348] sm:$0xff] %v1730_v5 }
 0x18c   : > { %1733 = vst [vmem:[%s2817_s30 + $0x350] sm:$0xff] %v1732_v6 }
 0x18d   : > { %1735 = vst [vmem:[%s2817_s30 + $0x358] sm:$0xff] %v1734_v7 }
 0x18e   : > { %1737 = vst [vmem:[%s2817_s30 + $0x380] sm:$0xff] %v1736_v10 }
 0x18f   : > { %1739 = vst [vmem:[%s2817_s30 + $0x388] sm:$0xff] %v1738_v11 }
 0x190   : > { %1741 = vst [vmem:[%s2817_s30 + $0x390] sm:$0xff] %v1740_v12 }
 0x191   : > { %1743 = vst [vmem:[%s2817_s30 + $0x398] sm:$0xff] %v1742_v13 }
 0x192   : > { %1745 = vst [vmem:[%s2817_s30 + $0x3c0] sm:$0xff] %v1744_v14 }
 0x193   : > { %1747 = vst [vmem:[%s2817_s30 + $0x3c8] sm:$0xff] %v1746_v15 }
 0x194   : > { %1749 = vst [vmem:[%s2817_s30 + $0x3d0] sm:$0xff] %v1748_v16 }
 0x195   : > { %1751 = vst [vmem:[%s2817_s30 + $0x3d8] sm:$0xff] %v1750_v17 }
 0x196 PF: > { %s15_s24 = sadd.s32 1, %s2249_s24   ;;  %s2973_s18 = smov %s2229_s19 }
 0x197   : > { %p12_p12 = scmp.ge.s32.totalorder %s15_s24, 6   ;;  %s2974_s19 = smov %s2337_s8 }
 0x198   : > { %s2975_s20 = smov %s2241_s22  ;;  %s2976_s21 = smov %s2245_s23 }
 0x199   : > { %s2977_s22 = smov %s2980_s25  ;;  %s2978_s23 = smov %s2984_s26 }
 0x19a   :  { %14 = sbr.rel (!%p12_p12) target bundleno = 4 (0x4), region = 140 }

// kernel: scale_up_forward.3
= control target key start
LH: loop header
LB: loop body
LE: loop exit
PB: predicated region body
PF: predicated region fallthrough
CT: control target
= control target key end

     0   :  { %s2686_s18 = smov 0   ;;  %s2688_s19 = smov 0   ;;  %s3280_s0 = inlined_call_operand.vmem [shape: f32[512,4], index: 0, kind: input, shape index: {}]   ;;  %s3281_s1 = inlined_call_operand.vmem [shape: bf16[4,512], index: 1, kind: input, shape index: {}]   ;;  %s3282_s2 = inlined_call_operand.vmem [shape: f32[1,512], index: 2, kind: input, shape index: {}]   ;;  %s3283_s3 = inlined_call_operand.vmem [shape: bf16[4,512,128], index: 3, kind: output, shape index: {0}]   ;;  %s3284_s4 = inlined_call_operand.vmem [shape: f32[2,8,128], index: 4, kind: output, shape index: {1}]   ;;  %s3285_s5 = inlined_call_operand.vmem [shape: f32[2,8,128], index: 5, kind: output, shape index: {2}]  }
   0x1   :  { %s2690_s20 = smov 0  }
   0x2 LB: > { %s2699_s21 = sadd.s32 4294967295, %s2654_s20   ;;  %s2701_s22 = sadd.s32 1, %s2654_s20   ;;  %s2654_s20 = sphi %s2690_s20, %s3289_s20   ;;  %s2650_s19 = sphi %s2688_s19, %s3288_s19   ;;  %s2646_s18 = sphi %s2686_s18, %s3287_s18  }
   0x3   : > { %s88_s23 = ssub.s32 %s2654_s20, %s2701_s22  ;;  %s91_s24 = sadd.s32 1, %s2650_s19 }
   0x4   : > { %p89_p0 = scmp.eq.s32.totalorder %s88_s23, 0  ;;  %p101_p1 = scmp.ne.s32.totalorder %s2650_s19, %s2646_s18 }
   0x5   : > { %p102_p2 = scmp.eq.s32.totalorder %s2699_s21, 1  ;;  %p2053_p3 = scmp.ge.s32.totalorder %s2654_s20, 1 }
   0x6   : > { %s2709_s25 = scalar_select %p89_p0, %s2650_s19, %s91_s24  }
   0x7   : > { %p2711_p4 = por %p102_p2, %p101_p1  ;;  %p193_p5 = scmp.lt.s32.totalorder %s2654_s20, 3 }
   0x9   : > { %p194_p6 = pnand %p2053_p3, %p193_p5 }
   0xa   : > { %s2055_s29 = sshll.u32 (!%p194_p6), %s2699_s21, 5  ;;  %s213_s11 = sand.u32 (!%p194_p6), 1, %s2646_s18  }
   0xb   : > { %197 = sbr.rel (%p194_p6) target bundleno = 469 (0x1d5), region = 32  ;;  %p229_p7 = scmp.lt.s32.totalorder (!%p194_p6), %s2055_s29, 63 }
   0xc   : > { %s2054_s12 = sshll.u32 (!%p194_p6), %s213_s11, 9  ;;  %p235_p8 = scmp.lt.s32.totalorder (!%p194_p6), %s2699_s21, 1 }
   0xd   : > { %s2802_s13 = scalar_lea.vmem (!%p194_p6), [#allocation2], %s2054_s12 }
  0x10   : > { %v292_v0 = vld [vmem:[%s3281_s1] sm:$0xff]  ;;  %s3291_s29 = smov (!%p229_p7, %s2055_s29), 63  ;;  %vm358_vm0 = vcmask 1041408   ;;  %vm309_vm1 = vcmask 31744   ;;  %s2224_s27 = sshll.u32 (%p2711_p4), %s2699_s21, 7 }
  0x11   : > { %304 = vst [vmem:[#allocation1] ss:$4 sm:$0xff] %v292_v0  ;;  %s2056_s30 = sshll.u32 %s3291_s29, 3  ;;  %v293_v33 = vld [vmem:[%s3282_s2] sm:$0xf] }
  0x12   : > { %s2722_s8 = scalar_lea.vmem %s3280_s0, %s2056_s30  ;;  %v2781_v36 = vperm.slane %v293_v33, 0  ;;  %v2783_v37 = vperm.slane %v293_v33, 1  ;;  %v2790_v46 = vperm.slane %v293_v33, 2  ;;  %v2794_v48 = vperm.slane %v293_v33, 3  ;;  %s3142_s30 = scalar_lea.vmem (%p2711_p4), %s3283_s3, %s2224_s27 }
  0x13   : > { %v244_v1 = vld [vmem:[%s2722_s8] sm:$0xff]  ;;  %v245_v2 = vld [vmem:[%s2722_s8 + $0x8] sm:$0xff]  ;;  %v246_v12 = vld [vmem:[%s2722_s8 + $0x10] sm:$0xff]  ;;  %s236_s14 = scalar_select %p235_p8, %s2699_s21, 1 }
  0x14   : > { %v276_v8 = vpack.c.bf16 %v245_v2, %v244_v1  ;;  %v247_v13 = vld [vmem:[%s2722_s8 + $0x18] sm:$0xff]  ;;  %v248_v15 = vld [vmem:[%s2722_s8 + $0x20] sm:$0xff]  ;;  %v249_v16 = vld [vmem:[%s2722_s8 + $0x28] sm:$0xff] }
  0x15   : > { %v277_v14 = vpack.c.bf16 %v247_v13, %v246_v12  ;;  %v278_v17 = vpack.c.bf16 %v249_v16, %v248_v15  ;;  %v250_v18 = vld [vmem:[%s2722_s8 + $0x30] sm:$0xff]  ;;  %v251_v19 = vld [vmem:[%s2722_s8 + $0x38] sm:$0xff]  ;;  %v252_v21 = vld [vmem:[%s2722_s8 + $0x40] sm:$0xff]  ;;  %s2057_s15 = sshll.u32 %s236_s14, 3 }
  0x16   : > { %v279_v20 = vpack.c.bf16 %v251_v19, %v250_v18  ;;  %v253_v22 = vld [vmem:[%s2722_s8 + $0x48] sm:$0xff]  ;;  %v254_v24 = vld [vmem:[%s2722_s8 + $0x50] sm:$0xff]  ;;  %v255_v25 = vld [vmem:[%s2722_s8 + $0x58] sm:$0xff]  ;;  %s238_s18 = scalar_lea.vmem %s3284_s4, %s2057_s15  ;;  %s242_s24 = scalar_lea.vmem %s3285_s5, %s2057_s15 }
  0x17   : > { %v280_v23 = vpack.c.bf16 %v253_v22, %v252_v21  ;;  %v281_v26 = vpack.c.bf16 %v255_v25, %v254_v24  ;;  %v256_v27 = vld [vmem:[%s2722_s8 + $0x60] sm:$0xff]  ;;  %v257_v28 = vld [vmem:[%s2722_s8 + $0x68] sm:$0xff]  ;;  %v258_v30 = vld [vmem:[%s2722_s8 + $0x70] sm:$0xff] }
  0x18   : > { %v305_v3 = vld.sshfl [vmem:[#allocation1] sm:$0xff pattern:$0x73625140]  ;;  %v306_v4 = vld.sshfl [vmem:[#allocation1 + $0x8] sm:$0xff pattern:$0x73625140]  ;;  %v282_v29 = vpack.c.bf16 %v257_v28, %v256_v27 }
  0x19   : > { %v359_v5 = vsel %vm358_vm0, %v305_v3, 0  ;;  %v361_v6 = vsel %vm358_vm0, %v306_v4, 0  ;;  %v307_v7 = vld.sshfl [vmem:[#allocation1 + $0x10] sm:$0xff pattern:$0x73625140]  ;;  %v259_v31 = vld [vmem:[%s2722_s8 + $0x78] sm:$0xff] }
  0x1a   : > { %374 = vmatpush.bf16.msra.mxu0 %v359_v5  ;;  %463 = vmatpush.bf16.msra.mxu1 %v361_v6  ;;  %v363_v9 = vsel %vm358_vm0, %v307_v7, 0  ;;  %v308_v10 = vld.sshfl [vmem:[#allocation1 + $0x18] sm:$0xff pattern:$0x73625140]  ;;  %v283_v32 = vpack.c.bf16 %v259_v31, %v258_v30  ;;  %v260_v34 = vld [vmem:[%s2722_s8 + $0x80] sm:$0xff]  ;;  %v261_v35 = vld [vmem:[%s2722_s8 + $0x88] sm:$0xff] }
  0x1b   : > { %552 = vmatpush.bf16.msra.mxu2 %v363_v9  ;;  %v365_v11 = vsel %vm358_vm0, %v308_v10, 0  ;;  %v284_v38 = vpack.c.bf16 %v261_v35, %v260_v34  ;;  %v262_v2 = vld [vmem:[%s2722_s8 + $0x90] sm:$0xff]  ;;  %v263_v3 = vld [vmem:[%s2722_s8 + $0x98] sm:$0xff] }
  0x1c   : > { %641 = vmatpush.bf16.msra.mxu3 %v365_v11 }
  0x1d   : > { %2059 = vmatmul.msk.bf16.vlgmr.msra.gmra.mxu0 %vm309_vm1, %v276_v8  ;;  %2075 = vmatmul.msk.bf16.vlgmr.msra.gmra.mxu1 %vm309_vm1, %v276_v8 }
  0x1e   : > { %2091 = vmatmul.msk.bf16.vlgmr.msra.gmra.mxu2 %vm309_vm1, %v276_v8 }
  0x1f   : > { %2107 = vmatmul.msk.bf16.vlgmr.msra.gmra.mxu3 %vm309_vm1, %v276_v8  ;;  %v285_v8 = vpack.c.bf16 %v263_v3, %v262_v2 }
  0x2d   : > { %2060 = vmatmul.msk.bf16.gmra.mxu0 %vm309_vm1, %v277_v14  ;;  %2076 = vmatmul.msk.bf16.gmra.mxu1 %vm309_vm1, %v277_v14 }
  0x2e   : > { %2092 = vmatmul.msk.bf16.gmra.mxu2 %vm309_vm1, %v277_v14 }
  0x2f   : > { %2108 = vmatmul.msk.bf16.gmra.mxu3 %vm309_vm1, %v277_v14 }
  0x3d   : > { %2061 = vmatmul.msk.bf16.gmra.mxu0 %vm309_vm1, %v278_v17  ;;  %2077 = vmatmul.msk.bf16.gmra.mxu1 %vm309_vm1, %v278_v17 }
  0x3e   : > { %2093 = vmatmul.msk.bf16.gmra.mxu2 %vm309_vm1, %v278_v17 }
  0x3f   : > { %2109 = vmatmul.msk.bf16.gmra.mxu3 %vm309_vm1, %v278_v17 }
  0x4d   : > { %2062 = vmatmul.msk.bf16.gmra.mxu0 %vm309_vm1, %v279_v20  ;;  %2078 = vmatmul.msk.bf16.gmra.mxu1 %vm309_vm1, %v279_v20 }
  0x4e   : > { %2094 = vmatmul.msk.bf16.gmra.mxu2 %vm309_vm1, %v279_v20 }
  0x4f   : > { %2110 = vmatmul.msk.bf16.gmra.mxu3 %vm309_vm1, %v279_v20 }
  0x5d   : > { %2063 = vmatmul.msk.bf16.gmra.mxu0 %vm309_vm1, %v280_v23  ;;  %2079 = vmatmul.msk.bf16.gmra.mxu1 %vm309_vm1, %v280_v23 }
  0x5e   : > { %2095 = vmatmul.msk.bf16.gmra.mxu2 %vm309_vm1, %v280_v23 }
  0x5f   : > { %2111 = vmatmul.msk.bf16.gmra.mxu3 %vm309_vm1, %v280_v23 }
  0x6d   : > { %2064 = vmatmul.msk.bf16.gmra.mxu0 %vm309_vm1, %v281_v26  ;;  %2080 = vmatmul.msk.bf16.gmra.mxu1 %vm309_vm1, %v281_v26 }
  0x6e   : > { %2096 = vmatmul.msk.bf16.gmra.mxu2 %vm309_vm1, %v281_v26 }
  0x6f   : > { %2112 = vmatmul.msk.bf16.gmra.mxu3 %vm309_vm1, %v281_v26 }
  0x7d   : > { %2065 = vmatmul.msk.bf16.gmra.mxu0 %vm309_vm1, %v282_v29  ;;  %2081 = vmatmul.msk.bf16.gmra.mxu1 %vm309_vm1, %v282_v29 }
  0x7e   : > { %2097 = vmatmul.msk.bf16.gmra.mxu2 %vm309_vm1, %v282_v29 }
  0x7f   : > { %2113 = vmatmul.msk.bf16.gmra.mxu3 %vm309_vm1, %v282_v29 }
  0x8d   : > { %2066 = vmatmul.msk.bf16.gmra.mxu0 %vm309_vm1, %v283_v32  ;;  %2082 = vmatmul.msk.bf16.gmra.mxu1 %vm309_vm1, %v283_v32 }
  0x8e   : > { %2098 = vmatmul.msk.bf16.gmra.mxu2 %vm309_vm1, %v283_v32 }
  0x8f   : > { %2114 = vmatmul.msk.bf16.gmra.mxu3 %vm309_vm1, %v283_v32 }
  0x9a   : > { %v376_v39 = vpop.f32.mrf.mxu0  ;;  %v465_v40 = vpop.f32.mrf.mxu1 }
  0x9b   : > { %v377_v41 = vadd.f32 %v376_v39, %v2781_v36  ;;  %v466_v42 = vadd.f32 %v465_v40, %v2783_v37 }
  0x9d   : > { %v856_v43 = vmul.f32 %v377_v41, %v377_v41  ;;  %v723_v44 = vadd.f32 %v466_v42, %v377_v41  ;;  %v888_v45 = vmul.f32 %v466_v42, %v466_v42  ;;  %2067 = vmatmul.msk.bf16.gmra.mxu0 %vm309_vm1, %v284_v38  ;;  %2083 = vmatmul.msk.bf16.gmra.mxu1 %vm309_vm1, %v284_v38 }
  0x9e   : > { %2099 = vmatmul.msk.bf16.gmra.mxu2 %vm309_vm1, %v284_v38 }
  0x9f   : > { %v920_v47 = vadd.f32 %v888_v45, %v856_v43  ;;  %2115 = vmatmul.msk.bf16.gmra.mxu3 %vm309_vm1, %v284_v38 }
  0xa1   : > { %v554_v49 = vpop.f32.mrf.mxu2 }
  0xa2   : > { %v555_v50 = vadd.f32 %v554_v49, %v2790_v46  ;;  %v643_v51 = vpop.f32.mrf.mxu3  ;;  %v378_v52 = vpop.f32.mrf.mxu0 }
  0xa3   : > { %v644_v53 = vadd.f32 %v643_v51, %v2794_v48  ;;  %v379_v54 = vadd.f32 %v378_v52, %v2781_v36  ;;  %v467_v55 = vpop.f32.mrf.mxu1  ;;  %v264_v51 = vld [vmem:[%s2722_s8 + $0xa0] sm:$0xff]  ;;  %v265_v52 = vld [vmem:[%s2722_s8 + $0xa8] sm:$0xff] }
  0xa4   : > { %v755_v56 = vadd.f32 %v723_v44, %v555_v50  ;;  %v952_v57 = vmul.f32 %v555_v50, %v555_v50  ;;  %v468_v58 = vadd.f32 %v467_v55, %v2783_v37 }
  0xa5   : > { %v1016_v59 = vmul.f32 %v644_v53, %v644_v53  ;;  %v857_v60 = vmul.f32 %v379_v54, %v379_v54  ;;  %v2228_v61 = vpack.c.bf16 %v379_v54, %v377_v41 }
  0xa6   : > { %v984_v62 = vadd.f32 %v952_v57, %v920_v47  ;;  %v787_v63 = vadd.f32 %v755_v56, %v644_v53  ;;  %v724_v0 = vadd.f32 %v468_v58, %v379_v54  ;;  %v889_v1 = vmul.f32 %v468_v58, %v468_v58 }
  0xa7   : > { %2229 = vst [vmem:[%s2802_s13] sm:$0xff] %v2228_v61   ;;  %v2308_v4 = vpack.c.bf16 %v468_v58, %v466_v42  ;;  %v286_v58 = vpack.c.bf16 %v265_v52, %v264_v51 }
  0xa8   : > { %v1048_v5 = vadd.f32 %v1016_v59, %v984_v62  ;;  %v921_v6 = vadd.f32 %v889_v1, %v857_v60 }
  0xa9   : > { %2560 = vst [vmem:[%s2802_s13 + $0x80] sm:$0xff] %v2308_v4   ;;  %v556_v7 = vpop.f32.mrf.mxu2 }
  0xaa   : > { %v557_v9 = vadd.f32 %v556_v7, %v2790_v46  ;;  %v645_v10 = vpop.f32.mrf.mxu3  ;;  %v381_v11 = vpop.f32.mrf.mxu0 }
  0xab   : > { %v646_v12 = vadd.f32 %v645_v10, %v2794_v48  ;;  %v382_v13 = vadd.f32 %v381_v11, %v2781_v36  ;;  %v470_v14 = vpop.f32.mrf.mxu1 }
  0xac   : > { %v756_v15 = vadd.f32 %v724_v0, %v557_v9  ;;  %v953_v16 = vmul.f32 %v557_v9, %v557_v9  ;;  %v2388_v17 = vpack.c.bf16 %v557_v9, %v555_v50  ;;  %v471_v18 = vadd.f32 %v470_v14, %v2783_v37 }
  0xad   : > { %v1017_v19 = vmul.f32 %v646_v12, %v646_v12  ;;  %v2468_v20 = vpack.c.bf16 %v646_v12, %v644_v53  ;;  %v858_v21 = vmul.f32 %v382_v13, %v382_v13  ;;  %2068 = vmatmul.msk.bf16.gmra.mxu0 %vm309_vm1, %v285_v8  ;;  %2084 = vmatmul.msk.bf16.gmra.mxu1 %vm309_vm1, %v285_v8 }
  0xae   : > { %v985_v22 = vadd.f32 %v953_v16, %v921_v6  ;;  %2576 = vst [vmem:[%s2802_s13 + $0x100] sm:$0xff] %v2388_v17   ;;  %v788_v23 = vadd.f32 %v756_v15, %v646_v12  ;;  %v725_v24 = vadd.f32 %v471_v18, %v382_v13  ;;  %v890_v25 = vmul.f32 %v471_v18, %v471_v18 }
  0xaf   : > { %2592 = vst [vmem:[%s2802_s13 + $0x180] sm:$0xff] %v2468_v20   ;;  %2100 = vmatmul.msk.bf16.gmra.mxu2 %vm309_vm1, %v285_v8  ;;  %2116 = vmatmul.msk.bf16.gmra.mxu3 %vm309_vm1, %v285_v8 }
  0xb0   : > { %v819_v26 = vadd.f32 %v788_v23, %v787_v63  ;;  %v1049_v27 = vadd.f32 %v1017_v19, %v985_v22  ;;  %v922_v28 = vadd.f32 %v890_v25, %v858_v21 }
  0xb1   : > { %v559_v29 = vpop.f32.mrf.mxu2 }
  0xb2   : > { %v1080_v30 = vadd.f32 %v1049_v27, %v1048_v5  ;;  %v560_v31 = vadd.f32 %v559_v29, %v2790_v46  ;;  %v648_v32 = vpop.f32.mrf.mxu3  ;;  %v383_v33 = vpop.f32.mrf.mxu0 }
  0xb3   : > { %v649_v34 = vadd.f32 %v648_v32, %v2794_v48  ;;  %v384_v35 = vadd.f32 %v383_v33, %v2781_v36  ;;  %v472_v38 = vpop.f32.mrf.mxu1 }
  0xb4   : > { %v757_v39 = vadd.f32 %v725_v24, %v560_v31  ;;  %v954_v40 = vmul.f32 %v560_v31, %v560_v31  ;;  %v473_v41 = vadd.f32 %v472_v38, %v2783_v37 }
  0xb5   : > { %v1018_v42 = vmul.f32 %v649_v34, %v649_v34  ;;  %v859_v43 = vmul.f32 %v384_v35, %v384_v35  ;;  %v2233_v44 = vpack.c.bf16 %v384_v35, %v382_v13 }
  0xb6   : > { %v986_v45 = vadd.f32 %v954_v40, %v922_v28  ;;  %v789_v47 = vadd.f32 %v757_v39, %v649_v34  ;;  %v726_v49 = vadd.f32 %v473_v41, %v384_v35  ;;  %v891_v50 = vmul.f32 %v473_v41, %v473_v41  ;;  %v267_v35 = vld [vmem:[%s2722_s8 + $0xb8] sm:$0xff] }
  0xb7   : > { %2545 = vst [vmem:[%s2802_s13 + $0x8] sm:$0xff] %v2233_v44   ;;  %v2313_v53 = vpack.c.bf16 %v473_v41, %v471_v18 }
  0xb8   : > { %v820_v54 = vadd.f32 %v819_v26, %v789_v47  ;;  %v1050_v55 = vadd.f32 %v1018_v42, %v986_v45  ;;  %v923_v56 = vadd.f32 %v891_v50, %v859_v43 }
  0xb9   : > { %2561 = vst [vmem:[%s2802_s13 + $0x88] sm:$0xff] %v2313_v53   ;;  %v561_v57 = vpop.f32.mrf.mxu2 }
  0xba   : > { %v1081_v59 = vadd.f32 %v1080_v30, %v1050_v55  ;;  %v562_v60 = vadd.f32 %v561_v57, %v2790_v46  ;;  %v650_v61 = vpop.f32.mrf.mxu3  ;;  %v386_v62 = vpop.f32.mrf.mxu0 }
  0xbb   : > { %v651_v63 = vadd.f32 %v650_v61, %v2794_v48  ;;  %v387_v0 = vadd.f32 %v386_v62, %v2781_v36  ;;  %v475_v1 = vpop.f32.mrf.mxu1 }
  0xbc   : > { %v758_v2 = vadd.f32 %v726_v49, %v562_v60  ;;  %v955_v3 = vmul.f32 %v562_v60, %v562_v60  ;;  %v2393_v4 = vpack.c.bf16 %v562_v60, %v560_v31  ;;  %v476_v5 = vadd.f32 %v475_v1, %v2783_v37 }
  0xbd   : > { %v1019_v6 = vmul.f32 %v651_v63, %v651_v63  ;;  %v2473_v7 = vpack.c.bf16 %v651_v63, %v649_v34  ;;  %v860_v8 = vmul.f32 %v387_v0, %v387_v0  ;;  %2069 = vmatmul.msk.bf16.gmra.mxu0 %vm309_vm1, %v286_v58  ;;  %2085 = vmatmul.msk.bf16.gmra.mxu1 %vm309_vm1, %v286_v58  ;;  %v266_v34 = vld [vmem:[%s2722_s8 + $0xb0] sm:$0xff] }
  0xbe   : > { %v987_v9 = vadd.f32 %v955_v3, %v923_v56  ;;  %2577 = vst [vmem:[%s2802_s13 + $0x108] sm:$0xff] %v2393_v4   ;;  %v790_v10 = vadd.f32 %v758_v2, %v651_v63  ;;  %v727_v11 = vadd.f32 %v476_v5, %v387_v0  ;;  %v892_v12 = vmul.f32 %v476_v5, %v476_v5 }
  0xbf   : > { %2593 = vst [vmem:[%s2802_s13 + $0x188] sm:$0xff] %v2473_v7   ;;  %2101 = vmatmul.msk.bf16.gmra.mxu2 %vm309_vm1, %v286_v58  ;;  %2117 = vmatmul.msk.bf16.gmra.mxu3 %vm309_vm1, %v286_v58  ;;  %v287_v43 = vpack.c.bf16 %v267_v35, %v266_v34 }
  0xc0   : > { %v821_v13 = vadd.f32 %v820_v54, %v790_v10  ;;  %v1051_v14 = vadd.f32 %v1019_v6, %v987_v9  ;;  %v924_v15 = vadd.f32 %v892_v12, %v860_v8 }
  0xc1   : > { %v564_v16 = vpop.f32.mrf.mxu2 }
  0xc2   : > { %v1082_v17 = vadd.f32 %v1081_v59, %v1051_v14  ;;  %v565_v18 = vadd.f32 %v564_v16, %v2790_v46  ;;  %v653_v19 = vpop.f32.mrf.mxu3  ;;  %v388_v20 = vpop.f32.mrf.mxu0 }
  0xc3   : > { %v654_v21 = vadd.f32 %v653_v19, %v2794_v48  ;;  %v389_v22 = vadd.f32 %v388_v20, %v2781_v36  ;;  %v477_v23 = vpop.f32.mrf.mxu1 }
  0xc4   : > { %v759_v24 = vadd.f32 %v727_v11, %v565_v18  ;;  %v956_v25 = vmul.f32 %v565_v18, %v565_v18  ;;  %v478_v26 = vadd.f32 %v477_v23, %v2783_v37 }
  0xc5   : > { %v1020_v27 = vmul.f32 %v654_v21, %v654_v21  ;;  %v861_v28 = vmul.f32 %v389_v22, %v389_v22  ;;  %v2238_v29 = vpack.c.bf16 %v389_v22, %v387_v0 }
  0xc6   : > { %v988_v30 = vadd.f32 %v956_v25, %v924_v15  ;;  %v791_v31 = vadd.f32 %v759_v24, %v654_v21  ;;  %v728_v32 = vadd.f32 %v478_v26, %v389_v22  ;;  %v893_v33 = vmul.f32 %v478_v26, %v478_v26  ;;  %v269_v22 = vld [vmem:[%s2722_s8 + $0xc8] sm:$0xff] }
  0xc7   : > { %2546 = vst [vmem:[%s2802_s13 + $0x10] sm:$0xff] %v2238_v29   ;;  %v2318_v38 = vpack.c.bf16 %v478_v26, %v476_v5 }
  0xc8   : > { %v822_v39 = vadd.f32 %v821_v13, %v791_v31  ;;  %v1052_v40 = vadd.f32 %v1020_v27, %v988_v30  ;;  %v925_v41 = vadd.f32 %v893_v33, %v861_v28 }
  0xc9   : > { %2562 = vst [vmem:[%s2802_s13 + $0x90] sm:$0xff] %v2318_v38   ;;  %v566_v42 = vpop.f32.mrf.mxu2 }
  0xca   : > { %v1083_v44 = vadd.f32 %v1082_v17, %v1052_v40  ;;  %v567_v45 = vadd.f32 %v566_v42, %v2790_v46  ;;  %v655_v47 = vpop.f32.mrf.mxu3  ;;  %v391_v49 = vpop.f32.mrf.mxu0 }
  0xcb   : > { %v656_v50 = vadd.f32 %v655_v47, %v2794_v48  ;;  %v392_v51 = vadd.f32 %v391_v49, %v2781_v36  ;;  %v480_v52 = vpop.f32.mrf.mxu1 }
  0xcc   : > { %v760_v53 = vadd.f32 %v728_v32, %v567_v45  ;;  %v957_v54 = vmul.f32 %v567_v45, %v567_v45  ;;  %v2398_v55 = vpack.c.bf16 %v567_v45, %v565_v18  ;;  %v481_v56 = vadd.f32 %v480_v52, %v2783_v37 }
  0xcd   : > { %v1021_v57 = vmul.f32 %v656_v50, %v656_v50  ;;  %v2478_v58 = vpack.c.bf16 %v656_v50, %v654_v21  ;;  %v862_v59 = vmul.f32 %v392_v51, %v392_v51  ;;  %2070 = vmatmul.msk.bf16.gmra.mxu0 %vm309_vm1, %v287_v43  ;;  %2086 = vmatmul.msk.bf16.gmra.mxu1 %vm309_vm1, %v287_v43  ;;  %v268_v21 = vld [vmem:[%s2722_s8 + $0xc0] sm:$0xff] }
  0xce   : > { %v989_v60 = vadd.f32 %v957_v54, %v925_v41  ;;  %2578 = vst [vmem:[%s2802_s13 + $0x110] sm:$0xff] %v2398_v55   ;;  %v792_v61 = vadd.f32 %v760_v53, %v656_v50  ;;  %v729_v62 = vadd.f32 %v481_v56, %v392_v51  ;;  %v894_v63 = vmul.f32 %v481_v56, %v481_v56 }
  0xcf   : > { %2594 = vst [vmem:[%s2802_s13 + $0x190] sm:$0xff] %v2478_v58   ;;  %2102 = vmatmul.msk.bf16.gmra.mxu2 %vm309_vm1, %v287_v43  ;;  %2118 = vmatmul.msk.bf16.gmra.mxu3 %vm309_vm1, %v287_v43  ;;  %v288_v28 = vpack.c.bf16 %v269_v22, %v268_v21 }
  0xd0   : > { %v823_v0 = vadd.f32 %v822_v39, %v792_v61  ;;  %v1053_v1 = vadd.f32 %v1021_v57, %v989_v60  ;;  %v926_v2 = vadd.f32 %v894_v63, %v862_v59 }
  0xd1   : > { %v569_v3 = vpop.f32.mrf.mxu2 }
  0xd2   : > { %v1084_v4 = vadd.f32 %v1083_v44, %v1053_v1  ;;  %v570_v5 = vadd.f32 %v569_v3, %v2790_v46  ;;  %v658_v6 = vpop.f32.mrf.mxu3  ;;  %v393_v7 = vpop.f32.mrf.mxu0 }
  0xd3   : > { %v659_v8 = vadd.f32 %v658_v6, %v2794_v48  ;;  %v394_v9 = vadd.f32 %v393_v7, %v2781_v36  ;;  %v482_v10 = vpop.f32.mrf.mxu1 }
  0xd4   : > { %v761_v11 = vadd.f32 %v729_v62, %v570_v5  ;;  %v958_v12 = vmul.f32 %v570_v5, %v570_v5  ;;  %v483_v13 = vadd.f32 %v482_v10, %v2783_v37 }
  0xd5   : > { %v1022_v14 = vmul.f32 %v659_v8, %v659_v8  ;;  %v863_v15 = vmul.f32 %v394_v9, %v394_v9  ;;  %v2243_v16 = vpack.c.bf16 %v394_v9, %v392_v51 }
  0xd6   : > { %v990_v17 = vadd.f32 %v958_v12, %v926_v2  ;;  %v793_v18 = vadd.f32 %v761_v11, %v659_v8  ;;  %v730_v19 = vadd.f32 %v483_v13, %v394_v9  ;;  %v895_v20 = vmul.f32 %v483_v13, %v483_v13  ;;  %v271_v9 = vld [vmem:[%s2722_s8 + $0xd8] sm:$0xff] }
  0xd7   : > { %2547 = vst [vmem:[%s2802_s13 + $0x18] sm:$0xff] %v2243_v16   ;;  %v2323_v23 = vpack.c.bf16 %v483_v13, %v481_v56 }
  0xd8   : > { %v824_v24 = vadd.f32 %v823_v0, %v793_v18  ;;  %v1054_v25 = vadd.f32 %v1022_v14, %v990_v17  ;;  %v927_v26 = vadd.f32 %v895_v20, %v863_v15 }
  0xd9   : > { %2563 = vst [vmem:[%s2802_s13 + $0x98] sm:$0xff] %v2323_v23   ;;  %v571_v27 = vpop.f32.mrf.mxu2 }
  0xda   : > { %v1085_v29 = vadd.f32 %v1084_v4, %v1054_v25  ;;  %v572_v30 = vadd.f32 %v571_v27, %v2790_v46  ;;  %v660_v31 = vpop.f32.mrf.mxu3  ;;  %v396_v32 = vpop.f32.mrf.mxu0 }
  0xdb   : > { %v661_v33 = vadd.f32 %v660_v31, %v2794_v48  ;;  %v397_v34 = vadd.f32 %v396_v32, %v2781_v36  ;;  %v485_v35 = vpop.f32.mrf.mxu1 }
  0xdc   : > { %v762_v38 = vadd.f32 %v730_v19, %v572_v30  ;;  %v959_v39 = vmul.f32 %v572_v30, %v572_v30  ;;  %v2403_v40 = vpack.c.bf16 %v572_v30, %v570_v5  ;;  %v486_v41 = vadd.f32 %v485_v35, %v2783_v37 }
  0xdd   : > { %v1023_v42 = vmul.f32 %v661_v33, %v661_v33  ;;  %v2483_v43 = vpack.c.bf16 %v661_v33, %v659_v8  ;;  %v864_v44 = vmul.f32 %v397_v34, %v397_v34  ;;  %2071 = vmatmul.msk.bf16.gmra.mxu0 %vm309_vm1, %v288_v28  ;;  %2087 = vmatmul.msk.bf16.gmra.mxu1 %vm309_vm1, %v288_v28  ;;  %v270_v8 = vld [vmem:[%s2722_s8 + $0xd0] sm:$0xff] }
  0xde   : > { %v991_v45 = vadd.f32 %v959_v39, %v927_v26  ;;  %2579 = vst [vmem:[%s2802_s13 + $0x118] sm:$0xff] %v2403_v40   ;;  %v794_v47 = vadd.f32 %v762_v38, %v661_v33  ;;  %v731_v49 = vadd.f32 %v486_v41, %v397_v34  ;;  %v896_v50 = vmul.f32 %v486_v41, %v486_v41 }
  0xdf   : > { %2595 = vst [vmem:[%s2802_s13 + $0x198] sm:$0xff] %v2483_v43   ;;  %2103 = vmatmul.msk.bf16.gmra.mxu2 %vm309_vm1, %v288_v28  ;;  %2119 = vmatmul.msk.bf16.gmra.mxu3 %vm309_vm1, %v288_v28  ;;  %v289_v15 = vpack.c.bf16 %v271_v9, %v270_v8 }
  0xe0   : > { %v825_v51 = vadd.f32 %v824_v24, %v794_v47  ;;  %v1055_v52 = vadd.f32 %v1023_v42, %v991_v45  ;;  %v928_v53 = vadd.f32 %v896_v50, %v864_v44 }
  0xe1   : > { %v574_v54 = vpop.f32.mrf.mxu2 }
  0xe2   : > { %v1086_v55 = vadd.f32 %v1085_v29, %v1055_v52  ;;  %v575_v56 = vadd.f32 %v574_v54, %v2790_v46  ;;  %v663_v57 = vpop.f32.mrf.mxu3  ;;  %v398_v58 = vpop.f32.mrf.mxu0 }
  0xe3   : > { %v664_v59 = vadd.f32 %v663_v57, %v2794_v48  ;;  %v399_v60 = vadd.f32 %v398_v58, %v2781_v36  ;;  %v487_v61 = vpop.f32.mrf.mxu1 }
  0xe4   : > { %v763_v62 = vadd.f32 %v731_v49, %v575_v56  ;;  %v960_v63 = vmul.f32 %v575_v56, %v575_v56  ;;  %v488_v0 = vadd.f32 %v487_v61, %v2783_v37 }
  0xe5   : > { %v1024_v1 = vmul.f32 %v664_v59, %v664_v59  ;;  %v865_v2 = vmul.f32 %v399_v60, %v399_v60  ;;  %v2248_v3 = vpack.c.bf16 %v399_v60, %v397_v34 }
  0xe6   : > { %v992_v4 = vadd.f32 %v960_v63, %v928_v53  ;;  %v795_v5 = vadd.f32 %v763_v62, %v664_v59  ;;  %v732_v6 = vadd.f32 %v488_v0, %v399_v60  ;;  %v897_v7 = vmul.f32 %v488_v0, %v488_v0  ;;  %v273_v60 = vld [vmem:[%s2722_s8 + $0xe8] sm:$0xff] }
  0xe7   : > { %2548 = vst [vmem:[%s2802_s13 + $0x20] sm:$0xff] %v2248_v3   ;;  %v2328_v10 = vpack.c.bf16 %v488_v0, %v486_v41 }
  0xe8   : > { %v826_v11 = vadd.f32 %v825_v51, %v795_v5  ;;  %v1056_v12 = vadd.f32 %v1024_v1, %v992_v4  ;;  %v929_v13 = vadd.f32 %v897_v7, %v865_v2 }
  0xe9   : > { %2564 = vst [vmem:[%s2802_s13 + $0xa0] sm:$0xff] %v2328_v10   ;;  %v576_v14 = vpop.f32.mrf.mxu2 }
  0xea   : > { %v1087_v16 = vadd.f32 %v1086_v55, %v1056_v12  ;;  %v577_v17 = vadd.f32 %v576_v14, %v2790_v46  ;;  %v665_v18 = vpop.f32.mrf.mxu3  ;;  %v401_v19 = vpop.f32.mrf.mxu0 }
  0xeb   : > { %v666_v20 = vadd.f32 %v665_v18, %v2794_v48  ;;  %v402_v21 = vadd.f32 %v401_v19, %v2781_v36  ;;  %v490_v22 = vpop.f32.mrf.mxu1 }
  0xec   : > { %v764_v23 = vadd.f32 %v732_v6, %v577_v17  ;;  %v961_v24 = vmul.f32 %v577_v17, %v577_v17  ;;  %v2408_v25 = vpack.c.bf16 %v577_v17, %v575_v56  ;;  %v491_v26 = vadd.f32 %v490_v22, %v2783_v37 }
  0xed   : > { %v1025_v27 = vmul.f32 %v666_v20, %v666_v20  ;;  %v2488_v28 = vpack.c.bf16 %v666_v20, %v664_v59  ;;  %v866_v29 = vmul.f32 %v402_v21, %v402_v21  ;;  %2072 = vmatmul.msk.bf16.gmra.mxu0 %vm309_vm1, %v289_v15  ;;  %2088 = vmatmul.msk.bf16.gmra.mxu1 %vm309_vm1, %v289_v15  ;;  %v272_v59 = vld [vmem:[%s2722_s8 + $0xe0] sm:$0xff] }
  0xee   : > { %v993_v30 = vadd.f32 %v961_v24, %v929_v13  ;;  %2580 = vst [vmem:[%s2802_s13 + $0x120] sm:$0xff] %v2408_v25   ;;  %v796_v31 = vadd.f32 %v764_v23, %v666_v20  ;;  %v733_v32 = vadd.f32 %v491_v26, %v402_v21  ;;  %v898_v33 = vmul.f32 %v491_v26, %v491_v26 }
  0xef   : > { %2596 = vst [vmem:[%s2802_s13 + $0x1a0] sm:$0xff] %v2488_v28   ;;  %2104 = vmatmul.msk.bf16.gmra.mxu2 %vm309_vm1, %v289_v15  ;;  %2120 = vmatmul.msk.bf16.gmra.mxu3 %vm309_vm1, %v289_v15  ;;  %v290_v2 = vpack.c.bf16 %v273_v60, %v272_v59 }
  0xf0   : > { %v827_v34 = vadd.f32 %v826_v11, %v796_v31  ;;  %v1057_v35 = vadd.f32 %v1025_v27, %v993_v30  ;;  %v930_v38 = vadd.f32 %v898_v33, %v866_v29 }
  0xf1   : > { %v579_v39 = vpop.f32.mrf.mxu2 }
  0xf2   : > { %v1088_v40 = vadd.f32 %v1087_v16, %v1057_v35  ;;  %v580_v41 = vadd.f32 %v579_v39, %v2790_v46  ;;  %v668_v42 = vpop.f32.mrf.mxu3  ;;  %v403_v43 = vpop.f32.mrf.mxu0 }
  0xf3   : > { %v669_v44 = vadd.f32 %v668_v42, %v2794_v48  ;;  %v404_v45 = vadd.f32 %v403_v43, %v2781_v36  ;;  %v492_v47 = vpop.f32.mrf.mxu1 }
  0xf4   : > { %v765_v49 = vadd.f32 %v733_v32, %v580_v41  ;;  %v962_v50 = vmul.f32 %v580_v41, %v580_v41  ;;  %v493_v51 = vadd.f32 %v492_v47, %v2783_v37 }
  0xf5   : > { %v1026_v52 = vmul.f32 %v669_v44, %v669_v44  ;;  %v867_v53 = vmul.f32 %v404_v45, %v404_v45  ;;  %v2253_v54 = vpack.c.bf16 %v404_v45, %v402_v21 }
  0xf6   : > { %v994_v55 = vadd.f32 %v962_v50, %v930_v38  ;;  %v797_v56 = vadd.f32 %v765_v49, %v669_v44  ;;  %v734_v57 = vadd.f32 %v493_v51, %v404_v45  ;;  %v899_v58 = vmul.f32 %v493_v51, %v493_v51  ;;  %v275_v45 = vld [vmem:[%s2722_s8 + $0xf8] sm:$0xff] }
  0xf7   : > { %2549 = vst [vmem:[%s2802_s13 + $0x28] sm:$0xff] %v2253_v54   ;;  %v2333_v61 = vpack.c.bf16 %v493_v51, %v491_v26 }
  0xf8   : > { %v828_v62 = vadd.f32 %v827_v34, %v797_v56  ;;  %v1058_v63 = vadd.f32 %v1026_v52, %v994_v55  ;;  %v931_v0 = vadd.f32 %v899_v58, %v867_v53 }
  0xf9   : > { %2565 = vst [vmem:[%s2802_s13 + $0xa8] sm:$0xff] %v2333_v61   ;;  %v581_v1 = vpop.f32.mrf.mxu2 }
  0xfa   : > { %v1089_v3 = vadd.f32 %v1088_v40, %v1058_v63  ;;  %v582_v4 = vadd.f32 %v581_v1, %v2790_v46  ;;  %v670_v5 = vpop.f32.mrf.mxu3  ;;  %v406_v6 = vpop.f32.mrf.mxu0 }
  0xfb   : > { %v671_v7 = vadd.f32 %v670_v5, %v2794_v48  ;;  %v407_v8 = vadd.f32 %v406_v6, %v2781_v36  ;;  %v495_v9 = vpop.f32.mrf.mxu1 }
  0xfc   : > { %v766_v10 = vadd.f32 %v734_v57, %v582_v4  ;;  %v963_v11 = vmul.f32 %v582_v4, %v582_v4  ;;  %v2413_v12 = vpack.c.bf16 %v582_v4, %v580_v41  ;;  %v496_v13 = vadd.f32 %v495_v9, %v2783_v37 }
  0xfd   : > { %v1027_v14 = vmul.f32 %v671_v7, %v671_v7  ;;  %v2493_v15 = vpack.c.bf16 %v671_v7, %v669_v44  ;;  %v868_v16 = vmul.f32 %v407_v8, %v407_v8  ;;  %2073 = vmatmul.msk.bf16.gmra.mxu0 %vm309_vm1, %v290_v2  ;;  %2089 = vmatmul.msk.bf16.gmra.mxu1 %vm309_vm1, %v290_v2  ;;  %v274_v44 = vld [vmem:[%s2722_s8 + $0xf0] sm:$0xff] }
  0xfe   : > { %v995_v17 = vadd.f32 %v963_v11, %v931_v0  ;;  %2581 = vst [vmem:[%s2802_s13 + $0x128] sm:$0xff] %v2413_v12   ;;  %v798_v18 = vadd.f32 %v766_v10, %v671_v7  ;;  %v735_v19 = vadd.f32 %v496_v13, %v407_v8  ;;  %v900_v20 = vmul.f32 %v496_v13, %v496_v13 }
  0xff   : > { %2597 = vst [vmem:[%s2802_s13 + $0x1a8] sm:$0xff] %v2493_v15   ;;  %2105 = vmatmul.msk.bf16.gmra.mxu2 %vm309_vm1, %v290_v2  ;;  %2121 = vmatmul.msk.bf16.gmra.mxu3 %vm309_vm1, %v290_v2  ;;  %v291_v53 = vpack.c.bf16 %v275_v45, %v274_v44 }
 0x100   : > { %v829_v21 = vadd.f32 %v828_v62, %v798_v18  ;;  %v1059_v22 = vadd.f32 %v1027_v14, %v995_v17  ;;  %v932_v23 = vadd.f32 %v900_v20, %v868_v16 }
 0x101   : > { %v584_v24 = vpop.f32.mrf.mxu2 }
 0x102   : > { %v1090_v25 = vadd.f32 %v1089_v3, %v1059_v22  ;;  %v585_v26 = vadd.f32 %v584_v24, %v2790_v46  ;;  %v673_v27 = vpop.f32.mrf.mxu3  ;;  %v408_v28 = vpop.f32.mrf.mxu0 }
 0x103   : > { %v674_v29 = vadd.f32 %v673_v27, %v2794_v48  ;;  %v409_v30 = vadd.f32 %v408_v28, %v2781_v36  ;;  %v497_v31 = vpop.f32.mrf.mxu1 }
 0x104   : > { %v767_v32 = vadd.f32 %v735_v19, %v585_v26  ;;  %v964_v33 = vmul.f32 %v585_v26, %v585_v26  ;;  %v498_v34 = vadd.f32 %v497_v31, %v2783_v37 }
 0x105   : > { %v1028_v35 = vmul.f32 %v674_v29, %v674_v29  ;;  %v869_v38 = vmul.f32 %v409_v30, %v409_v30  ;;  %v2258_v39 = vpack.c.bf16 %v409_v30, %v407_v8 }
 0x106   : > { %v996_v40 = vadd.f32 %v964_v33, %v932_v23  ;;  %v799_v41 = vadd.f32 %v767_v32, %v674_v29  ;;  %v736_v42 = vadd.f32 %v498_v34, %v409_v30  ;;  %v901_v43 = vmul.f32 %v498_v34, %v498_v34 }
 0x107   : > { %2550 = vst [vmem:[%s2802_s13 + $0x30] sm:$0xff] %v2258_v39   ;;  %v2338_v47 = vpack.c.bf16 %v498_v34, %v496_v13 }
 0x108   : > { %v830_v49 = vadd.f32 %v829_v21, %v799_v41  ;;  %v1060_v50 = vadd.f32 %v1028_v35, %v996_v40  ;;  %v933_v51 = vadd.f32 %v901_v43, %v869_v38 }
 0x109   : > { %2566 = vst [vmem:[%s2802_s13 + $0xb0] sm:$0xff] %v2338_v47   ;;  %v586_v52 = vpop.f32.mrf.mxu2 }
 0x10a   : > { %v1091_v54 = vadd.f32 %v1090_v25, %v1060_v50  ;;  %v587_v55 = vadd.f32 %v586_v52, %v2790_v46  ;;  %v675_v56 = vpop.f32.mrf.mxu3  ;;  %v411_v57 = vpop.f32.mrf.mxu0 }
 0x10b   : > { %v676_v58 = vadd.f32 %v675_v56, %v2794_v48  ;;  %v412_v59 = vadd.f32 %v411_v57, %v2781_v36  ;;  %v500_v60 = vpop.f32.mrf.mxu1 }
 0x10c   : > { %v768_v61 = vadd.f32 %v736_v42, %v587_v55  ;;  %v965_v62 = vmul.f32 %v587_v55, %v587_v55  ;;  %v2418_v63 = vpack.c.bf16 %v587_v55, %v585_v26  ;;  %v501_v0 = vadd.f32 %v500_v60, %v2783_v37 }
 0x10d   : > { %v1029_v1 = vmul.f32 %v676_v58, %v676_v58  ;;  %v2498_v2 = vpack.c.bf16 %v676_v58, %v674_v29  ;;  %v870_v3 = vmul.f32 %v412_v59, %v412_v59  ;;  %2074 = vmatmul.msk.bf16.gmra.mxu0 %vm309_vm1, %v291_v53  ;;  %2090 = vmatmul.msk.bf16.gmra.mxu1 %vm309_vm1, %v291_v53 }
 0x10e   : > { %v997_v4 = vadd.f32 %v965_v62, %v933_v51  ;;  %2582 = vst [vmem:[%s2802_s13 + $0x130] sm:$0xff] %v2418_v63   ;;  %v800_v5 = vadd.f32 %v768_v61, %v676_v58  ;;  %v737_v6 = vadd.f32 %v501_v0, %v412_v59  ;;  %v902_v7 = vmul.f32 %v501_v0, %v501_v0 }
 0x10f   : > { %2598 = vst [vmem:[%s2802_s13 + $0x1b0] sm:$0xff] %v2498_v2   ;;  %2106 = vmatmul.msk.bf16.gmra.mxu2 %vm309_vm1, %v291_v53  ;;  %2122 = vmatmul.msk.bf16.gmra.mxu3 %vm309_vm1, %v291_v53 }
 0x110   : > { %v831_v8 = vadd.f32 %v830_v49, %v800_v5  ;;  %v1061_v9 = vadd.f32 %v1029_v1, %v997_v4  ;;  %v934_v10 = vadd.f32 %v902_v7, %v870_v3 }
 0x111   : > { %v589_v11 = vpop.f32.mrf.mxu2 }
 0x112   : > { %v1092_v12 = vadd.f32 %v1091_v54, %v1061_v9  ;;  %v590_v13 = vadd.f32 %v589_v11, %v2790_v46  ;;  %v678_v14 = vpop.f32.mrf.mxu3  ;;  %v413_v15 = vpop.f32.mrf.mxu0 }
 0x113   : > { %v679_v16 = vadd.f32 %v678_v14, %v2794_v48  ;;  %v414_v17 = vadd.f32 %v413_v15, %v2781_v36  ;;  %v502_v18 = vpop.f32.mrf.mxu1 }
 0x114   : > { %v769_v19 = vadd.f32 %v737_v6, %v590_v13  ;;  %v966_v20 = vmul.f32 %v590_v13, %v590_v13  ;;  %v503_v21 = vadd.f32 %v502_v18, %v2783_v37 }
 0x115   : > { %v1030_v22 = vmul.f32 %v679_v16, %v679_v16  ;;  %v871_v23 = vmul.f32 %v414_v17, %v414_v17  ;;  %v2263_v24 = vpack.c.bf16 %v414_v17, %v412_v59 }
 0x116   : > { %v998_v25 = vadd.f32 %v966_v20, %v934_v10  ;;  %v801_v26 = vadd.f32 %v769_v19, %v679_v16  ;;  %v738_v27 = vadd.f32 %v503_v21, %v414_v17  ;;  %v903_v28 = vmul.f32 %v503_v21, %v503_v21 }
 0x117   : > { %2551 = vst [vmem:[%s2802_s13 + $0x38] sm:$0xff] %v2263_v24   ;;  %v2343_v29 = vpack.c.bf16 %v503_v21, %v501_v0 }
 0x118   : > { %v832_v30 = vadd.f32 %v831_v8, %v801_v26  ;;  %v1062_v31 = vadd.f32 %v1030_v22, %v998_v25  ;;  %v935_v32 = vadd.f32 %v903_v28, %v871_v23 }
 0x119   : > { %2567 = vst [vmem:[%s2802_s13 + $0xb8] sm:$0xff] %v2343_v29   ;;  %v591_v33 = vpop.f32.mrf.mxu2 }
 0x11a   : > { %v1093_v34 = vadd.f32 %v1092_v12, %v1062_v31  ;;  %v592_v35 = vadd.f32 %v591_v33, %v2790_v46  ;;  %v680_v38 = vpop.f32.mrf.mxu3  ;;  %v416_v39 = vpop.f32.mrf.mxu0 }
 0x11b   : > { %v681_v40 = vadd.f32 %v680_v38, %v2794_v48  ;;  %v417_v41 = vadd.f32 %v416_v39, %v2781_v36  ;;  %v505_v42 = vpop.f32.mrf.mxu1 }
 0x11c   : > { %v770_v43 = vadd.f32 %v738_v27, %v592_v35  ;;  %v967_v44 = vmul.f32 %v592_v35, %v592_v35  ;;  %v2423_v45 = vpack.c.bf16 %v592_v35, %v590_v13  ;;  %v506_v47 = vadd.f32 %v505_v42, %v2783_v37 }
 0x11d   : > { %v1031_v49 = vmul.f32 %v681_v40, %v681_v40  ;;  %v2503_v50 = vpack.c.bf16 %v681_v40, %v679_v16  ;;  %v872_v51 = vmul.f32 %v417_v41, %v417_v41 }
 0x11e   : > { %v999_v52 = vadd.f32 %v967_v44, %v935_v32  ;;  %2583 = vst [vmem:[%s2802_s13 + $0x138] sm:$0xff] %v2423_v45   ;;  %v802_v53 = vadd.f32 %v770_v43, %v681_v40  ;;  %v739_v54 = vadd.f32 %v506_v47, %v417_v41  ;;  %v904_v55 = vmul.f32 %v506_v47, %v506_v47 }
 0x11f   : > { %2599 = vst [vmem:[%s2802_s13 + $0x1b8] sm:$0xff] %v2503_v50  }
 0x120   : > { %v833_v56 = vadd.f32 %v832_v30, %v802_v53  ;;  %v1063_v57 = vadd.f32 %v1031_v49, %v999_v52  ;;  %v936_v58 = vadd.f32 %v904_v55, %v872_v51 }
 0x121   : > { %v594_v59 = vpop.f32.mrf.mxu2 }
 0x122   : > { %v1094_v60 = vadd.f32 %v1093_v34, %v1063_v57  ;;  %v595_v61 = vadd.f32 %v594_v59, %v2790_v46  ;;  %v683_v62 = vpop.f32.mrf.mxu3  ;;  %v418_v63 = vpop.f32.mrf.mxu0 }
 0x123   : > { %v684_v0 = vadd.f32 %v683_v62, %v2794_v48  ;;  %v419_v1 = vadd.f32 %v418_v63, %v2781_v36  ;;  %v507_v2 = vpop.f32.mrf.mxu1 }
 0x124   : > { %v771_v3 = vadd.f32 %v739_v54, %v595_v61  ;;  %v968_v4 = vmul.f32 %v595_v61, %v595_v61  ;;  %v508_v5 = vadd.f32 %v507_v2, %v2783_v37 }
 0x125   : > { %v1032_v6 = vmul.f32 %v684_v0, %v684_v0  ;;  %v873_v7 = vmul.f32 %v419_v1, %v419_v1  ;;  %v2268_v8 = vpack.c.bf16 %v419_v1, %v417_v41 }
 0x126   : > { %v1000_v9 = vadd.f32 %v968_v4, %v936_v58  ;;  %v803_v10 = vadd.f32 %v771_v3, %v684_v0  ;;  %v740_v11 = vadd.f32 %v508_v5, %v419_v1  ;;  %v905_v12 = vmul.f32 %v508_v5, %v508_v5 }
 0x127   : > { %2552 = vst [vmem:[%s2802_s13 + $0x40] sm:$0xff] %v2268_v8   ;;  %v2348_v13 = vpack.c.bf16 %v508_v5, %v506_v47 }
 0x128   : > { %v834_v14 = vadd.f32 %v833_v56, %v803_v10  ;;  %v1064_v15 = vadd.f32 %v1032_v6, %v1000_v9  ;;  %v937_v16 = vadd.f32 %v905_v12, %v873_v7 }
 0x129   : > { %2568 = vst [vmem:[%s2802_s13 + $0xc0] sm:$0xff] %v2348_v13   ;;  %v596_v17 = vpop.f32.mrf.mxu2 }
 0x12a   : > { %v1095_v18 = vadd.f32 %v1094_v60, %v1064_v15  ;;  %v597_v19 = vadd.f32 %v596_v17, %v2790_v46  ;;  %v685_v20 = vpop.f32.mrf.mxu3  ;;  %v421_v21 = vpop.f32.mrf.mxu0 }
 0x12b   : > { %v686_v22 = vadd.f32 %v685_v20, %v2794_v48  ;;  %v422_v23 = vadd.f32 %v421_v21, %v2781_v36  ;;  %v510_v24 = vpop.f32.mrf.mxu1 }
 0x12c   : > { %v772_v25 = vadd.f32 %v740_v11, %v597_v19  ;;  %v969_v26 = vmul.f32 %v597_v19, %v597_v19  ;;  %v2428_v27 = vpack.c.bf16 %v597_v19, %v595_v61  ;;  %v511_v28 = vadd.f32 %v510_v24, %v2783_v37 }
 0x12d   : > { %v1033_v29 = vmul.f32 %v686_v22, %v686_v22  ;;  %v2508_v30 = vpack.c.bf16 %v686_v22, %v684_v0  ;;  %v874_v31 = vmul.f32 %v422_v23, %v422_v23 }
 0x12e   : > { %v1001_v32 = vadd.f32 %v969_v26, %v937_v16  ;;  %2584 = vst [vmem:[%s2802_s13 + $0x140] sm:$0xff] %v2428_v27   ;;  %v804_v33 = vadd.f32 %v772_v25, %v686_v22  ;;  %v741_v34 = vadd.f32 %v511_v28, %v422_v23  ;;  %v906_v35 = vmul.f32 %v511_v28, %v511_v28 }
 0x12f   : > { %2600 = vst [vmem:[%s2802_s13 + $0x1c0] sm:$0xff] %v2508_v30  }
 0x130   : > { %v835_v38 = vadd.f32 %v834_v14, %v804_v33  ;;  %v1065_v39 = vadd.f32 %v1033_v29, %v1001_v32  ;;  %v938_v40 = vadd.f32 %v906_v35, %v874_v31 }
 0x132   : > { %v1096_v41 = vadd.f32 %v1095_v18, %v1065_v39  ;;  %v599_v42 = vpop.f32.mrf.mxu2  ;;  %v688_v43 = vpop.f32.mrf.mxu3 }
 0x133   : > { %v600_v44 = vadd.f32 %v599_v42, %v2790_v46  ;;  %v689_v45 = vadd.f32 %v688_v43, %v2794_v48  ;;  %v423_v47 = vpop.f32.mrf.mxu0  ;;  %v512_v49 = vpop.f32.mrf.mxu1 }
 0x134   : > { %v424_v50 = vadd.f32 %v423_v47, %v2781_v36  ;;  %v513_v51 = vadd.f32 %v512_v49, %v2783_v37 }
 0x135   : > { %v773_v52 = vadd.f32 %v741_v34, %v600_v44  ;;  %v970_v53 = vmul.f32 %v600_v44, %v600_v44  ;;  %v1034_v54 = vmul.f32 %v689_v45, %v689_v45 }
 0x136   : > { %v875_v55 = vmul.f32 %v424_v50, %v424_v50  ;;  %v2273_v56 = vpack.c.bf16 %v424_v50, %v422_v23  ;;  %v742_v57 = vadd.f32 %v513_v51, %v424_v50  ;;  %v907_v58 = vmul.f32 %v513_v51, %v513_v51 }
 0x137   : > { %v1002_v59 = vadd.f32 %v970_v53, %v938_v40  ;;  %v805_v60 = vadd.f32 %v773_v52, %v689_v45  ;;  %v2353_v61 = vpack.c.bf16 %v513_v51, %v511_v28 }
 0x138   : > { %2553 = vst [vmem:[%s2802_s13 + $0x48] sm:$0xff] %v2273_v56   ;;  %v939_v62 = vadd.f32 %v907_v58, %v875_v55 }
 0x139   : > { %v836_v63 = vadd.f32 %v835_v38, %v805_v60  ;;  %v1066_v0 = vadd.f32 %v1034_v54, %v1002_v59  ;;  %2569 = vst [vmem:[%s2802_s13 + $0xc8] sm:$0xff] %v2353_v61  }
 0x13a   : > { %v601_v1 = vpop.f32.mrf.mxu2  ;;  %v690_v2 = vpop.f32.mrf.mxu3 }
 0x13b   : > { %v1097_v3 = vadd.f32 %v1096_v41, %v1066_v0  ;;  %v602_v4 = vadd.f32 %v601_v1, %v2790_v46  ;;  %v691_v5 = vadd.f32 %v690_v2, %v2794_v48  ;;  %v426_v6 = vpop.f32.mrf.mxu0  ;;  %v515_v7 = vpop.f32.mrf.mxu1 }
 0x13c   : > { %v427_v8 = vadd.f32 %v426_v6, %v2781_v36  ;;  %v516_v9 = vadd.f32 %v515_v7, %v2783_v37 }
 0x13d   : > { %v774_v10 = vadd.f32 %v742_v57, %v602_v4  ;;  %v971_v11 = vmul.f32 %v602_v4, %v602_v4  ;;  %v2433_v12 = vpack.c.bf16 %v602_v4, %v600_v44  ;;  %v1035_v13 = vmul.f32 %v691_v5, %v691_v5 }
 0x13e   : > { %v2513_v14 = vpack.c.bf16 %v691_v5, %v689_v45  ;;  %v876_v17 = vmul.f32 %v427_v8, %v427_v8  ;;  %v908_v18 = vmul.f32 %v516_v9, %v516_v9  ;;  %v743_v21 = vadd.f32 %v516_v9, %v427_v8 }
 0x13f   : > { %v1003_v15 = vadd.f32 %v971_v11, %v939_v62  ;;  %2585 = vst [vmem:[%s2802_s13 + $0x148] sm:$0xff] %v2433_v12   ;;  %v806_v16 = vadd.f32 %v774_v10, %v691_v5 }
 0x140   : > { %2601 = vst [vmem:[%s2802_s13 + $0x1c8] sm:$0xff] %v2513_v14   ;;  %v940_v25 = vadd.f32 %v908_v18, %v876_v17 }
 0x141   : > { %v837_v19 = vadd.f32 %v836_v63, %v806_v16  ;;  %v1067_v20 = vadd.f32 %v1035_v13, %v1003_v15 }
 0x142   : > { %v604_v22 = vpop.f32.mrf.mxu2  ;;  %v693_v23 = vpop.f32.mrf.mxu3 }
 0x143   : > { %v1098_v24 = vadd.f32 %v1097_v3, %v1067_v20  ;;  %v605_v26 = vadd.f32 %v604_v22, %v2790_v46  ;;  %v694_v27 = vadd.f32 %v693_v23, %v2794_v48  ;;  %v428_v28 = vpop.f32.mrf.mxu0  ;;  %v517_v29 = vpop.f32.mrf.mxu1 }
 0x144   : > { %v429_v30 = vadd.f32 %v428_v28, %v2781_v36  ;;  %v518_v31 = vadd.f32 %v517_v29, %v2783_v37 }
 0x145   : > { %v775_v32 = vadd.f32 %v743_v21, %v605_v26  ;;  %v972_v33 = vmul.f32 %v605_v26, %v605_v26  ;;  %v1036_v34 = vmul.f32 %v694_v27, %v694_v27 }
 0x146   : > { %v877_v35 = vmul.f32 %v429_v30, %v429_v30  ;;  %v2278_v38 = vpack.c.bf16 %v429_v30, %v427_v8  ;;  %v744_v39 = vadd.f32 %v518_v31, %v429_v30  ;;  %v909_v40 = vmul.f32 %v518_v31, %v518_v31 }
 0x147   : > { %v1004_v41 = vadd.f32 %v972_v33, %v940_v25  ;;  %v807_v42 = vadd.f32 %v775_v32, %v694_v27  ;;  %v2358_v43 = vpack.c.bf16 %v518_v31, %v516_v9 }
 0x148   : > { %2554 = vst [vmem:[%s2802_s13 + $0x50] sm:$0xff] %v2278_v38   ;;  %v941_v44 = vadd.f32 %v909_v40, %v877_v35 }
 0x149   : > { %v838_v45 = vadd.f32 %v837_v19, %v807_v42  ;;  %v1068_v47 = vadd.f32 %v1036_v34, %v1004_v41  ;;  %2570 = vst [vmem:[%s2802_s13 + $0xd0] sm:$0xff] %v2358_v43  }
 0x14a   : > { %v606_v49 = vpop.f32.mrf.mxu2  ;;  %v695_v50 = vpop.f32.mrf.mxu3 }
 0x14b   : > { %v1099_v51 = vadd.f32 %v1098_v24, %v1068_v47  ;;  %v607_v52 = vadd.f32 %v606_v49, %v2790_v46  ;;  %v696_v53 = vadd.f32 %v695_v50, %v2794_v48  ;;  %v431_v54 = vpop.f32.mrf.mxu0  ;;  %v520_v55 = vpop.f32.mrf.mxu1 }
 0x14c   : > { %v432_v6 = vadd.f32 %v431_v54, %v2781_v36  ;;  %v521_v9 = vadd.f32 %v520_v55, %v2783_v37 }
 0x14d   : > { %v776_v56 = vadd.f32 %v744_v39, %v607_v52  ;;  %v973_v57 = vmul.f32 %v607_v52, %v607_v52  ;;  %v2438_v58 = vpack.c.bf16 %v607_v52, %v605_v26  ;;  %v2518_v59 = vpack.c.bf16 %v696_v53, %v694_v27 }
 0x14e   : > { %v1037_v62 = vmul.f32 %v696_v53, %v696_v53  ;;  %v745_v55 = vadd.f32 %v521_v9, %v432_v6 }
 0x14f   : > { %v1005_v60 = vadd.f32 %v973_v57, %v941_v44  ;;  %2586 = vst [vmem:[%s2802_s13 + $0x150] sm:$0xff] %v2438_v58   ;;  %v808_v61 = vadd.f32 %v776_v56, %v696_v53  ;;  %v878_v44 = vmul.f32 %v432_v6, %v432_v6 }
 0x150   : > { %2602 = vst [vmem:[%s2802_s13 + $0x1d0] sm:$0xff] %v2518_v59  }
 0x151   : > { %v2970_v63 = vadd.f32 %v838_v45, %v808_v61  ;;  %v1069_v0 = vadd.f32 %v1037_v62, %v1005_v60  ;;  %v910_v45 = vmul.f32 %v521_v9, %v521_v9 }
 0x152   : > { %v609_v1 = vpop.f32.mrf.mxu2  ;;  %v698_v2 = vpop.f32.mrf.mxu3 }
 0x153   : > { %v2972_v3 = vadd.f32 %v1099_v51, %v1069_v0  ;;  %v433_v4 = vpop.f32.mrf.mxu0  ;;  %v522_v5 = vpop.f32.mrf.mxu1  ;;  %v610_v14 = vadd.f32 %v609_v1, %v2790_v46  ;;  %v2994_v19 = vadd.f32 %v698_v2, %v2794_v48  ;;  %v942_v57 = vadd.f32 %v910_v45, %v878_v44 }
 0x154   : > { %v2976_v7 = vadd.f32 %v433_v4, %v2781_v36  ;;  %v2979_v8 = vadd.f32 %v522_v5, %v2783_v37 }
 0x155   : > { %v974_v58 = vmul.f32 %v610_v14, %v610_v14  ;;  %v777_v0 = vadd.f32 %v745_v55, %v610_v14  ;;  %v1038_v5 = vmul.f32 %v2994_v19, %v2994_v19 }
 0x156   : > { %v2283_v10 = vpack.c.bf16 %v2976_v7, %v432_v6  ;;  %v2363_v11 = vpack.c.bf16 %v2979_v8, %v521_v9  ;;  %v879_v61 = vmul.f32 %v2976_v7, %v2976_v7  ;;  %v911_v62 = vmul.f32 %v2979_v8, %v2979_v8 }
 0x157   : > { %v1006_v4 = vadd.f32 %v974_v58, %v942_v57 }
 0x158   : > { %2555 = vst [vmem:[%s2802_s13 + $0x58] sm:$0xff] %v2283_v10  }
 0x159   : > { %2571 = vst [vmem:[%s2802_s13 + $0xd8] sm:$0xff] %v2363_v11  }
 0x15a   : > { %v611_v12 = vpop.f32.mrf.mxu2  ;;  %v700_v13 = vpop.f32.mrf.mxu3 }
 0x15b   : > { %v2988_v15 = vadd.f32 %v611_v12, %v2790_v46  ;;  %v2991_v16 = vadd.f32 %v700_v13, %v2794_v48  ;;  %v436_v17 = vpop.f32.mrf.mxu0  ;;  %v525_v18 = vpop.f32.mrf.mxu1 }
 0x15c   : > { %v437_v26 = vadd.f32 %v436_v17, %v2781_v36  ;;  %v526_v29 = vadd.f32 %v525_v18, %v2783_v37 }
 0x15d   : > { %v2443_v20 = vpack.c.bf16 %v2988_v15, %v610_v14  ;;  %v2523_v21 = vpack.c.bf16 %v2991_v16, %v2994_v19  ;;  %v975_v6 = vmul.f32 %v2988_v15, %v2988_v15 }
 0x15e   : > { %v880_v1 = vmul.f32 %v437_v26, %v437_v26  ;;  %v912_v2 = vmul.f32 %v526_v29, %v526_v29  ;;  %v747_v11 = vadd.f32 %v526_v29, %v437_v26 }
 0x15f   : > { %2587 = vst [vmem:[%s2802_s13 + $0x158] sm:$0xff] %v2443_v20   ;;  %v746_v20 = vadd.f32 %v2979_v8, %v2976_v7 }
 0x160   : > { %2603 = vst [vmem:[%s2802_s13 + $0x1d8] sm:$0xff] %v2523_v21   ;;  %v943_v21 = vadd.f32 %v911_v62, %v879_v61 }
 0x162   : > { %v614_v22 = vpop.f32.mrf.mxu2  ;;  %v703_v23 = vpop.f32.mrf.mxu3 }
 0x163   : > { %v438_v24 = vpop.f32.mrf.mxu0  ;;  %v527_v25 = vpop.f32.mrf.mxu1  ;;  %v615_v34 = vadd.f32 %v614_v22, %v2790_v46  ;;  %v3021_v41 = vadd.f32 %v703_v23, %v2794_v48  ;;  %v809_v23 = vadd.f32 %v777_v0, %v2994_v19  ;;  %v1039_v19 = vmul.f32 %v2991_v16, %v2991_v16 }
 0x164   : > { %v3003_v27 = vadd.f32 %v438_v24, %v2781_v36  ;;  %v3006_v28 = vadd.f32 %v527_v25, %v2783_v37  ;;  %v944_v24 = vadd.f32 %v912_v2, %v880_v1 }
 0x165   : > { %v976_v25 = vmul.f32 %v615_v34, %v615_v34 }
 0x166   : > { %v2288_v30 = vpack.c.bf16 %v3003_v27, %v437_v26  ;;  %v2368_v31 = vpack.c.bf16 %v3006_v28, %v526_v29  ;;  %v1070_v29 = vadd.f32 %v1038_v5, %v1006_v4  ;;  %v881_v7 = vmul.f32 %v3003_v27, %v3003_v27 }
 0x167   : > { %v913_v8 = vmul.f32 %v3006_v28, %v3006_v28  ;;  %v748_v45 = vadd.f32 %v3006_v28, %v3003_v27 }
 0x168   : > { %2556 = vst [vmem:[%s2802_s13 + $0x60] sm:$0xff] %v2288_v30   ;;  %v778_v30 = vadd.f32 %v746_v20, %v2988_v15  ;;  %v1040_v15 = vmul.f32 %v3021_v41, %v3021_v41 }
 0x169   : > { %2572 = vst [vmem:[%s2802_s13 + $0xe0] sm:$0xff] %v2368_v31   ;;  %v1007_v31 = vadd.f32 %v975_v6, %v943_v21 }
 0x16a   : > { %v616_v32 = vpop.f32.mrf.mxu2  ;;  %v705_v33 = vpop.f32.mrf.mxu3 }
 0x16b   : > { %v3015_v35 = vadd.f32 %v616_v32, %v2790_v46  ;;  %v3018_v38 = vadd.f32 %v705_v33, %v2794_v48  ;;  %v441_v39 = vpop.f32.mrf.mxu0  ;;  %v530_v40 = vpop.f32.mrf.mxu1  ;;  %v779_v33 = vadd.f32 %v747_v11, %v615_v34  ;;  %v1071_v44 = vadd.f32 %v1039_v19, %v1007_v31 }
 0x16c   : > { %v442_v52 = vadd.f32 %v441_v39, %v2781_v36  ;;  %v531_v56 = vadd.f32 %v530_v40, %v2783_v37  ;;  %v840_v39 = vadd.f32 %v2970_v63, %v809_v23  ;;  %v1008_v40 = vadd.f32 %v976_v25, %v944_v24 }
 0x16d   : > { %v2448_v42 = vpack.c.bf16 %v3015_v35, %v615_v34  ;;  %v2528_v43 = vpack.c.bf16 %v3018_v38, %v3021_v41  ;;  %v977_v34 = vmul.f32 %v3015_v35, %v3015_v35  ;;  %v945_v63 = vadd.f32 %v913_v8, %v881_v7 }
 0x16e   : > { %v749_v55 = vadd.f32 %v531_v56, %v442_v52  ;;  %v1072_v61 = vadd.f32 %v1040_v15, %v1008_v40  ;;  %v780_v27 = vadd.f32 %v748_v45, %v3015_v35 }
 0x16f   : > { %2588 = vst [vmem:[%s2802_s13 + $0x160] sm:$0xff] %v2448_v42   ;;  %v1101_v42 = vadd.f32 %v2972_v3, %v1070_v29  ;;  %v1009_v28 = vadd.f32 %v977_v34, %v945_v63 }
 0x170   : > { %2604 = vst [vmem:[%s2802_s13 + $0x1e0] sm:$0xff] %v2528_v43   ;;  %v810_v43 = vadd.f32 %v778_v30, %v2991_v16 }
 0x172   : > { %v619_v47 = vpop.f32.mrf.mxu2  ;;  %v708_v49 = vpop.f32.mrf.mxu3  ;;  %v841_v0 = vadd.f32 %v840_v39, %v810_v43 }
 0x173   : > { %v443_v50 = vpop.f32.mrf.mxu0  ;;  %v532_v51 = vpop.f32.mrf.mxu1  ;;  %v620_v12 = vadd.f32 %v619_v47, %v2790_v46  ;;  %v3058_v22 = vadd.f32 %v708_v49, %v2794_v48 }
 0x174   : > { %v3030_v53 = vadd.f32 %v443_v50, %v2781_v36  ;;  %v3033_v54 = vadd.f32 %v532_v51, %v2783_v37  ;;  %v811_v50 = vadd.f32 %v779_v33, %v3021_v41  ;;  %v882_v51 = vmul.f32 %v442_v52, %v442_v52 }
 0x175   : > { %v781_v4 = vadd.f32 %v749_v55, %v620_v12  ;;  %v978_v5 = vmul.f32 %v620_v12, %v620_v12  ;;  %v1042_v11 = vmul.f32 %v3058_v22, %v3058_v22 }
 0x176   : > { %v2293_v59 = vpack.c.bf16 %v3030_v53, %v442_v52  ;;  %v2373_v60 = vpack.c.bf16 %v3033_v54, %v531_v56  ;;  %v1102_v52 = vadd.f32 %v1101_v42, %v1071_v44  ;;  %v842_v6 = vadd.f32 %v841_v0, %v811_v50 }
 0x177   : > { %v813_v31 = vadd.f32 %v781_v4, %v3058_v22 }
 0x178   : > { %2557 = vst [vmem:[%s2802_s13 + $0x68] sm:$0xff] %v2293_v59   ;;  %v914_v59 = vmul.f32 %v531_v56, %v531_v56  ;;  %v1041_v56 = vmul.f32 %v3018_v38, %v3018_v38 }
 0x179   : > { %2573 = vst [vmem:[%s2802_s13 + $0xe8] sm:$0xff] %v2373_v60  }
 0x17a   : > { %v621_v9 = vpop.f32.mrf.mxu2  ;;  %v710_v10 = vpop.f32.mrf.mxu3  ;;  %v946_v2 = vadd.f32 %v914_v59, %v882_v51  ;;  %v1073_v35 = vadd.f32 %v1041_v56, %v1009_v28 }
 0x17b   : > { %v3050_v13 = vadd.f32 %v621_v9, %v2790_v46  ;;  %v3053_v14 = vadd.f32 %v710_v10, %v2794_v48  ;;  %v446_v17 = vpop.f32.mrf.mxu0  ;;  %v535_v18 = vpop.f32.mrf.mxu1  ;;  %v1103_v9 = vadd.f32 %v1102_v52, %v1072_v61  ;;  %v812_v10 = vadd.f32 %v780_v27, %v3018_v38 }
 0x17c   : > { %v447_v60 = vadd.f32 %v446_v17, %v2781_v36  ;;  %v536_v41 = vadd.f32 %v535_v18, %v2783_v37  ;;  %v883_v17 = vmul.f32 %v3030_v53, %v3030_v53  ;;  %v915_v18 = vmul.f32 %v3033_v54, %v3033_v54 }
 0x17d   : > { %v2453_v26 = vpack.c.bf16 %v3050_v13, %v620_v12  ;;  %v2533_v32 = vpack.c.bf16 %v3053_v14, %v3058_v22  ;;  %v1010_v30 = vadd.f32 %v978_v5, %v946_v2  ;;  %v979_v7 = vmul.f32 %v3050_v13, %v3050_v13 }
 0x17e   : > { %v884_v20 = vmul.f32 %v447_v60, %v447_v60  ;;  %v916_v12 = vmul.f32 %v536_v41, %v536_v41  ;;  %v843_v40 = vadd.f32 %v842_v6, %v812_v10  ;;  %v751_v34 = vadd.f32 %v536_v41, %v447_v60 }
 0x17f   : > { %2589 = vst [vmem:[%s2802_s13 + $0x168] sm:$0xff] %v2453_v26   ;;  %v1104_v22 = vadd.f32 %v1103_v9, %v1073_v35  ;;  %v947_v43 = vadd.f32 %v915_v18, %v883_v17  ;;  %v1074_v45 = vadd.f32 %v1042_v11, %v1010_v30  ;;  %v1043_v63 = vmul.f32 %v3053_v14, %v3053_v14 }
 0x180   : > { %2605 = vst [vmem:[%s2802_s13 + $0x1e8] sm:$0xff] %v2533_v32   ;;  %v750_v32 = vadd.f32 %v3033_v54, %v3030_v53  ;;  %v948_v44 = vadd.f32 %v916_v12, %v884_v20  ;;  %v844_v54 = vadd.f32 %v843_v40, %v813_v31 }
 0x181   : > { %v1011_v50 = vadd.f32 %v979_v7, %v947_v43 }
 0x182   : > { %v624_v47 = vpop.f32.mrf.mxu2  ;;  %v713_v49 = vpop.f32.mrf.mxu3  ;;  %v782_v15 = vadd.f32 %v750_v32, %v3050_v13 }
 0x183   : > { %v448_v57 = vpop.f32.mrf.mxu0  ;;  %v537_v58 = vpop.f32.mrf.mxu1  ;;  %v625_v24 = vadd.f32 %v624_v47, %v2790_v46  ;;  %v714_v33 = vadd.f32 %v713_v49, %v2794_v48  ;;  %v1075_v6 = vadd.f32 %v1043_v63, %v1011_v50 }
 0x184   : > { %v449_v3 = vadd.f32 %v448_v57, %v2781_v36  ;;  %v538_v16 = vadd.f32 %v537_v58, %v2783_v37  ;;  %v814_v13 = vadd.f32 %v782_v15, %v3053_v14  ;;  %v1105_v14 = vadd.f32 %v1104_v22, %v1074_v45 }
 0x185   : > { %v980_v53 = vmul.f32 %v625_v24, %v625_v24  ;;  %v783_v57 = vadd.f32 %v751_v34, %v625_v24  ;;  %v1044_v28 = vmul.f32 %v714_v33, %v714_v33 }
 0x186   : > { %v2298_v62 = vpack.c.bf16 %v449_v3, %v447_v60  ;;  %v2378_v1 = vpack.c.bf16 %v538_v16, %v536_v41  ;;  %v885_v47 = vmul.f32 %v449_v3, %v449_v3  ;;  %v917_v49 = vmul.f32 %v538_v16, %v538_v16 }
 0x187   : > { %v752_v58 = vadd.f32 %v538_v16, %v449_v3  ;;  %v1012_v27 = vadd.f32 %v980_v53, %v948_v44  ;;  %v815_v9 = vadd.f32 %v783_v57, %v714_v33  ;;  %v845_v11 = vadd.f32 %v844_v54, %v814_v13 }
 0x188   : > { %2558 = vst [vmem:[%s2802_s13 + $0x70] sm:$0xff] %v2298_v62   ;;  %v949_v56 = vadd.f32 %v917_v49, %v885_v47 }
 0x189   : > { %2574 = vst [vmem:[%s2802_s13 + $0xf0] sm:$0xff] %v2378_v1   ;;  %v1076_v17 = vadd.f32 %v1044_v28, %v1012_v27 }
 0x18a   : > { %v626_v21 = vpop.f32.mrf.mxu2  ;;  %v715_v23 = vpop.f32.mrf.mxu3 }
 0x18b   : > { %v627_v25 = vadd.f32 %v626_v21, %v2790_v46  ;;  %v716_v38 = vadd.f32 %v715_v23, %v2794_v48  ;;  %v451_v26 = vpop.f32.mrf.mxu0  ;;  %v540_v29 = vpop.f32.mrf.mxu1 }
 0x18c   : > { %v452_v19 = vadd.f32 %v451_v26, %v2781_v36  ;;  %v541_v39 = vadd.f32 %v540_v29, %v2783_v37  ;;  %v846_v26 = vadd.f32 %v845_v11, %v815_v9  ;;  %v1464_v9 = vld [vmem:[%s2802_s13 + $0x68] sm:$0xff] (%p2711_p4)   ;;  %v1476_v11 = vld [vmem:[%s2802_s13 + $0x80] sm:$0xff] (%p2711_p4)  }
 0x18d   : > { %v2458_v8 = vpack.c.bf16 %v627_v25, %v625_v24  ;;  %v2538_v42 = vpack.c.bf16 %v716_v38, %v714_v33  ;;  %v981_v59 = vmul.f32 %v627_v25, %v627_v25  ;;  %v784_v1 = vadd.f32 %v752_v58, %v627_v25  ;;  %1465 = vst [vmem:[%s3142_s30 + $0x68] sm:$0xff] (%p2711_p4), %v1464_v9  }
 0x18e   : > { %v886_v51 = vmul.f32 %v452_v19, %v452_v19  ;;  %v918_v55 = vmul.f32 %v541_v39, %v541_v39  ;;  %v753_v41 = vadd.f32 %v541_v39, %v452_v19  ;;  %v1045_v23 = vmul.f32 %v716_v38, %v716_v38  ;;  %1477 = vst [vmem:[%s3142_s30 + $0x100] sm:$0xff] (%p2711_p4), %v1476_v11  }
 0x18f   : > { %2590 = vst [vmem:[%s2802_s13 + $0x170] sm:$0xff] %v2458_v8   ;;  %v1013_v10 = vadd.f32 %v981_v59, %v949_v56  ;;  %v816_v21 = vadd.f32 %v784_v1, %v716_v38  ;;  %v1106_v25 = vadd.f32 %v1105_v14, %v1075_v6  ;;  %v1428_v56 = vld [vmem:[%s2802_s13 + $0x20] sm:$0xff] (%p2711_p4)   ;;  %v1432_v1 = vld [vmem:[%s2802_s13 + $0x28] sm:$0xff] (%p2711_p4)  }
 0x190   : > { %2606 = vst [vmem:[%s2802_s13 + $0x1f0] sm:$0xff] %v2538_v42   ;;  %v950_v5 = vadd.f32 %v918_v55, %v886_v51  ;;  %v1444_v14 = vld [vmem:[%s2802_s13 + $0x40] sm:$0xff] (%p2711_p4)  }
 0x191   : > { %v1077_v29 = vadd.f32 %v1045_v23, %v1013_v10  ;;  %v1107_v38 = vadd.f32 %v1106_v25, %v1076_v17  ;;  %1429 = vst [vmem:[%s3142_s30 + $0x20] sm:$0xff] (%p2711_p4), %v1428_v56   ;;  %v1460_v6 = vld [vmem:[%s2802_s13 + $0x60] sm:$0xff] (%p2711_p4)   ;;  %v1468_v10 = vld [vmem:[%s2802_s13 + $0x70] sm:$0xff] (%p2711_p4)   ;;  %v1480_v17 = vld [vmem:[%s2802_s13 + $0x88] sm:$0xff] (%p2711_p4)  }
 0x192   : > { %v629_v60 = vpop.f32.mrf.mxu2  ;;  %v718_v61 = vpop.f32.mrf.mxu3  ;;  %1433 = vst [vmem:[%s3142_s30 + $0x28] sm:$0xff] (%p2711_p4), %v1432_v1   ;;  %v1496_v23 = vld [vmem:[%s2802_s13 + $0xa8] sm:$0xff] (%p2711_p4)   ;;  %v1516_v25 = vld [vmem:[%s2802_s13 + $0xd0] sm:$0xff] (%p2711_p4)  }
 0x193   : > { %v630_v62 = vadd.f32 %v629_v60, %v2790_v46  ;;  %v453_v0 = vpop.f32.mrf.mxu0  ;;  %v542_v52 = vpop.f32.mrf.mxu1  ;;  %v719_v16 = vadd.f32 %v718_v61, %v2794_v48  ;;  %v1108_v22 = vadd.f32 %v1107_v38, %v1077_v29  ;;  %1445 = vst [vmem:[%s3142_s30 + $0x40] sm:$0xff] (%p2711_p4), %v1444_v14   ;;  %v1524_v29 = vld [vmem:[%s2802_s13 + $0xe0] sm:$0xff] (%p2711_p4)   ;;  %v1552_v38 = vld [vmem:[%s2802_s13 + $0x118] sm:$0xff] (%p2711_p4)  }
 0x194   : > { %v454_v2 = vadd.f32 %v453_v0, %v2781_v36  ;;  %v543_v4 = vadd.f32 %v542_v52, %v2783_v37  ;;  %v1420_v0 = vld [vmem:[%s2802_s13 + $0x10] sm:$0xff] (%p2711_p4)   ;;  %v1424_v52 = vld [vmem:[%s2802_s13 + $0x18] sm:$0xff] (%p2711_p4)   ;;  %1461 = vst [vmem:[%s3142_s30 + $0x60] sm:$0xff] (%p2711_p4), %v1460_v6  }
 0x195   : > { %v982_v3 = vmul.f32 %v630_v62, %v630_v62  ;;  %v785_v18 = vadd.f32 %v753_v41, %v630_v62  ;;  %v1046_v24 = vmul.f32 %v719_v16, %v719_v16  ;;  %v1412_v41 = vld [vmem:[%s2802_s13] sm:$0xff] (%p2711_p4)   ;;  %1421 = vst [vmem:[%s3142_s30 + $0x10] sm:$0xff] (%p2711_p4), %v1420_v0  }
 0x196   : > { %v2303_v35 = vpack.c.bf16 %v454_v2, %v452_v19  ;;  %v2383_v20 = vpack.c.bf16 %v543_v4, %v541_v39  ;;  %v887_v36 = vmul.f32 %v454_v2, %v454_v2  ;;  %v919_v37 = vmul.f32 %v543_v4, %v543_v4  ;;  %1413 = vst [vmem:[%s3142_s30] sm:$0xff] (%p2711_p4), %v1412_v41  }
 0x197   : > { %v1014_v12 = vadd.f32 %v982_v3, %v950_v5  ;;  %v817_v32 = vadd.f32 %v785_v18, %v719_v16  ;;  %v754_v33 = vadd.f32 %v543_v4, %v454_v2  ;;  %v847_v19 = vadd.f32 %v846_v26, %v816_v21  ;;  %1425 = vst [vmem:[%s3142_s30 + $0x18] sm:$0xff] (%p2711_p4), %v1424_v52   ;;  %v1436_v2 = vld [vmem:[%s2802_s13 + $0x30] sm:$0xff] (%p2711_p4)   ;;  %v1440_v4 = vld [vmem:[%s2802_s13 + $0x38] sm:$0xff] (%p2711_p4)   ;;  %v1448_v5 = vld [vmem:[%s2802_s13 + $0x48] sm:$0xff] (%p2711_p4)  }
 0x198   : > { %2559 = vst [vmem:[%s2802_s13 + $0x78] sm:$0xff] %v2303_v35   ;;  %v951_v39 = vadd.f32 %v919_v37, %v887_v36  ;;  %v1452_v3 = vld [vmem:[%s2802_s13 + $0x50] sm:$0xff] (%p2711_p4)   ;;  %v1492_v21 = vld [vmem:[%s2802_s13 + $0xa0] sm:$0xff] (%p2711_p4)   ;;  %v1504_v37 = vld [vmem:[%s2802_s13 + $0xb8] sm:$0xff] (%p2711_p4)  }
 0x199   : > { %2575 = vst [vmem:[%s2802_s13 + $0xf8] sm:$0xff] %v2383_v20   ;;  %v1078_v40 = vadd.f32 %v1046_v24, %v1014_v12  ;;  %v848_v44 = vadd.f32 %v847_v19, %v817_v32  ;;  %v1484_v18 = vld [vmem:[%s2802_s13 + $0x90] sm:$0xff] (%p2711_p4)   ;;  %v1488_v20 = vld [vmem:[%s2802_s13 + $0x98] sm:$0xff] (%p2711_p4)   ;;  %v1508_v12 = vld [vmem:[%s2802_s13 + $0xc0] sm:$0xff] (%p2711_p4)  }
 0x19a   : > { %v631_v30 = vpop.f32.mrf.mxu2  ;;  %v720_v31 = vpop.f32.mrf.mxu3  ;;  %1437 = vst [vmem:[%s3142_s30 + $0x30] sm:$0xff] (%p2711_p4), %v1436_v2   ;;  %v1500_v36 = vld [vmem:[%s2802_s13 + $0xb0] sm:$0xff] (%p2711_p4)   ;;  %v1512_v24 = vld [vmem:[%s2802_s13 + $0xc8] sm:$0xff] (%p2711_p4)   ;;  %v1520_v26 = vld [vmem:[%s2802_s13 + $0xd8] sm:$0xff] (%p2711_p4)  }
 0x19b   : > { %v632_v7 = vadd.f32 %v631_v30, %v2790_v46  ;;  %v721_v8 = vadd.f32 %v720_v31, %v2794_v48  ;;  %v1109_v46 = vadd.f32 %v1108_v22, %v1078_v40  ;;  %1441 = vst [vmem:[%s3142_s30 + $0x38] sm:$0xff] (%p2711_p4), %v1440_v4   ;;  %v1528_v30 = vld [vmem:[%s2802_s13 + $0xe8] sm:$0xff] (%p2711_p4)   ;;  %v1532_v31 = vld [vmem:[%s2802_s13 + $0xf0] sm:$0xff] (%p2711_p4)   ;;  %v1556_v19 = vld [vmem:[%s2802_s13 + $0x120] sm:$0xff] (%p2711_p4)  }
 0x19c   : > { %1449 = vst [vmem:[%s3142_s30 + $0x48] sm:$0xff] (%p2711_p4), %v1448_v5   ;;  %v1564_v40 = vld [vmem:[%s2802_s13 + $0x130] sm:$0xff] (%p2711_p4)  }
 0x19d   : > { %v786_v15 = vadd.f32 %v754_v33, %v632_v7  ;;  %v983_v34 = vmul.f32 %v632_v7, %v632_v7  ;;  %v2463_v42 = vpack.c.bf16 %v632_v7, %v630_v62  ;;  %v2543_v43 = vpack.c.bf16 %v721_v8, %v719_v16  ;;  %v1416_v62 = vld [vmem:[%s2802_s13 + $0x8] sm:$0xff] (%p2711_p4)   ;;  %v1456_v16 = vld [vmem:[%s2802_s13 + $0x58] sm:$0xff] (%p2711_p4)   ;;  %1453 = vst [vmem:[%s3142_s30 + $0x50] sm:$0xff] (%p2711_p4), %v1452_v3   ;;  %v1540_v33 = vld [vmem:[%s2802_s13 + $0x100] sm:$0xff] (%p2711_p4)  }
 0x19e   : > { %v1047_v45 = vmul.f32 %v721_v8, %v721_v8  ;;  %1417 = vst [vmem:[%s3142_s30 + $0x8] sm:$0xff] (%p2711_p4), %v1416_v62   ;;  %v1544_v7 = vld [vmem:[%s2802_s13 + $0x108] sm:$0xff] (%p2711_p4)   ;;  %v1580_v22 = vld [vmem:[%s2802_s13 + $0x150] sm:$0xff] (%p2711_p4)  }
 0x19f   : > { %v1015_v53 = vadd.f32 %v983_v34, %v951_v39  ;;  %2591 = vst [vmem:[%s2802_s13 + $0x178] sm:$0xff] %v2463_v42   ;;  %v818_v54 = vadd.f32 %v786_v15, %v721_v8  ;;  %v1472_v35 = vld [vmem:[%s2802_s13 + $0x78] sm:$0xff] (%p2711_p4)   ;;  %v1548_v8 = vld [vmem:[%s2802_s13 + $0x110] sm:$0xff] (%p2711_p4)   ;;  %v1560_v39 = vld [vmem:[%s2802_s13 + $0x128] sm:$0xff] (%p2711_p4)  }
 0x1a0   : > { %2607 = vst [vmem:[%s2802_s13 + $0x1f8] sm:$0xff] %v2543_v43   ;;  %v1536_v32 = vld [vmem:[%s2802_s13 + $0xf8] sm:$0xff] (%p2711_p4)   ;;  %v1572_v34 = vld [vmem:[%s2802_s13 + $0x140] sm:$0xff] (%p2711_p4)   ;;  %v1576_v42 = vld [vmem:[%s2802_s13 + $0x148] sm:$0xff] (%p2711_p4)  }
 0x1a1   : > { %v849_v48 = vadd.f32 %v848_v44, %v818_v54  ;;  %v1079_v47 = vadd.f32 %v1047_v45, %v1015_v53  ;;  %1457 = vst [vmem:[%s3142_s30 + $0x58] sm:$0xff] (%p2711_p4), %v1456_v16   ;;  %v1568_v15 = vld [vmem:[%s2802_s13 + $0x138] sm:$0xff] (%p2711_p4)   ;;  %v1588_v44 = vld [vmem:[%s2802_s13 + $0x160] sm:$0xff] (%p2711_p4)   ;;  %v1592_v53 = vld [vmem:[%s2802_s13 + $0x168] sm:$0xff] (%p2711_p4)  }
 0x1a2   : > { %1469 = vst [vmem:[%s3142_s30 + $0x70] sm:$0xff] (%p2711_p4), %v1468_v10   ;;  %v1584_v43 = vld [vmem:[%s2802_s13 + $0x158] sm:$0xff] (%p2711_p4)   ;;  %v1596_v54 = vld [vmem:[%s2802_s13 + $0x170] sm:$0xff] (%p2711_p4)  }
 0x1a3   : > { %v850_v49 = vrot.slane %v849_v48, 4  ;;  %v1110_v50 = vadd.f32 %v1109_v46, %v1079_v47  ;;  %1473 = vst [vmem:[%s3142_s30 + $0x78] sm:$0xff] (%p2711_p4), %v1472_v35   ;;  %v1604_v46 = vld [vmem:[%s2802_s13 + $0x180] sm:$0xff] (%p2711_p4)   ;;  %v1612_v47 = vld [vmem:[%s2802_s13 + $0x190] sm:$0xff] (%p2711_p4)  }
 0x1a4   : > { %1481 = vst [vmem:[%s3142_s30 + $0x108] sm:$0xff] (%p2711_p4), %v1480_v17  }
 0x1a5   : > { %v851_v63 = vadd.f32 %v850_v49, %v849_v48  ;;  %v1111_v51 = vrot.slane %v1110_v50, 4  ;;  %1485 = vst [vmem:[%s3142_s30 + $0x110] sm:$0xff] (%p2711_p4), %v1484_v18   ;;  %v1608_v48 = vld [vmem:[%s2802_s13 + $0x188] sm:$0xff] (%p2711_p4)   ;;  %v1616_v49 = vld [vmem:[%s2802_s13 + $0x198] sm:$0xff] (%p2711_p4)  }
 0x1a6   : > { %1489 = vst [vmem:[%s3142_s30 + $0x118] sm:$0xff] (%p2711_p4), %v1488_v20   ;;  %v1600_v45 = vld [vmem:[%s2802_s13 + $0x178] sm:$0xff] (%p2711_p4)  }
 0x1a7   : > { %v852_v55 = vrot.slane %v851_v63, 2  ;;  %v1112_v13 = vadd.f32 %v1111_v51, %v1110_v50  ;;  %1493 = vst [vmem:[%s3142_s30 + $0x120] sm:$0xff] (%p2711_p4), %v1492_v21   ;;  %v1620_v50 = vld [vmem:[%s2802_s13 + $0x1a0] sm:$0xff] (%p2711_p4)   ;;  %v1628_v51 = vld [vmem:[%s2802_s13 + $0x1b0] sm:$0xff] (%p2711_p4)  }
 0x1a8   : > { %1497 = vst [vmem:[%s3142_s30 + $0x128] sm:$0xff] (%p2711_p4), %v1496_v23  }
 0x1a9   : > { %v853_v57 = vadd.f32 %v852_v55, %v851_v63  ;;  %v1113_v58 = vrot.slane %v1112_v13, 2  ;;  %1501 = vst [vmem:[%s3142_s30 + $0x130] sm:$0xff] (%p2711_p4), %v1500_v36   ;;  %v1624_v63 = vld [vmem:[%s2802_s13 + $0x1a8] sm:$0xff] (%p2711_p4)   ;;  %v1632_v55 = vld [vmem:[%s2802_s13 + $0x1b8] sm:$0xff] (%p2711_p4)  }
 0x1aa   : > { %1505 = vst [vmem:[%s3142_s30 + $0x138] sm:$0xff] (%p2711_p4), %v1504_v37  }
 0x1ab   : > { %v854_v59 = vrot.slane %v853_v57, 1  ;;  %v1114_v60 = vadd.f32 %v1113_v58, %v1112_v13  ;;  %1509 = vst [vmem:[%s3142_s30 + $0x140] sm:$0xff] (%p2711_p4), %v1508_v12   ;;  %v1636_v13 = vld [vmem:[%s2802_s13 + $0x1c0] sm:$0xff] (%p2711_p4)   ;;  %v1644_v58 = vld [vmem:[%s2802_s13 + $0x1d0] sm:$0xff] (%p2711_p4)  }
 0x1ac   : > { %1513 = vst [vmem:[%s3142_s30 + $0x148] sm:$0xff] (%p2711_p4), %v1512_v24  }
 0x1ad   : > { %v855_v61 = vadd.f32 %v854_v59, %v853_v57  ;;  %v1115_v27 = vrot.slane %v1114_v60, 1  ;;  %1392 = sbr.rel (!%p2711_p4) target bundleno = 469 (0x1d5), region = 36  ;;  %1517 = vst [vmem:[%s3142_s30 + $0x150] sm:$0xff] (%p2711_p4), %v1516_v25   ;;  %v1640_v57 = vld [vmem:[%s2802_s13 + $0x1c8] sm:$0xff] (%p2711_p4)   ;;  %v1648_v59 = vld [vmem:[%s2802_s13 + $0x1d8] sm:$0xff] (%p2711_p4)  }
 0x1ae   : > { %1521 = vst [vmem:[%s3142_s30 + $0x158] sm:$0xff] (%p2711_p4), %v1520_v26  }
 0x1af   : > { %v1116_v28 = vadd.f32 %v1115_v27, %v1114_v60  ;;  %1117 = vst [vmem:[%s238_s18] sm:$0xff] %v855_v61  ;;  %v1652_v60 = vld [vmem:[%s2802_s13 + $0x1e0] sm:$0xff] (%p2711_p4)   ;;  %v1656_v61 = vld [vmem:[%s2802_s13 + $0x1e8] sm:$0xff] (%p2711_p4)   ;;  %v1660_v27 = vld [vmem:[%s2802_s13 + $0x1f0] sm:$0xff] (%p2711_p4)  }
 0x1b0   : > { %1525 = vst [vmem:[%s3142_s30 + $0x160] sm:$0xff] (%p2711_p4), %v1524_v29  }
 0x1b1   : > { %1118 = vst [vmem:[%s242_s24] sm:$0xff] %v1116_v28  ;;  %v1664_v28 = vld [vmem:[%s2802_s13 + $0x1f8] sm:$0xff] (%p2711_p4)  }
 0x1b2   : > { %1529 = vst [vmem:[%s3142_s30 + $0x168] sm:$0xff] %v1528_v30  }
 0x1b3   : > { %1533 = vst [vmem:[%s3142_s30 + $0x170] sm:$0xff] %v1532_v31  }
 0x1b4   : > { %1537 = vst [vmem:[%s3142_s30 + $0x178] sm:$0xff] %v1536_v32  }
 0x1b5   : > { %1541 = vst [vmem:[%s3142_s30 + $0x200] sm:$0xff] %v1540_v33  }
 0x1b6   : > { %1545 = vst [vmem:[%s3142_s30 + $0x208] sm:$0xff] %v1544_v7  }
 0x1b7   : > { %1549 = vst [vmem:[%s3142_s30 + $0x210] sm:$0xff] %v1548_v8  }
 0x1b8   : > { %1553 = vst [vmem:[%s3142_s30 + $0x218] sm:$0xff] %v1552_v38  }
 0x1b9   : > { %1557 = vst [vmem:[%s3142_s30 + $0x220] sm:$0xff] %v1556_v19  }
 0x1ba   : > { %1561 = vst [vmem:[%s3142_s30 + $0x228] sm:$0xff] %v1560_v39  }
 0x1bb   : > { %1565 = vst [vmem:[%s3142_s30 + $0x230] sm:$0xff] %v1564_v40  }
 0x1bc   : > { %1569 = vst [vmem:[%s3142_s30 + $0x238] sm:$0xff] %v1568_v15  }
 0x1bd   : > { %1573 = vst [vmem:[%s3142_s30 + $0x240] sm:$0xff] %v1572_v34  }
 0x1be   : > { %1577 = vst [vmem:[%s3142_s30 + $0x248] sm:$0xff] %v1576_v42  }
 0x1bf   : > { %1581 = vst [vmem:[%s3142_s30 + $0x250] sm:$0xff] %v1580_v22  }
 0x1c0   : > { %1585 = vst [vmem:[%s3142_s30 + $0x258] sm:$0xff] %v1584_v43  }
 0x1c1   : > { %1589 = vst [vmem:[%s3142_s30 + $0x260] sm:$0xff] %v1588_v44  }
 0x1c2   : > { %1593 = vst [vmem:[%s3142_s30 + $0x268] sm:$0xff] %v1592_v53  }
 0x1c3   : > { %1597 = vst [vmem:[%s3142_s30 + $0x270] sm:$0xff] %v1596_v54  }
 0x1c4   : > { %1601 = vst [vmem:[%s3142_s30 + $0x278] sm:$0xff] %v1600_v45  }
 0x1c5   : > { %1605 = vst [vmem:[%s3142_s30 + $0x300] sm:$0xff] %v1604_v46  }
 0x1c6   : > { %1609 = vst [vmem:[%s3142_s30 + $0x308] sm:$0xff] %v1608_v48  }
 0x1c7   : > { %1613 = vst [vmem:[%s3142_s30 + $0x310] sm:$0xff] %v1612_v47  }
 0x1c8   : > { %1617 = vst [vmem:[%s3142_s30 + $0x318] sm:$0xff] %v1616_v49  }
 0x1c9   : > { %1621 = vst [vmem:[%s3142_s30 + $0x320] sm:$0xff] %v1620_v50  }
 0x1ca   : > { %1625 = vst [vmem:[%s3142_s30 + $0x328] sm:$0xff] %v1624_v63  }
 0x1cb   : > { %1629 = vst [vmem:[%s3142_s30 + $0x330] sm:$0xff] %v1628_v51  }
 0x1cc   : > { %1633 = vst [vmem:[%s3142_s30 + $0x338] sm:$0xff] %v1632_v55  }
 0x1cd   : > { %1637 = vst [vmem:[%s3142_s30 + $0x340] sm:$0xff] %v1636_v13  }
 0x1ce   : > { %1641 = vst [vmem:[%s3142_s30 + $0x348] sm:$0xff] %v1640_v57  }
 0x1cf   : > { %1645 = vst [vmem:[%s3142_s30 + $0x350] sm:$0xff] %v1644_v58  }
 0x1d0   : > { %1649 = vst [vmem:[%s3142_s30 + $0x358] sm:$0xff] %v1648_v59  }
 0x1d1   : > { %1653 = vst [vmem:[%s3142_s30 + $0x360] sm:$0xff] %v1652_v60  }
 0x1d2   : > { %1657 = vst [vmem:[%s3142_s30 + $0x368] sm:$0xff] %v1656_v61  }
 0x1d3   : > { %1661 = vst [vmem:[%s3142_s30 + $0x370] sm:$0xff] %v1660_v27  }
 0x1d4   : > { %1665 = vst [vmem:[%s3142_s30 + $0x378] sm:$0xff] %v1664_v28  }
 0x1d5 PF: > { %p13_p9 = scmp.ge.s32.totalorder %s2701_s22, 4   ;;  %s3287_s18 = smov %s2650_s19 }
 0x1d6   : > { %s3288_s19 = smov %s2709_s25  ;;  %s3289_s20 = smov %s2701_s22 }
 0x1d7   :  { %15 = sbr.rel (!%p13_p9) target bundleno = 2 (0x2), region = 130 }

// kernel: scale_up_forward.4
= control target key start
LH: loop header
LB: loop body
LE: loop exit
PB: predicated region body
PF: predicated region fallthrough
CT: control target
= control target key end

     0   :  { %s4347_s30 = smov 0   ;;  %s6311_s0 = inlined_call_operand.vmem [shape: bf16[8,16,16,128], index: 0, kind: input, shape index: {}]   ;;  %s6312_s1 = inlined_call_operand.vmem [shape: f32[1,128], index: 1, kind: input, shape index: {}]   ;;  %s6313_s2 = inlined_call_operand.vmem [shape: f32[1,128], index: 2, kind: input, shape index: {}]   ;;  %s6314_s3 = inlined_call_operand.vmem [shape: bf16[9,128,128], index: 3, kind: input, shape index: {}]   ;;  %s6315_s4 = inlined_call_operand.vmem [shape: f32[1,128], index: 4, kind: input, shape index: {}]   ;;  %s6316_s5 = inlined_call_operand.vmem [shape: f32[256,1], index: 5, kind: input, shape index: {}]   ;;  %s6317_s6 = inlined_call_operand.vmem [shape: f32[256,1], index: 6, kind: input, shape index: {}]   ;;  %s6318_s7 = inlined_call_operand.vmem [shape: bf16[8,16,16,128], index: 7, kind: output, shape index: {0}]   ;;  %s6319_s8 = inlined_call_operand.vmem [shape: f32[8,8,128], index: 8, kind: output, shape index: {1}]   ;;  %s6320_s9 = inlined_call_operand.vmem [shape: f32[8,8,128], index: 9, kind: output, shape index: {2}]  }
   0x1 LB: > { %s3566_s10 = sadd.s32 4294967295, %s4292_s30   ;;  %p3570_p0 = scmp.ge.s32.totalorder %s4292_s30, 1  ;;  %s4292_s30 = sphi %s4347_s30, %s20_s30  }
   0x2   : > { %p292_p1 = scmp.lt.s32.totalorder %s4292_s30, 9 }
   0x4   : > { %p293_p2 = pnand %p3570_p0, %p292_p1 }
   0x6   : > { %296 = sbr.rel (%p293_p2) target bundleno = 806 (0x326), region = 48 }
   0xb   : > { %v1285_v0 = vld [vmem:[%s6317_s6 + $0x10] sm:$0xff]  ;;  %v1283_v1 = vld [vmem:[%s6317_s6] sm:$0xff]  ;;  %p336_p3 = scmp.lt.s32.totalorder %s3566_s10, 7  ;;  %v4294_v3 = vmov 0   ;;  %v4012_v4 = vld [vmem:[%s6314_s3 + $0x78] sm:$0xff]  ;;  %v4295_v5 = vmov 0.0  }
   0xc   : > { %v656_v2 = vld [vmem:[%s6316_s5] sm:$0xff]  ;;  %4279 = vset.pattern.permute.xlu2 %v4294_v3  ;;  %4278 = vset.pattern.permute.xlu1 %v4294_v3  ;;  %587 = vst [vmem:[#allocation2 + $0x8] sm:$0xff] %v4295_v5  ;;  %v4011_v6 = vld [vmem:[%s6314_s3 + $0x70] sm:$0xff]  ;;  %v1286_v7 = vld [vmem:[%s6317_s6 + $0x18] sm:$0xff] }
   0xd   : > { %4277 = vset.pattern.permute.xlu0 %v4294_v3  ;;  %1327 = vperm.xlu2 %4279, %v1285_v0   ;;  %588 = vst [vmem:[#allocation2 + $0x10] sm:$0xff] %v4295_v5  ;;  %s6778_s10 = smov (!%p336_p3, %s3566_s10), 7  ;;  %v1284_v8 = vld [vmem:[%s6317_s6 + $0x8] sm:$0xff]  ;;  %v4396_v14 = vld [vmem:[%s6312_s1] ss:$0 sm:$0xff]  ;;  %v658_v22 = vld [vmem:[%s6316_s5 + $0x10] sm:$0xff] }
   0xe   : > { %1317 = vperm.xlu0 %4277, %v1283_v1   ;;  %690 = vperm.xlu1 %4278, %v656_v2   ;;  %586 = vst [vmem:[#allocation2] sm:$0xff] %v4295_v5  ;;  %s3995_s21 = sshll.u32 %s6778_s10, 7  ;;  %v657_v9 = vld [vmem:[%s6316_s5 + $0x8] sm:$0xff]  ;;  %v4403_v17 = vld [vmem:[%s6313_s2] ss:$0 sm:$0xff]  ;;  %v659_v25 = vld [vmem:[%s6316_s5 + $0x18] sm:$0xff] }
   0xf   : > { %1025 = vmatpush.bf16.msra.mxu0 %v4012_v4  ;;  %4244 = vmatpush.bf16.msra.mxu2 %v4012_v4  ;;  %589 = vst [vmem:[#allocation2 + $0x118] sm:$0xff] %v4295_v5  ;;  %s4378_s24 = scalar_lea.vmem %s6311_s0, %s3995_s21  ;;  %v4010_v10 = vld [vmem:[%s6314_s3 + $0x68] sm:$0xff]  ;;  %v4009_v18 = vld [vmem:[%s6314_s3 + $0x60] sm:$0xff]  ;;  %v4008_v26 = vld [vmem:[%s6314_s3 + $0x58] sm:$0xff]  ;;  %s6140_s23 = scalar_lea.vmem %s6318_s7, %s3995_s21 }
  0x10   : > { %4245 = vmatpush.bf16.msra.mxu3 %v4012_v4  ;;  %4243 = vmatpush.bf16.msra.mxu1 %v4012_v4  ;;  %590 = vst [vmem:[#allocation2 + $0x120] sm:$0xff] %v4295_v5  ;;  %v4070_v11 = vld [vmem:[%s4378_s24] sm:$0xff]   ;;  %v4219_v27 = vld [vmem:[%s4378_s24 + $0x38] sm:$0xff]   ;;  %v4007_v37 = vld [vmem:[%s6314_s3 + $0x50] sm:$0xff]  ;;  %s3575_s21 = sshll.u32 %s6778_s10, 3 }
  0x11   : > { %591 = vst [vmem:[#allocation2 + $0x128] sm:$0xff] %v4295_v5  ;;  %v4071_v12 = vunpack.c.l.bf16 %v4070_v11  ;;  %v4072_v13 = vunpack.c.h.bf16 %v4070_v11  ;;  %v1287_v21 = vld [vmem:[%s6317_s6 + $0x20] sm:$0xff]  ;;  %v4099_v29 = vunpack.c.l.bf16 %v4219_v27  ;;  %v4100_v30 = vunpack.c.h.bf16 %v4219_v27  ;;  %v4223_v32 = vld [vmem:[%s4378_s24 + $0x58] sm:$0xff]   ;;  %v661_v43 = vld [vmem:[%s6316_s5 + $0x28] sm:$0xff]  ;;  %s349_s27 = scalar_lea.vmem %s6319_s8, %s3575_s21  ;;  %s353_s11 = scalar_lea.vmem %s6320_s9, %s3575_s21 }
  0x12   : > { %v4115_v35 = vunpack.c.l.bf16 %v4223_v32  ;;  %v4116_v36 = vunpack.c.h.bf16 %v4223_v32  ;;  %v4215_v38 = vld [vmem:[%s4378_s24 + $0x18] sm:$0xff]   ;;  %v1288_v44 = vld [vmem:[%s6317_s6 + $0x28] sm:$0xff]  ;;  %v660_v49 = vld [vmem:[%s6316_s5 + $0x20] sm:$0xff] }
  0x13   : > { %1026 = vmatpush.bf16.msra.mxu0 %v4011_v6  ;;  %4247 = vmatpush.bf16.msra.mxu2 %v4011_v6  ;;  %v422_v15 = vmul.f32 %v4396_v14, %v4071_v12  ;;  %v423_v16 = vmul.f32 %v4396_v14, %v4072_v13  ;;  %v436_v33 = vmul.f32 %v4396_v14, %v4099_v29  ;;  %v4083_v42 = vunpack.c.l.bf16 %v4215_v38  ;;  %v4006_v50 = vld [vmem:[%s6314_s3 + $0x48] sm:$0xff]  ;;  %v4005_v0 = vld [vmem:[%s6314_s3 + $0x40] sm:$0xff]  ;;  %v1290_v13 = vld [vmem:[%s6317_s6 + $0x38] sm:$0xff] }
  0x14   : > { %4248 = vmatpush.bf16.msra.mxu3 %v4011_v6  ;;  %4246 = vmatpush.bf16.msra.mxu1 %v4011_v6  ;;  %v437_v34 = vmul.f32 %v4396_v14, %v4100_v30  ;;  %v444_v41 = vmul.f32 %v4396_v14, %v4115_v35  ;;  %v445_v45 = vmul.f32 %v4396_v14, %v4116_v36  ;;  %v4084_v46 = vunpack.c.h.bf16 %v4215_v38  ;;  %v4213_v54 = vld [vmem:[%s4378_s24 + $0x8] sm:$0xff]   ;;  %v4020_v6 = vld [vmem:[%s6314_s3 + $0xb8] sm:$0xff] }
  0x15   : > { %1332 = vperm.xlu2 %4279, %v1286_v7   ;;  %v458_v19 = vadd.f32 %v4403_v17, %v422_v15  ;;  %v459_v20 = vadd.f32 %v4403_v17, %v423_v16  ;;  %v472_v39 = vadd.f32 %v4403_v17, %v436_v33  ;;  %v428_v53 = vmul.f32 %v4396_v14, %v4083_v42  ;;  %v4036_v27 = vld [vmem:[%s6314_s3 + $0x138] sm:$0xff]  ;;  %v1292_v42 = vld [vmem:[%s6317_s6 + $0x48] sm:$0xff] }
  0x16   : > { %1322 = vperm.xlu0 %4277, %v1284_v8   ;;  %695 = vperm.xlu1 %4278, %v657_v9   ;;  %v473_v40 = vadd.f32 %v4403_v17, %v437_v34  ;;  %v480_v51 = vadd.f32 %v4403_v17, %v444_v41  ;;  %v481_v52 = vadd.f32 %v4403_v17, %v445_v45  ;;  %v4075_v57 = vunpack.c.l.bf16 %v4213_v54  ;;  %v662_v9 = vld [vmem:[%s6316_s5 + $0x30] sm:$0xff]  ;;  %v4028_v36 = vld [vmem:[%s6314_s3 + $0xf8] sm:$0xff]  ;;  %v4216_v41 = vld [vmem:[%s4378_s24 + $0x20] sm:$0xff]  }
  0x17   : > { %1027 = vmatpush.bf16.msra.mxu0 %v4010_v10  ;;  %4250 = vmatpush.bf16.msra.mxu2 %v4010_v10  ;;  %v522_v23 = vmul.f32 0.01, %v458_v19  ;;  %v523_v24 = vmul.f32 0.01, %v459_v20  ;;  %vm490_vm0 = vcmp.ge.f32.partialorder %v458_v19, 0.0  ;;  %vm491_vm1 = vcmp.ge.f32.partialorder %v459_v20, 0.0 }
  0x18   : > { %4251 = vmatpush.bf16.msra.mxu3 %v4010_v10  ;;  %4249 = vmatpush.bf16.msra.mxu1 %v4010_v10  ;;  %vm504_vm2 = vcmp.ge.f32.partialorder %v472_v39, 0.0  ;;  %vm505_vm3 = vcmp.ge.f32.partialorder %v473_v40, 0.0  ;;  %v536_v47 = vmul.f32 0.01, %v472_v39  ;;  %v537_v48 = vmul.f32 0.01, %v473_v40 }
  0x19   : > { %v4423_v28 = vsel %vm490_vm0, %v458_v19, %v522_v23  ;;  %v4425_v31 = vsel %vm491_vm1, %v459_v20, %v523_v24  ;;  %v429_v56 = vmul.f32 %v4396_v14, %v4084_v46  ;;  %vm512_vm4 = vcmp.ge.f32.partialorder %v480_v51, 0.0  ;;  %v1289_v10 = vld [vmem:[%s6317_s6 + $0x30] sm:$0xff]  ;;  %v4220_v19 = vld [vmem:[%s4378_s24 + $0x40] sm:$0xff]  }
  0x1a   : > { %592 = vst [vmem:[#allocation2 + $0x18] sm:$0xff] %v4423_v28  ;;  %v4456_v55 = vsel %vm504_vm2, %v472_v39, %v536_v47  ;;  %v4460_v58 = vsel %vm505_vm3, %v473_v40, %v537_v48  ;;  %vm513_vm5 = vcmp.ge.f32.partialorder %v481_v52, 0.0  ;;  %v544_v59 = vmul.f32 0.01, %v480_v51  ;;  %v4019_v40 = vld [vmem:[%s6314_s3 + $0xb0] sm:$0xff] }
  0x1b   : > { %1028 = vmatpush.bf16.msra.mxu0 %v4009_v18  ;;  %4253 = vmatpush.bf16.msra.mxu2 %v4009_v18  ;;  %593 = vst [vmem:[#allocation2 + $0x20] sm:$0xff] %v4425_v31  ;;  %v545_v60 = vmul.f32 0.01, %v481_v52  ;;  %v464_v61 = vadd.f32 %v4403_v17, %v428_v53  ;;  %v465_v62 = vadd.f32 %v4403_v17, %v429_v56  ;;  %v4076_v63 = vunpack.c.h.bf16 %v4213_v54  ;;  %v4214_v56 = vld [vmem:[%s4378_s24 + $0x10] sm:$0xff]  }
  0x1c   : > { %4254 = vmatpush.bf16.msra.mxu3 %v4009_v18  ;;  %4252 = vmatpush.bf16.msra.mxu1 %v4009_v18  ;;  %606 = vst [vmem:[#allocation2 + $0x88] sm:$0xff] %v4456_v55  ;;  %v576_v1 = vsel %vm512_vm4, %v480_v51, %v544_v59  ;;  %v424_v2 = vmul.f32 %v4396_v14, %v4075_v57  ;;  %v4104_v23 = vunpack.c.h.bf16 %v4220_v19  ;;  %v4296_v34 = vmov 0.0|0.0   ;;  %v1291_v51 = vld [vmem:[%s6317_s6 + $0x40] sm:$0xff] }
  0x1d   : > { %1337 = vperm.xlu2 %4279, %v1287_v21   ;;  %607 = vst [vmem:[#allocation2 + $0x90] sm:$0xff] %v4460_v58  ;;  %v577_v3 = vsel %vm513_vm5, %v481_v52, %v545_v60  ;;  %vm496_vm6 = vcmp.ge.f32.partialorder %v464_v61, 0.0  ;;  %vm497_vm7 = vcmp.ge.f32.partialorder %v465_v62, 0.0  ;;  %v528_v4 = vmul.f32 0.01, %v464_v61 }
  0x1e   : > { %700 = vperm.xlu0 %4277, %v658_v22   ;;  %705 = vperm.xlu1 %4278, %v659_v25   ;;  %614 = vst [vmem:[#allocation2 + $0xc8] sm:$0xff] %v576_v1  ;;  %v529_v5 = vmul.f32 0.01, %v465_v62  ;;  %v425_v7 = vmul.f32 %v4396_v14, %v4076_v63  ;;  %v460_v8 = vadd.f32 %v4403_v17, %v424_v2  ;;  %v4103_v22 = vunpack.c.l.bf16 %v4220_v19  ;;  %v4027_v63 = vld [vmem:[%s6314_s3 + $0xf0] sm:$0xff] }
  0x1f   : > { %1029 = vmatpush.bf16.msra.mxu0 %v4008_v26  ;;  %4256 = vmatpush.bf16.msra.mxu2 %v4008_v26  ;;  %615 = vst [vmem:[#allocation2 + $0xd0] sm:$0xff] %v577_v3  ;;  %v952_v11 = vpack.c.bf16 %v4460_v58, %v4456_v55  ;;  %v560_v12 = vsel %vm496_vm6, %v464_v61, %v528_v4  ;;  %v4087_v46 = vunpack.c.l.bf16 %v4216_v41  ;;  %v4088_v47 = vunpack.c.h.bf16 %v4216_v41  ;;  %v4003_v4 = vld [vmem:[%s6314_s3 + $0x30] sm:$0xff] }
  0x20   : > { %4257 = vmatpush.bf16.msra.mxu3 %v4008_v26  ;;  %4255 = vmatpush.bf16.msra.mxu1 %v4008_v26  ;;  %v561_v15 = vsel %vm497_vm7, %v465_v62, %v529_v5  ;;  %598 = vst [vmem:[#allocation2 + $0x48] sm:$0xff] %v560_v12  ;;  %v461_v16 = vadd.f32 %v4403_v17, %v425_v7  ;;  %vm492_vm8 = vcmp.ge.f32.partialorder %v460_v8, 0.0  ;;  %v524_v18 = vmul.f32 0.01, %v460_v8  ;;  %v4224_v26 = vld [vmem:[%s4378_s24 + $0x60] sm:$0xff]   ;;  %v4018_v5 = vld [vmem:[%s6314_s3 + $0xa8] sm:$0xff] }
  0x21   : > { %v956_v20 = vpack.c.bf16 %v577_v3, %v576_v1  ;;  %599 = vst [vmem:[#allocation2 + $0x50] sm:$0xff] %v561_v15  ;;  %v948_v21 = vpack.c.bf16 %v561_v15, %v560_v12  ;;  %v438_v29 = vmul.f32 %v4396_v14, %v4103_v22  ;;  %v439_v30 = vmul.f32 %v4396_v14, %v4104_v23  ;;  %v664_v15 = vld [vmem:[%s6316_s5 + $0x40] sm:$0xff] }
  0x22   : > { %vm493_vm9 = vcmp.ge.f32.partialorder %v461_v16, 0.0  ;;  %v525_v24 = vmul.f32 0.01, %v461_v16  ;;  %v4489_v25 = vsel %vm492_vm8, %v460_v8, %v524_v18  ;;  %v4119_v32 = vunpack.c.l.bf16 %v4224_v26 }
  0x23   : > { %1030 = vmatpush.bf16.msra.mxu0 %v4007_v37  ;;  %4259 = vmatpush.bf16.msra.mxu2 %v4007_v37  ;;  %594 = vst [vmem:[#allocation2 + $0x28] sm:$0xff] %v4489_v25  ;;  %v4120_v33 = vunpack.c.h.bf16 %v4224_v26  ;;  %v474_v38 = vadd.f32 %v4403_v17, %v438_v29  ;;  %v475_v39 = vadd.f32 %v4403_v17, %v439_v30  ;;  %v4079_v58 = vunpack.c.l.bf16 %v4214_v56 }
  0x24   : > { %4260 = vmatpush.bf16.msra.mxu3 %v4007_v37  ;;  %4258 = vmatpush.bf16.msra.mxu1 %v4007_v37  ;;  %v4498_v35 = vsel %vm493_vm9, %v461_v16, %v525_v24  ;;  %v4004_v37 = vld [vmem:[%s6314_s3 + $0x38] sm:$0xff]  ;;  %v430_v54 = vmul.f32 %v4396_v14, %v4087_v46  ;;  %v431_v55 = vmul.f32 %v4396_v14, %v4088_v47  ;;  %v4080_v59 = vunpack.c.h.bf16 %v4214_v56  ;;  %v4217_v46 = vld [vmem:[%s4378_s24 + $0x28] sm:$0xff]   ;;  %v4031_v47 = vld [vmem:[%s6314_s3 + $0x110] sm:$0xff] }
  0x25   : > { %715 = vperm.xlu2 %4279, %v661_v43   ;;  %595 = vst [vmem:[#allocation2 + $0x30] sm:$0xff] %v4498_v35  ;;  %v4035_v43 = vld [vmem:[%s6314_s3 + $0x130] sm:$0xff]  ;;  %v447_v45 = vmul.f32 %v4396_v14, %v4120_v33  ;;  %vm506_vm10 = vcmp.ge.f32.partialorder %v474_v38, 0.0  ;;  %vm507_vm11 = vcmp.ge.f32.partialorder %v475_v39, 0.0  ;;  %v538_v48 = vmul.f32 0.01, %v474_v38 }
  0x26   : > { %1342 = vperm.xlu0 %4277, %v1288_v44   ;;  %710 = vperm.xlu1 %4278, %v660_v49   ;;  %v446_v44 = vmul.f32 %v4396_v14, %v4119_v32  ;;  %v539_v49 = vmul.f32 0.01, %v475_v39  ;;  %v466_v1 = vadd.f32 %v4403_v17, %v430_v54  ;;  %v467_v2 = vadd.f32 %v4403_v17, %v431_v55  ;;  %v4225_v32 = vld [vmem:[%s4378_s24 + $0x68] sm:$0xff]   ;;  %v1294_v55 = vld [vmem:[%s6317_s6 + $0x58] sm:$0xff]  ;;  %v666_v56 = vld [vmem:[%s6316_s5 + $0x50] sm:$0xff] }
  0x27   : > { %1031 = vmatpush.bf16.msra.mxu0 %v4006_v50  ;;  %4262 = vmatpush.bf16.msra.mxu2 %v4006_v50  ;;  %v483_v53 = vadd.f32 %v4403_v17, %v447_v45  ;;  %v4532_v57 = vsel %vm506_vm10, %v474_v38, %v538_v48  ;;  %v427_v7 = vmul.f32 %v4396_v14, %v4080_v59  ;;  %v4124_v38 = vunpack.c.h.bf16 %v4225_v32 }
  0x28   : > { %4263 = vmatpush.bf16.msra.mxu3 %v4006_v50  ;;  %4261 = vmatpush.bf16.msra.mxu1 %v4006_v50  ;;  %v663_v50 = vld [vmem:[%s6316_s5 + $0x38] sm:$0xff]  ;;  %v482_v52 = vadd.f32 %v4403_v17, %v446_v44  ;;  %v4535_v60 = vsel %vm507_vm11, %v475_v39, %v539_v49  ;;  %608 = vst [vmem:[#allocation2 + $0x98] sm:$0xff] %v4532_v57  ;;  %vm498_vm14 = vcmp.ge.f32.partialorder %v466_v1, 0.0  ;;  %vm499_vm15 = vcmp.ge.f32.partialorder %v467_v2, 0.0  ;;  %v4026_v39 = vld [vmem:[%s6314_s3 + $0xe8] sm:$0xff] }
  0x29   : > { %vm515_vm13 = vcmp.ge.f32.partialorder %v483_v53, 0.0  ;;  %609 = vst [vmem:[#allocation2 + $0xa0] sm:$0xff] %v4535_v60  ;;  %v547_v62 = vmul.f32 0.01, %v483_v53  ;;  %v4567_v16 = vpack.c.bf16 %v4425_v31, %v4423_v28  ;;  %v953_v18 = vpack.c.bf16 %v4535_v60, %v4532_v57  ;;  %v4221_v28 = vld [vmem:[%s4378_s24 + $0x48] sm:$0xff]  }
  0x2a   : > { %vm514_vm12 = vcmp.ge.f32.partialorder %v482_v52, 0.0  ;;  %v546_v61 = vmul.f32 0.01, %v482_v52  ;;  %v4108_v30 = vunpack.c.h.bf16 %v4221_v28  ;;  %v449_v45 = vmul.f32 %v4396_v14, %v4124_v38 }
  0x2b   : > { %1032 = vmatpush.bf16.msra.mxu0 %v4005_v0  ;;  %4265 = vmatpush.bf16.msra.mxu2 %v4005_v0  ;;  %v579_v8 = vsel %vm515_vm13, %v483_v53, %v547_v62  ;;  %v4091_v49 = vunpack.c.l.bf16 %v4217_v46 }
  0x2c   : > { %4266 = vmatpush.bf16.msra.mxu3 %v4005_v0  ;;  %4264 = vmatpush.bf16.msra.mxu1 %v4005_v0  ;;  %v4034_v0 = vld [vmem:[%s6314_s3 + $0x128] sm:$0xff]  ;;  %v578_v3 = vsel %vm514_vm12, %v482_v52, %v546_v61  ;;  %617 = vst [vmem:[#allocation2 + $0xe0] sm:$0xff] %v579_v8  ;;  %v441_v41 = vmul.f32 %v4396_v14, %v4108_v30 }
  0x2d   : > { %720 = vperm.xlu2 %4279, %v662_v9   ;;  %616 = vst [vmem:[#allocation2 + $0xd8] sm:$0xff] %v578_v3  ;;  %v530_v9 = vmul.f32 0.01, %v466_v1  ;;  %v957_v22 = vpack.c.bf16 %v579_v8, %v578_v3  ;;  %v485_v54 = vadd.f32 %v4403_v17, %v449_v45  ;;  %v4030_v3 = vld [vmem:[%s6314_s3 + $0x108] sm:$0xff] }
  0x2e   : > { %1347 = vperm.xlu0 %4277, %v1289_v10   ;;  %1352 = vperm.xlu1 %4278, %v1290_v13   ;;  %v531_v10 = vmul.f32 0.01, %v467_v2  ;;  %v1293_v13 = vld [vmem:[%s6317_s6 + $0x50] sm:$0xff]  ;;  %v477_v48 = vadd.f32 %v4403_v17, %v441_v41 }
  0x2f   : > { %1588 = vmatpush.bf16.msrb.mxu2 %v4020_v6  ;;  %1033 = vmatmul.bf16.vlgmr.msra.gmra.mxu0 %v4296_v34  ;;  %v426_v6 = vmul.f32 %v4396_v14, %v4079_v58  ;;  %v562_v19 = vsel %vm498_vm14, %v466_v1, %v530_v9  ;;  %v4032_v34 = vld [vmem:[%s6314_s3 + $0x118] sm:$0xff]  ;;  %v432_v58 = vmul.f32 %v4396_v14, %v4091_v49  ;;  %v549_v62 = vmul.f32 0.01, %v485_v54 }
  0x30   : > { %1073 = vmatmul.bf16.vlgmr.msra.gmra.mxu2 %v952_v11  ;;  %1093 = vmatmul.bf16.vlgmr.msra.gmra.mxu3 %v956_v20  ;;  %v4033_v11 = vld [vmem:[%s6314_s3 + $0x120] sm:$0xff]  ;;  %v463_v20 = vadd.f32 %v4403_v17, %v427_v7  ;;  %v563_v23 = vsel %vm499_vm15, %v467_v2, %v531_v10  ;;  %600 = vst [vmem:[#allocation2 + $0x58] sm:$0xff] %v562_v19  ;;  %vm509_vm3 = vcmp.ge.f32.partialorder %v477_v48, 0.0  ;;  %v541_v57 = vmul.f32 0.01, %v477_v48 }
  0x31   : > { %1053 = vmatmul.bf16.vlgmr.msra.gmra.mxu1 %v948_v21  ;;  %1854 = vmatpush.bf16.msrb.mxu3 %v4028_v36  ;;  %v462_v12 = vadd.f32 %v4403_v17, %v426_v6  ;;  %v665_v21 = vld [vmem:[%s6316_s5 + $0x48] sm:$0xff]  ;;  %601 = vst [vmem:[#allocation2 + $0x60] sm:$0xff] %v563_v23  ;;  %v4577_v31 = vpack.c.bf16 %v563_v23, %v562_v19  ;;  %vm517_vm5 = vcmp.ge.f32.partialorder %v485_v54, 0.0  ;;  %v4025_v2 = vld [vmem:[%s6314_s3 + $0xe0] sm:$0xff] }
  0x32   : > { %2088 = vmatpush.bf16.msrb.mxu0 %v4036_v27  ;;  %1162 = vmatpush.bf16.msrb.mxu1 %v4004_v37  ;;  %vm495_vm1 = vcmp.ge.f32.partialorder %v463_v20, 0.0  ;;  %v527_v26 = vmul.f32 0.01, %v463_v20  ;;  %v4107_v27 = vunpack.c.l.bf16 %v4221_v28  ;;  %v4123_v37 = vunpack.c.l.bf16 %v4225_v32  ;;  %v4001_v7 = vld [vmem:[%s6314_s3 + $0x20] sm:$0xff]  ;;  %v4024_v32 = vld [vmem:[%s6314_s3 + $0xd8] sm:$0xff] }
  0x33   : > { %1589 = vmatpush.bf16.msrb.mxu2 %v4019_v40  ;;  %vm494_vm0 = vcmp.ge.f32.partialorder %v462_v12, 0.0  ;;  %v526_v24 = vmul.f32 0.01, %v462_v12  ;;  %v4002_v40 = vld [vmem:[%s6314_s3 + $0x28] sm:$0xff]  ;;  %v4029_v10 = vld [vmem:[%s6314_s3 + $0x100] sm:$0xff] }
  0x34   : > { %v4582_v33 = vsel %vm495_vm1, %v463_v20, %v527_v26  ;;  %v440_v36 = vmul.f32 %v4396_v14, %v4107_v27  ;;  %v448_v44 = vmul.f32 %v4396_v14, %v4123_v37  ;;  %v4226_v26 = vld [vmem:[%s4378_s24 + $0x70] sm:$0xff]  }
  0x35   : > { %1362 = vperm.xlu2 %4279, %v1292_v42   ;;  %1855 = vmatpush.bf16.msrb.mxu3 %v4027_v63  ;;  %v4579_v29 = vsel %vm494_vm0, %v462_v12, %v526_v24  ;;  %597 = vst [vmem:[#allocation2 + $0x40] sm:$0xff] %v4582_v33  ;;  %v573_v63 = vsel %vm509_vm3, %v477_v48, %v541_v57  ;;  %v668_v12 = vld [vmem:[%s6316_s5 + $0x60] sm:$0xff]  ;;  %v4128_v30 = vunpack.c.h.bf16 %v4226_v26  ;;  %v1297_v48 = vld [vmem:[%s6317_s6 + $0x70] sm:$0xff] }
  0x36   : > { %2089 = vmatpush.bf16.msrb.mxu0 %v4035_v43  ;;  %725 = vperm.xlu0 %4277, %v663_v50   ;;  %596 = vst [vmem:[#allocation2 + $0x38] sm:$0xff] %v4579_v29  ;;  %v476_v42 = vadd.f32 %v4403_v17, %v440_v36  ;;  %v4017_v43 = vld [vmem:[%s6314_s3 + $0xa0] sm:$0xff]  ;;  %v4092_v50 = vunpack.c.h.bf16 %v4217_v46  ;;  %v484_v53 = vadd.f32 %v4403_v17, %v448_v44  ;;  %v4000_v36 = vld [vmem:[%s6314_s3 + $0x18] sm:$0xff]  ;;  %v4023_v57 = vld [vmem:[%s6314_s3 + $0xd0] sm:$0xff] }
  0x37   : > { %1357 = vperm.xlu1 %4278, %v1291_v51   ;;  %1163 = vmatpush.bf16.msrb.mxu1 %v4003_v4  ;;  %v667_v51 = vld [vmem:[%s6316_s5 + $0x58] sm:$0xff]  ;;  %611 = vst [vmem:[#allocation2 + $0xb0] sm:$0xff] %v573_v63  ;;  %v581_v4 = vsel %vm517_vm5, %v485_v54, %v549_v62 }
  0x38   : > { %1590 = vmatpush.bf16.msrb.mxu2 %v4018_v5  ;;  %vm508_vm2 = vcmp.ge.f32.partialorder %v476_v42, 0.0  ;;  %v540_v52 = vmul.f32 0.01, %v476_v42  ;;  %v433_v59 = vmul.f32 %v4396_v14, %v4092_v50  ;;  %v548_v61 = vmul.f32 0.01, %v484_v53  ;;  %619 = vst [vmem:[#allocation2 + $0xf0] sm:$0xff] %v581_v4 }
  0x39   : > { %1856 = vmatpush.bf16.msrb.mxu3 %v4026_v39  ;;  %vm516_vm4 = vcmp.ge.f32.partialorder %v484_v53, 0.0  ;;  %v4015_v39 = vld [vmem:[%s6314_s3 + $0x90] sm:$0xff] }
  0x3a   : > { %2090 = vmatpush.bf16.msrb.mxu0 %v4034_v0  ;;  %v572_v60 = vsel %vm508_vm2, %v476_v42, %v540_v52  ;;  %v468_v0 = vadd.f32 %v4403_v17, %v432_v58  ;;  %v580_v1 = vsel %vm516_vm4, %v484_v53, %v548_v61  ;;  %v469_v5 = vadd.f32 %v4403_v17, %v433_v59  ;;  %v1298_v42 = vld [vmem:[%s6317_s6 + $0x78] sm:$0xff] }
  0x3b   : > { %1164 = vmatpush.bf16.msrb.mxu1 %v4002_v40  ;;  %610 = vst [vmem:[#allocation2 + $0xa8] sm:$0xff] %v572_v60  ;;  %v954_v19 = vpack.c.bf16 %v573_v63, %v572_v60  ;;  %v3999_v63 = vld [vmem:[%s6314_s3 + $0x10] sm:$0xff] }
  0x3c   : > { %1591 = vmatpush.bf16.msrb.mxu2 %v4017_v43  ;;  %618 = vst [vmem:[#allocation2 + $0xe8] sm:$0xff] %v580_v1  ;;  %vm500_vm6 = vcmp.ge.f32.partialorder %v468_v0, 0.0  ;;  %v532_v6 = vmul.f32 0.01, %v468_v0  ;;  %vm501_vm7 = vcmp.ge.f32.partialorder %v469_v5, 0.0  ;;  %v451_v43 = vmul.f32 %v4396_v14, %v4128_v30 }
  0x3d   : > { %1367 = vperm.xlu2 %4279, %v1293_v13   ;;  %1857 = vmatpush.bf16.msrb.mxu3 %v4025_v2  ;;  %v533_v8 = vmul.f32 0.01, %v469_v5  ;;  %v1295_v13 = vld [vmem:[%s6317_s6 + $0x60] sm:$0xff]  ;;  %v670_v2 = vld [vmem:[%s6316_s5 + $0x70] sm:$0xff] }
  0x3e   : > { %2091 = vmatpush.bf16.msrb.mxu0 %v4033_v11  ;;  %730 = vperm.xlu0 %4277, %v664_v15   ;;  %v564_v9 = vsel %vm500_vm6, %v468_v0, %v532_v6  ;;  %v4016_v11 = vld [vmem:[%s6314_s3 + $0x98] sm:$0xff]  ;;  %v1296_v15 = vld [vmem:[%s6317_s6 + $0x68] sm:$0xff]  ;;  %v487_v50 = vadd.f32 %v4403_v17, %v451_v43 }
  0x3f   : > { %735 = vperm.xlu1 %4278, %v665_v21   ;;  %1038 = vmatmul.bf16.gmra.mxu0 %v4567_v16  ;;  %602 = vst [vmem:[#allocation2 + $0x68] sm:$0xff] %v564_v9  ;;  %v565_v20 = vsel %vm501_vm7, %v469_v5, %v533_v8  ;;  %v4222_v21 = vld [vmem:[%s4378_s24 + $0x50] sm:$0xff]   ;;  %v4014_v0 = vld [vmem:[%s6314_s3 + $0x88] sm:$0xff] }
  0x40   : > { %1078 = vmatmul.bf16.gmra.mxu2 %v953_v18  ;;  %1098 = vmatmul.bf16.gmra.mxu3 %v957_v22  ;;  %v4651_v18 = vpack.c.bf16 %v4498_v35, %v4489_v25  ;;  %v958_v22 = vpack.c.bf16 %v581_v4, %v580_v1  ;;  %603 = vst [vmem:[#allocation2 + $0x70] sm:$0xff] %v565_v20  ;;  %v4111_v24 = vunpack.c.l.bf16 %v4222_v21  ;;  %v4112_v28 = vunpack.c.h.bf16 %v4222_v21  ;;  %v1981_v43 = vld [vmem:[#allocation2 + $0x48] sm:$0xff] }
  0x41   : > { %1058 = vmatmul.bf16.gmra.mxu1 %v4577_v31  ;;  %1592 = vmatpush.bf16.msrb.mxu2 %v4016_v11  ;;  %v4654_v23 = vpack.c.bf16 %v565_v20, %v564_v9  ;;  %v4127_v35 = vunpack.c.l.bf16 %v4226_v26  ;;  %vm519_vm11 = vcmp.ge.f32.partialorder %v487_v50, 0.0  ;;  %v4710_v4 = vpack.c.bf16 %v4582_v33, %v4579_v29  ;;  %v4022_v29 = vld [vmem:[%s6314_s3 + $0xc8] sm:$0xff]  ;;  %v672_v11 = vld [vmem:[%s6316_s5 + $0x80] sm:$0xff]  ;;  %v1302_v26 = vld [vmem:[%s6317_s6 + $0x98] sm:$0xff] }
  0x42   : > { %2092 = vmatpush.bf16.msrb.mxu0 %v4032_v34  ;;  %1165 = vmatpush.bf16.msrb.mxu1 %v4001_v7  ;;  %v442_v27 = vmul.f32 %v4396_v14, %v4111_v24  ;;  %v443_v25 = vmul.f32 %v4396_v14, %v4112_v28  ;;  %v4218_v34 = vld [vmem:[%s4378_s24 + $0x30] sm:$0xff]   ;;  %v673_v33 = vld [vmem:[%s6316_s5 + $0x88] sm:$0xff] }
  0x43   : > { %v450_v40 = vmul.f32 %v4396_v14, %v4127_v35  ;;  %v4095_v41 = vunpack.c.l.bf16 %v4218_v34  ;;  %1858 = vmatpush.bf16.msrb.mxu3 %v4024_v32  ;;  %v4096_v44 = vunpack.c.h.bf16 %v4218_v34  ;;  %v3998_v9 = vld [vmem:[%s6314_s3 + $0x8] sm:$0xff]  ;;  %v674_v24 = vld [vmem:[%s6316_s5 + $0x90] sm:$0xff]  ;;  %v4052_v35 = vld [vmem:[%s6314_s3 + $0x1b8] sm:$0xff] }
  0x44   : > { %v478_v37 = vadd.f32 %v4403_v17, %v442_v27  ;;  %v479_v38 = vadd.f32 %v4403_v17, %v443_v25  ;;  %v4741_v20 = vld [vmem:[#allocation2 + $0x29] sm:$0xff]  ;;  %v3997_v27 = vld [vmem:[%s6314_s3] sm:$0xff]  ;;  %v4771_v32 = vld [vmem:[#allocation2 + $0x31] sm:$0xff] }
  0x45   : > { %745 = vperm.xlu2 %4279, %v667_v51   ;;  %1593 = vmatpush.bf16.msrb.mxu2 %v4015_v39  ;;  %v486_v49 = vadd.f32 %v4403_v17, %v450_v40  ;;  %v434_v51 = vmul.f32 %v4396_v14, %v4095_v41  ;;  %v435_v52 = vmul.f32 %v4396_v14, %v4096_v44  ;;  %v1301_v28 = vld [vmem:[%s6317_s6 + $0x90] sm:$0xff]  ;;  %v4763_v25 = vld [vmem:[#allocation2 + $0x41] sm:$0xff]  ;;  %v675_v39 = vld [vmem:[%s6316_s5 + $0x98] sm:$0xff] }
  0x46   : > { %2093 = vmatpush.bf16.msrb.mxu0 %v4031_v47  ;;  %1372 = vperm.xlu0 %4277, %v1294_v55   ;;  %vm510_vm8 = vcmp.ge.f32.partialorder %v478_v37, 0.0  ;;  %vm511_vm9 = vcmp.ge.f32.partialorder %v479_v38, 0.0  ;;  %v542_v45 = vmul.f32 0.01, %v478_v37  ;;  %v543_v46 = vmul.f32 0.01, %v479_v38 }
  0x47   : > { %740 = vperm.xlu1 %4278, %v666_v56   ;;  %1166 = vmatpush.bf16.msrb.mxu1 %v4000_v36  ;;  %v669_v47 = vld [vmem:[%s6316_s5 + $0x68] sm:$0xff]  ;;  %vm518_vm10 = vcmp.ge.f32.partialorder %v486_v49, 0.0  ;;  %v550_v55 = vmul.f32 0.01, %v486_v49  ;;  %v551_v56 = vmul.f32 0.01, %v487_v50  ;;  %v470_v58 = vadd.f32 %v4403_v17, %v434_v51 }
  0x48   : > { %v574_v53 = vsel %vm510_vm8, %v478_v37, %v542_v45  ;;  %v575_v54 = vsel %vm511_vm9, %v479_v38, %v543_v46  ;;  %v471_v59 = vadd.f32 %v4403_v17, %v435_v52  ;;  %1859 = vmatpush.bf16.msrb.mxu3 %v4023_v57  ;;  %v1299_v17 = vld [vmem:[%s6317_s6 + $0x80] sm:$0xff]  ;;  %v4060_v37 = vld [vmem:[%s6314_s3 + $0x1f8] sm:$0xff]  ;;  %v1304_v38 = vld [vmem:[%s6317_s6 + $0xa8] sm:$0xff] }
  0x49   : > { %612 = vst [vmem:[#allocation2 + $0xb8] sm:$0xff] %v574_v53  ;;  %v582_v14 = vsel %vm518_vm10, %v486_v49, %v550_v55  ;;  %v583_v60 = vsel %vm519_vm11, %v487_v50, %v551_v56  ;;  %vm502_vm12 = vcmp.ge.f32.partialorder %v470_v58, 0.0  ;;  %v534_v61 = vmul.f32 0.01, %v470_v58  ;;  %1594 = vmatpush.bf16.msrb.mxu2 %v4014_v0  ;;  %v1303_v40 = vld [vmem:[%s6317_s6 + $0xa0] sm:$0xff]  ;;  %v4796_v41 = vld [vmem:[#allocation2 + $0x49] sm:$0xff] }
  0x4a   : > { %2094 = vmatpush.bf16.msrb.mxu0 %v4030_v3  ;;  %613 = vst [vmem:[#allocation2 + $0xc0] sm:$0xff] %v575_v54  ;;  %vm503_vm13 = vcmp.ge.f32.partialorder %v471_v59, 0.0  ;;  %v535_v62 = vmul.f32 0.01, %v471_v59  ;;  %v671_v3 = vld [vmem:[%s6316_s5 + $0x78] sm:$0xff]  ;;  %v955_v5 = vpack.c.bf16 %v575_v54, %v574_v53  ;;  %v959_v7 = vpack.c.bf16 %v583_v60, %v582_v14  ;;  %v676_v49 = vld [vmem:[%s6316_s5 + $0xa0] sm:$0xff] }
  0x4b   : > { %620 = vst [vmem:[#allocation2 + $0xf8] sm:$0xff] %v582_v14  ;;  %v566_v1 = vsel %vm502_vm12, %v470_v58, %v534_v61  ;;  %1167 = vmatpush.bf16.msrb.mxu1 %v3999_v63  ;;  %v4068_v45 = vld [vmem:[%s6314_s3 + $0x238] sm:$0xff]  ;;  %v677_v50 = vld [vmem:[%s6316_s5 + $0xa8] sm:$0xff]  ;;  %v678_v61 = vld [vmem:[%s6316_s5 + $0xb0] sm:$0xff] }
  0x4c   : > { %621 = vst [vmem:[#allocation2 + $0x100] sm:$0xff] %v583_v60  ;;  %v567_v6 = vsel %vm503_vm13, %v471_v59, %v535_v62  ;;  %1860 = vmatpush.bf16.msrb.mxu3 %v4022_v29  ;;  %v4824_v51 = vld [vmem:[#allocation2 + $0x4f] sm:$0xff]  ;;  %v4826_v52 = vld [vmem:[#allocation2 + $0x19] sm:$0xff]  ;;  %v4831_v54 = vld [vmem:[#allocation2 + $0x27] sm:$0xff] }
  0x4d   : > { %750 = vperm.xlu2 %4279, %v668_v12   ;;  %604 = vst [vmem:[#allocation2 + $0x78] sm:$0xff] %v566_v1  ;;  %v4712_v8 = vpack.c.bf16 %v567_v6, %v566_v1  ;;  %v4013_v12 = vld [vmem:[%s6314_s3 + $0x80] sm:$0xff]  ;;  %v1306_v60 = vld [vmem:[%s6317_s6 + $0xb8] sm:$0xff]  ;;  %v1251_v62 = vld [vmem:[#allocation2 + $0x9] sm:$0xff] }
  0x4e   : > { %2095 = vmatpush.bf16.msrb.mxu0 %v4029_v10  ;;  %1377 = vperm.xlu0 %4277, %v1295_v13   ;;  %605 = vst [vmem:[#allocation2 + $0x80] sm:$0xff] %v567_v6  ;;  %v1300_v10 = vld [vmem:[%s6317_s6 + $0x88] sm:$0xff]  ;;  %v4734_v13 = vld [vmem:[#allocation2 + $0x39] sm:$0xff] }
  0x4f   : > { %1382 = vperm.xlu1 %4278, %v1296_v15   ;;  %1043 = vmatmul.bf16.gmra.mxu0 %v4651_v18  ;;  %v4021_v15 = vld [vmem:[%s6314_s3 + $0xc0] sm:$0xff]  ;;  %v4855_v0 = vld [vmem:[#allocation2 + $0x57] sm:$0xff] }
  0x50   : > { %1083 = vmatmul.bf16.gmra.mxu2 %v954_v19  ;;  %1103 = vmatmul.bf16.gmra.mxu3 %v958_v22  ;;  %v624_v63 = vld [vmem:[#allocation2 + $0x7] sm:$0xff]  ;;  %v1710_v6 = vld [vmem:[#allocation2 + $0x1f] sm:$0xff] }
  0x51   : > { %1063 = vmatmul.bf16.gmra.mxu1 %v4654_v23  ;;  %1595 = vmatpush.bf16.msrb.mxu2 %v4013_v12  ;;  %v2210_v1 = vld [vmem:[#allocation2 + $0x21] sm:$0xff] }
  0x52   : > { %1168 = vmatpush.bf16.msrb.mxu1 %v3998_v9  ;;  %1861 = vmatpush.bf16.msrb.mxu3 %v4021_v15 }
  0x53   : > { %3120 = vmatpush.bf16.msra.mxu0 %v4068_v45  ;;  %v1982_v45 = vld [vmem:[#allocation2 + $0x50] sm:$0xff] }
  0x55   : > { %1392 = vperm.xlu2 %4279, %v1298_v42   ;;  %2620 = vmatpush.bf16.msra.mxu2 %v4052_v35 }
  0x56   : > { %755 = vperm.xlu0 %4277, %v669_v47   ;;  %1169 = vmatpush.bf16.msrb.mxu1 %v3997_v27 }
  0x57   : > { %1387 = vperm.xlu1 %4278, %v1297_v48   ;;  %2854 = vmatpush.bf16.msra.mxu3 %v4060_v37  ;;  %v1305_v48 = vld [vmem:[%s6317_s6 + $0xb0] sm:$0xff] }
  0x5d   : > { %1397 = vperm.xlu2 %4279, %v1299_v17   ;;  %v1252_v17 = vld [vmem:[#allocation2 + $0x11] sm:$0xff] }
  0x5e   : > { %760 = vperm.xlu0 %4277, %v670_v2   ;;  %v625_v2 = vld [vmem:[#allocation2 + $0xf] sm:$0xff] }
  0x5f   : > { %765 = vperm.xlu1 %4278, %v671_v3   ;;  %1048 = vmatmul.bf16.gmra.mxu0 %v4710_v4  ;;  %v1709_v3 = vld [vmem:[#allocation2 + $0x17] sm:$0xff] }
  0x60   : > { %1088 = vmatmul.bf16.gmra.mxu2 %v955_v5  ;;  %1108 = vmatmul.bf16.gmra.mxu3 %v959_v7  ;;  %v4859_v7 = vld [vmem:[#allocation2 + $0x2f] sm:$0xff] }
  0x61   : > { %1068 = vmatmul.bf16.gmra.mxu1 %v4712_v8 }
  0x65   : > { %775 = vperm.xlu2 %4279, %v673_v33  }
  0x66   : > { %1402 = vperm.xlu0 %4277, %v1300_v10  }
  0x67   : > { %770 = vperm.xlu1 %4278, %v672_v11   ;;  %v4739_v19 = vpop.permute.xlu2 %1327 }
  0x68   : > { %v4745_v21 = vmul.f32 %v4741_v20, %v4739_v19  ;;  %v4749_v22 = vmul.f32 %v4734_v13, %v4739_v19 }
  0x6a   : > { %6441 = vst [vmem:[#allocation3_spill] sm:$0xff] %v4745_v21 }
  0x6b   : > { %6442 = vst [vmem:[#allocation4_spill] sm:$0xff] %v4749_v22 }
  0x6d   : > { %780 = vperm.xlu2 %4279, %v674_v24  }
  0x6e   : > { %1407 = vperm.xlu0 %4277, %v1301_v28  }
  0x6f   : > { %1412 = vperm.xlu1 %4278, %v1302_v26   ;;  %2096 = vmatmul.bf16.vlgmr.msrb.gmra.mxu0 %v4567_v16  ;;  %v4769_v30 = vpop.permute.xlu2 %1332  ;;  %v4044_v16 = vld [vmem:[%s6314_s3 + $0x178] sm:$0xff] }
  0x70   : > { %v4775_v34 = vmul.f32 %v4771_v32, %v4769_v30  ;;  %v4779_v36 = vmul.f32 %v4763_v25, %v4769_v30  ;;  %2354 = vmatpush.bf16.msra.mxu1 %v4044_v16  ;;  %v684_v16 = vld [vmem:[%s6316_s5 + $0xe0] sm:$0xff] }
  0x72   : > { %6443 = vst [vmem:[#allocation5_spill] sm:$0xff] %v4775_v34  ;;  %v4042_v34 = vld [vmem:[%s6314_s3 + $0x168] sm:$0xff] }
  0x73   : > { %6444 = vst [vmem:[#allocation6_spill] sm:$0xff] %v4779_v36 }
  0x75   : > { %1422 = vperm.xlu2 %4279, %v1304_v38  }
  0x76   : > { %785 = vperm.xlu0 %4277, %v675_v39  }
  0x77   : > { %1417 = vperm.xlu1 %4278, %v1303_v40   ;;  %v4802_v44 = vpop.permute.xlu2 %1337  ;;  %v680_v40 = vld [vmem:[%s6316_s5 + $0xc0] sm:$0xff] }
  0x78   : > { %v4809_v46 = vmul.f32 %v4734_v13, %v4802_v44  ;;  %v4813_v47 = vmul.f32 %v4796_v41, %v4802_v44 }
  0x7a   : > { %6445 = vst [vmem:[#allocation7_spill] sm:$0xff] %v4809_v46 }
  0x7b   : > { %6446 = vst [vmem:[#allocation8_spill] sm:$0xff] %v4813_v47 }
  0x7d   : > { %1427 = vperm.xlu2 %4279, %v1305_v48  }
  0x7e   : > { %790 = vperm.xlu0 %4277, %v676_v49   ;;  %v1307_v49 = vld [vmem:[%s6317_s6 + $0xc0] sm:$0xff] }
  0x7f   : > { %795 = vperm.xlu1 %4278, %v677_v50   ;;  %2101 = vmatmul.bf16.gmra.mxu0 %v4651_v18  ;;  %v4829_v53 = vpop.permute.xlu2 %715  ;;  %v679_v18 = vld [vmem:[%s6316_s5 + $0xb8] sm:$0xff]  ;;  %v1308_v50 = vld [vmem:[%s6317_s6 + $0xc8] sm:$0xff] }
  0x80   : > { %v1318_v55 = vpop.permute.xlu0 %1317  ;;  %v4835_v56 = vmul.f32 %v4824_v51, %v4829_v53  ;;  %v691_v57 = vpop.permute.xlu1 %690 }
  0x81   : > { %v4838_v58 = vmul.f32 %v4826_v52, %v1318_v55  ;;  %v4841_v59 = vmul.f32 %v4741_v20, %v1318_v55  ;;  %v4844_v14 = vmul.f32 %v4831_v54, %v691_v57  ;;  %v1475_v29 = vmul.f32 %v1318_v55, %v1251_v62  ;;  %v4888_v55 = vld [vmem:[#allocation2 + $0x61] sm:$0xff] }
  0x82   : > { %6447 = vst [vmem:[#allocation9_spill] sm:$0xff] %v4835_v56  ;;  %v848_v33 = vmul.f32 %v691_v57, %v624_v63  ;;  %v1741_v26 = vmul.f32 %v1709_v3, %v691_v57  ;;  %v4890_v57 = vld [vmem:[#allocation2 + $0x71] sm:$0xff] }
  0x83   : > { %6448 = vst [vmem:[#allocation10_spill] sm:$0xff] %v4838_v58 }
  0x84   : > { %6449 = vst [vmem:[#allocation11_spill] sm:$0xff] %v4841_v59 }
  0x85   : > { %6450 = vst [vmem:[#allocation12_spill] sm:$0xff] %v4844_v14  ;;  %805 = vperm.xlu2 %4279, %v679_v18   ;;  %v4892_v18 = vld [vmem:[#allocation2 + $0x37] sm:$0xff] }
  0x86   : > { %1432 = vperm.xlu0 %4277, %v1306_v60   ;;  %v4894_v60 = vld [vmem:[#allocation2 + $0x3f] sm:$0xff] }
  0x87   : > { %800 = vperm.xlu1 %4278, %v678_v61   ;;  %v4857_v5 = vpop.permute.xlu2 %720  ;;  %v4051_v61 = vld [vmem:[%s6314_s3 + $0x1b0] sm:$0xff] }
  0x88   : > { %v1323_v9 = vpop.permute.xlu0 %1322  ;;  %v4863_v10 = vmul.f32 %v4855_v0, %v4857_v5  ;;  %v696_v11 = vpop.permute.xlu1 %695  ;;  %2621 = vmatpush.bf16.msra.mxu2 %v4051_v61 }
  0x89   : > { %v1476_v12 = vmul.f32 %v1323_v9, %v1252_v17  ;;  %v4865_v15 = vmul.f32 %v2210_v1, %v1323_v9  ;;  %v4868_v24 = vmul.f32 %v4771_v32, %v1323_v9  ;;  %v849_v28 = vmul.f32 %v696_v11, %v625_v2 }
  0x8a   : > { %6451 = vst [vmem:[#allocation13_spill] sm:$0xff] %v4863_v10  ;;  %v1742_v27 = vmul.f32 %v1710_v6, %v696_v11  ;;  %v4871_v35 = vmul.f32 %v4859_v7, %v696_v11  ;;  %v4043_v11 = vld [vmem:[%s6314_s3 + $0x170] sm:$0xff] }
  0x8b   : > { %6452 = vst [vmem:[#allocation14_spill] sm:$0xff] %v4865_v15  ;;  %v880_v38 = vpack.c.bf16 %v849_v28, %v848_v33  ;;  %v1507_v39 = vpack.c.bf16 %v1476_v12, %v1475_v29  ;;  %v4059_v33 = vld [vmem:[%s6314_s3 + $0x1f0] sm:$0xff]  ;;  %v1310_v12 = vld [vmem:[%s6317_s6 + $0xd8] sm:$0xff]  ;;  %2355 = vmatpush.bf16.msra.mxu1 %v4043_v11 }
  0x8c   : > { %6453 = vst [vmem:[#allocation15_spill] sm:$0xff] %v4868_v24  ;;  %v1773_v48 = vpack.c.bf16 %v1742_v27, %v1741_v26  ;;  %2855 = vmatpush.bf16.msra.mxu3 %v4059_v33  ;;  %v681_v26 = vld [vmem:[%s6316_s5 + $0xc8] sm:$0xff]  ;;  %v1309_v27 = vld [vmem:[%s6317_s6 + $0xd0] sm:$0xff] }
  0x8d   : > { %6454 = vst [vmem:[#allocation16_spill] sm:$0xff] %v4871_v35  ;;  %1170 = vmatmul.bf16.vlgmr.msrb.gmra.mxu1 %v880_v38  ;;  %1596 = vmatmul.bf16.vlgmr.msrb.gmra.mxu2 %v1507_v39  ;;  %v4933_v38 = vld [vmem:[#allocation2 + $0x69] sm:$0xff]  ;;  %v4935_v39 = vld [vmem:[#allocation2 + $0x79] sm:$0xff] }
  0x8e   : > { %1862 = vmatmul.bf16.vlgmr.msrb.gmra.mxu3 %v1773_v48  ;;  %810 = vperm.xlu2 %4279, %v680_v40   ;;  %v1477_v40 = vmul.f32 %v4826_v52, %v4739_v19  ;;  %v1478_v48 = vmul.f32 %v2210_v1, %v4769_v30  ;;  %v4067_v33 = vld [vmem:[%s6314_s3 + $0x230] sm:$0xff]  ;;  %v4955_v1 = vld [vmem:[#allocation2 + $0x47] sm:$0xff] }
  0x8f   : > { %1437 = vperm.xlu0 %4277, %v1307_v49   ;;  %1442 = vperm.xlu1 %4278, %v1308_v50   ;;  %v4899_v62 = vpop.permute.xlu2 %1362  ;;  %v4953_v30 = vld [vmem:[#allocation2 + $0x51] sm:$0xff]  ;;  %v5127_v10 = vld [vmem:[#allocation2 + $0xa9] sm:$0xff]  ;;  %v1747_v14 = vmul.f32 %v4955_v1, %v4857_v5 }
  0x90   : > { %2106 = vmatmul.bf16.gmra.mxu0 %v4710_v4  ;;  %v4904_v63 = vmul.f32 %v4888_v55, %v4899_v62  ;;  %v4908_v17 = vmul.f32 %v4890_v57, %v4899_v62  ;;  %v701_v2 = vpop.permute.xlu0 %700  ;;  %v706_v29 = vpop.permute.xlu1 %705  ;;  %v1508_v37 = vpack.c.bf16 %v1478_v48, %v1477_v40  ;;  %v683_v40 = vld [vmem:[%s6316_s5 + $0xd8] sm:$0xff]  ;;  %v2010_v48 = vpack.c.bf16 %v1982_v45, %v1981_v43 }
  0x91   : > { %v4914_v9 = vmul.f32 %v4892_v18, %v701_v2  ;;  %v4917_v4 = vmul.f32 %v4894_v60, %v706_v29  ;;  %v850_v50 = vmul.f32 %v1709_v3, %v701_v2  ;;  %v851_v61 = vmul.f32 %v1710_v6, %v706_v29  ;;  %3121 = vmatpush.bf16.msra.mxu0 %v4067_v33  ;;  %v682_v33 = vld [vmem:[%s6316_s5 + $0xd0] sm:$0xff] }
  0x92   : > { %6455 = vst [vmem:[#allocation17_spill] sm:$0xff] %v4904_v63  ;;  %v1743_v3 = vmul.f32 %v4831_v54, %v701_v2  ;;  %v1744_v6 = vmul.f32 %v4859_v7, %v706_v29  ;;  %v1311_v2 = vld [vmem:[%s6317_s6 + $0xe0] sm:$0xff]  ;;  %2356 = vmatpush.bf16.msra.mxu1 %v4042_v34 }
  0x93   : > { %6456 = vst [vmem:[#allocation18_spill] sm:$0xff] %v4908_v17  ;;  %v881_v42 = vpack.c.bf16 %v851_v61, %v850_v50  ;;  %v4983_v50 = vld [vmem:[#allocation2 + $0x7f] sm:$0xff]  ;;  %v5026_v29 = vld [vmem:[#allocation2 + $0x87] sm:$0xff]  ;;  %v854_v17 = vmul.f32 %v4892_v18, %v4857_v5 }
  0x94   : > { %6457 = vst [vmem:[#allocation19_spill] sm:$0xff] %v4914_v9  ;;  %v4993_v9 = vld [vmem:[#allocation2 + $0x59] sm:$0xff] }
  0x95   : > { %6458 = vst [vmem:[#allocation20_spill] sm:$0xff] %v4917_v4  ;;  %v1774_v4 = vpack.c.bf16 %v1744_v6, %v1743_v3  ;;  %v5125_v63 = vld [vmem:[#allocation2 + $0x99] sm:$0xff] }
  0x96   : > { %1452 = vperm.xlu2 %4279, %v1310_v12  }
  0x97   : > { %815 = vperm.xlu0 %4277, %v681_v26   ;;  %1447 = vperm.xlu1 %4278, %v1309_v27   ;;  %v4940_v49 = vpop.permute.xlu2 %1367 }
  0x98   : > { %v4947_v11 = vmul.f32 %v4933_v38, %v4940_v49  ;;  %v4951_v12 = vmul.f32 %v4935_v39, %v4940_v49  ;;  %v1343_v19 = vpop.permute.xlu0 %1342  ;;  %v711_v52 = vpop.permute.xlu1 %710 }
  0x99   : > { %v4960_v26 = vmul.f32 %v4763_v25, %v1343_v19  ;;  %v4963_v27 = vmul.f32 %v4953_v30, %v1343_v19  ;;  %v4966_v28 = vmul.f32 %v4955_v1, %v711_v52 }
  0x9a   : > { %6459 = vst [vmem:[#allocation21_spill] sm:$0xff] %v4947_v11  ;;  %v5221_v11 = vld [vmem:[#allocation2 + $0xb7] sm:$0xff] }
  0x9b   : > { %6460 = vst [vmem:[#allocation22_spill] sm:$0xff] %v4951_v12  ;;  %v4283_v12 = vld [vmem:[%s6312_s1] ss:$0 sm:$0xff] }
  0x9c   : > { %6461 = vst [vmem:[#allocation23_spill] sm:$0xff] %v4960_v26 }
  0x9d   : > { %6462 = vst [vmem:[#allocation24_spill] sm:$0xff] %v4963_v27  ;;  %1175 = vmatmul.bf16.gmra.mxu1 %v881_v42  ;;  %1601 = vmatmul.bf16.gmra.mxu2 %v1508_v37 }
  0x9e   : > { %6463 = vst [vmem:[#allocation25_spill] sm:$0xff] %v4966_v28  ;;  %1867 = vmatmul.bf16.gmra.mxu3 %v1774_v4  ;;  %1457 = vperm.xlu2 %4279, %v1311_v2   ;;  %v685_v2 = vld [vmem:[%s6316_s5 + $0xe8] sm:$0xff]  ;;  %v852_v28 = vmul.f32 %v4831_v54, %v711_v52  ;;  %v1745_v54 = vmul.f32 %v4892_v18, %v711_v52  ;;  %v686_v52 = vld [vmem:[%s6316_s5 + $0xf0] sm:$0xff] }
  0x9f   : > { %820 = vperm.xlu0 %4277, %v682_v33   ;;  %825 = vperm.xlu1 %4278, %v683_v40   ;;  %v4985_v61 = vpop.permute.xlu2 %745  ;;  %v1480_v33 = vmul.f32 %v4771_v32, %v1343_v19  ;;  %v5179_v18 = vld [vmem:[#allocation2 + $0xaf] sm:$0xff]  ;;  %6494 = vst [vmem:[#allocation56_spill] sm:$0xff] %v5221_v11 }
  0xa0   : > { %2111 = vmatmul.bf16.gmra.mxu0 %v2010_v48  ;;  %v4989_v3 = vmul.f32 %v4983_v50, %v4985_v61  ;;  %v4991_v6 = vpop.permute.xlu0 %1347  ;;  %v4995_v43 = vpop.permute.xlu1 %1352  ;;  %v1312_v48 = vld [vmem:[%s6317_s6 + $0xe8] sm:$0xff]  ;;  %6485 = vst [vmem:[#allocation47_spill] sm:$0xff] %v5179_v18 }
  0xa1   : > { %v4999_v42 = vmul.f32 %v4796_v41, %v4991_v6  ;;  %v5003_v37 = vmul.f32 %v4993_v9, %v4991_v6  ;;  %v5007_v45 = vmul.f32 %v4953_v30, %v4995_v43  ;;  %v5011_v4 = vmul.f32 %v4888_v55, %v4995_v43 }
  0xa2   : > { %6464 = vst [vmem:[#allocation26_spill] sm:$0xff] %v4989_v3  ;;  %v1481_v34 = vmul.f32 %v4734_v13, %v4991_v6  ;;  %v5146_v13 = vld [vmem:[#allocation2 + $0x81] sm:$0xff] }
  0xa3   : > { %6465 = vst [vmem:[#allocation27_spill] sm:$0xff] %v4999_v42 }
  0xa4   : > { %6466 = vst [vmem:[#allocation28_spill] sm:$0xff] %v5003_v37 }
  0xa5   : > { %6467 = vst [vmem:[#allocation29_spill] sm:$0xff] %v5007_v45  ;;  %v5036_v45 = vld [vmem:[#allocation2 + $0x5f] sm:$0xff] }
  0xa6   : > { %6468 = vst [vmem:[#allocation30_spill] sm:$0xff] %v5011_v4  ;;  %835 = vperm.xlu2 %4279, %v685_v2   ;;  %v853_v2 = vmul.f32 %v4859_v7, %v4829_v53  ;;  %v1746_v7 = vmul.f32 %v4894_v60, %v4829_v53  ;;  %v1314_v53 = vld [vmem:[%s6317_s6 + $0xf8] sm:$0xff] }
  0xa7   : > { %1462 = vperm.xlu0 %4277, %v1312_v48   ;;  %830 = vperm.xlu1 %4278, %v684_v16   ;;  %v5029_v56 = vpop.permute.xlu2 %750  ;;  %v1479_v48 = vmul.f32 %v4741_v20, %v4802_v44  ;;  %v1313_v44 = vld [vmem:[%s6317_s6 + $0xf0] sm:$0xff]  ;;  %v687_v4 = vld [vmem:[%s6316_s5 + $0xf8] sm:$0xff] }
  0xa8   : > { %v5034_v40 = vmul.f32 %v5026_v29, %v5029_v56  ;;  %v726_v42 = vpop.permute.xlu0 %725  ;;  %v882_v26 = vpack.c.bf16 %v853_v2, %v852_v28  ;;  %v1775_v20 = vpack.c.bf16 %v1746_v7, %v1745_v54  ;;  %v5075_v28 = vld [vmem:[#allocation2 + $0x91] sm:$0xff]  ;;  %v4050_v2 = vld [vmem:[%s6314_s3 + $0x1a8] sm:$0xff] }
  0xa9   : > { %v5038_v46 = vpop.permute.xlu1 %1357  ;;  %v5044_v16 = vmul.f32 %v5036_v45, %v726_v42  ;;  %v1509_v37 = vpack.c.bf16 %v1480_v33, %v1479_v48  ;;  %v5077_v33 = vld [vmem:[#allocation2 + $0xa1] sm:$0xff]  ;;  %2622 = vmatpush.bf16.msra.mxu2 %v4050_v2 }
  0xaa   : > { %6469 = vst [vmem:[#allocation31_spill] sm:$0xff] %v5034_v40  ;;  %v5048_v32 = vmul.f32 %v4993_v9, %v5038_v46  ;;  %v5052_v19 = vmul.f32 %v4933_v38, %v5038_v46  ;;  %v5095_v7 = vld [vmem:[#allocation2 + $0x67] sm:$0xff] }
  0xab   : > { %6470 = vst [vmem:[#allocation32_spill] sm:$0xff] %v5044_v16  ;;  %v4065_v40 = vld [vmem:[%s6314_s3 + $0x220] sm:$0xff] }
  0xac   : > { %6471 = vst [vmem:[#allocation33_spill] sm:$0xff] %v5048_v32  ;;  %v5067_v47 = vpop.f32.mrf.mxu0  ;;  %v4066_v32 = vld [vmem:[%s6314_s3 + $0x228] sm:$0xff] }
  0xad   : > { %6472 = vst [vmem:[#allocation34_spill] sm:$0xff] %v5052_v19  ;;  %1180 = vmatmul.bf16.gmra.mxu1 %v882_v26  ;;  %1606 = vmatmul.bf16.gmra.mxu2 %v1509_v37 }
  0xae   : > { %1872 = vmatmul.bf16.gmra.mxu3 %v1775_v20  ;;  %840 = vperm.xlu2 %4279, %v686_v52   ;;  %v5099_v20 = vld [vmem:[#allocation2 + $0x6f] sm:$0xff]  ;;  %v5169_v35 = vpop.f32.mrf.mxu1 }
  0xaf   : > { %1467 = vperm.xlu0 %4277, %v1313_v44   ;;  %1472 = vperm.xlu1 %4278, %v1314_v53   ;;  %v5082_v54 = vpop.permute.xlu2 %1392  ;;  %6483 = vst [vmem:[#allocation45_spill] sm:$0xff] %v5169_v35 }
  0xb0   : > { %2116 = vmatmul.bf16.gmra.mxu0 %v4577_v31  ;;  %v5087_v26 = vmul.f32 %v5075_v28, %v5082_v54  ;;  %v5091_v37 = vmul.f32 %v5077_v33, %v5082_v54  ;;  %v5093_v48 = vpop.permute.xlu0 %730  ;;  %v4058_v31 = vld [vmem:[%s6314_s3 + $0x1e8] sm:$0xff] }
  0xb1   : > { %v5097_v52 = vpop.permute.xlu1 %735  ;;  %v5106_v44 = vmul.f32 %v5095_v7, %v5093_v48  ;;  %2856 = vmatpush.bf16.msra.mxu3 %v4058_v31  ;;  %v1482_v31 = vmul.f32 %v4763_v25, %v4995_v43  ;;  %3122 = vmatpush.bf16.msra.mxu0 %v4066_v32  ;;  %v5150_v25 = vld [vmem:[#allocation2 + $0x77] sm:$0xff]  ;;  %v1748_v43 = vmul.f32 %v4824_v51, %v726_v42 }
  0xb2   : > { %6473 = vst [vmem:[#allocation35_spill] sm:$0xff] %v5087_v26  ;;  %v5110_v53 = vmul.f32 %v5099_v20, %v5097_v52  ;;  %v856_v58 = vmul.f32 %v4955_v1, %v5093_v48  ;;  %v1484_v1 = vmul.f32 %v4953_v30, %v4899_v62 }
  0xb3   : > { %6474 = vst [vmem:[#allocation36_spill] sm:$0xff] %v5091_v37  ;;  %v1510_v27 = vpack.c.bf16 %v1482_v31, %v1481_v34  ;;  %v1776_v59 = vpack.c.bf16 %v1748_v43, %v1747_v14  ;;  %v5210_v43 = vpop.f32.mrf.mxu2  ;;  %v5213_v22 = vpop.f32.mrf.mxu3 }
  0xb4   : > { %6475 = vst [vmem:[#allocation37_spill] sm:$0xff] %v5106_v44  ;;  %v5117_v21 = vpop.f32.mrf.mxu0  ;;  %v855_v44 = vmul.f32 %v4894_v60, %v726_v42 }
  0xb5   : > { %6476 = vst [vmem:[#allocation38_spill] sm:$0xff] %v5110_v53  ;;  %3123 = vmatpush.bf16.msra.mxu0 %v4065_v40 }
  0xb6   : > { %6477 = vst [vmem:[#allocation39_spill] sm:$0xff] %v5117_v21  ;;  %v883_v42 = vpack.c.bf16 %v855_v44, %v854_v17  ;;  %v5183_v17 = vld [vmem:[#allocation2 + $0x89] sm:$0xff] }
  0xb7   : > { %845 = vperm.xlu0 %4277, %v687_v4   ;;  %v5133_v2 = vpop.permute.xlu2 %1397  ;;  %6491 = vst [vmem:[#allocation53_spill] sm:$0xff] %v5210_v43 }
  0xb8   : > { %v5138_v53 = vmul.f32 %v5125_v63, %v5133_v2  ;;  %v5142_v16 = vmul.f32 %v5127_v10, %v5133_v2  ;;  %v5144_v19 = vpop.permute.xlu0 %1372  ;;  %6492 = vst [vmem:[#allocation54_spill] sm:$0xff] %v5213_v22  ;;  %v1483_v22 = vmul.f32 %v4796_v41, %v5038_v46 }
  0xb9   : > { %v5148_v6 = vpop.permute.xlu1 %740  ;;  %v5155_v60 = vmul.f32 %v4890_v57, %v5144_v19  ;;  %v5159_v4 = vmul.f32 %v5146_v13, %v5144_v19 }
  0xba   : > { %6478 = vst [vmem:[#allocation40_spill] sm:$0xff] %v5138_v53  ;;  %v5163_v32 = vmul.f32 %v5150_v25, %v5148_v6  ;;  %v1511_v35 = vpack.c.bf16 %v1484_v1, %v1483_v22 }
  0xbb   : > { %6479 = vst [vmem:[#allocation41_spill] sm:$0xff] %v5142_v16 }
  0xbc   : > { %6480 = vst [vmem:[#allocation42_spill] sm:$0xff] %v5155_v60  ;;  %v5177_v36 = vpop.f32.mrf.mxu0  ;;  %v5223_v60 = vpop.f32.mrf.mxu1 }
  0xbd   : > { %6481 = vst [vmem:[#allocation43_spill] sm:$0xff] %v5159_v4  ;;  %1185 = vmatmul.bf16.gmra.mxu1 %v883_v42  ;;  %1611 = vmatmul.bf16.gmra.mxu2 %v1510_v27  ;;  %v4227_v42 = vld [vmem:[%s4378_s24 + $0x78] sm:$0xff]  }
  0xbe   : > { %6482 = vst [vmem:[#allocation44_spill] sm:$0xff] %v5163_v32  ;;  %1877 = vmatmul.bf16.gmra.mxu3 %v1776_v59  ;;  %v4131_v15 = vunpack.c.l.bf16 %v4227_v42  ;;  %v857_v32 = vmul.f32 %v4824_v51, %v5097_v52  ;;  %v1749_v51 = vmul.f32 %v4855_v0, %v5093_v48  ;;  %v5267_v48 = vpop.f32.mrf.mxu2 }
  0xbf   : > { %6484 = vst [vmem:[#allocation46_spill] sm:$0xff] %v5177_v36  ;;  %v5181_v5 = vpop.permute.xlu2 %775 }
  0xc0   : > { %2121 = vmatmul.bf16.gmra.mxu0 %v4654_v23  ;;  %v5188_v44 = vmul.f32 %v5179_v18, %v5181_v5  ;;  %v5190_v34 = vpop.permute.xlu0 %1377  ;;  %6495 = vst [vmem:[#allocation57_spill] sm:$0xff] %v5223_v60  ;;  %v452_v4 = vmul.f32 %v4283_v12, %v4131_v15  ;;  %v884_v30 = vpack.c.bf16 %v857_v32, %v856_v58  ;;  %v5279_v58 = vld [vmem:[#allocation2 + $0xc1] sm:$0xff]  ;;  %v5281_v32 = vld [vmem:[#allocation2 + $0xd1] sm:$0xff] }
  0xc1   : > { %v5192_v31 = vpop.permute.xlu1 %1382  ;;  %v5196_v14 = vmul.f32 %v4935_v39, %v5190_v34  ;;  %v5200_v59 = vmul.f32 %v5190_v34, %v5183_v17  ;;  %6501 = vst [vmem:[#allocation63_spill] sm:$0xff] %v5267_v48  ;;  %v1485_v48 = vmul.f32 %v4993_v9, %v4940_v49 }
  0xc2   : > { %6486 = vst [vmem:[#allocation48_spill] sm:$0xff] %v5188_v44  ;;  %v5204_v27 = vmul.f32 %v5146_v13, %v5192_v31  ;;  %v5208_v23 = vmul.f32 %v5075_v28, %v5192_v31  ;;  %v1487_v44 = vmul.f32 %v4933_v38, %v5190_v34  ;;  %v1488_v53 = vmul.f32 %v4890_v57, %v5192_v31  ;;  %v1991_v34 = vld [vmem:[#allocation2 + $0x98] sm:$0xff]  ;;  %v1992_v57 = vld [vmem:[#allocation2 + $0xa0] sm:$0xff] }
  0xc3   : > { %6487 = vst [vmem:[#allocation49_spill] sm:$0xff] %v5196_v14  ;;  %v4284_v14 = vld [vmem:[%s6313_s2] ss:$0 sm:$0xff]  ;;  %v860_v38 = vmul.f32 %v5095_v7, %v5029_v56 }
  0xc4   : > { %6488 = vst [vmem:[#allocation50_spill] sm:$0xff] %v5200_v59  ;;  %v5219_v3 = vpop.f32.mrf.mxu0  ;;  %v5239_v59 = vld [vmem:[#allocation2 + $0x8f] sm:$0xff] }
  0xc5   : > { %6489 = vst [vmem:[#allocation51_spill] sm:$0xff] %v5204_v27  ;;  %v488_v27 = vadd.f32 %v4284_v14, %v452_v4 }
  0xc6   : > { %6490 = vst [vmem:[#allocation52_spill] sm:$0xff] %v5208_v23  ;;  %v1750_v23 = vmul.f32 %v5036_v45, %v5097_v52  ;;  %v4041_v52 = vld [vmem:[%s6314_s3 + $0x160] sm:$0xff] }
  0xc7   : > { %6493 = vst [vmem:[#allocation55_spill] sm:$0xff] %v5219_v3  ;;  %v5230_v43 = vpop.permute.xlu2 %780  ;;  %vm520_vm14 = vcmp.ge.f32.partialorder %v488_v27, 0.0  ;;  %v552_v62 = vmul.f32 0.01, %v488_v27  ;;  %2357 = vmatpush.bf16.msra.mxu1 %v4041_v52 }
  0xc8   : > { %6496 = vst [vmem:[#allocation58_spill] sm:$0xff] %v5230_v43  ;;  %v5243_v15 = vmul.f32 %v5221_v11, %v5230_v43  ;;  %v5245_v41 = vpop.permute.xlu0 %755  ;;  %v4132_v11 = vunpack.c.h.bf16 %v4227_v42  ;;  %v1777_v43 = vpack.c.bf16 %v1750_v23, %v1749_v51  ;;  %v5283_v42 = vpop.f32.mrf.mxu3 }
  0xc9   : > { %v5247_v46 = vpop.permute.xlu1 %1387  ;;  %v5257_v4 = vmul.f32 %v5245_v41, %v5239_v59  ;;  %v5275_v18 = vsel %vm520_vm14, %v488_v27, %v552_v62  ;;  %6504 = vst [vmem:[#allocation66_spill] sm:$0xff] %v5281_v32  ;;  %v4049_v27 = vld [vmem:[%s6314_s3 + $0x1a0] sm:$0xff]  ;;  %v5291_v51 = vpop.f32.mrf.mxu1  ;;  %v1754_v21 = vmul.f32 %v4983_v50, %v5245_v41 }
  0xca   : > { %6497 = vst [vmem:[#allocation59_spill] sm:$0xff] %v5243_v15  ;;  %v5261_v24 = vmul.f32 %v5247_v46, %v5183_v17  ;;  %v5265_v60 = vmul.f32 %v5125_v63, %v5247_v46  ;;  %v453_v1 = vmul.f32 %v4283_v12, %v4132_v11  ;;  %2623 = vmatpush.bf16.msra.mxu2 %v4049_v27 }
  0xcb   : > { %6498 = vst [vmem:[#allocation60_spill] sm:$0xff] %v5257_v4  ;;  %v5334_v4 = vld [vmem:[#allocation2 + $0xc9] sm:$0xff] }
  0xcc   : > { %6499 = vst [vmem:[#allocation61_spill] sm:$0xff] %v5261_v24  ;;  %v5273_v36 = vpop.f32.mrf.mxu0  ;;  %v489_v62 = vadd.f32 %v4284_v14, %v453_v1  ;;  %v4057_v14 = vld [vmem:[%s6314_s3 + $0x1e0] sm:$0xff]  ;;  %v858_v24 = vmul.f32 %v4855_v0, %v5148_v6  ;;  %v1751_v0 = vmul.f32 %v5095_v7, %v5148_v6  ;;  %v1990_v6 = vld [vmem:[#allocation2 + $0x90] sm:$0xff] }
  0xcd   : > { %6500 = vst [vmem:[#allocation62_spill] sm:$0xff] %v5265_v60  ;;  %1190 = vmatmul.bf16.gmra.mxu1 %v884_v30  ;;  %1616 = vmatmul.bf16.gmra.mxu2 %v1511_v35  ;;  %v5293_v35 = vld [vmem:[#allocation2 + $0x9f] sm:$0xff]  ;;  %v5295_v30 = vld [vmem:[#allocation2 + $0x97] sm:$0xff]  ;;  %v5338_v60 = vpop.f32.mrf.mxu2 }
  0xce   : > { %6502 = vst [vmem:[#allocation64_spill] sm:$0xff] %v5273_v36  ;;  %1882 = vmatmul.bf16.gmra.mxu3 %v1777_v43  ;;  %v553_v3 = vmul.f32 0.01, %v489_v62  ;;  %vm521_vm15 = vcmp.ge.f32.partialorder %v489_v62, 0.0 }
  0xcf   : > { %6503 = vst [vmem:[#allocation65_spill] sm:$0xff] %v5275_v18  ;;  %v5289_v23 = vpop.permute.xlu2 %1422  ;;  %2857 = vmatpush.bf16.msra.mxu3 %v4057_v14  ;;  %v5336_v14 = vld [vmem:[#allocation2 + $0xd9] sm:$0xff] }
  0xd0   : > { %6505 = vst [vmem:[#allocation67_spill] sm:$0xff] %v5283_v42  ;;  %2126 = vmatmul.bf16.gmra.mxu0 %v4712_v8  ;;  %v5300_v22 = vmul.f32 %v5279_v58, %v5289_v23  ;;  %v5304_v11 = vmul.f32 %v5281_v32, %v5289_v23  ;;  %v5306_v12 = vpop.permute.xlu0 %760  ;;  %v5324_v27 = vsel %vm521_vm15, %v489_v62, %v553_v3  ;;  %v5342_v62 = vpop.f32.mrf.mxu3 }
  0xd1   : > { %622 = vst [vmem:[#allocation2 + $0x108] sm:$0xff] %v5275_v18  ;;  %v5308_v43 = vpop.permute.xlu1 %765  ;;  %v5315_v8 = vmul.f32 %v5306_v12, %v5295_v30 }
  0xd2   : > { %6506 = vst [vmem:[#allocation68_spill] sm:$0xff] %v5289_v23  ;;  %v5319_v1 = vmul.f32 %v5293_v35, %v5308_v43  ;;  %v5436_v23 = vld [vmem:[#allocation2 + $0xe7] sm:$0xff] }
  0xd3   : > { %6507 = vst [vmem:[#allocation69_spill] sm:$0xff] %v5291_v51  ;;  %v5378_v51 = vpop.f32.mrf.mxu1 }
  0xd4   : > { %6508 = vst [vmem:[#allocation70_spill] sm:$0xff] %v5300_v22  ;;  %v5328_v26 = vpop.f32.mrf.mxu0  ;;  %v4064_v22 = vld [vmem:[%s6314_s3 + $0x218] sm:$0xff] }
  0xd5   : > { %6509 = vst [vmem:[#allocation71_spill] sm:$0xff] %v5304_v11  ;;  %v862_v11 = vmul.f32 %v5150_v25, %v5306_v12  ;;  %3124 = vmatpush.bf16.msra.mxu0 %v4064_v22  ;;  %v1994_v22 = vld [vmem:[#allocation2 + $0xb0] sm:$0xff] }
  0xd6   : > { %6510 = vst [vmem:[#allocation72_spill] sm:$0xff] %v5315_v8  ;;  %v1486_v8 = vmul.f32 %v4888_v55, %v5144_v19 }
  0xd7   : > { %6511 = vst [vmem:[#allocation73_spill] sm:$0xff] %v5319_v1  ;;  %v5340_v3 = vpop.permute.xlu2 %1427  ;;  %v5348_v1 = vld [vmem:[#allocation2 + $0xb1] sm:$0xff] }
  0xd8   : > { %6512 = vst [vmem:[#allocation74_spill] sm:$0xff] %v5324_v27  ;;  %v5352_v37 = vmul.f32 %v5334_v4, %v5340_v3  ;;  %v5356_v52 = vmul.f32 %v5336_v14, %v5340_v3  ;;  %v5358_v40 = vpop.permute.xlu0 %1402  ;;  %v1512_v36 = vpack.c.bf16 %v1486_v8, %v1485_v48 }
  0xd9   : > { %6513 = vst [vmem:[#allocation75_spill] sm:$0xff] %v5328_v26  ;;  %v5360_v42 = vpop.permute.xlu1 %770  ;;  %v5368_v55 = vmul.f32 %v5077_v33, %v5358_v40  ;;  %v5372_v19 = vmul.f32 %v5358_v40, %v5348_v1 }
  0xda   : > { %623 = vst [vmem:[#allocation2 + $0x110] sm:$0xff] %v5324_v27  ;;  %v1989_v27 = vld [vmem:[#allocation2 + $0x88] sm:$0xff] }
  0xdb   : > { %6514 = vst [vmem:[#allocation76_spill] sm:$0xff] %v5334_v4 }
  0xdc   : > { %6515 = vst [vmem:[#allocation77_spill] sm:$0xff] %v5338_v60  ;;  %v859_v60 = vmul.f32 %v5036_v45, %v4985_v61  ;;  %v5390_v9 = vpop.f32.mrf.mxu0 }
  0xdd   : > { %6516 = vst [vmem:[#allocation78_spill] sm:$0xff] %v5340_v3  ;;  %v1752_v3 = vmul.f32 %v5099_v20, %v4985_v61  ;;  %1621 = vmatmul.bf16.gmra.mxu2 %v1512_v36  ;;  %v5398_v61 = vpop.f32.mrf.mxu2 }
  0xde   : > { %6517 = vst [vmem:[#allocation79_spill] sm:$0xff] %v5342_v62  ;;  %v5364_v62 = vld [vmem:[#allocation2 + $0xa7] sm:$0xff]  ;;  %v885_v26 = vpack.c.bf16 %v859_v60, %v858_v24  ;;  %v5400_v60 = vld [vmem:[#allocation2 + $0xb9] sm:$0xff] }
  0xdf   : > { %6518 = vst [vmem:[#allocation80_spill] sm:$0xff] %v5352_v37  ;;  %v5382_v18 = vmul.f32 %v5364_v62, %v5360_v42  ;;  %v1778_v49 = vpack.c.bf16 %v1752_v3, %v1751_v0  ;;  %v5396_v24 = vpop.permute.xlu2 %805  ;;  %v5426_v0 = vpop.f32.mrf.mxu3  ;;  %v1757_v37 = vmul.f32 %v5360_v42, %v5295_v30 }
  0xe0   : > { %6519 = vst [vmem:[#allocation81_spill] sm:$0xff] %v5356_v52  ;;  %1195 = vmatmul.bf16.gmra.mxu1 %v885_v26  ;;  %v5406_v8 = vpop.permute.xlu0 %1407  ;;  %v1491_v52 = vmul.f32 %v5133_v2, %v5183_v17 }
  0xe1   : > { %6520 = vst [vmem:[#allocation82_spill] sm:$0xff] %v5364_v62  ;;  %v5394_v62 = vld [vmem:[#allocation2 + $0xdf] sm:$0xff]  ;;  %1887 = vmatmul.bf16.gmra.mxu3 %v1778_v49  ;;  %v5412_v36 = vmul.f32 %v5127_v10, %v5406_v8  ;;  %v5416_v26 = vmul.f32 %v5406_v8, %v5400_v60 }
  0xe2   : > { %6521 = vst [vmem:[#allocation83_spill] sm:$0xff] %v5368_v55  ;;  %v5404_v48 = vmul.f32 %v5394_v62, %v5396_v24 }
  0xe3   : > { %6522 = vst [vmem:[#allocation84_spill] sm:$0xff] %v5372_v19  ;;  %v1513_v19 = vpack.c.bf16 %v1488_v53, %v1487_v44  ;;  %v5488_v53 = vld [vmem:[#allocation2 + $0xf1] sm:$0xff]  ;;  %v5490_v44 = vld [vmem:[#allocation2 + $0x101] sm:$0xff] }
  0xe4   : > { %6523 = vst [vmem:[#allocation85_spill] sm:$0xff] %v5378_v51  ;;  %v2014_v51 = vpack.c.bf16 %v1990_v6, %v1989_v27  ;;  %v5408_v27 = vpop.permute.xlu1 %1412  ;;  %v5428_v6 = vpop.f32.mrf.mxu1 }
  0xe5   : > { %6524 = vst [vmem:[#allocation86_spill] sm:$0xff] %v5382_v18  ;;  %v5420_v3 = vmul.f32 %v5408_v27, %v5348_v1  ;;  %v5430_v49 = vpop.f32.mrf.mxu0  ;;  %v861_v18 = vmul.f32 %v5099_v20, %v5245_v41 }
  0xe6   : > { %6525 = vst [vmem:[#allocation87_spill] sm:$0xff] %v5390_v9  ;;  %2131 = vmatmul.bf16.gmra.mxu0 %v2014_v51  ;;  %v5424_v51 = vmul.f32 %v5279_v58, %v5408_v27 }
  0xe7   : > { %6526 = vst [vmem:[#allocation88_spill] sm:$0xff] %v5394_v62  ;;  %v886_v7 = vpack.c.bf16 %v861_v18, %v860_v38 }
  0xe8   : > { %6527 = vst [vmem:[#allocation89_spill] sm:$0xff] %v5398_v61  ;;  %v5444_v55 = vpop.permute.xlu2 %810  ;;  %v5446_v16 = vpop.permute.xlu0 %785 }
  0xe9   : > { %6528 = vst [vmem:[#allocation90_spill] sm:$0xff] %v5404_v48  ;;  %v5454_v45 = vmul.f32 %v5436_v23, %v5444_v55  ;;  %v864_v48 = vmul.f32 %v5026_v29, %v5360_v42 }
  0xea   : > { %6529 = vst [vmem:[#allocation91_spill] sm:$0xff] %v5412_v36  ;;  %v5468_v36 = vpop.f32.mrf.mxu2 }
  0xeb   : > { %6530 = vst [vmem:[#allocation92_spill] sm:$0xff] %v5416_v26  ;;  %v5450_v26 = vld [vmem:[#allocation2 + $0xbf] sm:$0xff] }
  0xec   : > { %6531 = vst [vmem:[#allocation93_spill] sm:$0xff] %v5420_v3  ;;  %v5456_v20 = vpop.permute.xlu1 %1417  ;;  %v5462_v31 = vmul.f32 %v5446_v16, %v5450_v26  ;;  %v1753_v3 = vmul.f32 %v5150_v25, %v5029_v56  ;;  %v5484_v56 = vpop.f32.mrf.mxu1 }
  0xed   : > { %6532 = vst [vmem:[#allocation94_spill] sm:$0xff] %v5424_v51  ;;  %v5466_v41 = vmul.f32 %v5456_v20, %v5400_v60  ;;  %v5474_v51 = vmul.f32 %v5334_v4, %v5456_v20  ;;  %v5478_v61 = vpop.f32.mrf.mxu0  ;;  %1626 = vmatmul.bf16.gmra.mxu2 %v1513_v19  ;;  %v4056_v19 = vld [vmem:[%s6314_s3 + $0x1d8] sm:$0xff] }
  0xee   : > { %6533 = vst [vmem:[#allocation95_spill] sm:$0xff] %v5426_v0  ;;  %v5476_v0 = vpop.f32.mrf.mxu3  ;;  %2858 = vmatpush.bf16.msra.mxu3 %v4056_v19  ;;  %v1755_v19 = vmul.f32 %v5026_v29, %v5306_v12  ;;  %v1758_v29 = vmul.f32 %v5293_v35, %v5181_v5 }
  0xef   : > { %6534 = vst [vmem:[#allocation96_spill] sm:$0xff] %v5428_v6  ;;  %v1779_v6 = vpack.c.bf16 %v1754_v21, %v1753_v3  ;;  %v4048_v21 = vld [vmem:[%s6314_s3 + $0x198] sm:$0xff] }
  0xf0   : > { %6535 = vst [vmem:[#allocation97_spill] sm:$0xff] %v5430_v49  ;;  %1200 = vmatmul.bf16.gmra.mxu1 %v886_v7  ;;  %v5495_v3 = vpop.permute.xlu2 %1452  ;;  %v5497_v38 = vpop.permute.xlu0 %790  ;;  %2624 = vmatpush.bf16.msra.mxu2 %v4048_v21  ;;  %v5514_v7 = vld [vmem:[#allocation2 + $0xcf] sm:$0xff] }
  0xf1   : > { %6536 = vst [vmem:[#allocation98_spill] sm:$0xff] %v5436_v23  ;;  %v2015_v23 = vpack.c.bf16 %v1992_v57, %v1991_v34  ;;  %1892 = vmatmul.bf16.gmra.mxu3 %v1779_v6  ;;  %v5502_v34 = vld [vmem:[#allocation2 + $0xc7] sm:$0xff]  ;;  %v5506_v6 = vmul.f32 %v5488_v53, %v5495_v3  ;;  %v5510_v57 = vmul.f32 %v5490_v44, %v5495_v3 }
  0xf2   : > { %6537 = vst [vmem:[#allocation99_spill] sm:$0xff] %v5444_v55  ;;  %v5518_v21 = vmul.f32 %v5497_v38, %v5502_v34  ;;  %v4040_v55 = vld [vmem:[%s6314_s3 + $0x158] sm:$0xff]  ;;  %v5527_v18 = vpop.f32.mrf.mxu2 }
  0xf3   : > { %6538 = vst [vmem:[#allocation100_spill] sm:$0xff] %v5454_v45  ;;  %2358 = vmatpush.bf16.msra.mxu1 %v4040_v55  ;;  %v1489_v55 = vmul.f32 %v4935_v39, %v5247_v46  ;;  %v1490_v39 = vmul.f32 %v5146_v13, %v5082_v54  ;;  %v1993_v46 = vld [vmem:[#allocation2 + $0xa8] sm:$0xff] }
  0xf4   : > { %6539 = vst [vmem:[#allocation101_spill] sm:$0xff] %v5462_v31  ;;  %v5538_v31 = vld [vmem:[#allocation2 + $0xf9] sm:$0xff]  ;;  %v2016_v13 = vpack.c.bf16 %v1994_v22, %v1993_v46 }
  0xf5   : > { %6540 = vst [vmem:[#allocation102_spill] sm:$0xff] %v5466_v41  ;;  %v5529_v41 = vpop.f32.mrf.mxu0  ;;  %v1514_v62 = vpack.c.bf16 %v1490_v39, %v1489_v55 }
  0xf6   : > { %6541 = vst [vmem:[#allocation103_spill] sm:$0xff] %v5468_v36  ;;  %2136 = vmatmul.bf16.gmra.mxu0 %v2015_v23  ;;  %v5512_v23 = vpop.permute.xlu1 %795  ;;  %v5536_v15 = vpop.f32.mrf.mxu3 }
  0xf7   : > { %6542 = vst [vmem:[#allocation104_spill] sm:$0xff] %v5474_v51  ;;  %v5522_v36 = vmul.f32 %v5514_v7, %v5512_v23  ;;  %v5540_v51 = vpop.f32.mrf.mxu1 }
  0xf8   : > { %6543 = vst [vmem:[#allocation105_spill] sm:$0xff] %v5476_v0  ;;  %v863_v0 = vmul.f32 %v4983_v50, %v5308_v43 }
  0xf9   : > { %6544 = vst [vmem:[#allocation106_spill] sm:$0xff] %v5484_v56  ;;  %v5550_v56 = vpop.permute.xlu0 %1432 }
  0xfa   : > { %6545 = vst [vmem:[#allocation107_spill] sm:$0xff] %v5490_v44  ;;  %v5570_v12 = vmul.f32 %v5281_v32, %v5550_v56  ;;  %v865_v32 = vmul.f32 %v5181_v5, %v5239_v59  ;;  %v867_v5 = vmul.f32 %v5293_v35, %v5446_v16  ;;  %v6582_v35 = vld [vmem:[#allocation82_spill] sm:$0xff] }
  0xfb   : > { %6546 = vst [vmem:[#allocation108_spill] sm:$0xff] %v5495_v3  ;;  %v887_v3 = vpack.c.bf16 %v863_v0, %v862_v11  ;;  %v5590_v11 = vld [vmem:[#allocation2 + $0x10f] sm:$0xff] }
  0xfc   : > { %6547 = vst [vmem:[#allocation109_spill] sm:$0xff] %v5506_v6  ;;  %v3004_v6 = vld [vmem:[#allocation2 + $0x111] sm:$0xff] }
  0xfd   : > { %6548 = vst [vmem:[#allocation110_spill] sm:$0xff] %v5510_v57  ;;  %v5580_v49 = vpop.f32.mrf.mxu0  ;;  %1631 = vmatmul.bf16.gmra.mxu2 %v1514_v62 }
  0xfe   : > { %6549 = vst [vmem:[#allocation111_spill] sm:$0xff] %v5514_v7  ;;  %v5562_v50 = vpop.permute.xlu1 %800  ;;  %v5588_v7 = vpop.f32.mrf.mxu2 }
  0xff   : > { %6550 = vst [vmem:[#allocation112_spill] sm:$0xff] %v5518_v21  ;;  %v1756_v21 = vmul.f32 %v5308_v43, %v5239_v59  ;;  %v5592_v0 = vpop.f32.mrf.mxu3  ;;  %v5606_v39 = vpop.f32.mrf.mxu1 }
 0x100   : > { %6551 = vst [vmem:[#allocation113_spill] sm:$0xff] %v5522_v36  ;;  %v5556_v36 = vld [vmem:[#allocation2 + $0xe1] sm:$0xff]  ;;  %1205 = vmatmul.bf16.gmra.mxu1 %v887_v3 }
 0x101   : > { %6552 = vst [vmem:[#allocation114_spill] sm:$0xff] %v5527_v18  ;;  %v5548_v18 = vpop.permute.xlu2 %1457  ;;  %v5574_v43 = vmul.f32 %v5550_v56, %v5556_v36  ;;  %v1780_v54 = vpack.c.bf16 %v1756_v21, %v1755_v19  ;;  %v5596_v19 = vld [vmem:[#allocation2 + $0xe9] sm:$0xff]  ;;  %v5602_v62 = vpop.permute.xlu0 %1437 }
 0x102   : > { %6553 = vst [vmem:[#allocation115_spill] sm:$0xff] %v5536_v15  ;;  %v5560_v25 = vmul.f32 %v5538_v31, %v5548_v18  ;;  %v5566_v15 = vld [vmem:[#allocation2 + $0xd7] sm:$0xff]  ;;  %v5610_v46 = vmul.f32 %v5336_v14, %v5602_v62  ;;  %v5614_v22 = vmul.f32 %v5602_v62, %v5596_v19 }
 0x103   : > { %6554 = vst [vmem:[#allocation116_spill] sm:$0xff] %v5538_v31  ;;  %1897 = vmatmul.bf16.gmra.mxu3 %v1780_v54 }
 0x104   : > { %6555 = vst [vmem:[#allocation117_spill] sm:$0xff] %v5540_v51  ;;  %v5578_v51 = vmul.f32 %v5566_v15, %v5562_v50 }
 0x105   : > { %6556 = vst [vmem:[#allocation118_spill] sm:$0xff] %v5560_v25  ;;  %v5624_v9 = vpop.f32.mrf.mxu0 }
 0x106   : > { %6557 = vst [vmem:[#allocation119_spill] sm:$0xff] %v5570_v12  ;;  %2141 = vmatmul.bf16.gmra.mxu0 %v2016_v13  ;;  %v5604_v3 = vpop.permute.xlu1 %1442  ;;  %v5636_v12 = vpop.f32.mrf.mxu2 }
 0x107   : > { %6558 = vst [vmem:[#allocation120_spill] sm:$0xff] %v5574_v43  ;;  %v5618_v54 = vmul.f32 %v5604_v3, %v5556_v36  ;;  %v5622_v13 = vmul.f32 %v5488_v53, %v5604_v3  ;;  %v5650_v42 = vpop.f32.mrf.mxu3 }
 0x108   : > { %6559 = vst [vmem:[#allocation121_spill] sm:$0xff] %v5578_v51  ;;  %v1492_v51 = vmul.f32 %v5075_v28, %v5358_v40  ;;  %v1995_v28 = vld [vmem:[#allocation2 + $0xb8] sm:$0xff]  ;;  %v1996_v40 = vld [vmem:[#allocation2 + $0xc0] sm:$0xff] }
 0x109   : > { %6560 = vst [vmem:[#allocation122_spill] sm:$0xff] %v5588_v7  ;;  %v5594_v21 = vpop.permute.xlu2 %835  ;;  %v5644_v4 = vpop.permute.xlu0 %815  ;;  %v6579_v7 = vld [vmem:[#allocation39_spill] sm:$0xff] }
 0x10a   : > { %6561 = vst [vmem:[#allocation123_spill] sm:$0xff] %v5590_v11  ;;  %v5600_v55 = vmul.f32 %v5590_v11, %v5594_v21  ;;  %v1171_v2 = vpop.f32.mrf.mxu1  ;;  %v1515_v43 = vpack.c.bf16 %v1492_v51, %v1491_v52  ;;  %v5679_v51 = vld [vmem:[#allocation2 + $0xf7] sm:$0xff] }
 0x10b   : > { %6562 = vst [vmem:[#allocation124_spill] sm:$0xff] %v5592_v0  ;;  %v1781_v0 = vpack.c.bf16 %v1758_v29, %v1757_v37  ;;  %v1172_v37 = vadd.f32 %v1171_v2, %v5067_v47 }
 0x10c   : > { %6563 = vst [vmem:[#allocation125_spill] sm:$0xff] %v5594_v21 }
 0x10d   : > { %6564 = vst [vmem:[#allocation126_spill] sm:$0xff] %v5600_v55  ;;  %1636 = vmatmul.bf16.gmra.mxu2 %v1515_v43 }
 0x10e   : > { %6565 = vst [vmem:[#allocation127_spill] sm:$0xff] %v5606_v39 }
 0x10f   : > { %6566 = vst [vmem:[#allocation128_spill] sm:$0xff] %v5610_v46  ;;  %v5646_v46 = vpop.permute.xlu1 %1447 }
 0x110   : > { %6567 = vst [vmem:[#allocation129_spill] sm:$0xff] %v5614_v22  ;;  %v5642_v22 = vld [vmem:[#allocation2 + $0xef] sm:$0xff]  ;;  %v5658_v17 = vmul.f32 %v5646_v46, %v5596_v19  ;;  %v5662_v59 = vmul.f32 %v5538_v31, %v5646_v46  ;;  %v1597_v52 = vpop.f32.mrf.mxu2 }
 0x111   : > { %6568 = vst [vmem:[#allocation130_spill] sm:$0xff] %v5618_v54  ;;  %v5654_v54 = vmul.f32 %v5644_v4, %v5642_v22  ;;  %v5681_v43 = vpop.permute.xlu0 %820  ;;  %v1863_v47 = vpop.f32.mrf.mxu3 }
 0x112   : > { %6569 = vst [vmem:[#allocation131_spill] sm:$0xff] %v5622_v13  ;;  %v888_v13 = vpack.c.bf16 %v865_v32, %v864_v48  ;;  %v4047_v32 = vld [vmem:[%s6314_s3 + $0x190] sm:$0xff] }
 0x113   : > { %6570 = vst [vmem:[#allocation132_spill] sm:$0xff] %v5636_v12  ;;  %v2017_v12 = vpack.c.bf16 %v1996_v40, %v1995_v28  ;;  %1902 = vmatmul.bf16.gmra.mxu3 %v1781_v0  ;;  %2625 = vmatpush.bf16.msra.mxu2 %v4047_v32  ;;  %v4055_v48 = vld [vmem:[%s6314_s3 + $0x1d0] sm:$0xff]  ;;  %v1677_v0 = vadd.f32 %v1597_v52, %v1172_v37  ;;  %v5685_v28 = vld [vmem:[#allocation2 + $0xff] sm:$0xff] }
 0x114   : > { %6571 = vst [vmem:[#allocation133_spill] sm:$0xff] %v5650_v42  ;;  %v5666_v42 = vpop.f32.mrf.mxu0  ;;  %1210 = vmatmul.bf16.gmra.mxu1 %v888_v13  ;;  %v5689_v40 = vmul.f32 %v5681_v43, %v5679_v51  ;;  %2859 = vmatpush.bf16.msra.mxu3 %v4055_v48  ;;  %v4039_v32 = vld [vmem:[%s6314_s3 + $0x150] sm:$0xff]  ;;  %v6581_v48 = vld [vmem:[#allocation58_spill] sm:$0xff] }
 0x115   : > { %6572 = vst [vmem:[#allocation134_spill] sm:$0xff] %v5654_v54  ;;  %v1943_v2 = vadd.f32 %v1863_v47, %v1677_v0  ;;  %2359 = vmatpush.bf16.msra.mxu1 %v4039_v32  ;;  %v4063_v37 = vld [vmem:[%s6314_s3 + $0x210] sm:$0xff]  ;;  %v1493_v0 = vmul.f32 %v5125_v63, %v5406_v8  ;;  %v1494_v47 = vmul.f32 %v5077_v33, %v5408_v27  ;;  %v1997_v8 = vld [vmem:[#allocation2 + $0xc8] sm:$0xff] }
 0x116   : > { %6573 = vst [vmem:[#allocation135_spill] sm:$0xff] %v5658_v17  ;;  %2146 = vmatmul.bf16.gmra.mxu0 %v2017_v12  ;;  %v1173_v12 = vpop.f32.mrf.mxu1  ;;  %v3003_v32 = vld [vmem:[#allocation2 + $0x109] sm:$0xff]  ;;  %v1759_v54 = vmul.f32 %v6582_v35, %v6581_v48 }
 0x117   : > { %6574 = vst [vmem:[#allocation136_spill] sm:$0xff] %v5662_v59  ;;  %v5683_v13 = vpop.permute.xlu1 %825  ;;  %v5704_v52 = vadd.f32 %v5478_v61, %v1943_v2  ;;  %v1174_v17 = vadd.f32 %v1173_v12, %v6579_v7  ;;  %3125 = vmatpush.bf16.msra.mxu0 %v4063_v37  ;;  %v6580_v61 = vld [vmem:[#allocation47_spill] sm:$0xff]  ;;  %v5726_v7 = vmul.f32 %v3003_v32, %v5548_v18  ;;  %v5728_v12 = vld [vmem:[#allocation2 + $0x107] sm:$0xff] }
 0x118   : > { %6575 = vst [vmem:[#allocation137_spill] sm:$0xff] %v5685_v28  ;;  %v5693_v29 = vmul.f32 %v5685_v28, %v5683_v13  ;;  %v1760_v2 = vmul.f32 %v6580_v61, %v5446_v16  ;;  %v1599_v45 = vpop.f32.mrf.mxu2  ;;  %v1998_v27 = vld [vmem:[#allocation2 + $0xd0] sm:$0xff]  ;;  %v1516_v57 = vpack.c.bf16 %v1494_v47, %v1493_v0  ;;  %v3005_v0 = vld [vmem:[#allocation2 + $0x119] sm:$0xff]  ;;  %v3006_v47 = vld [vmem:[#allocation2 + $0x121] sm:$0xff] }
 0x119   : > { %6576 = vst [vmem:[#allocation138_spill] sm:$0xff] %v5689_v40  ;;  %v866_v40 = vmul.f32 %v6581_v48, %v5295_v30  ;;  %v1678_v33 = vadd.f32 %v1599_v45, %v1174_v17  ;;  %v1865_v37 = vpop.f32.mrf.mxu3  ;;  %v5741_v11 = vpack.c.bf16 %v1998_v27, %v1997_v8 }
 0x11a   : > { %6577 = vst [vmem:[#allocation139_spill] sm:$0xff] %v5693_v29  ;;  %v5719_v29 = vpop.permute.xlu0 %1462 }
 0x11b   : > { %6578 = vst [vmem:[#allocation140_spill] sm:$0xff] %v5704_v52  ;;  %v5732_v16 = vmul.f32 %v5490_v44, %v5719_v29  ;;  %v5735_v30 = vmul.f32 %v3004_v6, %v5719_v29  ;;  %v1944_v17 = vadd.f32 %v1865_v37, %v1678_v33  ;;  %v889_v48 = vpack.c.bf16 %v867_v5, %v866_v40  ;;  %v2506_v44 = vld [vmem:[#allocation2 + $0x11f] sm:$0xff] }
 0x11c   : > { %v5698_v39 = vpop.f32.mrf.mxu0  ;;  %v1782_v52 = vpack.c.bf16 %v1760_v2, %v1759_v54  ;;  %v6585_v54 = vld [vmem:[#allocation46_spill] sm:$0xff] }
 0x11d   : > { %6583 = vst [vmem:[#allocation39_spill] sm:$0xff] %v5732_v16  ;;  %1641 = vmatmul.bf16.gmra.mxu2 %v1516_v57  ;;  %v5750_v21 = vadd.f32 %v5529_v41, %v1944_v17 }
 0x11e   : > { %v1176_v59 = vpop.f32.mrf.mxu1 }
 0x11f   : > { %v5721_v63 = vpop.permute.xlu1 %830  ;;  %v1177_v40 = vadd.f32 %v1176_v59, %v6585_v54  ;;  %v6588_v54 = vld [vmem:[#allocation55_spill] sm:$0xff] }
 0x120   : > { %v5739_v45 = vmul.f32 %v5728_v12, %v5721_v63  ;;  %v1602_v2 = vpop.f32.mrf.mxu2 }
 0x121   : > { %v1679_v27 = vadd.f32 %v1602_v2, %v1177_v40  ;;  %v1868_v37 = vpop.f32.mrf.mxu3  ;;  %v1495_v2 = vmul.f32 %v5127_v10, %v5456_v20  ;;  %v6589_v40 = vld [vmem:[#allocation56_spill] sm:$0xff] }
 0x122   : > { %6584 = vst [vmem:[#allocation47_spill] sm:$0xff] %v5739_v45  ;;  %v5756_v33 = vpop.permute.xlu0 %1467  ;;  %v1761_v31 = vmul.f32 %v6589_v40, %v5497_v38  ;;  %v6590_v10 = vld [vmem:[#allocation68_spill] sm:$0xff] }
 0x123   : > { %1907 = vmatmul.bf16.gmra.mxu3 %v1782_v52  ;;  %v5761_v57 = vmul.f32 %v3003_v32, %v5756_v33  ;;  %v5764_v41 = vmul.f32 %v3005_v0, %v5756_v33  ;;  %v1496_v20 = vmul.f32 %v6590_v10, %v5348_v1 }
 0x124   : > { %v5747_v28 = vpop.f32.mrf.mxu0  ;;  %1215 = vmatmul.bf16.gmra.mxu1 %v889_v48  ;;  %v1945_v48 = vadd.f32 %v1868_v37, %v1679_v27  ;;  %v5787_v27 = vpop.permute.xlu2 %840  ;;  %v2505_v37 = vld [vmem:[#allocation2 + $0x117] sm:$0xff] }
 0x125   : > { %6586 = vst [vmem:[#allocation58_spill] sm:$0xff] %v5761_v57  ;;  %v5799_v45 = vmul.f32 %v2505_v37, %v5787_v27 }
 0x126   : > { %2151 = vmatmul.bf16.gmra.mxu0 %v5741_v11  ;;  %v1178_v52 = vpop.f32.mrf.mxu1  ;;  %v5779_v0 = vadd.f32 %v5580_v49, %v1945_v48  ;;  %v1762_v49 = vmul.f32 %v5512_v23, %v5450_v26 }
 0x127   : > { %v5758_v8 = vpop.permute.xlu1 %1472  ;;  %v1179_v5 = vadd.f32 %v1178_v52, %v6588_v54 }
 0x128   : > { %v5767_v59 = vmul.f32 %v3004_v6, %v5758_v8  ;;  %v5770_v17 = vmul.f32 %v3006_v47, %v5758_v8  ;;  %v868_v6 = vmul.f32 %v6582_v35, %v5497_v38  ;;  %v869_v47 = vmul.f32 %v6580_v61, %v5512_v23  ;;  %v1604_v48 = vpop.f32.mrf.mxu2  ;;  %v1999_v61 = vld [vmem:[#allocation2 + $0xd8] sm:$0xff] }
 0x129   : > { %v1680_v57 = vadd.f32 %v1604_v48, %v1179_v5  ;;  %v1870_v54 = vpop.f32.mrf.mxu3  ;;  %v1517_v23 = vpack.c.bf16 %v1496_v20, %v1495_v2  ;;  %v1783_v1 = vpack.c.bf16 %v1762_v49, %v1761_v31  ;;  %v4054_v31 = vld [vmem:[%s6314_s3 + $0x1c8] sm:$0xff] }
 0x12a   : > { %6587 = vst [vmem:[#allocation82_spill] sm:$0xff] %v5767_v59  ;;  %v5796_v35 = vpop.permute.xlu0 %845  ;;  %v2000_v59 = vld [vmem:[#allocation2 + $0xe0] sm:$0xff]  ;;  %v890_v25 = vpack.c.bf16 %v869_v47, %v868_v6  ;;  %2860 = vmatpush.bf16.msra.mxu3 %v4054_v31  ;;  %v4062_v48 = vld [vmem:[%s6314_s3 + $0x208] sm:$0xff] }
 0x12b   : > { %v5802_v52 = vmul.f32 %v2506_v44, %v5796_v35  ;;  %v1946_v55 = vadd.f32 %v1870_v54, %v1680_v57  ;;  %v5806_v10 = vpack.c.bf16 %v2000_v59, %v1999_v61  ;;  %v4046_v44 = vld [vmem:[%s6314_s3 + $0x188] sm:$0xff]  ;;  %v6591_v57 = vld [vmem:[#allocation64_spill] sm:$0xff]  ;;  %v1498_v61 = vmul.f32 %v5279_v58, %v5550_v56  ;;  %3126 = vmatpush.bf16.msra.mxu0 %v4062_v48  ;;  %v6594_v58 = vld [vmem:[#allocation111_spill] sm:$0xff] }
 0x12c   : > { %v5776_v32 = vpop.f32.mrf.mxu0  ;;  %2626 = vmatpush.bf16.msra.mxu2 %v4046_v44  ;;  %v870_v54 = vmul.f32 %v6589_v40, %v5562_v50  ;;  %v2001_v31 = vld [vmem:[#allocation2 + $0xe8] sm:$0xff]  ;;  %v1764_v56 = vmul.f32 %v6594_v58, %v5396_v24 }
 0x12d   : > { %1646 = vmatmul.bf16.gmra.mxu2 %v1517_v23  ;;  %v5811_v37 = vadd.f32 %v5624_v9, %v1946_v55  ;;  %v4038_v55 = vld [vmem:[%s6314_s3 + $0x148] sm:$0xff] }
 0x12e   : > { %v1181_v38 = vpop.f32.mrf.mxu1  ;;  %2360 = vmatpush.bf16.msra.mxu1 %v4038_v55 }
 0x12f   : > { %v1182_v2 = vadd.f32 %v1181_v38, %v6591_v57  ;;  %v6592_v38 = vld [vmem:[#allocation75_spill] sm:$0xff]  ;;  %v6593_v57 = vld [vmem:[#allocation78_spill] sm:$0xff] }
 0x130   : > { %v1607_v6 = vpop.f32.mrf.mxu2 }
 0x131   : > { %v1873_v59 = vpop.f32.mrf.mxu3 }
 0x133   : > { %1912 = vmatmul.bf16.gmra.mxu3 %v1783_v1  ;;  %v1763_v1 = vmul.f32 %v5562_v50, %v5502_v34 }
 0x134   : > { %v5808_v5 = vpop.f32.mrf.mxu0  ;;  %1220 = vmatmul.bf16.gmra.mxu1 %v890_v25  ;;  %v1681_v25 = vadd.f32 %v1607_v6, %v1182_v2  ;;  %v1497_v2 = vmul.f32 %v6593_v57, %v5400_v60 }
 0x135   : > { %v1784_v48 = vpack.c.bf16 %v1764_v56, %v1763_v1  ;;  %v6598_v56 = vld [vmem:[#allocation97_spill] sm:$0xff] }
 0x136   : > { %2156 = vmatmul.bf16.gmra.mxu0 %v5806_v10  ;;  %v1183_v47 = vpop.f32.mrf.mxu1  ;;  %v1947_v9 = vadd.f32 %v1873_v59, %v1681_v25  ;;  %v2002_v25 = vld [vmem:[#allocation2 + $0xf0] sm:$0xff]  ;;  %v1518_v55 = vpack.c.bf16 %v1498_v61, %v1497_v2 }
 0x137   : > { %v1184_v23 = vadd.f32 %v1183_v47, %v6592_v38  ;;  %v5845_v50 = vpack.c.bf16 %v2002_v25, %v2001_v31  ;;  %v873_v25 = vmul.f32 %v6594_v58, %v5644_v4 }
 0x138   : > { %v5830_v20 = vadd.f32 %v5666_v42, %v1947_v9  ;;  %v1609_v44 = vpop.f32.mrf.mxu2  ;;  %v871_v42 = vmul.f32 %v5396_v24, %v5450_v26  ;;  %v6595_v26 = vld [vmem:[#allocation87_spill] sm:$0xff] }
 0x139   : > { %v1682_v6 = vadd.f32 %v1609_v44, %v1184_v23  ;;  %v1875_v40 = vpop.f32.mrf.mxu3 }
 0x13a   : > { %v891_v9 = vpack.c.bf16 %v871_v42, %v870_v54  ;;  %v6596_v42 = vld [vmem:[#allocation76_spill] sm:$0xff] }
 0x13b   : > { %v1948_v47 = vadd.f32 %v1875_v40, %v1682_v6  ;;  %v1499_v6 = vmul.f32 %v6596_v42, %v5602_v62 }
 0x13c   : > { %v5824_v49 = vpop.f32.mrf.mxu0 }
 0x13d   : > { %1651 = vmatmul.bf16.gmra.mxu2 %v1518_v55  ;;  %v5850_v60 = vadd.f32 %v5698_v39, %v1948_v47  ;;  %v6597_v39 = vld [vmem:[#allocation66_spill] sm:$0xff]  ;;  %v6600_v55 = vld [vmem:[#allocation99_spill] sm:$0xff] }
 0x13e   : > { %v1186_v59 = vpop.f32.mrf.mxu1  ;;  %v1500_v31 = vmul.f32 %v6597_v39, %v5604_v3  ;;  %v1765_v62 = vmul.f32 %v5566_v15, %v6600_v55  ;;  %v6601_v39 = vld [vmem:[#allocation45_spill] sm:$0xff] }
 0x13f   : > { %v1187_v23 = vadd.f32 %v1186_v59, %v6595_v26  ;;  %v6599_v59 = vld [vmem:[#allocation88_spill] sm:$0xff] }
 0x140   : > { %v1612_v24 = vpop.f32.mrf.mxu2  ;;  %v1766_v47 = vmul.f32 %v6599_v59, %v5644_v4  ;;  %v2003_v26 = vld [vmem:[#allocation2 + $0xf8] sm:$0xff]  ;;  %v1519_v58 = vpack.c.bf16 %v1500_v31, %v1499_v6  ;;  %v4045_v6 = vld [vmem:[%s6314_s3 + $0x180] sm:$0xff] }
 0x141   : > { %v1683_v44 = vadd.f32 %v1612_v24, %v1187_v23  ;;  %v1878_v57 = vpop.f32.mrf.mxu3  ;;  %v2004_v23 = vld [vmem:[#allocation2 + $0x100] sm:$0xff]  ;;  %2627 = vmatpush.bf16.msra.mxu2 %v4045_v6 }
 0x142   : > { %v1785_v4 = vpack.c.bf16 %v1766_v47, %v1765_v62  ;;  %v875_v62 = vmul.f32 %v6599_v59, %v5683_v13  ;;  %v6605_v59 = vld [vmem:[#allocation65_spill] sm:$0xff] }
 0x143   : > { %1917 = vmatmul.bf16.gmra.mxu3 %v1784_v48  ;;  %v1949_v61 = vadd.f32 %v1878_v57, %v1683_v44  ;;  %v872_v48 = vmul.f32 %v6600_v55, %v5502_v34  ;;  %v4037_v55 = vld [vmem:[%s6314_s3 + $0x140] sm:$0xff] }
 0x144   : > { %v5847_v38 = vpop.f32.mrf.mxu0  ;;  %1225 = vmatmul.bf16.gmra.mxu1 %v891_v9 }
 0x145   : > { %v5857_v2 = vadd.f32 %v5747_v28, %v1949_v61  ;;  %v892_v57 = vpack.c.bf16 %v873_v25, %v872_v48  ;;  %v5875_v61 = vpack.c.bf16 %v2004_v23, %v2003_v26  ;;  %2361 = vmatpush.bf16.msra.mxu1 %v4037_v55  ;;  %v1501_v26 = vmul.f32 %v5336_v14, %v5646_v46 }
 0x146   : > { %2161 = vmatmul.bf16.gmra.mxu0 %v5845_v50  ;;  %v1188_v54 = vpop.f32.mrf.mxu1  ;;  %v874_v23 = vmul.f32 %v5566_v15, %v5681_v43 }
 0x147   : > { %v1189_v40 = vadd.f32 %v1188_v54, %v6598_v56  ;;  %v4061_v54 = vld [vmem:[%s6314_s3 + $0x200] sm:$0xff] }
 0x148   : > { %v1614_v9 = vpop.f32.mrf.mxu2  ;;  %3127 = vmatpush.bf16.msra.mxu0 %v4061_v54  ;;  %v4053_v56 = vld [vmem:[%s6314_s3 + $0x1c0] sm:$0xff]  ;;  %v893_v15 = vpack.c.bf16 %v875_v62, %v874_v23 }
 0x149   : > { %v1684_v28 = vadd.f32 %v1614_v9, %v1189_v40  ;;  %v1880_v24 = vpop.f32.mrf.mxu3  ;;  %2861 = vmatpush.bf16.msra.mxu3 %v4053_v56  ;;  %v6606_v56 = vld [vmem:[#allocation74_spill] sm:$0xff] }
 0x14b   : > { %v1950_v44 = vadd.f32 %v1880_v24, %v1684_v28  ;;  %v6602_v24 = vld [vmem:[#allocation57_spill] sm:$0xff] }
 0x14c   : > { %v5854_v1 = vpop.f32.mrf.mxu0 }
 0x14d   : > { %1656 = vmatmul.bf16.gmra.mxu2 %v1519_v58  ;;  %v5880_v34 = vadd.f32 %v5776_v32, %v1950_v44  ;;  %v6603_v44 = vld [vmem:[#allocation98_spill] sm:$0xff]  ;;  %v1768_v58 = vmul.f32 %v5683_v13, %v5642_v22  ;;  %v6607_v13 = vld [vmem:[#allocation69_spill] sm:$0xff] }
 0x14e   : > { %v1191_v3 = vpop.f32.mrf.mxu1 }
 0x14f   : > { %v1192_v31 = vadd.f32 %v1191_v3, %v6601_v39 }
 0x150   : > { %v1617_v25 = vpop.f32.mrf.mxu2 }
 0x151   : > { %v1685_v40 = vadd.f32 %v1617_v25, %v1192_v31  ;;  %v1883_v47 = vpop.f32.mrf.mxu3 }
 0x153   : > { %1922 = vmatmul.bf16.gmra.mxu3 %v1785_v4  ;;  %v1951_v9 = vadd.f32 %v1883_v47, %v1685_v40  ;;  %v2022_v40 = vpack.c.bf16 %v6606_v56, %v6605_v59  ;;  %v6613_v56 = vld [vmem:[#allocation11_spill] sm:$0xff] }
 0x154   : > { %v5877_v42 = vpop.f32.mrf.mxu0  ;;  %1230 = vmatmul.bf16.gmra.mxu1 %v892_v57  ;;  %v1767_v57 = vmul.f32 %v6603_v44, %v5681_v43 }
 0x155   : > { %v5896_v28 = vadd.f32 %v5808_v5, %v1951_v9  ;;  %v6604_v5 = vld [vmem:[#allocation108_spill] sm:$0xff] }
 0x156   : > { %2166 = vmatmul.bf16.gmra.mxu0 %v5875_v61  ;;  %v1193_v32 = vpop.f32.mrf.mxu1  ;;  %v1502_v4 = vmul.f32 %v6604_v5, %v5556_v36  ;;  %v1786_v25 = vpack.c.bf16 %v1768_v58, %v1767_v57  ;;  %v6608_v57 = vld [vmem:[#allocation85_spill] sm:$0xff] }
 0x157   : > { %v1194_v3 = vadd.f32 %v1193_v32, %v6602_v24 }
 0x158   : > { %v1619_v54 = vpop.f32.mrf.mxu2  ;;  %v1520_v31 = vpack.c.bf16 %v1502_v4, %v1501_v26  ;;  %v1503_v4 = vmul.f32 %v5548_v18, %v5596_v19  ;;  %v6611_v18 = vld [vmem:[#allocation96_spill] sm:$0xff] }
 0x159   : > { %v1686_v6 = vadd.f32 %v1619_v54, %v1194_v3  ;;  %v1885_v14 = vpop.f32.mrf.mxu3  ;;  %v1504_v3 = vmul.f32 %v5488_v53, %v5719_v29  ;;  %v1769_v54 = vmul.f32 %v5721_v63, %v5679_v51 }
 0x15b   : > { %v1952_v39 = vadd.f32 %v1885_v14, %v1686_v6  ;;  %v6609_v6 = vld [vmem:[#allocation125_spill] sm:$0xff] }
 0x15c   : > { %v5893_v48 = vpop.f32.mrf.mxu0  ;;  %v877_v14 = vmul.f32 %v6609_v6, %v5642_v22  ;;  %v6612_v22 = vld [vmem:[#allocation15_spill] sm:$0xff] }
 0x15d   : > { %1661 = vmatmul.bf16.gmra.mxu2 %v1520_v31  ;;  %v5916_v43 = vadd.f32 %v5824_v49, %v1952_v39  ;;  %v876_v49 = vmul.f32 %v6603_v44, %v5721_v63  ;;  %v1521_v31 = vpack.c.bf16 %v1504_v3, %v1503_v4  ;;  %v6618_v4 = vld [vmem:[#allocation123_spill] sm:$0xff] }
 0x15e   : > { %v1196_v46 = vpop.f32.mrf.mxu1 }
 0x15f   : > { %v1197_v36 = vadd.f32 %v1196_v46, %v6607_v13  ;;  %v6610_v46 = vld [vmem:[#allocation137_spill] sm:$0xff]  ;;  %v894_v44 = vpack.c.bf16 %v877_v14, %v876_v49  ;;  %v6616_v49 = vld [vmem:[#allocation107_spill] sm:$0xff] }
 0x160   : > { %v1622_v32 = vpop.f32.mrf.mxu2  ;;  %v1770_v39 = vmul.f32 %v6610_v46, %v6609_v6  ;;  %v1772_v6 = vmul.f32 %v6618_v4, %v5796_v35  ;;  %v6624_v4 = vld [vmem:[#allocation14_spill] sm:$0xff] }
 0x161   : > { %v1687_v9 = vadd.f32 %v1622_v32, %v1197_v36 }
 0x163   : > { %1927 = vmatmul.bf16.gmra.mxu3 %v1786_v25  ;;  %v1787_v25 = vpack.c.bf16 %v1770_v39, %v1769_v54  ;;  %v6617_v54 = vld [vmem:[#allocation106_spill] sm:$0xff]  ;;  %v1771_v39 = vmul.f32 %v5728_v12, %v5787_v27 }
 0x164   : > { %v5913_v47 = vpop.f32.mrf.mxu0  ;;  %1235 = vmatmul.bf16.gmra.mxu1 %v893_v15  ;;  %v1888_v55 = vpop.f32.mrf.mxu3 }
 0x165   : > { %v1953_v26 = vadd.f32 %v1888_v55, %v1687_v9 }
 0x166   : > { %2171 = vmatmul.bf16.gmra.mxu0 %v2022_v40  ;;  %v1198_v23 = vpop.f32.mrf.mxu1  ;;  %v6614_v40 = vpack.c.bf16 %v6612_v22, %v6613_v56 }
 0x167   : > { %v5922_v24 = vadd.f32 %v5847_v38, %v1953_v26  ;;  %v1199_v58 = vadd.f32 %v1198_v23, %v6608_v57  ;;  %v1506_v57 = vmul.f32 %v6616_v49, %v5758_v8 }
 0x168   : > { %v1624_v5 = vpop.f32.mrf.mxu2 }
 0x169   : > { %v1688_v38 = vadd.f32 %v1624_v5, %v1199_v58  ;;  %v879_v58 = vmul.f32 %v6610_v46, %v5796_v35  ;;  %v6619_v35 = vld [vmem:[#allocation117_spill] sm:$0xff] }
 0x16c   : > { %v5919_v62 = vpop.f32.mrf.mxu0  ;;  %v1890_v53 = vpop.f32.mrf.mxu3 }
 0x16d   : > { %v1954_v15 = vadd.f32 %v1890_v53, %v1688_v38  ;;  %1666 = vmatmul.bf16.gmra.mxu2 %v1521_v31  ;;  %v878_v38 = vmul.f32 %v5787_v27, %v5679_v51  ;;  %v6620_v51 = vld [vmem:[#allocation6_spill] sm:$0xff] }
 0x16e   : > { %v1201_v29 = vpop.f32.mrf.mxu1 }
 0x16f   : > { %v5940_v63 = vadd.f32 %v5854_v1, %v1954_v15  ;;  %v1202_v19 = vadd.f32 %v1201_v29, %v6611_v18  ;;  %v6615_v1 = vld [vmem:[#allocation116_spill] sm:$0xff]  ;;  %v895_v8 = vpack.c.bf16 %v879_v58, %v878_v38 }
 0x170   : > { %v1627_v13 = vpop.f32.mrf.mxu2  ;;  %v1505_v3 = vmul.f32 %v6615_v1, %v5756_v33  ;;  %v6621_v18 = vld [vmem:[#allocation4_spill] sm:$0xff] }
 0x171   : > { %v1689_v36 = vadd.f32 %v1627_v13, %v1202_v19  ;;  %v6622_v19 = vpack.c.bf16 %v6620_v51, %v6621_v18  ;;  %v6627_v38 = vld [vmem:[#allocation16_spill] sm:$0xff] }
 0x172   : > { %v1522_v29 = vpack.c.bf16 %v1506_v57, %v1505_v3 }
 0x173   : > { %1932 = vmatmul.bf16.gmra.mxu3 %v1787_v25 }
 0x174   : > { %v5937_v59 = vpop.f32.mrf.mxu0  ;;  %1240 = vmatmul.bf16.gmra.mxu1 %v894_v44  ;;  %v1893_v32 = vpop.f32.mrf.mxu3  ;;  %v1788_v44 = vpack.c.bf16 %v1772_v6, %v1771_v39  ;;  %v6625_v6 = vld [vmem:[#allocation10_spill] sm:$0xff] }
 0x175   : > { %v1955_v55 = vadd.f32 %v1893_v32, %v1689_v36  ;;  %v6623_v32 = vld [vmem:[#allocation127_spill] sm:$0xff] }
 0x176   : > { %3128 = vmatmul.bf16.vlgmr.msra.gmra.mxu0 %v6614_v40  ;;  %v1203_v9 = vpop.f32.mrf.mxu1 }
 0x177   : > { %v5949_v26 = vadd.f32 %v5877_v42, %v1955_v55  ;;  %v1204_v5 = vadd.f32 %v1203_v9, %v6617_v54  ;;  %v2742_v55 = vld [vmem:[#allocation2 + $0x30] sm:$0xff] }
 0x178   : > { %v1629_v14 = vpop.f32.mrf.mxu2 }
 0x179   : > { %v1690_v42 = vadd.f32 %v1629_v14, %v1204_v5  ;;  %v6626_v14 = vpack.c.bf16 %v6624_v4, %v6625_v6  ;;  %v6639_v4 = vld [vmem:[#allocation19_spill] sm:$0xff] }
 0x17c   : > { %v5946_v23 = vpop.f32.mrf.mxu0  ;;  %v1895_v33 = vpop.f32.mrf.mxu3 }
 0x17d   : > { %v1956_v15 = vadd.f32 %v1895_v33, %v1690_v42  ;;  %1671 = vmatmul.bf16.gmra.mxu2 %v1522_v29  ;;  %v6628_v42 = vld [vmem:[#allocation12_spill] sm:$0xff]  ;;  %v6630_v33 = vld [vmem:[#allocation53_spill] sm:$0xff] }
 0x17e   : > { %v1206_v53 = vpop.f32.mrf.mxu1  ;;  %v6629_v39 = vpack.c.bf16 %v6627_v38, %v6628_v42  ;;  %v6631_v29 = vld [vmem:[#allocation24_spill] sm:$0xff]  ;;  %v6642_v42 = vld [vmem:[#allocation30_spill] sm:$0xff] }
 0x17f   : > { %v5965_v31 = vadd.f32 %v5893_v48, %v1956_v15  ;;  %v1207_v25 = vadd.f32 %v1206_v53, %v6619_v35  ;;  %v2741_v48 = vld [vmem:[#allocation2 + $0x28] sm:$0xff] }
 0x180   : > { %v1632_v12 = vpop.f32.mrf.mxu2  ;;  %v2773_v58 = vpack.c.bf16 %v2742_v55, %v2741_v48 }
 0x181   : > { %v1691_v27 = vadd.f32 %v1632_v12, %v1207_v25 }
 0x183   : > { %1937 = vmatmul.bf16.gmra.mxu3 %v1788_v44 }
 0x184   : > { %v2142_v46 = vpop.f32.mrf.mxu0  ;;  %1245 = vmatmul.bf16.gmra.mxu1 %v895_v8  ;;  %v6632_v8 = vld [vmem:[#allocation8_spill] sm:$0xff] }
 0x185   : > { %v6633_v15 = vpack.c.bf16 %v6631_v29, %v6632_v8 }
 0x186   : > { %3133 = vmatmul.bf16.gmra.mxu0 %v6622_v19  ;;  %v1898_v22 = vpop.f32.mrf.mxu3  ;;  %v1208_v56 = vpop.f32.mrf.mxu1 }
 0x187   : > { %v1957_v40 = vadd.f32 %v1898_v22, %v1691_v27  ;;  %v1209_v9 = vadd.f32 %v1208_v56, %v6623_v32  ;;  %v6634_v27 = vld [vmem:[#allocation63_spill] sm:$0xff]  ;;  %v2744_v56 = vld [vmem:[#allocation2 + $0x40] sm:$0xff] }
 0x188   : > { %v1634_v1 = vpop.f32.mrf.mxu2 }
 0x189   : > { %v5972_v36 = vadd.f32 %v5913_v47, %v1957_v40  ;;  %v1692_v3 = vadd.f32 %v1634_v1, %v1209_v9 }
 0x18c   : > { %v2144_v13 = vpop.f32.mrf.mxu0 }
 0x18d   : > { %2628 = vmatmul.bf16.vlgmr.msra.gmra.mxu2 %v6629_v39  ;;  %v6643_v39 = vld [vmem:[#allocation28_spill] sm:$0xff] }
 0x18e   : > { %v1900_v49 = vpop.f32.mrf.mxu3 }
 0x18f   : > { %v1958_v54 = vadd.f32 %v1900_v49, %v1692_v3  ;;  %v6635_v49 = vld [vmem:[#allocation5_spill] sm:$0xff] }
 0x190   : > { %v1637_v44 = vpop.f32.mrf.mxu2 }
 0x191   : > { %v1211_v57 = vpop.f32.mrf.mxu1  ;;  %v5982_v47 = vadd.f32 %v5919_v62, %v1958_v54  ;;  %v2743_v62 = vld [vmem:[#allocation2 + $0x38] sm:$0xff] }
 0x192   : > { %v1212_v53 = vadd.f32 %v1211_v57, %v6630_v33  ;;  %v2774_v55 = vpack.c.bf16 %v2744_v56, %v2743_v62  ;;  %v6636_v57 = vld [vmem:[#allocation3_spill] sm:$0xff]  ;;  %v6638_v54 = vld [vmem:[#allocation20_spill] sm:$0xff]  ;;  %v6644_v33 = vpack.c.bf16 %v6642_v42, %v6643_v39 }
 0x193   : > { %2862 = vmatmul.bf16.vlgmr.msra.gmra.mxu3 %v2773_v58  ;;  %v6637_v58 = vpack.c.bf16 %v6635_v49, %v6636_v57  ;;  %v6640_v6 = vpack.c.bf16 %v6638_v54, %v6639_v4  ;;  %v6649_v57 = vld [vmem:[#allocation9_spill] sm:$0xff]  ;;  %v6652_v4 = vld [vmem:[#allocation103_spill] sm:$0xff] }
 0x194   : > { %v2147_v5 = vpop.f32.mrf.mxu0  ;;  %2362 = vmatmul.bf16.vlgmr.msra.gmra.mxu1 %v6626_v14  ;;  %v1693_v35 = vadd.f32 %v1637_v44, %v1212_v53  ;;  %v6641_v14 = vld [vmem:[#allocation77_spill] sm:$0xff] }
 0x196   : > { %3138 = vmatmul.bf16.gmra.mxu0 %v6633_v15  ;;  %v1903_v25 = vpop.f32.mrf.mxu3 }
 0x197   : > { %v1959_v18 = vadd.f32 %v1903_v25, %v1693_v35 }
 0x198   : > { %v1639_v40 = vpop.f32.mrf.mxu2 }
 0x199   : > { %v1213_v51 = vpop.f32.mrf.mxu1  ;;  %v5989_v12 = vadd.f32 %v5937_v59, %v1959_v18 }
 0x19a   : > { %v1214_v22 = vadd.f32 %v1213_v51, %v6634_v27  ;;  %v6645_v51 = vld [vmem:[#allocation89_spill] sm:$0xff]  ;;  %v2745_v27 = vld [vmem:[#allocation2 + $0x48] sm:$0xff] }
 0x19c   : > { %v2149_v19 = vpop.f32.mrf.mxu0  ;;  %v1694_v32 = vadd.f32 %v1639_v40, %v1214_v22 }
 0x19d   : > { %2633 = vmatmul.bf16.gmra.mxu2 %v6640_v6 }
 0x19e   : > { %v1905_v9 = vpop.f32.mrf.mxu3 }
 0x19f   : > { %v1960_v1 = vadd.f32 %v1905_v9, %v1694_v32 }
 0x1a0   : > { %v1642_v53 = vpop.f32.mrf.mxu2 }
 0x1a1   : > { %v1216_v48 = vpop.f32.mrf.mxu1  ;;  %v5999_v59 = vadd.f32 %v5946_v23, %v1960_v1  ;;  %v2746_v23 = vld [vmem:[#allocation2 + $0x50] sm:$0xff] }
 0x1a2   : > { %v1217_v38 = vadd.f32 %v1216_v48, %v6641_v14  ;;  %v2775_v32 = vpack.c.bf16 %v2746_v23, %v2745_v27  ;;  %v6647_v1 = vld [vmem:[#allocation7_spill] sm:$0xff]  ;;  %v6653_v14 = vld [vmem:[#allocation18_spill] sm:$0xff]  ;;  %v2747_v27 = vld [vmem:[#allocation2 + $0x58] sm:$0xff] }
 0x1a3   : > { %2867 = vmatmul.bf16.gmra.mxu3 %v2774_v55  ;;  %v6646_v55 = vld [vmem:[#allocation23_spill] sm:$0xff] }
 0x1a4   : > { %v2152_v3 = vpop.f32.mrf.mxu0  ;;  %2367 = vmatmul.bf16.gmra.mxu1 %v6637_v58  ;;  %v1695_v29 = vadd.f32 %v1642_v53, %v1217_v38  ;;  %v6648_v49 = vpack.c.bf16 %v6646_v55, %v6647_v1  ;;  %v6650_v58 = vld [vmem:[#allocation25_spill] sm:$0xff]  ;;  %v6654_v38 = vld [vmem:[#allocation34_spill] sm:$0xff]  ;;  %v6658_v1 = vld [vmem:[#allocation27_spill] sm:$0xff] }
 0x1a5   : > { %v6651_v54 = vpack.c.bf16 %v6649_v57, %v6650_v58  ;;  %v6655_v42 = vpack.c.bf16 %v6653_v14, %v6654_v38  ;;  %v6657_v55 = vld [vmem:[#allocation29_spill] sm:$0xff]  ;;  %v6660_v57 = vld [vmem:[#allocation32_spill] sm:$0xff]  ;;  %v6664_v14 = vld [vmem:[#allocation43_spill] sm:$0xff] }
 0x1a6   : > { %3143 = vmatmul.bf16.gmra.mxu0 %v6644_v33  ;;  %v1908_v8 = vpop.f32.mrf.mxu3  ;;  %v6661_v58 = vld [vmem:[#allocation13_spill] sm:$0xff]  ;;  %v6665_v38 = vld [vmem:[#allocation22_spill] sm:$0xff] }
 0x1a7   : > { %v1961_v44 = vadd.f32 %v1908_v8, %v1695_v29 }
 0x1a8   : > { %v1644_v22 = vpop.f32.mrf.mxu2 }
 0x1a9   : > { %v1218_v15 = vpop.f32.mrf.mxu1  ;;  %v6005_v25 = vadd.f32 %v2142_v46, %v1961_v44 }
 0x1aa   : > { %v1219_v18 = vadd.f32 %v1218_v15, %v6645_v51  ;;  %v6656_v51 = vld [vmem:[#allocation114_spill] sm:$0xff] }
 0x1ac   : > { %v2154_v35 = vpop.f32.mrf.mxu0  ;;  %v1696_v62 = vadd.f32 %v1644_v22, %v1219_v18 }
 0x1ad   : > { %2638 = vmatmul.bf16.gmra.mxu2 %v6651_v54  ;;  %v6662_v54 = vpack.c.bf16 %v6660_v57, %v6661_v58  ;;  %v6669_v57 = vld [vmem:[#allocation33_spill] sm:$0xff] }
 0x1ae   : > { %v1910_v56 = vpop.f32.mrf.mxu3 }
 0x1af   : > { %v1962_v9 = vadd.f32 %v1910_v56, %v1696_v62 }
 0x1b0   : > { %v1647_v39 = vpop.f32.mrf.mxu2 }
 0x1b1   : > { %v1221_v40 = vpop.f32.mrf.mxu1  ;;  %v6014_v46 = vadd.f32 %v2144_v13, %v1962_v9  ;;  %v2748_v13 = vld [vmem:[#allocation2 + $0x60] sm:$0xff] }
 0x1b2   : > { %v1222_v6 = vadd.f32 %v1221_v40, %v6652_v4  ;;  %v2776_v40 = vpack.c.bf16 %v2748_v13, %v2747_v27  ;;  %v6663_v4 = vld [vmem:[#allocation122_spill] sm:$0xff]  ;;  %v6667_v27 = vld [vmem:[#allocation132_spill] sm:$0xff] }
 0x1b3   : > { %2872 = vmatmul.bf16.gmra.mxu3 %v2775_v32 }
 0x1b4   : > { %v2157_v48 = vpop.f32.mrf.mxu0  ;;  %2372 = vmatmul.bf16.gmra.mxu1 %v6648_v49  ;;  %v1697_v33 = vadd.f32 %v1647_v39, %v1222_v6  ;;  %v6659_v49 = vpack.c.bf16 %v6657_v55, %v6658_v1 }
 0x1b6   : > { %3148 = vmatmul.bf16.gmra.mxu0 %v6655_v42  ;;  %v1913_v53 = vpop.f32.mrf.mxu3  ;;  %v6666_v42 = vpack.c.bf16 %v6664_v14, %v6665_v38  ;;  %v6674_v14 = vld [vmem:[#allocation54_spill] sm:$0xff] }
 0x1b7   : > { %v1963_v8 = vadd.f32 %v1913_v53, %v1697_v33 }
 0x1b8   : > { %v1649_v23 = vpop.f32.mrf.mxu2 }
 0x1b9   : > { %v1223_v29 = vpop.f32.mrf.mxu1  ;;  %v6020_v44 = vadd.f32 %v2147_v5, %v1963_v8 }
 0x1ba   : > { %v1224_v18 = vadd.f32 %v1223_v29, %v6656_v51 }
 0x1bc   : > { %v2159_v15 = vpop.f32.mrf.mxu0  ;;  %v1698_v22 = vadd.f32 %v1649_v23, %v1224_v18  ;;  %v2749_v23 = vld [vmem:[#allocation2 + $0x68] sm:$0xff] }
 0x1bd   : > { %2643 = vmatmul.bf16.gmra.mxu2 %v6662_v54  ;;  %v6671_v54 = vld [vmem:[#allocation38_spill] sm:$0xff] }
 0x1be   : > { %v1915_v62 = vpop.f32.mrf.mxu3 }
 0x1bf   : > { %v1964_v32 = vadd.f32 %v1915_v62, %v1698_v22 }
 0x1c0   : > { %v1652_v39 = vpop.f32.mrf.mxu2 }
 0x1c1   : > { %v1226_v56 = vpop.f32.mrf.mxu1  ;;  %v6029_v5 = vadd.f32 %v2149_v19, %v1964_v32  ;;  %v2750_v19 = vld [vmem:[#allocation2 + $0x70] sm:$0xff] }
 0x1c2   : > { %v1227_v6 = vadd.f32 %v1226_v56, %v6663_v4  ;;  %v2777_v32 = vpack.c.bf16 %v2750_v19, %v2749_v23  ;;  %v6672_v4 = vld [vmem:[#allocation37_spill] sm:$0xff] }
 0x1c3   : > { %2877 = vmatmul.bf16.gmra.mxu3 %v2776_v40 }
 0x1c4   : > { %v2162_v9 = vpop.f32.mrf.mxu0  ;;  %2377 = vmatmul.bf16.gmra.mxu1 %v6659_v49  ;;  %v1699_v33 = vadd.f32 %v1652_v39, %v1227_v6  ;;  %v6668_v49 = vld [vmem:[#allocation17_spill] sm:$0xff]  ;;  %v6673_v6 = vpack.c.bf16 %v6671_v54, %v6672_v4  ;;  %v6676_v39 = vld [vmem:[#allocation50_spill] sm:$0xff] }
 0x1c5   : > { %v6670_v58 = vpack.c.bf16 %v6668_v49, %v6669_v57  ;;  %v6679_v4 = vld [vmem:[#allocation42_spill] sm:$0xff] }
 0x1c6   : > { %3153 = vmatmul.bf16.gmra.mxu0 %v6666_v42  ;;  %v1918_v53 = vpop.f32.mrf.mxu3  ;;  %v6675_v42 = vld [vmem:[#allocation52_spill] sm:$0xff] }
 0x1c7   : > { %v1965_v8 = vadd.f32 %v1918_v53, %v1699_v33  ;;  %v6677_v33 = vpack.c.bf16 %v6675_v42, %v6676_v39  ;;  %v6683_v42 = vld [vmem:[#allocation44_spill] sm:$0xff] }
 0x1c8   : > { %v1654_v22 = vpop.f32.mrf.mxu2 }
 0x1c9   : > { %v1228_v29 = vpop.f32.mrf.mxu1  ;;  %v6035_v18 = vadd.f32 %v2152_v3, %v1965_v8 }
 0x1ca   : > { %v1229_v13 = vadd.f32 %v1228_v29, %v6667_v27 }
 0x1cc   : > { %v2164_v51 = vpop.f32.mrf.mxu0  ;;  %v1700_v62 = vadd.f32 %v1654_v22, %v1229_v13  ;;  %v6678_v22 = vld [vmem:[#allocation67_spill] sm:$0xff] }
 0x1cd   : > { %2648 = vmatmul.bf16.gmra.mxu2 %v6673_v6  ;;  %v6680_v6 = vld [vmem:[#allocation21_spill] sm:$0xff] }
 0x1ce   : > { %v1920_v40 = vpop.f32.mrf.mxu3 }
 0x1cf   : > { %v1966_v55 = vadd.f32 %v1920_v40, %v1700_v62  ;;  %v2751_v40 = vld [vmem:[#allocation2 + $0x78] sm:$0xff] }
 0x1d0   : > { %v1657_v53 = vpop.f32.mrf.mxu2 }
 0x1d1   : > { %v1231_v56 = vpop.f32.mrf.mxu1  ;;  %v6044_v3 = vadd.f32 %v2154_v35, %v1966_v55  ;;  %v2752_v35 = vld [vmem:[#allocation2 + $0x80] sm:$0xff] }
 0x1d2   : > { %v1232_v38 = vadd.f32 %v1231_v56, %v6674_v14  ;;  %v2778_v57 = vpack.c.bf16 %v2752_v35, %v2751_v40  ;;  %v6681_v14 = vpack.c.bf16 %v6679_v4, %v6680_v6  ;;  %v2753_v6 = vld [vmem:[#allocation2 + $0x88] sm:$0xff] }
 0x1d3   : > { %2882 = vmatmul.bf16.gmra.mxu3 %v2777_v32 }
 0x1d4   : > { %v2167_v1 = vpop.f32.mrf.mxu0  ;;  %2382 = vmatmul.bf16.gmra.mxu1 %v6670_v58  ;;  %v1701_v29 = vadd.f32 %v1657_v53, %v1232_v38  ;;  %v6682_v38 = vld [vmem:[#allocation26_spill] sm:$0xff] }
 0x1d5   : > { %v6684_v39 = vpack.c.bf16 %v6682_v38, %v6683_v42 }
 0x1d6   : > { %3158 = vmatmul.bf16.gmra.mxu0 %v6677_v33  ;;  %v1923_v8 = vpop.f32.mrf.mxu3  ;;  %v6685_v33 = vld [vmem:[#allocation79_spill] sm:$0xff] }
 0x1d7   : > { %v1967_v13 = vadd.f32 %v1923_v8, %v1701_v29  ;;  %v6686_v29 = vld [vmem:[#allocation36_spill] sm:$0xff]  ;;  %v6687_v8 = vld [vmem:[#allocation62_spill] sm:$0xff] }
 0x1d8   : > { %v1659_v55 = vpop.f32.mrf.mxu2 }
 0x1d9   : > { %v1233_v27 = vpop.f32.mrf.mxu1  ;;  %v6050_v19 = vadd.f32 %v2157_v48, %v1967_v13 }
 0x1da   : > { %v1234_v62 = vadd.f32 %v1233_v27, %v6678_v22  ;;  %v6688_v27 = vpack.c.bf16 %v6686_v29, %v6687_v8  ;;  %v6691_v29 = vld [vmem:[#allocation49_spill] sm:$0xff]  ;;  %v6693_v8 = vld [vmem:[#allocation60_spill] sm:$0xff] }
 0x1dc   : > { %v2169_v23 = vpop.f32.mrf.mxu0  ;;  %v1702_v32 = vadd.f32 %v1659_v55, %v1234_v62 }
 0x1dd   : > { %2653 = vmatmul.bf16.gmra.mxu2 %v6684_v39 }
 0x1de   : > { %v1925_v49 = vpop.f32.mrf.mxu3 }
 0x1df   : > { %v1968_v58 = vadd.f32 %v1925_v49, %v1702_v32  ;;  %v6689_v49 = vld [vmem:[#allocation95_spill] sm:$0xff] }
 0x1e0   : > { %v1662_v13 = vpop.f32.mrf.mxu2 }
 0x1e1   : > { %v1236_v56 = vpop.f32.mrf.mxu1  ;;  %v6059_v48 = vadd.f32 %v2159_v15, %v1968_v58  ;;  %v2754_v15 = vld [vmem:[#allocation2 + $0x90] sm:$0xff] }
 0x1e2   : > { %v1237_v53 = vadd.f32 %v1236_v56, %v6685_v33  ;;  %v2779_v38 = vpack.c.bf16 %v2754_v15, %v2753_v6  ;;  %v6690_v33 = vld [vmem:[#allocation51_spill] sm:$0xff] }
 0x1e3   : > { %2887 = vmatmul.bf16.gmra.mxu3 %v2778_v57 }
 0x1e4   : > { %v2172_v54 = vpop.f32.mrf.mxu0  ;;  %2387 = vmatmul.bf16.gmra.mxu1 %v6681_v14  ;;  %v1703_v22 = vadd.f32 %v1662_v13, %v1237_v53  ;;  %v6692_v53 = vpack.c.bf16 %v6690_v33, %v6691_v29  ;;  %v6700_v29 = vld [vmem:[#allocation115_spill] sm:$0xff] }
 0x1e6   : > { %3163 = vmatmul.bf16.gmra.mxu0 %v6688_v27  ;;  %v1928_v62 = vpop.f32.mrf.mxu3  ;;  %v6694_v27 = vld [vmem:[#allocation31_spill] sm:$0xff] }
 0x1e7   : > { %v1969_v35 = vadd.f32 %v1928_v62, %v1703_v22  ;;  %v6695_v13 = vpack.c.bf16 %v6693_v8, %v6694_v27  ;;  %v6696_v22 = vld [vmem:[#allocation105_spill] sm:$0xff]  ;;  %v2755_v8 = vld [vmem:[#allocation2 + $0x98] sm:$0xff] }
 0x1e8   : > { %v1664_v58 = vpop.f32.mrf.mxu2 }
 0x1e9   : > { %v1238_v40 = vpop.f32.mrf.mxu1  ;;  %v6065_v32 = vadd.f32 %v2162_v9, %v1969_v35  ;;  %v6698_v35 = vld [vmem:[#allocation41_spill] sm:$0xff] }
 0x1ea   : > { %v1239_v4 = vadd.f32 %v1238_v40, %v6689_v49  ;;  %v6697_v40 = vld [vmem:[#allocation84_spill] sm:$0xff] }
 0x1eb   : > { %v6699_v49 = vpack.c.bf16 %v6697_v40, %v6698_v35  ;;  %v6701_v35 = vld [vmem:[#allocation35_spill] sm:$0xff] }
 0x1ec   : > { %v2174_v55 = vpop.f32.mrf.mxu0  ;;  %v1704_v57 = vadd.f32 %v1664_v58, %v1239_v4 }
 0x1ed   : > { %2658 = vmatmul.bf16.gmra.mxu2 %v6695_v13 }
 0x1ee   : > { %v1930_v14 = vpop.f32.mrf.mxu3 }
 0x1ef   : > { %v1970_v42 = vadd.f32 %v1930_v14, %v1704_v57 }
 0x1f0   : > { %v1667_v4 = vpop.f32.mrf.mxu2 }
 0x1f1   : > { %v1241_v56 = vpop.f32.mrf.mxu1  ;;  %v6074_v9 = vadd.f32 %v2164_v51, %v1970_v42  ;;  %v2756_v51 = vld [vmem:[#allocation2 + $0xa0] sm:$0xff] }
 0x1f2   : > { %v1242_v62 = vadd.f32 %v1241_v56, %v6696_v22  ;;  %v2780_v13 = vpack.c.bf16 %v2756_v51, %v2755_v8 }
 0x1f3   : > { %2892 = vmatmul.bf16.gmra.mxu3 %v2779_v38 }
 0x1f4   : > { %v3129_v39 = vpop.f32.mrf.mxu0  ;;  %2392 = vmatmul.bf16.gmra.mxu1 %v6692_v53  ;;  %v1705_v6 = vadd.f32 %v1667_v4, %v1242_v62  ;;  %v6702_v62 = vld [vmem:[#allocation61_spill] sm:$0xff] }
 0x1f5   : > { %v6704_v4 = vld [vmem:[#allocation73_spill] sm:$0xff] }
 0x1f6   : > { %3168 = vmatmul.bf16.gmra.mxu0 %v6699_v49  ;;  %v1933_v15 = vpop.f32.mrf.mxu3  ;;  %v6703_v49 = vpack.c.bf16 %v6701_v35, %v6702_v62 }
 0x1f7   : > { %v1971_v57 = vadd.f32 %v1933_v15, %v1705_v6  ;;  %v6705_v6 = vld [vmem:[#allocation72_spill] sm:$0xff] }
 0x1f8   : > { %v1669_v42 = vpop.f32.mrf.mxu2 }
 0x1f9   : > { %v1243_v58 = vpop.f32.mrf.mxu1  ;;  %v6080_v33 = vadd.f32 %v2167_v1, %v1971_v57  ;;  %v6706_v1 = vpack.c.bf16 %v6704_v4, %v6705_v6 }
 0x1fa   : > { %v1244_v53 = vadd.f32 %v1243_v58, %v6700_v29  ;;  %v6708_v58 = vld [vmem:[#allocation124_spill] sm:$0xff]  ;;  %v6709_v29 = vld [vmem:[#allocation94_spill] sm:$0xff] }
 0x1fc   : > { %v3131_v14 = vpop.f32.mrf.mxu0  ;;  %v1706_v38 = vadd.f32 %v1669_v42, %v1244_v53  ;;  %v6710_v53 = vld [vmem:[#allocation92_spill] sm:$0xff] }
 0x1fd   : > { %2663 = vmatmul.bf16.gmra.mxu2 %v6706_v1  ;;  %v6711_v42 = vpack.c.bf16 %v6709_v29, %v6710_v53 }
 0x1fe   : > { %v1935_v27 = vpop.f32.mrf.mxu3 }
 0x1ff   : > { %v1972_v22 = vadd.f32 %v1935_v27, %v1706_v38 }
 0x200   : > { %v1672_v8 = vpop.f32.mrf.mxu2 }
 0x201   : > { %v1246_v56 = vpop.f32.mrf.mxu1  ;;  %v6091_v15 = vadd.f32 %v2169_v23, %v1972_v22  ;;  %v2757_v23 = vld [vmem:[#allocation2 + $0xa8] sm:$0xff]  ;;  %v2758_v22 = vld [vmem:[#allocation2 + $0xb0] sm:$0xff] }
 0x202   : > { %v1247_v57 = vadd.f32 %v1246_v56, %v6708_v58  ;;  %v2781_v58 = vpack.c.bf16 %v2758_v22, %v2757_v23 }
 0x203   : > { %6707 = vst [vmem:[#allocation46_spill] sm:$0xff] %v6091_v15  ;;  %2897 = vmatmul.bf16.gmra.mxu3 %v2780_v13 }
 0x204   : > { %v6083_v40 = vpop.f32.mrf.mxu0  ;;  %2397 = vmatmul.bf16.gmra.mxu1 %v6703_v49  ;;  %v1707_v51 = vadd.f32 %v1672_v8, %v1247_v57  ;;  %v6713_v49 = vld [vmem:[#allocation133_spill] sm:$0xff]  ;;  %v6714_v57 = vld [vmem:[#allocation83_spill] sm:$0xff] }
 0x206   : > { %3173 = vmatmul.bf16.gmra.mxu0 %v6711_v42  ;;  %v1938_v38 = vpop.f32.mrf.mxu3  ;;  %v6715_v42 = vld [vmem:[#allocation40_spill] sm:$0xff] }
 0x207   : > { %v1973_v16 = vadd.f32 %v1938_v38, %v1707_v51  ;;  %v6716_v8 = vpack.c.bf16 %v6714_v57, %v6715_v42  ;;  %v6717_v51 = vld [vmem:[#allocation48_spill] sm:$0xff]  ;;  %v6718_v38 = vld [vmem:[#allocation86_spill] sm:$0xff] }
 0x208   : > { %v1674_v13 = vpop.f32.mrf.mxu2 }
 0x209   : > { %v1248_v27 = vpop.f32.mrf.mxu1  ;;  %v6099_v62 = vadd.f32 %v2172_v54, %v1973_v16  ;;  %v6719_v16 = vpack.c.bf16 %v6717_v51, %v6718_v38  ;;  %v2760_v51 = vld [vmem:[#allocation2 + $0xc0] sm:$0xff] }
 0x20a   : > { %v1249_v4 = vadd.f32 %v1248_v27, %v6713_v49  ;;  %v6720_v27 = vld [vmem:[#allocation140_spill] sm:$0xff] }
 0x20b   : > { %6712 = vst [vmem:[#allocation55_spill] sm:$0xff] %v6099_v62 }
 0x20c   : > { %v6097_v35 = vpop.f32.mrf.mxu0  ;;  %v1708_v6 = vadd.f32 %v1674_v13, %v1249_v4  ;;  %v6721_v4 = vld [vmem:[#allocation71_spill] sm:$0xff]  ;;  %v6722_v13 = vld [vmem:[#allocation104_spill] sm:$0xff] }
 0x20d   : > { %2668 = vmatmul.bf16.gmra.mxu2 %v6719_v16  ;;  %v6723_v62 = vpack.c.bf16 %v6721_v4, %v6722_v13 }
 0x20e   : > { %v1940_v56 = vpop.f32.mrf.mxu3 }
 0x20f   : > { %v1974_v29 = vadd.f32 %v1940_v56, %v1708_v6 }
 0x210   : > { %v2629_v23 = vpop.f32.mrf.mxu2 }
 0x211   : > { %v2363_v1 = vpop.f32.mrf.mxu1  ;;  %v6110_v54 = vadd.f32 %v2174_v55, %v1974_v29 }
 0x212   : > { %v2443_v49 = vadd.f32 %v2363_v1, %v6720_v27  ;;  %v6122_v1 = vld [vmem:[%s6315_s4] ss:$0 sm:$0xff] }
 0x213   : > { %2902 = vmatmul.bf16.gmra.mxu3 %v2781_v58 }
 0x214   : > { %v6102_v53 = vpop.f32.mrf.mxu0  ;;  %2402 = vmatmul.bf16.gmra.mxu1 %v6716_v8  ;;  %v2709_v22 = vadd.f32 %v2629_v23, %v2443_v49  ;;  %v2759_v8 = vld [vmem:[#allocation2 + $0xb8] sm:$0xff]  ;;  %v6725_v23 = vld [vmem:[#allocation91_spill] sm:$0xff] }
 0x215   : > { %v2782_v16 = vpack.c.bf16 %v2760_v51, %v2759_v8  ;;  %v6731_v51 = vld [vmem:[#allocation81_spill] sm:$0xff] }
 0x216   : > { %3178 = vmatmul.bf16.gmra.mxu0 %v6723_v62  ;;  %v2863_v6 = vpop.f32.mrf.mxu3 }
 0x217   : > { %v2943_v15 = vadd.f32 %v2863_v6, %v2709_v22  ;;  %v6728_v22 = vld [vmem:[#allocation59_spill] sm:$0xff] }
 0x218   : > { %v2631_v58 = vpop.f32.mrf.mxu2 }
 0x219   : > { %v2365_v56 = vpop.f32.mrf.mxu1  ;;  %v3209_v55 = vadd.f32 %v3129_v39, %v2943_v15  ;;  %v6727_v15 = vld [vmem:[#allocation101_spill] sm:$0xff] }
 0x21a   : > { %v2444_v42 = vadd.f32 %v2365_v56, %v5750_v21  ;;  %v6724_v21 = vld [vmem:[#allocation93_spill] sm:$0xff]  ;;  %v6729_v6 = vpack.c.bf16 %v6727_v15, %v6728_v22 }
 0x21b   : > { %v3245_v49 = vadd.f32 %v6122_v1, %v3209_v55  ;;  %v6726_v39 = vpack.c.bf16 %v6724_v21, %v6725_v23 }
 0x21c   : > { %v6116_v57 = vpop.f32.mrf.mxu0  ;;  %v2710_v62 = vadd.f32 %v2631_v58, %v2444_v42 }
 0x21d   : > { %2673 = vmatmul.bf16.gmra.mxu2 %v6729_v6  ;;  %v3378_v8 = vmul.f32 %v3245_v49, %v3245_v49 }
 0x21e   : > { %v2865_v29 = vpop.f32.mrf.mxu3 }
 0x21f   : > { %v2944_v27 = vadd.f32 %v2865_v29, %v2710_v62 }
 0x220   : > { %v2634_v58 = vpop.f32.mrf.mxu2 }
 0x221   : > { %v2368_v38 = vpop.f32.mrf.mxu1  ;;  %v3210_v4 = vadd.f32 %v3131_v14, %v2944_v27  ;;  %v6730_v14 = vld [vmem:[#allocation120_spill] sm:$0xff] }
 0x222   : > { %v2445_v42 = vadd.f32 %v2368_v38, %v5779_v0  ;;  %v6732_v55 = vpack.c.bf16 %v6730_v14, %v6731_v51 }
 0x223   : > { %2907 = vmatmul.bf16.gmra.mxu3 %v2782_v16  ;;  %v3246_v56 = vadd.f32 %v6122_v1, %v3210_v4 }
 0x224   : > { %v6125_v13 = vpop.f32.mrf.mxu0  ;;  %2407 = vmatmul.bf16.gmra.mxu1 %v6726_v39  ;;  %v2711_v27 = vadd.f32 %v2634_v58, %v2445_v42 }
 0x225   : > { %v4136_v62 = vpack.c.bf16 %v3246_v56, %v3245_v49  ;;  %v3341_v29 = vadd.f32 %v3246_v56, %v3245_v49  ;;  %v3379_v16 = vmul.f32 %v3246_v56, %v3246_v56 }
 0x226   : > { %3183 = vmatmul.bf16.gmra.mxu0 %v6732_v55  ;;  %v2868_v4 = vpop.f32.mrf.mxu3 }
 0x227   : > { %4137 = vst [vmem:[%s6140_s23] sm:$0xff] %v4136_v62   ;;  %v3410_v0 = vadd.f32 %v3379_v16, %v3378_v8  ;;  %v2945_v38 = vadd.f32 %v2868_v4, %v2711_v27  ;;  %v6734_v16 = vld [vmem:[#allocation102_spill] sm:$0xff]  ;;  %v6736_v4 = vld [vmem:[#allocation113_spill] sm:$0xff] }
 0x228   : > { %v2636_v6 = vpop.f32.mrf.mxu2 }
 0x229   : > { %v2370_v21 = vpop.f32.mrf.mxu1  ;;  %v3211_v23 = vadd.f32 %v6083_v40, %v2945_v38  ;;  %v6733_v40 = vld [vmem:[#allocation70_spill] sm:$0xff]  ;;  %v6737_v38 = vld [vmem:[#allocation112_spill] sm:$0xff] }
 0x22a   : > { %v2446_v22 = vadd.f32 %v2370_v21, %v5811_v37  ;;  %v6735_v27 = vpack.c.bf16 %v6733_v40, %v6734_v16  ;;  %v6738_v37 = vpack.c.bf16 %v6736_v4, %v6737_v38 }
 0x22b   : > { %v3247_v15 = vadd.f32 %v6122_v1, %v3211_v23  ;;  %v6740_v23 = vld [vmem:[#allocation129_spill] sm:$0xff] }
 0x22c   : > { %v6147_v39 = vpop.f32.mrf.mxu0  ;;  %v2712_v55 = vadd.f32 %v2636_v6, %v2446_v22 }
 0x22d   : > { %v3342_v14 = vadd.f32 %v3341_v29, %v3247_v15  ;;  %v3380_v51 = vmul.f32 %v3247_v15, %v3247_v15  ;;  %2678 = vmatmul.bf16.gmra.mxu2 %v6738_v37 }
 0x22e   : > { %v2870_v49 = vpop.f32.mrf.mxu3 }
 0x22f   : > { %v3411_v42 = vadd.f32 %v3410_v0, %v3380_v51  ;;  %v2946_v58 = vadd.f32 %v2870_v49, %v2712_v55  ;;  %v6739_v0 = vld [vmem:[#allocation131_spill] sm:$0xff] }
 0x230   : > { %v6741_v22 = vpack.c.bf16 %v6739_v0, %v6740_v23 }
 0x231   : > { %v2373_v56 = vpop.f32.mrf.mxu1  ;;  %v3212_v8 = vadd.f32 %v6097_v35, %v2946_v58  ;;  %v2639_v35 = vpop.f32.mrf.mxu2 }
 0x232   : > { %v2447_v21 = vadd.f32 %v2373_v56, %v5830_v20 }
 0x233   : > { %2912 = vmatmul.bf16.gmra.mxu3 %v5741_v11  ;;  %v3248_v29 = vadd.f32 %v6122_v1, %v3212_v8 }
 0x234   : > { %v6152_v62 = vpop.f32.mrf.mxu0  ;;  %2412 = vmatmul.bf16.gmra.mxu1 %v6735_v27  ;;  %v2713_v49 = vadd.f32 %v2639_v35, %v2447_v21 }
 0x235   : > { %v4141_v6 = vpack.c.bf16 %v3248_v29, %v3247_v15  ;;  %v3343_v51 = vadd.f32 %v3342_v14, %v3248_v29  ;;  %v3381_v55 = vmul.f32 %v3248_v29, %v3248_v29 }
 0x236   : > { %3188 = vmatmul.bf16.gmra.mxu0 %v6741_v22  ;;  %v2873_v58 = vpop.f32.mrf.mxu3  ;;  %v6743_v22 = vld [vmem:[#allocation80_spill] sm:$0xff] }
 0x237   : > { %4228 = vst [vmem:[%s6140_s23 + $0x8] sm:$0xff] %v4141_v6   ;;  %v3412_v16 = vadd.f32 %v3411_v42, %v3381_v55  ;;  %v2947_v27 = vadd.f32 %v2873_v58, %v2713_v49  ;;  %v6745_v6 = vld [vmem:[#allocation90_spill] sm:$0xff]  ;;  %v6746_v55 = vld [vmem:[#allocation121_spill] sm:$0xff] }
 0x238   : > { %v6748_v58 = vld [vmem:[#allocation110_spill] sm:$0xff] }
 0x239   : > { %v2375_v40 = vpop.f32.mrf.mxu1  ;;  %v3213_v11 = vadd.f32 %v6102_v53, %v2947_v27  ;;  %v2641_v8 = vpop.f32.mrf.mxu2  ;;  %v6742_v53 = vld [vmem:[#allocation119_spill] sm:$0xff] }
 0x23a   : > { %v2448_v56 = vadd.f32 %v2375_v40, %v5850_v60  ;;  %v6744_v35 = vpack.c.bf16 %v6742_v53, %v6743_v22  ;;  %v6747_v60 = vpack.c.bf16 %v6745_v6, %v6746_v55  ;;  %v6749_v40 = vld [vmem:[#allocation136_spill] sm:$0xff] }
 0x23b   : > { %v3249_v20 = vadd.f32 %v6122_v1, %v3213_v11 }
 0x23c   : > { %v6168_v4 = vpop.f32.mrf.mxu0  ;;  %v2714_v15 = vadd.f32 %v2641_v8, %v2448_v56 }
 0x23d   : > { %v3344_v38 = vadd.f32 %v3343_v51, %v3249_v20  ;;  %v3382_v37 = vmul.f32 %v3249_v20, %v3249_v20  ;;  %2683 = vmatmul.bf16.gmra.mxu2 %v6747_v60 }
 0x23e   : > { %v2875_v14 = vpop.f32.mrf.mxu3 }
 0x23f   : > { %v3413_v21 = vadd.f32 %v3412_v16, %v3382_v37  ;;  %v2948_v0 = vadd.f32 %v2875_v14, %v2714_v15  ;;  %v6750_v16 = vpack.c.bf16 %v6748_v58, %v6749_v40  ;;  %v6754_v40 = vld [vmem:[#allocation134_spill] sm:$0xff] }
 0x241   : > { %v2378_v29 = vpop.f32.mrf.mxu1  ;;  %v3214_v42 = vadd.f32 %v6116_v57, %v2948_v0  ;;  %v2644_v57 = vpop.f32.mrf.mxu2 }
 0x242   : > { %v2449_v49 = vadd.f32 %v2378_v29, %v5857_v2 }
 0x243   : > { %2917 = vmatmul.bf16.gmra.mxu3 %v5806_v10  ;;  %v3250_v51 = vadd.f32 %v6122_v1, %v3214_v42 }
 0x244   : > { %v6173_v23 = vpop.f32.mrf.mxu0  ;;  %2417 = vmatmul.bf16.gmra.mxu1 %v6744_v35  ;;  %v2715_v8 = vadd.f32 %v2644_v57, %v2449_v49  ;;  %v6752_v49 = vld [vmem:[#allocation128_spill] sm:$0xff] }
 0x245   : > { %v4146_v27 = vpack.c.bf16 %v3250_v51, %v3249_v20  ;;  %v3345_v11 = vadd.f32 %v3344_v38, %v3250_v51  ;;  %v3383_v56 = vmul.f32 %v3250_v51, %v3250_v51 }
 0x246   : > { %3193 = vmatmul.bf16.gmra.mxu0 %v6750_v16  ;;  %v2878_v37 = vpop.f32.mrf.mxu3  ;;  %v6755_v16 = vld [vmem:[#allocation100_spill] sm:$0xff] }
 0x247   : > { %4229 = vst [vmem:[%s6140_s23 + $0x10] sm:$0xff] %v4146_v27   ;;  %v3414_v14 = vadd.f32 %v3413_v21, %v3383_v56  ;;  %v2949_v0 = vadd.f32 %v2878_v37, %v2715_v8 }
 0x249   : > { %v2380_v15 = vpop.f32.mrf.mxu1  ;;  %v3215_v10 = vadd.f32 %v6125_v13, %v2949_v0  ;;  %v2646_v42 = vpop.f32.mrf.mxu2  ;;  %v6751_v13 = vld [vmem:[#allocation130_spill] sm:$0xff] }
 0x24a   : > { %v2450_v29 = vadd.f32 %v2380_v15, %v5880_v34  ;;  %v6753_v58 = vpack.c.bf16 %v6751_v13, %v6752_v49  ;;  %v6756_v34 = vpack.c.bf16 %v6754_v40, %v6755_v16  ;;  %v6759_v13 = vld [vmem:[#allocation135_spill] sm:$0xff] }
 0x24b   : > { %v3251_v2 = vadd.f32 %v6122_v1, %v3215_v10  ;;  %v6761_v49 = vld [vmem:[#allocation139_spill] sm:$0xff] }
 0x24c   : > { %v6189_v53 = vpop.f32.mrf.mxu0  ;;  %v2716_v20 = vadd.f32 %v2646_v42, %v2450_v29 }
 0x24d   : > { %v3346_v22 = vadd.f32 %v3345_v11, %v3251_v2  ;;  %v3384_v35 = vmul.f32 %v3251_v2, %v3251_v2  ;;  %2688 = vmatmul.bf16.gmra.mxu2 %v6756_v34  ;;  %v6757_v11 = vpack.c.bf16 %v5735_v30, %v5726_v7  ;;  %v6764_v34 = vpack.c.bf16 %v5770_v17, %v5764_v41  ;;  %v2769_v41 = vld [vmem:[#allocation2 + $0x108] sm:$0xff]  ;;  %v2770_v17 = vld [vmem:[#allocation2 + $0x110] sm:$0xff] }
 0x24e   : > { %v2880_v38 = vpop.f32.mrf.mxu3 }
 0x24f   : > { %v3415_v55 = vadd.f32 %v3414_v14, %v3384_v35  ;;  %v2950_v60 = vadd.f32 %v2880_v38, %v2716_v20 }
 0x251   : > { %v2383_v6 = vpop.f32.mrf.mxu1  ;;  %v3216_v21 = vadd.f32 %v6147_v39, %v2950_v60  ;;  %v2649_v39 = vpop.f32.mrf.mxu2 }
 0x252   : > { %v2451_v27 = vadd.f32 %v2383_v6, %v5896_v28 }
 0x253   : > { %2922 = vmatmul.bf16.gmra.mxu3 %v5845_v50  ;;  %v3252_v57 = vadd.f32 %v6122_v1, %v3216_v21  ;;  %v6758_v21 = vld [vmem:[#allocation109_spill] sm:$0xff] }
 0x254   : > { %v6194_v51 = vpop.f32.mrf.mxu0  ;;  %2422 = vmatmul.bf16.gmra.mxu1 %v6753_v58  ;;  %v2717_v15 = vadd.f32 %v2649_v39, %v2451_v27  ;;  %v6762_v58 = vld [vmem:[#allocation138_spill] sm:$0xff] }
 0x255   : > { %v4151_v56 = vpack.c.bf16 %v3252_v57, %v3251_v2  ;;  %v3347_v8 = vadd.f32 %v3346_v22, %v3252_v57  ;;  %v3385_v37 = vmul.f32 %v3252_v57, %v3252_v57 }
 0x256   : > { %3198 = vmatmul.bf16.gmra.mxu0 %v6757_v11  ;;  %v2883_v14 = vpop.f32.mrf.mxu3 }
 0x257   : > { %4230 = vst [vmem:[%s6140_s23 + $0x18] sm:$0xff] %v4151_v56   ;;  %v3416_v10 = vadd.f32 %v3415_v55, %v3385_v37  ;;  %v2951_v29 = vadd.f32 %v2883_v14, %v2717_v15 }
 0x259   : > { %v2385_v0 = vpop.f32.mrf.mxu1  ;;  %v3217_v50 = vadd.f32 %v6152_v62, %v2951_v29  ;;  %v2651_v7 = vpop.f32.mrf.mxu2  ;;  %v6760_v62 = vpack.c.bf16 %v6758_v21, %v6759_v13 }
 0x25a   : > { %v2452_v28 = vadd.f32 %v2385_v0, %v5916_v43  ;;  %v6763_v43 = vpack.c.bf16 %v6761_v49, %v6762_v58 }
 0x25b   : > { %v3253_v42 = vadd.f32 %v6122_v1, %v3217_v50 }
 0x25c   : > { %v6212_v35 = vpop.f32.mrf.mxu0  ;;  %v2718_v2 = vadd.f32 %v2651_v7, %v2452_v28 }
 0x25d   : > { %v3348_v30 = vadd.f32 %v3347_v8, %v3253_v42  ;;  %v3386_v20 = vmul.f32 %v3253_v42, %v3253_v42  ;;  %2693 = vmatmul.bf16.gmra.mxu2 %v6763_v43 }
 0x25e   : > { %v2885_v22 = vpop.f32.mrf.mxu3 }
 0x25f   : > { %v3417_v6 = vadd.f32 %v3416_v10, %v3386_v20  ;;  %v2952_v60 = vadd.f32 %v2885_v22, %v2718_v2 }
 0x261   : > { %v2388_v38 = vpop.f32.mrf.mxu1  ;;  %v3218_v55 = vadd.f32 %v6168_v4, %v2952_v60  ;;  %v2654_v57 = vpop.f32.mrf.mxu2 }
 0x262   : > { %v2453_v16 = vadd.f32 %v2388_v38, %v5922_v24 }
 0x263   : > { %2927 = vmatmul.bf16.gmra.mxu3 %v5875_v61  ;;  %v3254_v40 = vadd.f32 %v6122_v1, %v3218_v55  ;;  %v6769_v55 = vld [vmem:[#allocation47_spill] sm:$0xff] }
 0x264   : > { %2427 = vmatmul.bf16.gmra.mxu1 %v6760_v62  ;;  %v6227_v39 = vpop.f32.mrf.mxu0  ;;  %v2719_v56 = vadd.f32 %v2654_v57, %v2453_v16 }
 0x265   : > { %v4156_v4 = vpack.c.bf16 %v3254_v40, %v3253_v42  ;;  %v3349_v27 = vadd.f32 %v3348_v30, %v3254_v40  ;;  %v3387_v11 = vmul.f32 %v3254_v40, %v3254_v40  ;;  %v2787_v30 = vpack.c.bf16 %v2770_v17, %v2769_v41 }
 0x266   : > { %3203 = vmatmul.bf16.gmra.mxu0 %v6764_v34  ;;  %v2888_v8 = vpop.f32.mrf.mxu3 }
 0x267   : > { %4231 = vst [vmem:[%s6140_s23 + $0x20] sm:$0xff] %v4156_v4   ;;  %v3418_v15 = vadd.f32 %v3417_v6, %v3387_v11  ;;  %v2953_v61 = vadd.f32 %v2888_v8, %v2719_v56  ;;  %v6766_v6 = vld [vmem:[#allocation118_spill] sm:$0xff] }
 0x269   : > { %v2390_v37 = vpop.f32.mrf.mxu1  ;;  %v3219_v14 = vadd.f32 %v6173_v23, %v2953_v61  ;;  %v2656_v10 = vpop.f32.mrf.mxu2  ;;  %v6765_v23 = vld [vmem:[#allocation39_spill] sm:$0xff] }
 0x26a   : > { %v2454_v0 = vadd.f32 %v2390_v37, %v5940_v63  ;;  %v6767_v60 = vpack.c.bf16 %v6765_v23, %v6766_v6  ;;  %v6768_v63 = vld [vmem:[#allocation126_spill] sm:$0xff] }
 0x26b   : > { %v3255_v24 = vadd.f32 %v6122_v1, %v3219_v14  ;;  %v6770_v21 = vpack.c.bf16 %v6768_v63, %v6769_v55 }
 0x26c   : > { %v2720_v42 = vadd.f32 %v2656_v10, %v2454_v0  ;;  %v3166_v2 = vpop.f32.mrf.mxu0  ;;  %v4285_v0 = vld [vmem:[#allocation2 + $0x8] sm:$0xff] }
 0x26d   : > { %v3350_v29 = vadd.f32 %v3349_v27, %v3255_v24  ;;  %v3388_v50 = vmul.f32 %v3255_v24, %v3255_v24  ;;  %2698 = vmatmul.bf16.gmra.mxu2 %v6770_v21  ;;  %v2788_v41 = vpack.c.bf16 %v4285_v0, %v4285_v0 }
 0x26e   : > { %v2890_v28 = vpop.f32.mrf.mxu3 }
 0x26f   : > { %v3419_v20 = vadd.f32 %v3418_v15, %v3388_v50  ;;  %v2954_v22 = vadd.f32 %v2890_v28, %v2720_v42  ;;  %v6771_v50 = vld [vmem:[#allocation82_spill] sm:$0xff] }
 0x270   : > { %v6772_v42 = vld [vmem:[#allocation58_spill] sm:$0xff] }
 0x271   : > { %v2393_v7 = vpop.f32.mrf.mxu1  ;;  %v3220_v38 = vadd.f32 %v6189_v53, %v2954_v22  ;;  %v2659_v49 = vpop.f32.mrf.mxu2 }
 0x272   : > { %v2455_v62 = vadd.f32 %v2393_v7, %v5949_v26 }
 0x273   : > { %2932 = vmatmul.bf16.gmra.mxu3 %v2787_v30  ;;  %v3256_v13 = vadd.f32 %v6122_v1, %v3220_v38 }
 0x274   : > { %2432 = vmatmul.bf16.gmra.mxu1 %v6767_v60  ;;  %v2721_v16 = vadd.f32 %v2659_v49, %v2455_v62  ;;  %v3169_v27 = vpop.f32.mrf.mxu0 }
 0x275   : > { %v4161_v58 = vpack.c.bf16 %v3256_v13, %v3255_v24  ;;  %v3351_v43 = vadd.f32 %v3350_v29, %v3256_v13  ;;  %v3389_v40 = vmul.f32 %v3256_v13, %v3256_v13 }
 0x276   : > { %v2893_v34 = vpop.f32.mrf.mxu3 }
 0x277   : > { %4232 = vst [vmem:[%s6140_s23 + $0x28] sm:$0xff] %v4161_v58   ;;  %v3420_v57 = vadd.f32 %v3419_v20, %v3389_v40  ;;  %v2955_v4 = vadd.f32 %v2893_v34, %v2721_v16 }
 0x279   : > { %v2395_v53 = vpop.f32.mrf.mxu1  ;;  %v3221_v11 = vadd.f32 %v6194_v51, %v2955_v4  ;;  %v2661_v37 = vpop.f32.mrf.mxu2  ;;  %v6773_v51 = vpack.c.bf16 %v6771_v50, %v6772_v42 }
 0x27a   : > { %v2456_v8 = vadd.f32 %v2395_v53, %v5965_v31  ;;  %v6774_v31 = vpack.c.bf16 %v5802_v52, %v5799_v45 }
 0x27b   : > { %v3257_v56 = vadd.f32 %v6122_v1, %v3221_v11 }
 0x27c   : > { %v2722_v61 = vadd.f32 %v2661_v37, %v2456_v8  ;;  %v3171_v28 = vpop.f32.mrf.mxu0 }
 0x27d   : > { %v3352_v15 = vadd.f32 %v3351_v43, %v3257_v56  ;;  %v3390_v26 = vmul.f32 %v3257_v56, %v3257_v56  ;;  %2703 = vmatmul.bf16.gmra.mxu2 %v6774_v31 }
 0x27e   : > { %v2895_v14 = vpop.f32.mrf.mxu3 }
 0x27f   : > { %v3421_v17 = vadd.f32 %v3420_v57, %v3390_v26  ;;  %v2956_v10 = vadd.f32 %v2895_v14, %v2722_v61 }
 0x281   : > { %v2398_v24 = vpop.f32.mrf.mxu1  ;;  %v3222_v29 = vadd.f32 %v6212_v35, %v2956_v10  ;;  %v2664_v20 = vpop.f32.mrf.mxu2 }
 0x282   : > { %v2457_v30 = vadd.f32 %v2398_v24, %v5972_v36 }
 0x283   : > { %2937 = vmatmul.bf16.gmra.mxu3 %v2788_v41  ;;  %v3258_v7 = vadd.f32 %v6122_v1, %v3222_v29 }
 0x284   : > { %2437 = vmatmul.bf16.gmra.mxu1 %v6773_v51  ;;  %v2723_v6 = vadd.f32 %v2664_v20, %v2457_v30  ;;  %v3174_v62 = vpop.f32.mrf.mxu0 }
 0x285   : > { %v4166_v22 = vpack.c.bf16 %v3258_v7, %v3257_v56  ;;  %v3353_v38 = vadd.f32 %v3352_v15, %v3258_v7  ;;  %v3391_v23 = vmul.f32 %v3258_v7, %v3258_v7 }
 0x286   : > { %v2898_v35 = vpop.f32.mrf.mxu3 }
 0x287   : > { %4233 = vst [vmem:[%s6140_s23 + $0x30] sm:$0xff] %v4166_v22   ;;  %v3422_v63 = vadd.f32 %v3421_v17, %v3391_v23  ;;  %v2957_v55 = vadd.f32 %v2898_v35, %v2723_v6 }
 0x289   : > { %v2400_v60 = vpop.f32.mrf.mxu1  ;;  %v3223_v21 = vadd.f32 %v6227_v39, %v2957_v55  ;;  %v2666_v13 = vpop.f32.mrf.mxu2 }
 0x28a   : > { %v2458_v52 = vadd.f32 %v2400_v60, %v5982_v47 }
 0x28b   : > { %v3259_v45 = vadd.f32 %v6122_v1, %v3223_v21 }
 0x28c   : > { %v2724_v58 = vadd.f32 %v2666_v13, %v2458_v52  ;;  %v3176_v26 = vpop.f32.mrf.mxu0 }
 0x28d   : > { %v3354_v49 = vadd.f32 %v3353_v38, %v3259_v45  ;;  %v3392_v36 = vmul.f32 %v3259_v45, %v3259_v45 }
 0x28e   : > { %v2900_v43 = vpop.f32.mrf.mxu3 }
 0x28f   : > { %v3423_v16 = vadd.f32 %v3422_v63, %v3392_v36  ;;  %v2958_v34 = vadd.f32 %v2900_v43, %v2724_v58 }
 0x291   : > { %v2403_v40 = vpop.f32.mrf.mxu1  ;;  %v3224_v53 = vadd.f32 %v3166_v2, %v2958_v34  ;;  %v2669_v39 = vpop.f32.mrf.mxu2 }
 0x292   : > { %v2459_v4 = vadd.f32 %v2403_v40, %v5989_v12 }
 0x293   : > { %v3260_v57 = vadd.f32 %v6122_v1, %v3224_v53 }
 0x294   : > { %v2725_v47 = vadd.f32 %v2669_v39, %v2459_v4  ;;  %v3179_v31 = vpop.f32.mrf.mxu0 }
 0x295   : > { %v4171_v11 = vpack.c.bf16 %v3260_v57, %v3259_v45  ;;  %v3355_v56 = vadd.f32 %v3354_v49, %v3260_v57  ;;  %v3393_v8 = vmul.f32 %v3260_v57, %v3260_v57 }
 0x296   : > { %v2903_v37 = vpop.f32.mrf.mxu3 }
 0x297   : > { %4234 = vst [vmem:[%s6140_s23 + $0x38] sm:$0xff] %v4171_v11   ;;  %v3424_v61 = vadd.f32 %v3423_v16, %v3393_v8  ;;  %v2959_v14 = vadd.f32 %v2903_v37, %v2725_v47 }
 0x299   : > { %v2405_v15 = vpop.f32.mrf.mxu1  ;;  %v3225_v24 = vadd.f32 %v3169_v27, %v2959_v14  ;;  %v2671_v41 = vpop.f32.mrf.mxu2 }
 0x29a   : > { %v2460_v2 = vadd.f32 %v2405_v15, %v5999_v59 }
 0x29b   : > { %v3261_v0 = vadd.f32 %v6122_v1, %v3225_v24 }
 0x29c   : > { %v2726_v12 = vadd.f32 %v2671_v41, %v2460_v2  ;;  %v3181_v21 = vpop.f32.mrf.mxu0 }
 0x29d   : > { %v3356_v17 = vadd.f32 %v3355_v56, %v3261_v0  ;;  %v3394_v10 = vmul.f32 %v3261_v0, %v3261_v0 }
 0x29e   : > { %v2905_v29 = vpop.f32.mrf.mxu3 }
 0x29f   : > { %v3425_v42 = vadd.f32 %v3424_v61, %v3394_v10  ;;  %v2960_v51 = vadd.f32 %v2905_v29, %v2726_v12 }
 0x2a1   : > { %v2408_v50 = vpop.f32.mrf.mxu1  ;;  %v3226_v7 = vadd.f32 %v3171_v28, %v2960_v51  ;;  %v2674_v27 = vpop.f32.mrf.mxu2 }
 0x2a2   : > { %v2461_v20 = vadd.f32 %v2408_v50, %v6005_v25 }
 0x2a3   : > { %v3262_v30 = vadd.f32 %v6122_v1, %v3226_v7 }
 0x2a4   : > { %v2727_v59 = vadd.f32 %v2674_v27, %v2461_v20  ;;  %v3184_v57 = vpop.f32.mrf.mxu0 }
 0x2a5   : > { %v4176_v22 = vpack.c.bf16 %v3262_v30, %v3261_v0  ;;  %v3357_v38 = vadd.f32 %v3356_v17, %v3262_v30  ;;  %v3395_v23 = vmul.f32 %v3262_v30, %v3262_v30 }
 0x2a6   : > { %v2908_v6 = vpop.f32.mrf.mxu3 }
 0x2a7   : > { %4235 = vst [vmem:[%s6140_s23 + $0x40] sm:$0xff] %v4176_v22   ;;  %v3426_v60 = vadd.f32 %v3425_v42, %v3395_v23  ;;  %v2961_v63 = vadd.f32 %v2908_v6, %v2727_v59 }
 0x2a9   : > { %v2410_v35 = vpop.f32.mrf.mxu1  ;;  %v3227_v55 = vadd.f32 %v3174_v62, %v2961_v63  ;;  %v2676_v52 = vpop.f32.mrf.mxu2 }
 0x2aa   : > { %v2462_v28 = vadd.f32 %v2410_v35, %v6014_v46 }
 0x2ab   : > { %v3263_v45 = vadd.f32 %v6122_v1, %v3227_v55 }
 0x2ac   : > { %v2728_v25 = vadd.f32 %v2676_v52, %v2462_v28  ;;  %v3186_v17 = vpop.f32.mrf.mxu0 }
 0x2ad   : > { %v3358_v13 = vadd.f32 %v3357_v38, %v3263_v45  ;;  %v3396_v49 = vmul.f32 %v3263_v45, %v3263_v45 }
 0x2ae   : > { %v2910_v36 = vpop.f32.mrf.mxu3 }
 0x2af   : > { %v3427_v43 = vadd.f32 %v3426_v60, %v3396_v49  ;;  %v2962_v40 = vadd.f32 %v2910_v36, %v2728_v25 }
 0x2b1   : > { %v2413_v58 = vpop.f32.mrf.mxu1  ;;  %v3228_v16 = vadd.f32 %v3176_v26, %v2962_v40  ;;  %v2679_v62 = vpop.f32.mrf.mxu2 }
 0x2b2   : > { %v2463_v53 = vadd.f32 %v2413_v58, %v6020_v44 }
 0x2b3   : > { %v3264_v34 = vadd.f32 %v6122_v1, %v3228_v16 }
 0x2b4   : > { %v2729_v46 = vadd.f32 %v2679_v62, %v2463_v53  ;;  %v3189_v23 = vpop.f32.mrf.mxu0 }
 0x2b5   : > { %v4181_v4 = vpack.c.bf16 %v3264_v34, %v3263_v45  ;;  %v3359_v39 = vadd.f32 %v3358_v13, %v3264_v34  ;;  %v3397_v11 = vmul.f32 %v3264_v34, %v3264_v34 }
 0x2b6   : > { %v2913_v56 = vpop.f32.mrf.mxu3 }
 0x2b7   : > { %4236 = vst [vmem:[%s6140_s23 + $0x48] sm:$0xff] %v4181_v4   ;;  %v3428_v47 = vadd.f32 %v3427_v43, %v3397_v11  ;;  %v2963_v37 = vadd.f32 %v2913_v56, %v2729_v46 }
 0x2b9   : > { %v2415_v8 = vpop.f32.mrf.mxu1  ;;  %v3229_v15 = vadd.f32 %v3179_v31, %v2963_v37  ;;  %v2681_v14 = vpop.f32.mrf.mxu2 }
 0x2ba   : > { %v2464_v26 = vadd.f32 %v2415_v8, %v6029_v5 }
 0x2bb   : > { %v3265_v61 = vadd.f32 %v6122_v1, %v3229_v15 }
 0x2bc   : > { %v2730_v44 = vadd.f32 %v2681_v14, %v2464_v26  ;;  %v3191_v49 = vpop.f32.mrf.mxu0 }
 0x2bd   : > { %v3360_v24 = vadd.f32 %v3359_v39, %v3265_v61  ;;  %v3398_v0 = vmul.f32 %v3265_v61, %v3265_v61 }
 0x2be   : > { %v2915_v2 = vpop.f32.mrf.mxu3 }
 0x2bf   : > { %v3429_v10 = vadd.f32 %v3428_v47, %v3398_v0  ;;  %v2964_v12 = vadd.f32 %v2915_v2, %v2730_v44 }
 0x2c1   : > { %v2418_v41 = vpop.f32.mrf.mxu1  ;;  %v3230_v29 = vadd.f32 %v3181_v21, %v2964_v12  ;;  %v2684_v51 = vpop.f32.mrf.mxu2 }
 0x2c2   : > { %v2465_v42 = vadd.f32 %v2418_v41, %v6035_v18 }
 0x2c3   : > { %v3266_v50 = vadd.f32 %v6122_v1, %v3230_v29 }
 0x2c4   : > { %v2731_v5 = vadd.f32 %v2684_v51, %v2465_v42  ;;  %v3194_v56 = vpop.f32.mrf.mxu0 }
 0x2c5   : > { %v4186_v31 = vpack.c.bf16 %v3266_v50, %v3265_v61  ;;  %v3361_v7 = vadd.f32 %v3360_v24, %v3266_v50  ;;  %v3399_v30 = vmul.f32 %v3266_v50, %v3266_v50 }
 0x2c6   : > { %v2918_v20 = vpop.f32.mrf.mxu3 }
 0x2c7   : > { %4237 = vst [vmem:[%s6140_s23 + $0x50] sm:$0xff] %v4186_v31   ;;  %v3430_v22 = vadd.f32 %v3429_v10, %v3399_v30  ;;  %v2965_v38 = vadd.f32 %v2918_v20, %v2731_v5 }
 0x2c9   : > { %v2420_v27 = vpop.f32.mrf.mxu1  ;;  %v3231_v59 = vadd.f32 %v3184_v57, %v2965_v38  ;;  %v2686_v60 = vpop.f32.mrf.mxu2 }
 0x2ca   : > { %v2466_v35 = vadd.f32 %v2420_v27, %v6044_v3 }
 0x2cb   : > { %v3267_v6 = vadd.f32 %v6122_v1, %v3231_v59 }
 0x2cc   : > { %v2732_v18 = vadd.f32 %v2686_v60, %v2466_v35  ;;  %v3196_v42 = vpop.f32.mrf.mxu0 }
 0x2cd   : > { %v3362_v63 = vadd.f32 %v3361_v7, %v3267_v6  ;;  %v3400_v55 = vmul.f32 %v3267_v6, %v3267_v6 }
 0x2ce   : > { %v2920_v21 = vpop.f32.mrf.mxu3 }
 0x2cf   : > { %v3431_v28 = vadd.f32 %v3430_v22, %v3400_v55  ;;  %v2966_v52 = vadd.f32 %v2920_v21, %v2732_v18 }
 0x2d1   : > { %v2423_v45 = vpop.f32.mrf.mxu1  ;;  %v3232_v13 = vadd.f32 %v3186_v17, %v2966_v52  ;;  %v2689_v58 = vpop.f32.mrf.mxu2 }
 0x2d2   : > { %v2467_v36 = vadd.f32 %v2423_v45, %v6050_v19 }
 0x2d3   : > { %v3268_v25 = vadd.f32 %v6122_v1, %v3232_v13 }
 0x2d4   : > { %v2733_v3 = vadd.f32 %v2689_v58, %v2467_v36  ;;  %v6775_v36 = vld [vmem:[#allocation46_spill] sm:$0xff] }
 0x2d5   : > { %v4191_v43 = vpack.c.bf16 %v3268_v25, %v3267_v6  ;;  %v3363_v40 = vadd.f32 %v3362_v63, %v3268_v25  ;;  %v3401_v16 = vmul.f32 %v3268_v25, %v3268_v25  ;;  %v3199_v6 = vpop.f32.mrf.mxu0 }
 0x2d6   : > { %v2923_v34 = vpop.f32.mrf.mxu3 }
 0x2d7   : > { %4238 = vst [vmem:[%s6140_s23 + $0x58] sm:$0xff] %v4191_v43   ;;  %v3432_v62 = vadd.f32 %v3431_v28, %v3401_v16  ;;  %v2967_v57 = vadd.f32 %v2923_v34, %v2733_v3 }
 0x2d9   : > { %v2425_v53 = vpop.f32.mrf.mxu1  ;;  %v3233_v4 = vadd.f32 %v3189_v23, %v2967_v57  ;;  %v2691_v46 = vpop.f32.mrf.mxu2 }
 0x2da   : > { %v2468_v11 = vadd.f32 %v2425_v53, %v6059_v48 }
 0x2db   : > { %v3269_v39 = vadd.f32 %v6122_v1, %v3233_v4 }
 0x2dc   : > { %v2734_v19 = vadd.f32 %v2691_v46, %v2468_v11  ;;  %v6776_v11 = vld [vmem:[#allocation55_spill] sm:$0xff] }
 0x2dd   : > { %v3364_v8 = vadd.f32 %v3363_v40, %v3269_v39  ;;  %v3402_v47 = vmul.f32 %v3269_v39, %v3269_v39  ;;  %v3201_v43 = vpop.f32.mrf.mxu0 }
 0x2de   : > { %v2925_v37 = vpop.f32.mrf.mxu3 }
 0x2df   : > { %v3433_v61 = vadd.f32 %v3432_v62, %v3402_v47  ;;  %v2968_v26 = vadd.f32 %v2925_v37, %v2734_v19 }
 0x2e1   : > { %v2428_v15 = vpop.f32.mrf.mxu1  ;;  %v3234_v14 = vadd.f32 %v3191_v49, %v2968_v26  ;;  %v2694_v44 = vpop.f32.mrf.mxu2 }
 0x2e2   : > { %v2469_v0 = vadd.f32 %v2428_v15, %v6065_v32 }
 0x2e3   : > { %v3270_v24 = vadd.f32 %v6122_v1, %v3234_v14 }
 0x2e4   : > { %v2735_v48 = vadd.f32 %v2694_v44, %v2469_v0 }
 0x2e5   : > { %v4196_v2 = vpack.c.bf16 %v3270_v24, %v3269_v39  ;;  %v3365_v41 = vadd.f32 %v3364_v8, %v3270_v24  ;;  %v3403_v17 = vmul.f32 %v3270_v24, %v3270_v24  ;;  %v3204_v15 = vpop.f32.mrf.mxu0 }
 0x2e6   : > { %v2928_v10 = vpop.f32.mrf.mxu3 }
 0x2e7   : > { %4239 = vst [vmem:[%s6140_s23 + $0x60] sm:$0xff] %v4196_v2   ;;  %v3434_v29 = vadd.f32 %v3433_v61, %v3403_v17  ;;  %v2969_v50 = vadd.f32 %v2928_v10, %v2735_v48 }
 0x2e9   : > { %v2430_v12 = vpop.f32.mrf.mxu1  ;;  %v3235_v51 = vadd.f32 %v3194_v56, %v2969_v50  ;;  %v2696_v30 = vpop.f32.mrf.mxu2 }
 0x2ea   : > { %v2470_v7 = vadd.f32 %v2430_v12, %v6074_v9 }
 0x2eb   : > { %v3271_v31 = vadd.f32 %v6122_v1, %v3235_v51 }
 0x2ec   : > { %v2736_v32 = vadd.f32 %v2696_v30, %v2470_v7 }
 0x2ed   : > { %v3366_v5 = vadd.f32 %v3365_v41, %v3271_v31  ;;  %v3404_v20 = vmul.f32 %v3271_v31, %v3271_v31 }
 0x2ee   : > { %v2930_v27 = vpop.f32.mrf.mxu3 }
 0x2ef   : > { %v3435_v38 = vadd.f32 %v3434_v29, %v3404_v20  ;;  %v2970_v23 = vadd.f32 %v2930_v27, %v2736_v32 }
 0x2f1   : > { %v2433_v22 = vpop.f32.mrf.mxu1  ;;  %v3236_v59 = vadd.f32 %v3196_v42, %v2970_v23  ;;  %v2699_v63 = vpop.f32.mrf.mxu2 }
 0x2f2   : > { %v2471_v60 = vadd.f32 %v2433_v22, %v6080_v33  ;;  %v3206_v42 = vpop.f32.mrf.mxu0 }
 0x2f3   : > { %v3272_v35 = vadd.f32 %v6122_v1, %v3236_v59 }
 0x2f4   : > { %v2737_v9 = vadd.f32 %v2699_v63, %v2471_v60 }
 0x2f5   : > { %v4201_v55 = vpack.c.bf16 %v3272_v35, %v3271_v31  ;;  %v3367_v18 = vadd.f32 %v3366_v5, %v3272_v35  ;;  %v3405_v21 = vmul.f32 %v3272_v35, %v3272_v35 }
 0x2f6   : > { %v2933_v45 = vpop.f32.mrf.mxu3 }
 0x2f7   : > { %4240 = vst [vmem:[%s6140_s23 + $0x68] sm:$0xff] %v4201_v55   ;;  %v3436_v52 = vadd.f32 %v3435_v38, %v3405_v21  ;;  %v2971_v13 = vadd.f32 %v2933_v45, %v2737_v9 }
 0x2f9   : > { %v2435_v28 = vpop.f32.mrf.mxu1  ;;  %v3237_v49 = vadd.f32 %v3199_v6, %v2971_v13  ;;  %v2701_v40 = vpop.f32.mrf.mxu2 }
 0x2fa   : > { %v2472_v58 = vadd.f32 %v2435_v28, %v6775_v36 }
 0x2fb   : > { %v3273_v25 = vadd.f32 %v6122_v1, %v3237_v49 }
 0x2fc   : > { %v2738_v33 = vadd.f32 %v2701_v40, %v2472_v58 }
 0x2fd   : > { %v3368_v16 = vadd.f32 %v3367_v18, %v3273_v25  ;;  %v3406_v3 = vmul.f32 %v3273_v25, %v3273_v25 }
 0x2fe   : > { %v2935_v34 = vpop.f32.mrf.mxu3 }
 0x2ff   : > { %v3437_v62 = vadd.f32 %v3436_v52, %v3406_v3  ;;  %v2972_v57 = vadd.f32 %v2935_v34, %v2738_v33 }
 0x301   : > { %v2438_v53 = vpop.f32.mrf.mxu1  ;;  %v3238_v4 = vadd.f32 %v3201_v43, %v2972_v57  ;;  %v2704_v56 = vpop.f32.mrf.mxu2 }
 0x302   : > { %v2473_v46 = vadd.f32 %v2438_v53, %v6776_v11 }
 0x303   : > { %v3274_v39 = vadd.f32 %v6122_v1, %v3238_v4 }
 0x304   : > { %v2739_v37 = vadd.f32 %v2704_v56, %v2473_v46 }
 0x305   : > { %v4206_v8 = vpack.c.bf16 %v3274_v39, %v3273_v25  ;;  %v3369_v47 = vadd.f32 %v3368_v16, %v3274_v39  ;;  %v3407_v19 = vmul.f32 %v3274_v39, %v3274_v39 }
 0x306   : > { %v2938_v61 = vpop.f32.mrf.mxu3 }
 0x307   : > { %4241 = vst [vmem:[%s6140_s23 + $0x70] sm:$0xff] %v4206_v8   ;;  %v3438_v26 = vadd.f32 %v3437_v62, %v3407_v19  ;;  %v2973_v14 = vadd.f32 %v2938_v61, %v2739_v37 }
 0x309   : > { %v2440_v24 = vpop.f32.mrf.mxu1  ;;  %v3239_v0 = vadd.f32 %v3204_v15, %v2973_v14  ;;  %v2706_v41 = vpop.f32.mrf.mxu2 }
 0x30a   : > { %v2474_v2 = vadd.f32 %v2440_v24, %v6110_v54 }
 0x30b   : > { %v3275_v44 = vadd.f32 %v6122_v1, %v3239_v0 }
 0x30c   : > { %v2740_v10 = vadd.f32 %v2706_v41, %v2474_v2 }
 0x30d   : > { %v3370_v17 = vadd.f32 %v3369_v47, %v3275_v44  ;;  %v3408_v48 = vmul.f32 %v3275_v44, %v3275_v44 }
 0x30e   : > { %v2940_v12 = vpop.f32.mrf.mxu3 }
 0x30f   : > { %v3439_v29 = vadd.f32 %v3438_v26, %v3408_v48  ;;  %v2974_v50 = vadd.f32 %v2940_v12, %v2740_v10 }
 0x311   : > { %v3240_v51 = vadd.f32 %v3206_v42, %v2974_v50 }
 0x313   : > { %v3276_v31 = vadd.f32 %v6122_v1, %v3240_v51 }
 0x315   : > { %v4211_v7 = vpack.c.bf16 %v3276_v31, %v3275_v44  ;;  %v3371_v30 = vadd.f32 %v3370_v17, %v3276_v31  ;;  %v3409_v5 = vmul.f32 %v3276_v31, %v3276_v31 }
 0x317   : > { %4242 = vst [vmem:[%s6140_s23 + $0x78] sm:$0xff] %v4211_v7   ;;  %v3372_v20 = vrot.slane %v3371_v30, 4  ;;  %v3440_v32 = vadd.f32 %v3439_v29, %v3409_v5 }
 0x319   : > { %v3373_v27 = vadd.f32 %v3372_v20, %v3371_v30  ;;  %v3441_v54 = vrot.slane %v3440_v32, 4 }
 0x31b   : > { %v3374_v22 = vrot.slane %v3373_v27, 2  ;;  %v3442_v38 = vadd.f32 %v3441_v54, %v3440_v32 }
 0x31d   : > { %v3375_v23 = vadd.f32 %v3374_v22, %v3373_v27  ;;  %v3443_v59 = vrot.slane %v3442_v38, 2 }
 0x31f   : > { %v3376_v6 = vrot.slane %v3375_v23, 1  ;;  %v3444_v35 = vadd.f32 %v3443_v59, %v3442_v38 }
 0x321   : > { %v3377_v1 = vadd.f32 %v3376_v6, %v3375_v23  ;;  %v3445_v60 = vrot.slane %v3444_v35, 1 }
 0x323   : > { %v3446_v63 = vadd.f32 %v3445_v60, %v3444_v35  ;;  %3447 = vst [vmem:[%s349_s27] sm:$0xff] %v3377_v1 }
 0x325   : > { %3448 = vst [vmem:[%s353_s11] sm:$0xff] %v3446_v63 }
 0x326 PF: > { %s20_s30 = sadd.s32 1, %s4292_s30  }
 0x327   : > { %p17_p4 = scmp.ge.s32.totalorder %s20_s30, 10  }
 0x329   :  { %19 = sbr.rel (!%p17_p4) target bundleno = 1 (0x1), region = 110 }

</bundles_post_ra>
